<compile_context>
chip_gen: v5e
topology: v5e:2x2
jax: 0.10.0
libtpu: 0.0.40
codegen_flags: <defaults>
</compile_context>

<pallas_src>
import numpy as np
import jax
import jax.numpy as jnp
from jax.experimental import pallas as pl
from jax.experimental.pallas import tpu as pltpu


# ----------------------------------------------------------------------------
# Static architecture constants (default module config).
# ----------------------------------------------------------------------------
C_IMG, H_IMG, W_IMG = 1, 32, 32            # input_shape of the autoencoder
EMBED = 16                                 # embed_dim
CH = 32                                    # hidden channel width
PACK = 4                                   # batch elements packed on the lane axis
LANES = PACK * CH                          # 128 -- full vreg lane width

K1 = ((H_IMG - 12) // 2 - 2) // 2 + 1      # 5  (tconv1 kernel, square)
K2, K3, K4, K5 = 3, 4, 5, 5
S2, S3 = 2, 2                              # strides of tconv2 / tconv3

H1 = K1                                    # 5   tconv1 output (1x1 spatial input)
H2 = S2 * (H1 - 1) + K2                    # 11  tconv2 output
H3 = S3 * (H2 - 1) + K3                    # 24  tconv3 output
H4 = H3 + K4 - 1                           # 28  tconv4 output
H5 = H4 + K5 - 1                           # 32  tconv5 output
assert H5 == H_IMG and C_IMG == 1

# Spatial sizes of the zero-dilated + (k-1)-zero-padded conv-input staging buffers.
P2 = S2 * (H1 - 1) + 1 + 2 * (K2 - 1)      # 13  (tconv2 input)
P3 = S3 * (H2 - 1) + 1 + 2 * (K3 - 1)      # 27  (tconv3 input)
P4 = H3 + 2 * (K4 - 1)                     # 32  (tconv4 input)
P5 = H4 + 2 * (K5 - 1)                     # 36  (tconv5 input)
assert P2 - K2 + 1 == H2 and P3 - K3 + 1 == H3
assert P4 - K4 + 1 == H4 and P5 - K5 + 1 == H5


# ----------------------------------------------------------------------------
# The fused decoder kernel (one grid step == PACK batch elements).
# ----------------------------------------------------------------------------
def _decoder_kernel(x_ref, w1_ref, w2_ref, w3_ref, w4_ref, w5_ref,
                    b1_ref, b2_ref, b3_ref, b4_ref, b5_ref,
                    o_ref, p2, p3, p4, p5):
    f32 = jnp.float32

    # Clear staging buffers: borders and stride-2 dilation holes must be zero;
    # the value positions are fully overwritten below.  (~1.7 MB of stores per
    # grid step -- negligible vs. the MXU work, and safe under megacore split.)
    p2[...] = jnp.zeros_like(p2)
    p3[...] = jnp.zeros_like(p3)
    p4[...] = jnp.zeros_like(p4)
    p5[...] = jnp.zeros_like(p5)

    # Constant stride-2 row-expansion matrix for the tconv2 -> p3 scatter:
    # (E2 @ v)[r] = v[r // 2] if r is even else 0,  E2 : (2*H2-1, H2).
    rr = jax.lax.broadcasted_iota(jnp.int32, (2 * H2 - 1, H2), 0)
    cc = jax.lax.broadcasted_iota(jnp.int32, (2 * H2 - 1, H2), 1)
    e2 = jnp.where(rr == 2 * cc, 1.0, 0.0).astype(f32)

    # ---- tconv1 (1x1 spatial input): ONE matmul
    #      (1, PACK*EMBED) x (PACK*EMBED, K1*K1*LANES), then 25 row scatters
    #      with stride-2 dilation (pad K2-1) into p2.
    r1 = jnp.dot(x_ref[0], w1_ref[...], preferred_element_type=f32)  # (1, 3200)
    b1v = b1_ref[...]
    for t in range(K1 * K1):
        iy, ix = divmod(t, K1)
        v = jnp.maximum(r1[:, t * LANES:(t + 1) * LANES] + b1v, 0.0)  # (1, 128)
        p2[K2 - 1 + 2 * iy, pl.ds(K2 - 1 + 2 * ix, 1), :] = v

    # ---- Generic transposed-conv layer (as a VALID conv over the dilated,
    #      zero-padded staging buffer): per-output-row register accumulator,
    #      statically unrolled taps, one fused bias+ReLU store per output row.
    def conv_rows(p_in, w_ref, b_ref, k, hout, store_row):
        bv = b_ref[...]                                   # (1, LANES)

        def body(oy, carry):
            # Tap 0 is an assignment (no zero-init, no VMEM accumulator).
            acc = jnp.dot(p_in[oy, pl.ds(0, hout), :], w_ref[0],
                          preferred_element_type=f32)     # (hout, LANES)
            for t in range(1, k * k):                     # unrolled, static (i, j)
                i, j = divmod(t, k)
                acc = acc + jnp.dot(p_in[oy + i, pl.ds(j, hout), :], w_ref[t],
                                    preferred_element_type=f32)
            store_row(oy, jnp.maximum(acc + bv, 0.0))
            return carry

        jax.lax.fori_loop(0, hout, body, 0)

    # tconv2 (k=3, s=2): tconv3 has stride 2, so its output row is written as a
    # stride-2 dilated 21-row slab (built by one tiny E2 matmul) into p3.
    def store2(oy, val):
        p3[K3 - 1 + 2 * oy, pl.ds(K3 - 1, 2 * H2 - 1), :] = jnp.dot(
            e2, val, preferred_element_type=f32)
    conv_rows(p2, w2_ref, b2_ref, K2, H2, store2)

    # tconv3 (k=4, s=2): tconv4 has stride 1 -> dense rows into p4's interior.
    def store3(oy, val):
        p4[K4 - 1 + oy, pl.ds(K4 - 1, H3), :] = val
    conv_rows(p3, w3_ref, b3_ref, K3, H3, store3)

    # tconv4 (k=5, s=1): dense rows into p5's interior.
    def store4(oy, val):
        p5[K5 - 1 + oy, pl.ds(K5 - 1, H4), :] = val
    conv_rows(p4, w4_ref, b4_ref, K4, H4, store4)

    # tconv5 (k=5, s=1): lane-dense 32x128 row slabs straight to the output block.
    def store5(oy, val):
        o_ref[0, oy, :, :] = val
    conv_rows(p5, w5_ref, b5_ref, K5, H5, store5)


# ----------------------------------------------------------------------------
# Parameters (PyTorch layout) + one-time preprocessing for the kernel.
# ----------------------------------------------------------------------------
def init_decoder_params(key):
    """Random parameters in PyTorch ConvTranspose2d layout: weight (Cin,Cout,kh,kw)."""
    layer_defs = [
        ("tconv1", EMBED, CH, K1, 1),
        ("tconv2", CH, CH, K2, S2),
        ("tconv3", CH, CH, K3, S3),
        ("tconv4", CH, CH, K4, 1),
        ("tconv5", CH, C_IMG, K5, 1),
    ]
    params = {}
    for name, cin, cout, k, stride in layer_defs:
        key, wkey, bkey = jax.random.split(key, 3)
        bound = 1.0 / np.sqrt(cin * k * k)
        w = jax.random.uniform(wkey, (cin, cout, k, k), jnp.float32, -bound, bound)
        b = jax.random.uniform(bkey, (cout,), jnp.float32, -bound, bound)
        params[name] = (w, b, stride)
    return params


def prepare_decoder_params(params):
    """One-time weight preprocessing (hoisted out of the forward pass).

    Weights become block-diagonal over the PACK packed images so that every
    in-kernel matmul is a lane-dense (.., 128) x (128, 128) operation, and the
    packed lane layout is  lane = image_slot * CH + channel.
    """
    eye_p = jnp.eye(PACK, dtype=jnp.float32)

    def conv_taps(w):
        # transposed conv == conv of the dilated/padded input with the spatially
        # flipped, channel-swapped filter; taps flattened to (k*k, Cin, Cout).
        k = w.shape[-1]
        wf = jnp.flip(w, axis=(2, 3)).transpose(2, 3, 0, 1)
        return wf.reshape(k * k, w.shape[0], w.shape[1])

    def block_diag(taps):                       # (k*k, Ci, Co) -> (k*k, P*Ci, P*Co)
        t, ci, co = taps.shape
        return jnp.einsum("pq,tio->tpiqo", eye_p, taps).reshape(
            t, PACK * ci, PACK * co)

    def pack_bias(b):                           # (Co,) -> (1, PACK*Co)
        return jnp.tile(b.reshape(1, b.shape[0]), (1, PACK))

    w1, b1, _ = params["tconv1"]
    w2, b2, _ = params["tconv2"]
    w3, b3, _ = params["tconv3"]
    w4, b4, _ = params["tconv4"]
    w5, b5, _ = params["tconv5"]

    # tconv1 on a 1x1 input: tap (iy, ix) IS output pixel (iy, ix) -- no flip.
    # One big matrix: row = p*EMBED + e, col = t*LANES + q*CH + c.
    w1_taps = jnp.transpose(w1, (2, 3, 0, 1)).reshape(K1 * K1, EMBED, CH)
    w1_big = jnp.einsum("pq,tec->petqc", eye_p, w1_taps).reshape(
        PACK * EMBED, K1 * K1 * LANES)

    # tconv5: Cout = C_IMG = 1, zero-padded to CH so the packed layout is uniform.
    w5_taps = jnp.pad(conv_taps(w5), ((0, 0), (0, 0), (0, CH - C_IMG)))
    b5_pad = jnp.pad(b5, (0, CH - C_IMG))

    return {
        "w1": w1_big,
        "w2": block_diag(conv_taps(w2)),
        "w3": block_diag(conv_taps(w3)),
        "w4": block_diag(conv_taps(w4)),
        "w5": block_diag(w5_taps),
        "b1": pack_bias(b1),
        "b2": pack_bias(b2),
        "b3": pack_bias(b3),
        "b4": pack_bias(b4),
        "b5": pack_bias(b5_pad),
    }


# ----------------------------------------------------------------------------
# Forward pass (single fused pallas_call; PACK images per grid step).
# ----------------------------------------------------------------------------
def decoder_forward(x_nchw, prep):
    """x_nchw: (N, EMBED, 1, 1) f32  ->  (N, C_IMG, H_IMG, W_IMG) f32."""
    n = x_nchw.shape[0]
    g = (n + PACK - 1) // PACK
    x = x_nchw.reshape(n, EMBED).astype(jnp.float32)
    if g * PACK != n:                                   # pad batch to a PACK multiple
        x = jnp.concatenate(
            [x, jnp.zeros((g * PACK - n, EMBED), jnp.float32)], axis=0)
    x_in = x.reshape(g, 1, PACK * EMBED)                # lane = slot*EMBED + e

    bias_spec = pl.BlockSpec((1, LANES), lambda i: (0, 0))
    grid_spec = pltpu.PrefetchScalarGridSpec(
        num_scalar_prefetch=0,
        grid=(g,),
        in_specs=[
            pl.BlockSpec((1, 1, PACK * EMBED), lambda i: (i, 0, 0)),
            pl.BlockSpec((PACK * EMBED, K1 * K1 * LANES), lambda i: (0, 0)),
            pl.BlockSpec((K2 * K2, LANES, LANES), lambda i: (0, 0, 0)),
            pl.BlockSpec((K3 * K3, LANES, LANES), lambda i: (0, 0, 0)),
            pl.BlockSpec((K4 * K4, LANES, LANES), lambda i: (0, 0, 0)),
            pl.BlockSpec((K5 * K5, LANES, LANES), lambda i: (0, 0, 0)),
            bias_spec, bias_spec, bias_spec, bias_spec, bias_spec,
        ],
        out_specs=pl.BlockSpec((1, H5, H5, LANES), lambda i: (i, 0, 0, 0)),
        scratch_shapes=[
            pltpu.VMEM((P2, P2, LANES), jnp.float32),   # tconv2 input (dilated+padded)
            pltpu.VMEM((P3, P3, LANES), jnp.float32),   # tconv3 input
            pltpu.VMEM((P4, P4, LANES), jnp.float32),   # tconv4 input
            pltpu.VMEM((P5, P5, LANES), jnp.float32),   # tconv5 input
        ],
    )

    out = pl.pallas_call(
        _decoder_kernel,
        out_shape=jax.ShapeDtypeStruct((g, H5, H5, LANES), jnp.float32),
        grid_spec=grid_spec,
        compiler_params=pltpu.CompilerParams(
            dimension_semantics=("parallel",),
            vmem_limit_bytes=32 * 1024 * 1024),
    )(x_in, prep["w1"], prep["w2"], prep["w3"], prep["w4"], prep["w5"],
      prep["b1"], prep["b2"], prep["b3"], prep["b4"], prep["b5"])

    # Unpack lanes (slot*CH + c), keep the real output channel, back to NCHW.
    out = out.reshape(g, H5, H5, PACK, CH)[..., :C_IMG]
    out = jnp.transpose(out, (0, 3, 4, 1, 2)).reshape(g * PACK, C_IMG, H5, H5)
    return out[:n]


# ----------------------------------------------------------------------------
# Pure-JAX reference (lax conv with lhs_dilation == transposed-conv identity).
# ----------------------------------------------------------------------------
def _ref_tconv_relu(x, w_t, b, stride):
    kh, kw = w_t.shape[2], w_t.shape[3]
    w_conv = jnp.flip(w_t, axis=(2, 3)).transpose(2, 3, 0, 1)
    out = jax.lax.conv_general_dilated(
        x, w_conv, window_strides=(1, 1),
        padding=[(kh - 1, kh - 1), (kw - 1, kw - 1)],
        lhs_dilation=(stride, stride),
        dimension_numbers=("NHWC", "HWIO", "NHWC"))
    return jax.nn.relu(out + b[None, None, None, :])


def decoder_forward_ref(x_nchw, params):
    x = jnp.transpose(x_nchw, (0, 2, 3, 1))
    for name in ("tconv1", "tconv2", "tconv3", "tconv4", "tconv5"):
        w, b, s = params[name]
        x = _ref_tconv_relu(x, w, b, s)
    return jnp.transpose(x, (0, 3, 1, 2))


if __name__ == "__main__":
    key = jax.random.PRNGKey(0)
    pkey, xkey = jax.random.split(key)

    params = init_decoder_params(pkey)
    prep = prepare_decoder_params(params)           # hoisted weight preprocessing

    # Decoder consumes the embedding map (N, embed_dim, 1, 1) -> (N, 1, 32, 32).
    # N = 8 -> two packed groups -> grid of 2 (keeps both v7x TensorCores busy).
    x = jax.random.normal(xkey, (8, EMBED, 1, 1), jnp.float32)

    fwd = jax.jit(decoder_forward)
    out = jax.block_until_ready(fwd(x, prep))
    assert out.shape == (8, C_IMG, H_IMG, W_IMG), out.shape

    ref = jax.block_until_ready(decoder_forward_ref(x, params))
    np.testing.assert_allclose(np.asarray(out), np.asarray(ref),
                               rtol=1e-4, atol=1e-4)
    print("KERNEL_OK")
</pallas_src>

<mosaic_0001>
module attributes {stable_mosaic.version = 11 : i64} {
  func.func @_decoder_kernel(%arg0: i32, %arg1: memref<1x1x64xf32, #tpu.memory_space<vmem>>, %arg2: memref<64x3200xf32, #tpu.memory_space<vmem>>, %arg3: memref<9x128x128xf32, #tpu.memory_space<vmem>>, %arg4: memref<16x128x128xf32, #tpu.memory_space<vmem>>, %arg5: memref<25x128x128xf32, #tpu.memory_space<vmem>>, %arg6: memref<25x128x128xf32, #tpu.memory_space<vmem>>, %arg7: memref<1x128xf32, #tpu.memory_space<vmem>>, %arg8: memref<1x128xf32, #tpu.memory_space<vmem>>, %arg9: memref<1x128xf32, #tpu.memory_space<vmem>>, %arg10: memref<1x128xf32, #tpu.memory_space<vmem>>, %arg11: memref<1x128xf32, #tpu.memory_space<vmem>>, %arg12: memref<1x32x32x128xf32, #tpu.memory_space<vmem>>, %arg13: memref<13x13x128xf32, #tpu.memory_space<vmem>>, %arg14: memref<27x27x128xf32, #tpu.memory_space<vmem>>, %arg15: memref<32x32x128xf32, #tpu.memory_space<vmem>>, %arg16: memref<36x36x128xf32, #tpu.memory_space<vmem>>) attributes {dimension_semantics = [#tpu.dimension_semantics<parallel>], iteration_bounds = array<i64: 2>, scalar_prefetch = 0 : i64, scratch_operands = 4 : i64, tpu.core_type = #tpu.core_type<tc>, window_params = [{transform_indices = @transform_0, window_bounds = array<i64: 1, 1, 64>}, {pipeline_mode = #tpu.pipeline_mode<synchronous>, transform_indices = @transform_1, window_bounds = array<i64: 64, 3200>}, {pipeline_mode = #tpu.pipeline_mode<synchronous>, transform_indices = @transform_2, window_bounds = array<i64: 9, 128, 128>}, {pipeline_mode = #tpu.pipeline_mode<synchronous>, transform_indices = @transform_3, window_bounds = array<i64: 16, 128, 128>}, {pipeline_mode = #tpu.pipeline_mode<synchronous>, transform_indices = @transform_4, window_bounds = array<i64: 25, 128, 128>}, {pipeline_mode = #tpu.pipeline_mode<synchronous>, transform_indices = @transform_5, window_bounds = array<i64: 25, 128, 128>}, {pipeline_mode = #tpu.pipeline_mode<synchronous>, transform_indices = @transform_6, window_bounds = array<i64: 1, 128>}, {pipeline_mode = #tpu.pipeline_mode<synchronous>, transform_indices = @transform_7, window_bounds = array<i64: 1, 128>}, {pipeline_mode = #tpu.pipeline_mode<synchronous>, transform_indices = @transform_8, window_bounds = array<i64: 1, 128>}, {pipeline_mode = #tpu.pipeline_mode<synchronous>, transform_indices = @transform_9, window_bounds = array<i64: 1, 128>}, {pipeline_mode = #tpu.pipeline_mode<synchronous>, transform_indices = @transform_10, window_bounds = array<i64: 1, 128>}, {transform_indices = @transform_11, window_bounds = array<i64: 1, 32, 32, 128>}]} {
    %cst = arith.constant 0.000000e+00 : f32
    %0 = vector.broadcast %cst : f32 to vector<13x13x128xf32>
    %c0 = arith.constant 0 : index
    %c0_0 = arith.constant 0 : index
    %c0_1 = arith.constant 0 : index
    %1 = vector.load %arg13[%c0, %c0_0, %c0_1] : memref<13x13x128xf32, #tpu.memory_space<vmem>>, vector<13x13x128xf32>
    tpu.vector_store %arg13[%c0, %c0_0, %c0_1], %0 {strides = array<i32>} : memref<13x13x128xf32, #tpu.memory_space<vmem>>, vector<13x13x128xf32>,
    %cst_2 = arith.constant 0.000000e+00 : f32
    %2 = vector.broadcast %cst_2 : f32 to vector<27x27x128xf32>
    %c0_3 = arith.constant 0 : index
    %c0_4 = arith.constant 0 : index
    %c0_5 = arith.constant 0 : index
    %3 = vector.load %arg14[%c0_3, %c0_4, %c0_5] : memref<27x27x128xf32, #tpu.memory_space<vmem>>, vector<27x27x128xf32>
    tpu.vector_store %arg14[%c0_3, %c0_4, %c0_5], %2 {strides = array<i32>} : memref<27x27x128xf32, #tpu.memory_space<vmem>>, vector<27x27x128xf32>,
    %cst_6 = arith.constant 0.000000e+00 : f32
    %4 = vector.broadcast %cst_6 : f32 to vector<32x32x128xf32>
    %c0_7 = arith.constant 0 : index
    %c0_8 = arith.constant 0 : index
    %c0_9 = arith.constant 0 : index
    %5 = vector.load %arg15[%c0_7, %c0_8, %c0_9] : memref<32x32x128xf32, #tpu.memory_space<vmem>>, vector<32x32x128xf32>
    tpu.vector_store %arg15[%c0_7, %c0_8, %c0_9], %4 {strides = array<i32>} : memref<32x32x128xf32, #tpu.memory_space<vmem>>, vector<32x32x128xf32>,
    %cst_10 = arith.constant 0.000000e+00 : f32
    %6 = vector.broadcast %cst_10 : f32 to vector<36x36x128xf32>
    %c0_11 = arith.constant 0 : index
    %c0_12 = arith.constant 0 : index
    %c0_13 = arith.constant 0 : index
    %7 = vector.load %arg16[%c0_11, %c0_12, %c0_13] : memref<36x36x128xf32, #tpu.memory_space<vmem>>, vector<36x36x128xf32>
    tpu.vector_store %arg16[%c0_11, %c0_12, %c0_13], %6 {strides = array<i32>} : memref<36x36x128xf32, #tpu.memory_space<vmem>>, vector<36x36x128xf32>,
    %8 = tpu.iota {dimensions = array<i32: 0>} : vector<21x11xi32>
    %9 = tpu.iota {dimensions = array<i32: 1>} : vector<21x11xi32>
    %c2_i32 = arith.constant 2 : i32
    %10 = vector.broadcast %c2_i32 : i32 to vector<21x11xi32>
    %11 = arith.muli %10, %9 : vector<21x11xi32>
    %12 = arith.cmpi eq, %8, %11 : vector<21x11xi32>
    %cst_14 = arith.constant 1.000000e+00 : f32
    %cst_15 = arith.constant 0.000000e+00 : f32
    %13 = vector.broadcast %cst_14 : f32 to vector<21x11xf32>
    %14 = vector.broadcast %cst_15 : f32 to vector<21x11xf32>
    %15 = arith.select %12, %13, %14 : vector<21x11xi1>, vector<21x11xf32>
    %c0_16 = arith.constant 0 : index
    %c0_17 = arith.constant 0 : index
    %c0_18 = arith.constant 0 : index
    %16 = vector.load %arg1[%c0_16, %c0_17, %c0_18] : memref<1x1x64xf32, #tpu.memory_space<vmem>>, vector<1x1x64xf32>
    %17 = vector.shape_cast %16 : vector<1x1x64xf32> to vector<1x64xf32>
    %c0_19 = arith.constant 0 : index
    %c0_20 = arith.constant 0 : index
    %18 = vector.load %arg2[%c0_19, %c0_20] : memref<64x3200xf32, #tpu.memory_space<vmem>>, vector<64x3200xf32>
    %cst_21 = arith.constant dense<0.000000e+00> : vector<1x3200xf32>
    %19 = tpu.matmul %17, %18, %cst_21 {dimension_numbers = #tpu.dot_dimension_numbers<[1], [0], [0], [1], [0, 0, 1, 1], [], []>} : vector<1x64xf32>, vector<64x3200xf32>, vector<1x3200xf32> -> vector<1x3200xf32>
    %c0_22 = arith.constant 0 : index
    %c0_23 = arith.constant 0 : index
    %20 = vector.load %arg7[%c0_22, %c0_23] : memref<1x128xf32, #tpu.memory_space<vmem>>, vector<1x128xf32>
    %21 = vector.extract_strided_slice %19 {offsets = [0, 0], sizes = [1, 128], strides = [1, 1]} : vector<1x3200xf32> to vector<1x128xf32>
    %22 = arith.addf %21, %20 : vector<1x128xf32>
    %cst_24 = arith.constant 0.000000e+00 : f32
    %23 = vector.broadcast %cst_24 : f32 to vector<1x128xf32>
    %24 = arith.maximumf %22, %23 : vector<1x128xf32>
    %c2 = arith.constant 2 : index
    %c2_25 = arith.constant 2 : index
    %c0_26 = arith.constant 0 : index
    %25 = vector.load %arg13[%c2, %c2_25, %c0_26] : memref<13x13x128xf32, #tpu.memory_space<vmem>>, vector<1x1x128xf32>
    %26 = vector.shape_cast %25 : vector<1x1x128xf32> to vector<1x128xf32>
    %27 = vector.shape_cast %24 : vector<1x128xf32> to vector<1x1x128xf32>
    tpu.vector_store %arg13[%c2, %c2_25, %c0_26], %27 {strides = array<i32>} : memref<13x13x128xf32, #tpu.memory_space<vmem>>, vector<1x1x128xf32>,
    %28 = vector.extract_strided_slice %19 {offsets = [0, 128], sizes = [1, 128], strides = [1, 1]} : vector<1x3200xf32> to vector<1x128xf32>
    %29 = arith.addf %28, %20 : vector<1x128xf32>
    %cst_27 = arith.constant 0.000000e+00 : f32
    %30 = vector.broadcast %cst_27 : f32 to vector<1x128xf32>
    %31 = arith.maximumf %29, %30 : vector<1x128xf32>
    %c2_28 = arith.constant 2 : index
    %c4 = arith.constant 4 : index
    %c0_29 = arith.constant 0 : index
    %32 = vector.load %arg13[%c2_28, %c4, %c0_29] : memref<13x13x128xf32, #tpu.memory_space<vmem>>, vector<1x1x128xf32>
    %33 = vector.shape_cast %32 : vector<1x1x128xf32> to vector<1x128xf32>
    %34 = vector.shape_cast %31 : vector<1x128xf32> to vector<1x1x128xf32>
    tpu.vector_store %arg13[%c2_28, %c4, %c0_29], %34 {strides = array<i32>} : memref<13x13x128xf32, #tpu.memory_space<vmem>>, vector<1x1x128xf32>,
    %35 = vector.extract_strided_slice %19 {offsets = [0, 256], sizes = [1, 128], strides = [1, 1]} : vector<1x3200xf32> to vector<1x128xf32>
    %36 = arith.addf %35, %20 : vector<1x128xf32>
    %cst_30 = arith.constant 0.000000e+00 : f32
    %37 = vector.broadcast %cst_30 : f32 to vector<1x128xf32>
    %38 = arith.maximumf %36, %37 : vector<1x128xf32>
    %c2_31 = arith.constant 2 : index
    %c6 = arith.constant 6 : index
    %c0_32 = arith.constant 0 : index
    %39 = vector.load %arg13[%c2_31, %c6, %c0_32] : memref<13x13x128xf32, #tpu.memory_space<vmem>>, vector<1x1x128xf32>
    %40 = vector.shape_cast %39 : vector<1x1x128xf32> to vector<1x128xf32>
    %41 = vector.shape_cast %38 : vector<1x128xf32> to vector<1x1x128xf32>
    tpu.vector_store %arg13[%c2_31, %c6, %c0_32], %41 {strides = array<i32>} : memref<13x13x128xf32, #tpu.memory_space<vmem>>, vector<1x1x128xf32>,
    %42 = vector.extract_strided_slice %19 {offsets = [0, 384], sizes = [1, 128], strides = [1, 1]} : vector<1x3200xf32> to vector<1x128xf32>
    %43 = arith.addf %42, %20 : vector<1x128xf32>
    %cst_33 = arith.constant 0.000000e+00 : f32
    %44 = vector.broadcast %cst_33 : f32 to vector<1x128xf32>
    %45 = arith.maximumf %43, %44 : vector<1x128xf32>
    %c2_34 = arith.constant 2 : index
    %c8 = arith.constant 8 : index
    %c0_35 = arith.constant 0 : index
    %46 = vector.load %arg13[%c2_34, %c8, %c0_35] : memref<13x13x128xf32, #tpu.memory_space<vmem>>, vector<1x1x128xf32>
    %47 = vector.shape_cast %46 : vector<1x1x128xf32> to vector<1x128xf32>
    %48 = vector.shape_cast %45 : vector<1x128xf32> to vector<1x1x128xf32>
    tpu.vector_store %arg13[%c2_34, %c8, %c0_35], %48 {strides = array<i32>} : memref<13x13x128xf32, #tpu.memory_space<vmem>>, vector<1x1x128xf32>,
    %49 = vector.extract_strided_slice %19 {offsets = [0, 512], sizes = [1, 128], strides = [1, 1]} : vector<1x3200xf32> to vector<1x128xf32>
    %50 = arith.addf %49, %20 : vector<1x128xf32>
    %cst_36 = arith.constant 0.000000e+00 : f32
    %51 = vector.broadcast %cst_36 : f32 to vector<1x128xf32>
    %52 = arith.maximumf %50, %51 : vector<1x128xf32>
    %c2_37 = arith.constant 2 : index
    %c10 = arith.constant 10 : index
    %c0_38 = arith.constant 0 : index
    %53 = vector.load %arg13[%c2_37, %c10, %c0_38] : memref<13x13x128xf32, #tpu.memory_space<vmem>>, vector<1x1x128xf32>
    %54 = vector.shape_cast %53 : vector<1x1x128xf32> to vector<1x128xf32>
    %55 = vector.shape_cast %52 : vector<1x128xf32> to vector<1x1x128xf32>
    tpu.vector_store %arg13[%c2_37, %c10, %c0_38], %55 {strides = array<i32>} : memref<13x13x128xf32, #tpu.memory_space<vmem>>, vector<1x1x128xf32>,
    %56 = vector.extract_strided_slice %19 {offsets = [0, 640], sizes = [1, 128], strides = [1, 1]} : vector<1x3200xf32> to vector<1x128xf32>
    %57 = arith.addf %56, %20 : vector<1x128xf32>
    %cst_39 = arith.constant 0.000000e+00 : f32
    %58 = vector.broadcast %cst_39 : f32 to vector<1x128xf32>
    %59 = arith.maximumf %57, %58 : vector<1x128xf32>
    %c4_40 = arith.constant 4 : index
    %c2_41 = arith.constant 2 : index
    %c0_42 = arith.constant 0 : index
    %60 = vector.load %arg13[%c4_40, %c2_41, %c0_42] : memref<13x13x128xf32, #tpu.memory_space<vmem>>, vector<1x1x128xf32>
    %61 = vector.shape_cast %60 : vector<1x1x128xf32> to vector<1x128xf32>
    %62 = vector.shape_cast %59 : vector<1x128xf32> to vector<1x1x128xf32>
    tpu.vector_store %arg13[%c4_40, %c2_41, %c0_42], %62 {strides = array<i32>} : memref<13x13x128xf32, #tpu.memory_space<vmem>>, vector<1x1x128xf32>,
    %63 = vector.extract_strided_slice %19 {offsets = [0, 768], sizes = [1, 128], strides = [1, 1]} : vector<1x3200xf32> to vector<1x128xf32>
    %64 = arith.addf %63, %20 : vector<1x128xf32>
    %cst_43 = arith.constant 0.000000e+00 : f32
    %65 = vector.broadcast %cst_43 : f32 to vector<1x128xf32>
    %66 = arith.maximumf %64, %65 : vector<1x128xf32>
    %c4_44 = arith.constant 4 : index
    %c4_45 = arith.constant 4 : index
    %c0_46 = arith.constant 0 : index
    %67 = vector.load %arg13[%c4_44, %c4_45, %c0_46] : memref<13x13x128xf32, #tpu.memory_space<vmem>>, vector<1x1x128xf32>
    %68 = vector.shape_cast %67 : vector<1x1x128xf32> to vector<1x128xf32>
    %69 = vector.shape_cast %66 : vector<1x128xf32> to vector<1x1x128xf32>
    tpu.vector_store %arg13[%c4_44, %c4_45, %c0_46], %69 {strides = array<i32>} : memref<13x13x128xf32, #tpu.memory_space<vmem>>, vector<1x1x128xf32>,
    %70 = vector.extract_strided_slice %19 {offsets = [0, 896], sizes = [1, 128], strides = [1, 1]} : vector<1x3200xf32> to vector<1x128xf32>
    %71 = arith.addf %70, %20 : vector<1x128xf32>
    %cst_47 = arith.constant 0.000000e+00 : f32
    %72 = vector.broadcast %cst_47 : f32 to vector<1x128xf32>
    %73 = arith.maximumf %71, %72 : vector<1x128xf32>
    %c4_48 = arith.constant 4 : index
    %c6_49 = arith.constant 6 : index
    %c0_50 = arith.constant 0 : index
    %74 = vector.load %arg13[%c4_48, %c6_49, %c0_50] : memref<13x13x128xf32, #tpu.memory_space<vmem>>, vector<1x1x128xf32>
    %75 = vector.shape_cast %74 : vector<1x1x128xf32> to vector<1x128xf32>
    %76 = vector.shape_cast %73 : vector<1x128xf32> to vector<1x1x128xf32>
    tpu.vector_store %arg13[%c4_48, %c6_49, %c0_50], %76 {strides = array<i32>} : memref<13x13x128xf32, #tpu.memory_space<vmem>>, vector<1x1x128xf32>,
    %77 = vector.extract_strided_slice %19 {offsets = [0, 1024], sizes = [1, 128], strides = [1, 1]} : vector<1x3200xf32> to vector<1x128xf32>
    %78 = arith.addf %77, %20 : vector<1x128xf32>
    %cst_51 = arith.constant 0.000000e+00 : f32
    %79 = vector.broadcast %cst_51 : f32 to vector<1x128xf32>
    %80 = arith.maximumf %78, %79 : vector<1x128xf32>
    %c4_52 = arith.constant 4 : index
    %c8_53 = arith.constant 8 : index
    %c0_54 = arith.constant 0 : index
    %81 = vector.load %arg13[%c4_52, %c8_53, %c0_54] : memref<13x13x128xf32, #tpu.memory_space<vmem>>, vector<1x1x128xf32>
    %82 = vector.shape_cast %81 : vector<1x1x128xf32> to vector<1x128xf32>
    %83 = vector.shape_cast %80 : vector<1x128xf32> to vector<1x1x128xf32>
    tpu.vector_store %arg13[%c4_52, %c8_53, %c0_54], %83 {strides = array<i32>} : memref<13x13x128xf32, #tpu.memory_space<vmem>>, vector<1x1x128xf32>,
    %84 = vector.extract_strided_slice %19 {offsets = [0, 1152], sizes = [1, 128], strides = [1, 1]} : vector<1x3200xf32> to vector<1x128xf32>
    %85 = arith.addf %84, %20 : vector<1x128xf32>
    %cst_55 = arith.constant 0.000000e+00 : f32
    %86 = vector.broadcast %cst_55 : f32 to vector<1x128xf32>
    %87 = arith.maximumf %85, %86 : vector<1x128xf32>
    %c4_56 = arith.constant 4 : index
    %c10_57 = arith.constant 10 : index
    %c0_58 = arith.constant 0 : index
    %88 = vector.load %arg13[%c4_56, %c10_57, %c0_58] : memref<13x13x128xf32, #tpu.memory_space<vmem>>, vector<1x1x128xf32>
    %89 = vector.shape_cast %88 : vector<1x1x128xf32> to vector<1x128xf32>
    %90 = vector.shape_cast %87 : vector<1x128xf32> to vector<1x1x128xf32>
    tpu.vector_store %arg13[%c4_56, %c10_57, %c0_58], %90 {strides = array<i32>} : memref<13x13x128xf32, #tpu.memory_space<vmem>>, vector<1x1x128xf32>,
    %91 = vector.extract_strided_slice %19 {offsets = [0, 1280], sizes = [1, 128], strides = [1, 1]} : vector<1x3200xf32> to vector<1x128xf32>
    %92 = arith.addf %91, %20 : vector<1x128xf32>
    %cst_59 = arith.constant 0.000000e+00 : f32
    %93 = vector.broadcast %cst_59 : f32 to vector<1x128xf32>
    %94 = arith.maximumf %92, %93 : vector<1x128xf32>
    %c6_60 = arith.constant 6 : index
    %c2_61 = arith.constant 2 : index
    %c0_62 = arith.constant 0 : index
    %95 = vector.load %arg13[%c6_60, %c2_61, %c0_62] : memref<13x13x128xf32, #tpu.memory_space<vmem>>, vector<1x1x128xf32>
    %96 = vector.shape_cast %95 : vector<1x1x128xf32> to vector<1x128xf32>
    %97 = vector.shape_cast %94 : vector<1x128xf32> to vector<1x1x128xf32>
    tpu.vector_store %arg13[%c6_60, %c2_61, %c0_62], %97 {strides = array<i32>} : memref<13x13x128xf32, #tpu.memory_space<vmem>>, vector<1x1x128xf32>,
    %98 = vector.extract_strided_slice %19 {offsets = [0, 1408], sizes = [1, 128], strides = [1, 1]} : vector<1x3200xf32> to vector<1x128xf32>
    %99 = arith.addf %98, %20 : vector<1x128xf32>
    %cst_63 = arith.constant 0.000000e+00 : f32
    %100 = vector.broadcast %cst_63 : f32 to vector<1x128xf32>
    %101 = arith.maximumf %99, %100 : vector<1x128xf32>
    %c6_64 = arith.constant 6 : index
    %c4_65 = arith.constant 4 : index
    %c0_66 = arith.constant 0 : index
    %102 = vector.load %arg13[%c6_64, %c4_65, %c0_66] : memref<13x13x128xf32, #tpu.memory_space<vmem>>, vector<1x1x128xf32>
    %103 = vector.shape_cast %102 : vector<1x1x128xf32> to vector<1x128xf32>
    %104 = vector.shape_cast %101 : vector<1x128xf32> to vector<1x1x128xf32>
    tpu.vector_store %arg13[%c6_64, %c4_65, %c0_66], %104 {strides = array<i32>} : memref<13x13x128xf32, #tpu.memory_space<vmem>>, vector<1x1x128xf32>,
    %105 = vector.extract_strided_slice %19 {offsets = [0, 1536], sizes = [1, 128], strides = [1, 1]} : vector<1x3200xf32> to vector<1x128xf32>
    %106 = arith.addf %105, %20 : vector<1x128xf32>
    %cst_67 = arith.constant 0.000000e+00 : f32
    %107 = vector.broadcast %cst_67 : f32 to vector<1x128xf32>
    %108 = arith.maximumf %106, %107 : vector<1x128xf32>
    %c6_68 = arith.constant 6 : index
    %c6_69 = arith.constant 6 : index
    %c0_70 = arith.constant 0 : index
    %109 = vector.load %arg13[%c6_68, %c6_69, %c0_70] : memref<13x13x128xf32, #tpu.memory_space<vmem>>, vector<1x1x128xf32>
    %110 = vector.shape_cast %109 : vector<1x1x128xf32> to vector<1x128xf32>
    %111 = vector.shape_cast %108 : vector<1x128xf32> to vector<1x1x128xf32>
    tpu.vector_store %arg13[%c6_68, %c6_69, %c0_70], %111 {strides = array<i32>} : memref<13x13x128xf32, #tpu.memory_space<vmem>>, vector<1x1x128xf32>,
    %112 = vector.extract_strided_slice %19 {offsets = [0, 1664], sizes = [1, 128], strides = [1, 1]} : vector<1x3200xf32> to vector<1x128xf32>
    %113 = arith.addf %112, %20 : vector<1x128xf32>
    %cst_71 = arith.constant 0.000000e+00 : f32
    %114 = vector.broadcast %cst_71 : f32 to vector<1x128xf32>
    %115 = arith.maximumf %113, %114 : vector<1x128xf32>
    %c6_72 = arith.constant 6 : index
    %c8_73 = arith.constant 8 : index
    %c0_74 = arith.constant 0 : index
    %116 = vector.load %arg13[%c6_72, %c8_73, %c0_74] : memref<13x13x128xf32, #tpu.memory_space<vmem>>, vector<1x1x128xf32>
    %117 = vector.shape_cast %116 : vector<1x1x128xf32> to vector<1x128xf32>
    %118 = vector.shape_cast %115 : vector<1x128xf32> to vector<1x1x128xf32>
    tpu.vector_store %arg13[%c6_72, %c8_73, %c0_74], %118 {strides = array<i32>} : memref<13x13x128xf32, #tpu.memory_space<vmem>>, vector<1x1x128xf32>,
    %119 = vector.extract_strided_slice %19 {offsets = [0, 1792], sizes = [1, 128], strides = [1, 1]} : vector<1x3200xf32> to vector<1x128xf32>
    %120 = arith.addf %119, %20 : vector<1x128xf32>
    %cst_75 = arith.constant 0.000000e+00 : f32
    %121 = vector.broadcast %cst_75 : f32 to vector<1x128xf32>
    %122 = arith.maximumf %120, %121 : vector<1x128xf32>
    %c6_76 = arith.constant 6 : index
    %c10_77 = arith.constant 10 : index
    %c0_78 = arith.constant 0 : index
    %123 = vector.load %arg13[%c6_76, %c10_77, %c0_78] : memref<13x13x128xf32, #tpu.memory_space<vmem>>, vector<1x1x128xf32>
    %124 = vector.shape_cast %123 : vector<1x1x128xf32> to vector<1x128xf32>
    %125 = vector.shape_cast %122 : vector<1x128xf32> to vector<1x1x128xf32>
    tpu.vector_store %arg13[%c6_76, %c10_77, %c0_78], %125 {strides = array<i32>} : memref<13x13x128xf32, #tpu.memory_space<vmem>>, vector<1x1x128xf32>,
    %126 = vector.extract_strided_slice %19 {offsets = [0, 1920], sizes = [1, 128], strides = [1, 1]} : vector<1x3200xf32> to vector<1x128xf32>
    %127 = arith.addf %126, %20 : vector<1x128xf32>
    %cst_79 = arith.constant 0.000000e+00 : f32
    %128 = vector.broadcast %cst_79 : f32 to vector<1x128xf32>
    %129 = arith.maximumf %127, %128 : vector<1x128xf32>
    %c8_80 = arith.constant 8 : index
    %c2_81 = arith.constant 2 : index
    %c0_82 = arith.constant 0 : index
    %130 = vector.load %arg13[%c8_80, %c2_81, %c0_82] : memref<13x13x128xf32, #tpu.memory_space<vmem>>, vector<1x1x128xf32>
    %131 = vector.shape_cast %130 : vector<1x1x128xf32> to vector<1x128xf32>
    %132 = vector.shape_cast %129 : vector<1x128xf32> to vector<1x1x128xf32>
    tpu.vector_store %arg13[%c8_80, %c2_81, %c0_82], %132 {strides = array<i32>} : memref<13x13x128xf32, #tpu.memory_space<vmem>>, vector<1x1x128xf32>,
    %133 = vector.extract_strided_slice %19 {offsets = [0, 2048], sizes = [1, 128], strides = [1, 1]} : vector<1x3200xf32> to vector<1x128xf32>
    %134 = arith.addf %133, %20 : vector<1x128xf32>
    %cst_83 = arith.constant 0.000000e+00 : f32
    %135 = vector.broadcast %cst_83 : f32 to vector<1x128xf32>
    %136 = arith.maximumf %134, %135 : vector<1x128xf32>
    %c8_84 = arith.constant 8 : index
    %c4_85 = arith.constant 4 : index
    %c0_86 = arith.constant 0 : index
    %137 = vector.load %arg13[%c8_84, %c4_85, %c0_86] : memref<13x13x128xf32, #tpu.memory_space<vmem>>, vector<1x1x128xf32>
    %138 = vector.shape_cast %137 : vector<1x1x128xf32> to vector<1x128xf32>
    %139 = vector.shape_cast %136 : vector<1x128xf32> to vector<1x1x128xf32>
    tpu.vector_store %arg13[%c8_84, %c4_85, %c0_86], %139 {strides = array<i32>} : memref<13x13x128xf32, #tpu.memory_space<vmem>>, vector<1x1x128xf32>,
    %140 = vector.extract_strided_slice %19 {offsets = [0, 2176], sizes = [1, 128], strides = [1, 1]} : vector<1x3200xf32> to vector<1x128xf32>
    %141 = arith.addf %140, %20 : vector<1x128xf32>
    %cst_87 = arith.constant 0.000000e+00 : f32
    %142 = vector.broadcast %cst_87 : f32 to vector<1x128xf32>
    %143 = arith.maximumf %141, %142 : vector<1x128xf32>
    %c8_88 = arith.constant 8 : index
    %c6_89 = arith.constant 6 : index
    %c0_90 = arith.constant 0 : index
    %144 = vector.load %arg13[%c8_88, %c6_89, %c0_90] : memref<13x13x128xf32, #tpu.memory_space<vmem>>, vector<1x1x128xf32>
    %145 = vector.shape_cast %144 : vector<1x1x128xf32> to vector<1x128xf32>
    %146 = vector.shape_cast %143 : vector<1x128xf32> to vector<1x1x128xf32>
    tpu.vector_store %arg13[%c8_88, %c6_89, %c0_90], %146 {strides = array<i32>} : memref<13x13x128xf32, #tpu.memory_space<vmem>>, vector<1x1x128xf32>,
    %147 = vector.extract_strided_slice %19 {offsets = [0, 2304], sizes = [1, 128], strides = [1, 1]} : vector<1x3200xf32> to vector<1x128xf32>
    %148 = arith.addf %147, %20 : vector<1x128xf32>
    %cst_91 = arith.constant 0.000000e+00 : f32
    %149 = vector.broadcast %cst_91 : f32 to vector<1x128xf32>
    %150 = arith.maximumf %148, %149 : vector<1x128xf32>
    %c8_92 = arith.constant 8 : index
    %c8_93 = arith.constant 8 : index
    %c0_94 = arith.constant 0 : index
    %151 = vector.load %arg13[%c8_92, %c8_93, %c0_94] : memref<13x13x128xf32, #tpu.memory_space<vmem>>, vector<1x1x128xf32>
    %152 = vector.shape_cast %151 : vector<1x1x128xf32> to vector<1x128xf32>
    %153 = vector.shape_cast %150 : vector<1x128xf32> to vector<1x1x128xf32>
    tpu.vector_store %arg13[%c8_92, %c8_93, %c0_94], %153 {strides = array<i32>} : memref<13x13x128xf32, #tpu.memory_space<vmem>>, vector<1x1x128xf32>,
    %154 = vector.extract_strided_slice %19 {offsets = [0, 2432], sizes = [1, 128], strides = [1, 1]} : vector<1x3200xf32> to vector<1x128xf32>
    %155 = arith.addf %154, %20 : vector<1x128xf32>
    %cst_95 = arith.constant 0.000000e+00 : f32
    %156 = vector.broadcast %cst_95 : f32 to vector<1x128xf32>
    %157 = arith.maximumf %155, %156 : vector<1x128xf32>
    %c8_96 = arith.constant 8 : index
    %c10_97 = arith.constant 10 : index
    %c0_98 = arith.constant 0 : index
    %158 = vector.load %arg13[%c8_96, %c10_97, %c0_98] : memref<13x13x128xf32, #tpu.memory_space<vmem>>, vector<1x1x128xf32>
    %159 = vector.shape_cast %158 : vector<1x1x128xf32> to vector<1x128xf32>
    %160 = vector.shape_cast %157 : vector<1x128xf32> to vector<1x1x128xf32>
    tpu.vector_store %arg13[%c8_96, %c10_97, %c0_98], %160 {strides = array<i32>} : memref<13x13x128xf32, #tpu.memory_space<vmem>>, vector<1x1x128xf32>,
    %161 = vector.extract_strided_slice %19 {offsets = [0, 2560], sizes = [1, 128], strides = [1, 1]} : vector<1x3200xf32> to vector<1x128xf32>
    %162 = arith.addf %161, %20 : vector<1x128xf32>
    %cst_99 = arith.constant 0.000000e+00 : f32
    %163 = vector.broadcast %cst_99 : f32 to vector<1x128xf32>
    %164 = arith.maximumf %162, %163 : vector<1x128xf32>
    %c10_100 = arith.constant 10 : index
    %c2_101 = arith.constant 2 : index
    %c0_102 = arith.constant 0 : index
    %165 = vector.load %arg13[%c10_100, %c2_101, %c0_102] : memref<13x13x128xf32, #tpu.memory_space<vmem>>, vector<1x1x128xf32>
    %166 = vector.shape_cast %165 : vector<1x1x128xf32> to vector<1x128xf32>
    %167 = vector.shape_cast %164 : vector<1x128xf32> to vector<1x1x128xf32>
    tpu.vector_store %arg13[%c10_100, %c2_101, %c0_102], %167 {strides = array<i32>} : memref<13x13x128xf32, #tpu.memory_space<vmem>>, vector<1x1x128xf32>,
    %168 = vector.extract_strided_slice %19 {offsets = [0, 2688], sizes = [1, 128], strides = [1, 1]} : vector<1x3200xf32> to vector<1x128xf32>
    %169 = arith.addf %168, %20 : vector<1x128xf32>
    %cst_103 = arith.constant 0.000000e+00 : f32
    %170 = vector.broadcast %cst_103 : f32 to vector<1x128xf32>
    %171 = arith.maximumf %169, %170 : vector<1x128xf32>
    %c10_104 = arith.constant 10 : index
    %c4_105 = arith.constant 4 : index
    %c0_106 = arith.constant 0 : index
    %172 = vector.load %arg13[%c10_104, %c4_105, %c0_106] : memref<13x13x128xf32, #tpu.memory_space<vmem>>, vector<1x1x128xf32>
    %173 = vector.shape_cast %172 : vector<1x1x128xf32> to vector<1x128xf32>
    %174 = vector.shape_cast %171 : vector<1x128xf32> to vector<1x1x128xf32>
    tpu.vector_store %arg13[%c10_104, %c4_105, %c0_106], %174 {strides = array<i32>} : memref<13x13x128xf32, #tpu.memory_space<vmem>>, vector<1x1x128xf32>,
    %175 = vector.extract_strided_slice %19 {offsets = [0, 2816], sizes = [1, 128], strides = [1, 1]} : vector<1x3200xf32> to vector<1x128xf32>
    %176 = arith.addf %175, %20 : vector<1x128xf32>
    %cst_107 = arith.constant 0.000000e+00 : f32
    %177 = vector.broadcast %cst_107 : f32 to vector<1x128xf32>
    %178 = arith.maximumf %176, %177 : vector<1x128xf32>
    %c10_108 = arith.constant 10 : index
    %c6_109 = arith.constant 6 : index
    %c0_110 = arith.constant 0 : index
    %179 = vector.load %arg13[%c10_108, %c6_109, %c0_110] : memref<13x13x128xf32, #tpu.memory_space<vmem>>, vector<1x1x128xf32>
    %180 = vector.shape_cast %179 : vector<1x1x128xf32> to vector<1x128xf32>
    %181 = vector.shape_cast %178 : vector<1x128xf32> to vector<1x1x128xf32>
    tpu.vector_store %arg13[%c10_108, %c6_109, %c0_110], %181 {strides = array<i32>} : memref<13x13x128xf32, #tpu.memory_space<vmem>>, vector<1x1x128xf32>,
    %182 = vector.extract_strided_slice %19 {offsets = [0, 2944], sizes = [1, 128], strides = [1, 1]} : vector<1x3200xf32> to vector<1x128xf32>
    %183 = arith.addf %182, %20 : vector<1x128xf32>
    %cst_111 = arith.constant 0.000000e+00 : f32
    %184 = vector.broadcast %cst_111 : f32 to vector<1x128xf32>
    %185 = arith.maximumf %183, %184 : vector<1x128xf32>
    %c10_112 = arith.constant 10 : index
    %c8_113 = arith.constant 8 : index
    %c0_114 = arith.constant 0 : index
    %186 = vector.load %arg13[%c10_112, %c8_113, %c0_114] : memref<13x13x128xf32, #tpu.memory_space<vmem>>, vector<1x1x128xf32>
    %187 = vector.shape_cast %186 : vector<1x1x128xf32> to vector<1x128xf32>
    %188 = vector.shape_cast %185 : vector<1x128xf32> to vector<1x1x128xf32>
    tpu.vector_store %arg13[%c10_112, %c8_113, %c0_114], %188 {strides = array<i32>} : memref<13x13x128xf32, #tpu.memory_space<vmem>>, vector<1x1x128xf32>,
    %189 = vector.extract_strided_slice %19 {offsets = [0, 3072], sizes = [1, 128], strides = [1, 1]} : vector<1x3200xf32> to vector<1x128xf32>
    %190 = arith.addf %189, %20 : vector<1x128xf32>
    %cst_115 = arith.constant 0.000000e+00 : f32
    %191 = vector.broadcast %cst_115 : f32 to vector<1x128xf32>
    %192 = arith.maximumf %190, %191 : vector<1x128xf32>
    %c10_116 = arith.constant 10 : index
    %c10_117 = arith.constant 10 : index
    %c0_118 = arith.constant 0 : index
    %193 = vector.load %arg13[%c10_116, %c10_117, %c0_118] : memref<13x13x128xf32, #tpu.memory_space<vmem>>, vector<1x1x128xf32>
    %194 = vector.shape_cast %193 : vector<1x1x128xf32> to vector<1x128xf32>
    %195 = vector.shape_cast %192 : vector<1x128xf32> to vector<1x1x128xf32>
    tpu.vector_store %arg13[%c10_116, %c10_117, %c0_118], %195 {strides = array<i32>} : memref<13x13x128xf32, #tpu.memory_space<vmem>>, vector<1x1x128xf32>,
    %c0_119 = arith.constant 0 : index
    %c0_120 = arith.constant 0 : index
    %196 = vector.load %arg8[%c0_119, %c0_120] : memref<1x128xf32, #tpu.memory_space<vmem>>, vector<1x128xf32>
    %c0_i32 = arith.constant 0 : i32
    %c11_i32 = arith.constant 11 : i32
    %197 = arith.addi %c0_i32, %c11_i32 : i32
    %c1_i32 = arith.constant 1 : i32
    scf.for %arg17 = %c0_i32 to %197 step %c1_i32  : i32 {
      %204 = arith.index_cast %arg17 : i32 to index
      %c0_137 = arith.constant 0 : index
      %c0_138 = arith.constant 0 : index
      %205 = vector.load %arg13[%204, %c0_137, %c0_138] : memref<13x13x128xf32, #tpu.memory_space<vmem>>, vector<1x11x128xf32>
      %206 = vector.shape_cast %205 : vector<1x11x128xf32> to vector<11x128xf32>
      %c0_139 = arith.constant 0 : index
      %c0_140 = arith.constant 0 : index
      %c0_141 = arith.constant 0 : index
      %207 = vector.load %arg3[%c0_139, %c0_140, %c0_141] : memref<9x128x128xf32, #tpu.memory_space<vmem>>, vector<1x128x128xf32>
      %208 = vector.shape_cast %207 : vector<1x128x128xf32> to vector<128x128xf32>
      %cst_142 = arith.constant dense<0.000000e+00> : vector<11x128xf32>
      %209 = tpu.matmul %206, %208, %cst_142 {dimension_numbers = #tpu.dot_dimension_numbers<[1], [0], [0], [1], [0, 0, 1, 1], [], []>} : vector<11x128xf32>, vector<128x128xf32>, vector<11x128xf32> -> vector<11x128xf32>
      %c0_i32_143 = arith.constant 0 : i32
      %210 = arith.addi %arg17, %c0_i32_143 : i32
      %211 = arith.index_cast %210 : i32 to index
      %c1 = arith.constant 1 : index
      %c0_144 = arith.constant 0 : index
      %212 = vector.load %arg13[%211, %c1, %c0_144] : memref<13x13x128xf32, #tpu.memory_space<vmem>>, vector<1x11x128xf32>
      %213 = vector.shape_cast %212 : vector<1x11x128xf32> to vector<11x128xf32>
      %c1_145 = arith.constant 1 : index
      %c0_146 = arith.constant 0 : index
      %c0_147 = arith.constant 0 : index
      %214 = vector.load %arg3[%c1_145, %c0_146, %c0_147] : memref<9x128x128xf32, #tpu.memory_space<vmem>>, vector<1x128x128xf32>
      %215 = vector.shape_cast %214 : vector<1x128x128xf32> to vector<128x128xf32>
      %cst_148 = arith.constant dense<0.000000e+00> : vector<11x128xf32>
      %216 = tpu.matmul %213, %215, %cst_148 {dimension_numbers = #tpu.dot_dimension_numbers<[1], [0], [0], [1], [0, 0, 1, 1], [], []>} : vector<11x128xf32>, vector<128x128xf32>, vector<11x128xf32> -> vector<11x128xf32>
      %217 = arith.addf %209, %216 : vector<11x128xf32>
      %c0_i32_149 = arith.constant 0 : i32
      %218 = arith.addi %arg17, %c0_i32_149 : i32
      %219 = arith.index_cast %218 : i32 to index
      %c2_150 = arith.constant 2 : index
      %c0_151 = arith.constant 0 : index
      %220 = vector.load %arg13[%219, %c2_150, %c0_151] : memref<13x13x128xf32, #tpu.memory_space<vmem>>, vector<1x11x128xf32>
      %221 = vector.shape_cast %220 : vector<1x11x128xf32> to vector<11x128xf32>
      %c2_152 = arith.constant 2 : index
      %c0_153 = arith.constant 0 : index
      %c0_154 = arith.constant 0 : index
      %222 = vector.load %arg3[%c2_152, %c0_153, %c0_154] : memref<9x128x128xf32, #tpu.memory_space<vmem>>, vector<1x128x128xf32>
      %223 = vector.shape_cast %222 : vector<1x128x128xf32> to vector<128x128xf32>
      %cst_155 = arith.constant dense<0.000000e+00> : vector<11x128xf32>
      %224 = tpu.matmul %221, %223, %cst_155 {dimension_numbers = #tpu.dot_dimension_numbers<[1], [0], [0], [1], [0, 0, 1, 1], [], []>} : vector<11x128xf32>, vector<128x128xf32>, vector<11x128xf32> -> vector<11x128xf32>
      %225 = arith.addf %217, %224 : vector<11x128xf32>
      %c1_i32_156 = arith.constant 1 : i32
      %226 = arith.addi %arg17, %c1_i32_156 : i32
      %227 = arith.index_cast %226 : i32 to index
      %c0_157 = arith.constant 0 : index
      %c0_158 = arith.constant 0 : index
      %228 = vector.load %arg13[%227, %c0_157, %c0_158] : memref<13x13x128xf32, #tpu.memory_space<vmem>>, vector<1x11x128xf32>
      %229 = vector.shape_cast %228 : vector<1x11x128xf32> to vector<11x128xf32>
      %c3 = arith.constant 3 : index
      %c0_159 = arith.constant 0 : index
      %c0_160 = arith.constant 0 : index
      %230 = vector.load %arg3[%c3, %c0_159, %c0_160] : memref<9x128x128xf32, #tpu.memory_space<vmem>>, vector<1x128x128xf32>
      %231 = vector.shape_cast %230 : vector<1x128x128xf32> to vector<128x128xf32>
      %cst_161 = arith.constant dense<0.000000e+00> : vector<11x128xf32>
      %232 = tpu.matmul %229, %231, %cst_161 {dimension_numbers = #tpu.dot_dimension_numbers<[1], [0], [0], [1], [0, 0, 1, 1], [], []>} : vector<11x128xf32>, vector<128x128xf32>, vector<11x128xf32> -> vector<11x128xf32>
      %233 = arith.addf %225, %232 : vector<11x128xf32>
      %c1_i32_162 = arith.constant 1 : i32
      %234 = arith.addi %arg17, %c1_i32_162 : i32
      %235 = arith.index_cast %234 : i32 to index
      %c1_163 = arith.constant 1 : index
      %c0_164 = arith.constant 0 : index
      %236 = vector.load %arg13[%235, %c1_163, %c0_164] : memref<13x13x128xf32, #tpu.memory_space<vmem>>, vector<1x11x128xf32>
      %237 = vector.shape_cast %236 : vector<1x11x128xf32> to vector<11x128xf32>
      %c4_165 = arith.constant 4 : index
      %c0_166 = arith.constant 0 : index
      %c0_167 = arith.constant 0 : index
      %238 = vector.load %arg3[%c4_165, %c0_166, %c0_167] : memref<9x128x128xf32, #tpu.memory_space<vmem>>, vector<1x128x128xf32>
      %239 = vector.shape_cast %238 : vector<1x128x128xf32> to vector<128x128xf32>
      %cst_168 = arith.constant dense<0.000000e+00> : vector<11x128xf32>
      %240 = tpu.matmul %237, %239, %cst_168 {dimension_numbers = #tpu.dot_dimension_numbers<[1], [0], [0], [1], [0, 0, 1, 1], [], []>} : vector<11x128xf32>, vector<128x128xf32>, vector<11x128xf32> -> vector<11x128xf32>
      %241 = arith.addf %233, %240 : vector<11x128xf32>
      %c1_i32_169 = arith.constant 1 : i32
      %242 = arith.addi %arg17, %c1_i32_169 : i32
      %243 = arith.index_cast %242 : i32 to index
      %c2_170 = arith.constant 2 : index
      %c0_171 = arith.constant 0 : index
      %244 = vector.load %arg13[%243, %c2_170, %c0_171] : memref<13x13x128xf32, #tpu.memory_space<vmem>>, vector<1x11x128xf32>
      %245 = vector.shape_cast %244 : vector<1x11x128xf32> to vector<11x128xf32>
      %c5 = arith.constant 5 : index
      %c0_172 = arith.constant 0 : index
      %c0_173 = arith.constant 0 : index
      %246 = vector.load %arg3[%c5, %c0_172, %c0_173] : memref<9x128x128xf32, #tpu.memory_space<vmem>>, vector<1x128x128xf32>
      %247 = vector.shape_cast %246 : vector<1x128x128xf32> to vector<128x128xf32>
      %cst_174 = arith.constant dense<0.000000e+00> : vector<11x128xf32>
      %248 = tpu.matmul %245, %247, %cst_174 {dimension_numbers = #tpu.dot_dimension_numbers<[1], [0], [0], [1], [0, 0, 1, 1], [], []>} : vector<11x128xf32>, vector<128x128xf32>, vector<11x128xf32> -> vector<11x128xf32>
      %249 = arith.addf %241, %248 : vector<11x128xf32>
      %c2_i32_175 = arith.constant 2 : i32
      %250 = arith.addi %arg17, %c2_i32_175 : i32
      %251 = arith.index_cast %250 : i32 to index
      %c0_176 = arith.constant 0 : index
      %c0_177 = arith.constant 0 : index
      %252 = vector.load %arg13[%251, %c0_176, %c0_177] : memref<13x13x128xf32, #tpu.memory_space<vmem>>, vector<1x11x128xf32>
      %253 = vector.shape_cast %252 : vector<1x11x128xf32> to vector<11x128xf32>
      %c6_178 = arith.constant 6 : index
      %c0_179 = arith.constant 0 : index
      %c0_180 = arith.constant 0 : index
      %254 = vector.load %arg3[%c6_178, %c0_179, %c0_180] : memref<9x128x128xf32, #tpu.memory_space<vmem>>, vector<1x128x128xf32>
      %255 = vector.shape_cast %254 : vector<1x128x128xf32> to vector<128x128xf32>
      %cst_181 = arith.constant dense<0.000000e+00> : vector<11x128xf32>
      %256 = tpu.matmul %253, %255, %cst_181 {dimension_numbers = #tpu.dot_dimension_numbers<[1], [0], [0], [1], [0, 0, 1, 1], [], []>} : vector<11x128xf32>, vector<128x128xf32>, vector<11x128xf32> -> vector<11x128xf32>
      %257 = arith.addf %249, %256 : vector<11x128xf32>
      %c2_i32_182 = arith.constant 2 : i32
      %258 = arith.addi %arg17, %c2_i32_182 : i32
      %259 = arith.index_cast %258 : i32 to index
      %c1_183 = arith.constant 1 : index
      %c0_184 = arith.constant 0 : index
      %260 = vector.load %arg13[%259, %c1_183, %c0_184] : memref<13x13x128xf32, #tpu.memory_space<vmem>>, vector<1x11x128xf32>
      %261 = vector.shape_cast %260 : vector<1x11x128xf32> to vector<11x128xf32>
      %c7 = arith.constant 7 : index
      %c0_185 = arith.constant 0 : index
      %c0_186 = arith.constant 0 : index
      %262 = vector.load %arg3[%c7, %c0_185, %c0_186] : memref<9x128x128xf32, #tpu.memory_space<vmem>>, vector<1x128x128xf32>
      %263 = vector.shape_cast %262 : vector<1x128x128xf32> to vector<128x128xf32>
      %cst_187 = arith.constant dense<0.000000e+00> : vector<11x128xf32>
      %264 = tpu.matmul %261, %263, %cst_187 {dimension_numbers = #tpu.dot_dimension_numbers<[1], [0], [0], [1], [0, 0, 1, 1], [], []>} : vector<11x128xf32>, vector<128x128xf32>, vector<11x128xf32> -> vector<11x128xf32>
      %265 = arith.addf %257, %264 : vector<11x128xf32>
      %c2_i32_188 = arith.constant 2 : i32
      %266 = arith.addi %arg17, %c2_i32_188 : i32
      %267 = arith.index_cast %266 : i32 to index
      %c2_189 = arith.constant 2 : index
      %c0_190 = arith.constant 0 : index
      %268 = vector.load %arg13[%267, %c2_189, %c0_190] : memref<13x13x128xf32, #tpu.memory_space<vmem>>, vector<1x11x128xf32>
      %269 = vector.shape_cast %268 : vector<1x11x128xf32> to vector<11x128xf32>
      %c8_191 = arith.constant 8 : index
      %c0_192 = arith.constant 0 : index
      %c0_193 = arith.constant 0 : index
      %270 = vector.load %arg3[%c8_191, %c0_192, %c0_193] : memref<9x128x128xf32, #tpu.memory_space<vmem>>, vector<1x128x128xf32>
      %271 = vector.shape_cast %270 : vector<1x128x128xf32> to vector<128x128xf32>
      %cst_194 = arith.constant dense<0.000000e+00> : vector<11x128xf32>
      %272 = tpu.matmul %269, %271, %cst_194 {dimension_numbers = #tpu.dot_dimension_numbers<[1], [0], [0], [1], [0, 0, 1, 1], [], []>} : vector<11x128xf32>, vector<128x128xf32>, vector<11x128xf32> -> vector<11x128xf32>
      %273 = arith.addf %265, %272 : vector<11x128xf32>
      %274 = vector.broadcast %196 : vector<1x128xf32> to vector<11x128xf32>
      %275 = arith.addf %273, %274 : vector<11x128xf32>
      %cst_195 = arith.constant 0.000000e+00 : f32
      %276 = vector.broadcast %cst_195 : f32 to vector<11x128xf32>
      %277 = arith.maximumf %275, %276 : vector<11x128xf32>
      %cst_196 = arith.constant dense<0.000000e+00> : vector<21x128xf32>
      %278 = tpu.matmul %15, %277, %cst_196 {dimension_numbers = #tpu.dot_dimension_numbers<[1], [0], [0], [1], [0, 0, 1, 1], [], []>} : vector<21x11xf32>, vector<11x128xf32>, vector<21x128xf32> -> vector<21x128xf32>
      %c2_i32_197 = arith.constant 2 : i32
      %279 = arith.muli %c2_i32_197, %arg17 : i32
      %c3_i32 = arith.constant 3 : i32
      %280 = arith.addi %c3_i32, %279 : i32
      %281 = arith.index_cast %280 : i32 to index
      %c3_198 = arith.constant 3 : index
      %c0_199 = arith.constant 0 : index
      %282 = vector.load %arg14[%281, %c3_198, %c0_199] : memref<27x27x128xf32, #tpu.memory_space<vmem>>, vector<1x21x128xf32>
      %283 = vector.shape_cast %282 : vector<1x21x128xf32> to vector<21x128xf32>
      %284 = vector.shape_cast %278 : vector<21x128xf32> to vector<1x21x128xf32>
      tpu.vector_store %arg14[%281, %c3_198, %c0_199], %284 {strides = array<i32>} : memref<27x27x128xf32, #tpu.memory_space<vmem>>, vector<1x21x128xf32>,
    }
    %c11_i32_121 = arith.constant 11 : i32
    %c0_122 = arith.constant 0 : index
    %c0_123 = arith.constant 0 : index
    %198 = vector.load %arg9[%c0_122, %c0_123] : memref<1x128xf32, #tpu.memory_space<vmem>>, vector<1x128xf32>
    %c0_i32_124 = arith.constant 0 : i32
    %c24_i32 = arith.constant 24 : i32
    %199 = arith.addi %c0_i32_124, %c24_i32 : i32
    %c1_i32_125 = arith.constant 1 : i32
    scf.for %arg17 = %c0_i32_124 to %199 step %c1_i32_125  : i32 {
      %204 = arith.index_cast %arg17 : i32 to index
      %c0_137 = arith.constant 0 : index
      %c0_138 = arith.constant 0 : index
      %205 = vector.load %arg14[%204, %c0_137, %c0_138] : memref<27x27x128xf32, #tpu.memory_space<vmem>>, vector<1x24x128xf32>
      %206 = vector.shape_cast %205 : vector<1x24x128xf32> to vector<24x128xf32>
      %c0_139 = arith.constant 0 : index
      %c0_140 = arith.constant 0 : index
      %c0_141 = arith.constant 0 : index
      %207 = vector.load %arg4[%c0_139, %c0_140, %c0_141] : memref<16x128x128xf32, #tpu.memory_space<vmem>>, vector<1x128x128xf32>
      %208 = vector.shape_cast %207 : vector<1x128x128xf32> to vector<128x128xf32>
      %cst_142 = arith.constant dense<0.000000e+00> : vector<24x128xf32>
      %209 = tpu.matmul %206, %208, %cst_142 {dimension_numbers = #tpu.dot_dimension_numbers<[1], [0], [0], [1], [0, 0, 1, 1], [], []>} : vector<24x128xf32>, vector<128x128xf32>, vector<24x128xf32> -> vector<24x128xf32>
      %c0_i32_143 = arith.constant 0 : i32
      %210 = arith.addi %arg17, %c0_i32_143 : i32
      %211 = arith.index_cast %210 : i32 to index
      %c1 = arith.constant 1 : index
      %c0_144 = arith.constant 0 : index
      %212 = vector.load %arg14[%211, %c1, %c0_144] : memref<27x27x128xf32, #tpu.memory_space<vmem>>, vector<1x24x128xf32>
      %213 = vector.shape_cast %212 : vector<1x24x128xf32> to vector<24x128xf32>
      %c1_145 = arith.constant 1 : index
      %c0_146 = arith.constant 0 : index
      %c0_147 = arith.constant 0 : index
      %214 = vector.load %arg4[%c1_145, %c0_146, %c0_147] : memref<16x128x128xf32, #tpu.memory_space<vmem>>, vector<1x128x128xf32>
      %215 = vector.shape_cast %214 : vector<1x128x128xf32> to vector<128x128xf32>
      %cst_148 = arith.constant dense<0.000000e+00> : vector<24x128xf32>
      %216 = tpu.matmul %213, %215, %cst_148 {dimension_numbers = #tpu.dot_dimension_numbers<[1], [0], [0], [1], [0, 0, 1, 1], [], []>} : vector<24x128xf32>, vector<128x128xf32>, vector<24x128xf32> -> vector<24x128xf32>
      %217 = arith.addf %209, %216 : vector<24x128xf32>
      %c0_i32_149 = arith.constant 0 : i32
      %218 = arith.addi %arg17, %c0_i32_149 : i32
      %219 = arith.index_cast %218 : i32 to index
      %c2_150 = arith.constant 2 : index
      %c0_151 = arith.constant 0 : index
      %220 = vector.load %arg14[%219, %c2_150, %c0_151] : memref<27x27x128xf32, #tpu.memory_space<vmem>>, vector<1x24x128xf32>
      %221 = vector.shape_cast %220 : vector<1x24x128xf32> to vector<24x128xf32>
      %c2_152 = arith.constant 2 : index
      %c0_153 = arith.constant 0 : index
      %c0_154 = arith.constant 0 : index
      %222 = vector.load %arg4[%c2_152, %c0_153, %c0_154] : memref<16x128x128xf32, #tpu.memory_space<vmem>>, vector<1x128x128xf32>
      %223 = vector.shape_cast %222 : vector<1x128x128xf32> to vector<128x128xf32>
      %cst_155 = arith.constant dense<0.000000e+00> : vector<24x128xf32>
      %224 = tpu.matmul %221, %223, %cst_155 {dimension_numbers = #tpu.dot_dimension_numbers<[1], [0], [0], [1], [0, 0, 1, 1], [], []>} : vector<24x128xf32>, vector<128x128xf32>, vector<24x128xf32> -> vector<24x128xf32>
      %225 = arith.addf %217, %224 : vector<24x128xf32>
      %c0_i32_156 = arith.constant 0 : i32
      %226 = arith.addi %arg17, %c0_i32_156 : i32
      %227 = arith.index_cast %226 : i32 to index
      %c3 = arith.constant 3 : index
      %c0_157 = arith.constant 0 : index
      %228 = vector.load %arg14[%227, %c3, %c0_157] : memref<27x27x128xf32, #tpu.memory_space<vmem>>, vector<1x24x128xf32>
      %229 = vector.shape_cast %228 : vector<1x24x128xf32> to vector<24x128xf32>
      %c3_158 = arith.constant 3 : index
      %c0_159 = arith.constant 0 : index
      %c0_160 = arith.constant 0 : index
      %230 = vector.load %arg4[%c3_158, %c0_159, %c0_160] : memref<16x128x128xf32, #tpu.memory_space<vmem>>, vector<1x128x128xf32>
      %231 = vector.shape_cast %230 : vector<1x128x128xf32> to vector<128x128xf32>
      %cst_161 = arith.constant dense<0.000000e+00> : vector<24x128xf32>
      %232 = tpu.matmul %229, %231, %cst_161 {dimension_numbers = #tpu.dot_dimension_numbers<[1], [0], [0], [1], [0, 0, 1, 1], [], []>} : vector<24x128xf32>, vector<128x128xf32>, vector<24x128xf32> -> vector<24x128xf32>
      %233 = arith.addf %225, %232 : vector<24x128xf32>
      %c1_i32_162 = arith.constant 1 : i32
      %234 = arith.addi %arg17, %c1_i32_162 : i32
      %235 = arith.index_cast %234 : i32 to index
      %c0_163 = arith.constant 0 : index
      %c0_164 = arith.constant 0 : index
      %236 = vector.load %arg14[%235, %c0_163, %c0_164] : memref<27x27x128xf32, #tpu.memory_space<vmem>>, vector<1x24x128xf32>
      %237 = vector.shape_cast %236 : vector<1x24x128xf32> to vector<24x128xf32>
      %c4_165 = arith.constant 4 : index
      %c0_166 = arith.constant 0 : index
      %c0_167 = arith.constant 0 : index
      %238 = vector.load %arg4[%c4_165, %c0_166, %c0_167] : memref<16x128x128xf32, #tpu.memory_space<vmem>>, vector<1x128x128xf32>
      %239 = vector.shape_cast %238 : vector<1x128x128xf32> to vector<128x128xf32>
      %cst_168 = arith.constant dense<0.000000e+00> : vector<24x128xf32>
      %240 = tpu.matmul %237, %239, %cst_168 {dimension_numbers = #tpu.dot_dimension_numbers<[1], [0], [0], [1], [0, 0, 1, 1], [], []>} : vector<24x128xf32>, vector<128x128xf32>, vector<24x128xf32> -> vector<24x128xf32>
      %241 = arith.addf %233, %240 : vector<24x128xf32>
      %c1_i32_169 = arith.constant 1 : i32
      %242 = arith.addi %arg17, %c1_i32_169 : i32
      %243 = arith.index_cast %242 : i32 to index
      %c1_170 = arith.constant 1 : index
      %c0_171 = arith.constant 0 : index
      %244 = vector.load %arg14[%243, %c1_170, %c0_171] : memref<27x27x128xf32, #tpu.memory_space<vmem>>, vector<1x24x128xf32>
      %245 = vector.shape_cast %244 : vector<1x24x128xf32> to vector<24x128xf32>
      %c5 = arith.constant 5 : index
      %c0_172 = arith.constant 0 : index
      %c0_173 = arith.constant 0 : index
      %246 = vector.load %arg4[%c5, %c0_172, %c0_173] : memref<16x128x128xf32, #tpu.memory_space<vmem>>, vector<1x128x128xf32>
      %247 = vector.shape_cast %246 : vector<1x128x128xf32> to vector<128x128xf32>
      %cst_174 = arith.constant dense<0.000000e+00> : vector<24x128xf32>
      %248 = tpu.matmul %245, %247, %cst_174 {dimension_numbers = #tpu.dot_dimension_numbers<[1], [0], [0], [1], [0, 0, 1, 1], [], []>} : vector<24x128xf32>, vector<128x128xf32>, vector<24x128xf32> -> vector<24x128xf32>
      %249 = arith.addf %241, %248 : vector<24x128xf32>
      %c1_i32_175 = arith.constant 1 : i32
      %250 = arith.addi %arg17, %c1_i32_175 : i32
      %251 = arith.index_cast %250 : i32 to index
      %c2_176 = arith.constant 2 : index
      %c0_177 = arith.constant 0 : index
      %252 = vector.load %arg14[%251, %c2_176, %c0_177] : memref<27x27x128xf32, #tpu.memory_space<vmem>>, vector<1x24x128xf32>
      %253 = vector.shape_cast %252 : vector<1x24x128xf32> to vector<24x128xf32>
      %c6_178 = arith.constant 6 : index
      %c0_179 = arith.constant 0 : index
      %c0_180 = arith.constant 0 : index
      %254 = vector.load %arg4[%c6_178, %c0_179, %c0_180] : memref<16x128x128xf32, #tpu.memory_space<vmem>>, vector<1x128x128xf32>
      %255 = vector.shape_cast %254 : vector<1x128x128xf32> to vector<128x128xf32>
      %cst_181 = arith.constant dense<0.000000e+00> : vector<24x128xf32>
      %256 = tpu.matmul %253, %255, %cst_181 {dimension_numbers = #tpu.dot_dimension_numbers<[1], [0], [0], [1], [0, 0, 1, 1], [], []>} : vector<24x128xf32>, vector<128x128xf32>, vector<24x128xf32> -> vector<24x128xf32>
      %257 = arith.addf %249, %256 : vector<24x128xf32>
      %c1_i32_182 = arith.constant 1 : i32
      %258 = arith.addi %arg17, %c1_i32_182 : i32
      %259 = arith.index_cast %258 : i32 to index
      %c3_183 = arith.constant 3 : index
      %c0_184 = arith.constant 0 : index
      %260 = vector.load %arg14[%259, %c3_183, %c0_184] : memref<27x27x128xf32, #tpu.memory_space<vmem>>, vector<1x24x128xf32>
      %261 = vector.shape_cast %260 : vector<1x24x128xf32> to vector<24x128xf32>
      %c7 = arith.constant 7 : index
      %c0_185 = arith.constant 0 : index
      %c0_186 = arith.constant 0 : index
      %262 = vector.load %arg4[%c7, %c0_185, %c0_186] : memref<16x128x128xf32, #tpu.memory_space<vmem>>, vector<1x128x128xf32>
      %263 = vector.shape_cast %262 : vector<1x128x128xf32> to vector<128x128xf32>
      %cst_187 = arith.constant dense<0.000000e+00> : vector<24x128xf32>
      %264 = tpu.matmul %261, %263, %cst_187 {dimension_numbers = #tpu.dot_dimension_numbers<[1], [0], [0], [1], [0, 0, 1, 1], [], []>} : vector<24x128xf32>, vector<128x128xf32>, vector<24x128xf32> -> vector<24x128xf32>
      %265 = arith.addf %257, %264 : vector<24x128xf32>
      %c2_i32_188 = arith.constant 2 : i32
      %266 = arith.addi %arg17, %c2_i32_188 : i32
      %267 = arith.index_cast %266 : i32 to index
      %c0_189 = arith.constant 0 : index
      %c0_190 = arith.constant 0 : index
      %268 = vector.load %arg14[%267, %c0_189, %c0_190] : memref<27x27x128xf32, #tpu.memory_space<vmem>>, vector<1x24x128xf32>
      %269 = vector.shape_cast %268 : vector<1x24x128xf32> to vector<24x128xf32>
      %c8_191 = arith.constant 8 : index
      %c0_192 = arith.constant 0 : index
      %c0_193 = arith.constant 0 : index
      %270 = vector.load %arg4[%c8_191, %c0_192, %c0_193] : memref<16x128x128xf32, #tpu.memory_space<vmem>>, vector<1x128x128xf32>
      %271 = vector.shape_cast %270 : vector<1x128x128xf32> to vector<128x128xf32>
      %cst_194 = arith.constant dense<0.000000e+00> : vector<24x128xf32>
      %272 = tpu.matmul %269, %271, %cst_194 {dimension_numbers = #tpu.dot_dimension_numbers<[1], [0], [0], [1], [0, 0, 1, 1], [], []>} : vector<24x128xf32>, vector<128x128xf32>, vector<24x128xf32> -> vector<24x128xf32>
      %273 = arith.addf %265, %272 : vector<24x128xf32>
      %c2_i32_195 = arith.constant 2 : i32
      %274 = arith.addi %arg17, %c2_i32_195 : i32
      %275 = arith.index_cast %274 : i32 to index
      %c1_196 = arith.constant 1 : index
      %c0_197 = arith.constant 0 : index
      %276 = vector.load %arg14[%275, %c1_196, %c0_197] : memref<27x27x128xf32, #tpu.memory_space<vmem>>, vector<1x24x128xf32>
      %277 = vector.shape_cast %276 : vector<1x24x128xf32> to vector<24x128xf32>
      %c9 = arith.constant 9 : index
      %c0_198 = arith.constant 0 : index
      %c0_199 = arith.constant 0 : index
      %278 = vector.load %arg4[%c9, %c0_198, %c0_199] : memref<16x128x128xf32, #tpu.memory_space<vmem>>, vector<1x128x128xf32>
      %279 = vector.shape_cast %278 : vector<1x128x128xf32> to vector<128x128xf32>
      %cst_200 = arith.constant dense<0.000000e+00> : vector<24x128xf32>
      %280 = tpu.matmul %277, %279, %cst_200 {dimension_numbers = #tpu.dot_dimension_numbers<[1], [0], [0], [1], [0, 0, 1, 1], [], []>} : vector<24x128xf32>, vector<128x128xf32>, vector<24x128xf32> -> vector<24x128xf32>
      %281 = arith.addf %273, %280 : vector<24x128xf32>
      %c2_i32_201 = arith.constant 2 : i32
      %282 = arith.addi %arg17, %c2_i32_201 : i32
      %283 = arith.index_cast %282 : i32 to index
      %c2_202 = arith.constant 2 : index
      %c0_203 = arith.constant 0 : index
      %284 = vector.load %arg14[%283, %c2_202, %c0_203] : memref<27x27x128xf32, #tpu.memory_space<vmem>>, vector<1x24x128xf32>
      %285 = vector.shape_cast %284 : vector<1x24x128xf32> to vector<24x128xf32>
      %c10_204 = arith.constant 10 : index
      %c0_205 = arith.constant 0 : index
      %c0_206 = arith.constant 0 : index
      %286 = vector.load %arg4[%c10_204, %c0_205, %c0_206] : memref<16x128x128xf32, #tpu.memory_space<vmem>>, vector<1x128x128xf32>
      %287 = vector.shape_cast %286 : vector<1x128x128xf32> to vector<128x128xf32>
      %cst_207 = arith.constant dense<0.000000e+00> : vector<24x128xf32>
      %288 = tpu.matmul %285, %287, %cst_207 {dimension_numbers = #tpu.dot_dimension_numbers<[1], [0], [0], [1], [0, 0, 1, 1], [], []>} : vector<24x128xf32>, vector<128x128xf32>, vector<24x128xf32> -> vector<24x128xf32>
      %289 = arith.addf %281, %288 : vector<24x128xf32>
      %c2_i32_208 = arith.constant 2 : i32
      %290 = arith.addi %arg17, %c2_i32_208 : i32
      %291 = arith.index_cast %290 : i32 to index
      %c3_209 = arith.constant 3 : index
      %c0_210 = arith.constant 0 : index
      %292 = vector.load %arg14[%291, %c3_209, %c0_210] : memref<27x27x128xf32, #tpu.memory_space<vmem>>, vector<1x24x128xf32>
      %293 = vector.shape_cast %292 : vector<1x24x128xf32> to vector<24x128xf32>
      %c11 = arith.constant 11 : index
      %c0_211 = arith.constant 0 : index
      %c0_212 = arith.constant 0 : index
      %294 = vector.load %arg4[%c11, %c0_211, %c0_212] : memref<16x128x128xf32, #tpu.memory_space<vmem>>, vector<1x128x128xf32>
      %295 = vector.shape_cast %294 : vector<1x128x128xf32> to vector<128x128xf32>
      %cst_213 = arith.constant dense<0.000000e+00> : vector<24x128xf32>
      %296 = tpu.matmul %293, %295, %cst_213 {dimension_numbers = #tpu.dot_dimension_numbers<[1], [0], [0], [1], [0, 0, 1, 1], [], []>} : vector<24x128xf32>, vector<128x128xf32>, vector<24x128xf32> -> vector<24x128xf32>
      %297 = arith.addf %289, %296 : vector<24x128xf32>
      %c3_i32 = arith.constant 3 : i32
      %298 = arith.addi %arg17, %c3_i32 : i32
      %299 = arith.index_cast %298 : i32 to index
      %c0_214 = arith.constant 0 : index
      %c0_215 = arith.constant 0 : index
      %300 = vector.load %arg14[%299, %c0_214, %c0_215] : memref<27x27x128xf32, #tpu.memory_space<vmem>>, vector<1x24x128xf32>
      %301 = vector.shape_cast %300 : vector<1x24x128xf32> to vector<24x128xf32>
      %c12 = arith.constant 12 : index
      %c0_216 = arith.constant 0 : index
      %c0_217 = arith.constant 0 : index
      %302 = vector.load %arg4[%c12, %c0_216, %c0_217] : memref<16x128x128xf32, #tpu.memory_space<vmem>>, vector<1x128x128xf32>
      %303 = vector.shape_cast %302 : vector<1x128x128xf32> to vector<128x128xf32>
      %cst_218 = arith.constant dense<0.000000e+00> : vector<24x128xf32>
      %304 = tpu.matmul %301, %303, %cst_218 {dimension_numbers = #tpu.dot_dimension_numbers<[1], [0], [0], [1], [0, 0, 1, 1], [], []>} : vector<24x128xf32>, vector<128x128xf32>, vector<24x128xf32> -> vector<24x128xf32>
      %305 = arith.addf %297, %304 : vector<24x128xf32>
      %c3_i32_219 = arith.constant 3 : i32
      %306 = arith.addi %arg17, %c3_i32_219 : i32
      %307 = arith.index_cast %306 : i32 to index
      %c1_220 = arith.constant 1 : index
      %c0_221 = arith.constant 0 : index
      %308 = vector.load %arg14[%307, %c1_220, %c0_221] : memref<27x27x128xf32, #tpu.memory_space<vmem>>, vector<1x24x128xf32>
      %309 = vector.shape_cast %308 : vector<1x24x128xf32> to vector<24x128xf32>
      %c13 = arith.constant 13 : index
      %c0_222 = arith.constant 0 : index
      %c0_223 = arith.constant 0 : index
      %310 = vector.load %arg4[%c13, %c0_222, %c0_223] : memref<16x128x128xf32, #tpu.memory_space<vmem>>, vector<1x128x128xf32>
      %311 = vector.shape_cast %310 : vector<1x128x128xf32> to vector<128x128xf32>
      %cst_224 = arith.constant dense<0.000000e+00> : vector<24x128xf32>
      %312 = tpu.matmul %309, %311, %cst_224 {dimension_numbers = #tpu.dot_dimension_numbers<[1], [0], [0], [1], [0, 0, 1, 1], [], []>} : vector<24x128xf32>, vector<128x128xf32>, vector<24x128xf32> -> vector<24x128xf32>
      %313 = arith.addf %305, %312 : vector<24x128xf32>
      %c3_i32_225 = arith.constant 3 : i32
      %314 = arith.addi %arg17, %c3_i32_225 : i32
      %315 = arith.index_cast %314 : i32 to index
      %c2_226 = arith.constant 2 : index
      %c0_227 = arith.constant 0 : index
      %316 = vector.load %arg14[%315, %c2_226, %c0_227] : memref<27x27x128xf32, #tpu.memory_space<vmem>>, vector<1x24x128xf32>
      %317 = vector.shape_cast %316 : vector<1x24x128xf32> to vector<24x128xf32>
      %c14 = arith.constant 14 : index
      %c0_228 = arith.constant 0 : index
      %c0_229 = arith.constant 0 : index
      %318 = vector.load %arg4[%c14, %c0_228, %c0_229] : memref<16x128x128xf32, #tpu.memory_space<vmem>>, vector<1x128x128xf32>
      %319 = vector.shape_cast %318 : vector<1x128x128xf32> to vector<128x128xf32>
      %cst_230 = arith.constant dense<0.000000e+00> : vector<24x128xf32>
      %320 = tpu.matmul %317, %319, %cst_230 {dimension_numbers = #tpu.dot_dimension_numbers<[1], [0], [0], [1], [0, 0, 1, 1], [], []>} : vector<24x128xf32>, vector<128x128xf32>, vector<24x128xf32> -> vector<24x128xf32>
      %321 = arith.addf %313, %320 : vector<24x128xf32>
      %c3_i32_231 = arith.constant 3 : i32
      %322 = arith.addi %arg17, %c3_i32_231 : i32
      %323 = arith.index_cast %322 : i32 to index
      %c3_232 = arith.constant 3 : index
      %c0_233 = arith.constant 0 : index
      %324 = vector.load %arg14[%323, %c3_232, %c0_233] : memref<27x27x128xf32, #tpu.memory_space<vmem>>, vector<1x24x128xf32>
      %325 = vector.shape_cast %324 : vector<1x24x128xf32> to vector<24x128xf32>
      %c15 = arith.constant 15 : index
      %c0_234 = arith.constant 0 : index
      %c0_235 = arith.constant 0 : index
      %326 = vector.load %arg4[%c15, %c0_234, %c0_235] : memref<16x128x128xf32, #tpu.memory_space<vmem>>, vector<1x128x128xf32>
      %327 = vector.shape_cast %326 : vector<1x128x128xf32> to vector<128x128xf32>
      %cst_236 = arith.constant dense<0.000000e+00> : vector<24x128xf32>
      %328 = tpu.matmul %325, %327, %cst_236 {dimension_numbers = #tpu.dot_dimension_numbers<[1], [0], [0], [1], [0, 0, 1, 1], [], []>} : vector<24x128xf32>, vector<128x128xf32>, vector<24x128xf32> -> vector<24x128xf32>
      %329 = arith.addf %321, %328 : vector<24x128xf32>
      %330 = vector.broadcast %198 : vector<1x128xf32> to vector<24x128xf32>
      %331 = arith.addf %329, %330 : vector<24x128xf32>
      %cst_237 = arith.constant 0.000000e+00 : f32
      %332 = vector.broadcast %cst_237 : f32 to vector<24x128xf32>
      %333 = arith.maximumf %331, %332 : vector<24x128xf32>
      %c4_i32 = arith.constant 4 : i32
      %334 = arith.addi %c4_i32, %arg17 : i32
      %335 = arith.index_cast %334 : i32 to index
      %c4_238 = arith.constant 4 : index
      %c0_239 = arith.constant 0 : index
      %336 = vector.load %arg15[%335, %c4_238, %c0_239] : memref<32x32x128xf32, #tpu.memory_space<vmem>>, vector<1x24x128xf32>
      %337 = vector.shape_cast %336 : vector<1x24x128xf32> to vector<24x128xf32>
      %338 = vector.shape_cast %333 : vector<24x128xf32> to vector<1x24x128xf32>
      tpu.vector_store %arg15[%335, %c4_238, %c0_239], %338 {strides = array<i32>} : memref<32x32x128xf32, #tpu.memory_space<vmem>>, vector<1x24x128xf32>,
    }
    %c24_i32_126 = arith.constant 24 : i32
    %c0_127 = arith.constant 0 : index
    %c0_128 = arith.constant 0 : index
    %200 = vector.load %arg10[%c0_127, %c0_128] : memref<1x128xf32, #tpu.memory_space<vmem>>, vector<1x128xf32>
    %c0_i32_129 = arith.constant 0 : i32
    %c28_i32 = arith.constant 28 : i32
    %201 = arith.addi %c0_i32_129, %c28_i32 : i32
    %c1_i32_130 = arith.constant 1 : i32
    scf.for %arg17 = %c0_i32_129 to %201 step %c1_i32_130  : i32 {
      %204 = arith.index_cast %arg17 : i32 to index
      %c0_137 = arith.constant 0 : index
      %c0_138 = arith.constant 0 : index
      %205 = vector.load %arg15[%204, %c0_137, %c0_138] : memref<32x32x128xf32, #tpu.memory_space<vmem>>, vector<1x28x128xf32>
      %206 = vector.shape_cast %205 : vector<1x28x128xf32> to vector<28x128xf32>
      %c0_139 = arith.constant 0 : index
      %c0_140 = arith.constant 0 : index
      %c0_141 = arith.constant 0 : index
      %207 = vector.load %arg5[%c0_139, %c0_140, %c0_141] : memref<25x128x128xf32, #tpu.memory_space<vmem>>, vector<1x128x128xf32>
      %208 = vector.shape_cast %207 : vector<1x128x128xf32> to vector<128x128xf32>
      %cst_142 = arith.constant dense<0.000000e+00> : vector<28x128xf32>
      %209 = tpu.matmul %206, %208, %cst_142 {dimension_numbers = #tpu.dot_dimension_numbers<[1], [0], [0], [1], [0, 0, 1, 1], [], []>} : vector<28x128xf32>, vector<128x128xf32>, vector<28x128xf32> -> vector<28x128xf32>
      %c0_i32_143 = arith.constant 0 : i32
      %210 = arith.addi %arg17, %c0_i32_143 : i32
      %211 = arith.index_cast %210 : i32 to index
      %c1 = arith.constant 1 : index
      %c0_144 = arith.constant 0 : index
      %212 = vector.load %arg15[%211, %c1, %c0_144] : memref<32x32x128xf32, #tpu.memory_space<vmem>>, vector<1x28x128xf32>
      %213 = vector.shape_cast %212 : vector<1x28x128xf32> to vector<28x128xf32>
      %c1_145 = arith.constant 1 : index
      %c0_146 = arith.constant 0 : index
      %c0_147 = arith.constant 0 : index
      %214 = vector.load %arg5[%c1_145, %c0_146, %c0_147] : memref<25x128x128xf32, #tpu.memory_space<vmem>>, vector<1x128x128xf32>
      %215 = vector.shape_cast %214 : vector<1x128x128xf32> to vector<128x128xf32>
      %cst_148 = arith.constant dense<0.000000e+00> : vector<28x128xf32>
      %216 = tpu.matmul %213, %215, %cst_148 {dimension_numbers = #tpu.dot_dimension_numbers<[1], [0], [0], [1], [0, 0, 1, 1], [], []>} : vector<28x128xf32>, vector<128x128xf32>, vector<28x128xf32> -> vector<28x128xf32>
      %217 = arith.addf %209, %216 : vector<28x128xf32>
      %c0_i32_149 = arith.constant 0 : i32
      %218 = arith.addi %arg17, %c0_i32_149 : i32
      %219 = arith.index_cast %218 : i32 to index
      %c2_150 = arith.constant 2 : index
      %c0_151 = arith.constant 0 : index
      %220 = vector.load %arg15[%219, %c2_150, %c0_151] : memref<32x32x128xf32, #tpu.memory_space<vmem>>, vector<1x28x128xf32>
      %221 = vector.shape_cast %220 : vector<1x28x128xf32> to vector<28x128xf32>
      %c2_152 = arith.constant 2 : index
      %c0_153 = arith.constant 0 : index
      %c0_154 = arith.constant 0 : index
      %222 = vector.load %arg5[%c2_152, %c0_153, %c0_154] : memref<25x128x128xf32, #tpu.memory_space<vmem>>, vector<1x128x128xf32>
      %223 = vector.shape_cast %222 : vector<1x128x128xf32> to vector<128x128xf32>
      %cst_155 = arith.constant dense<0.000000e+00> : vector<28x128xf32>
      %224 = tpu.matmul %221, %223, %cst_155 {dimension_numbers = #tpu.dot_dimension_numbers<[1], [0], [0], [1], [0, 0, 1, 1], [], []>} : vector<28x128xf32>, vector<128x128xf32>, vector<28x128xf32> -> vector<28x128xf32>
      %225 = arith.addf %217, %224 : vector<28x128xf32>
      %c0_i32_156 = arith.constant 0 : i32
      %226 = arith.addi %arg17, %c0_i32_156 : i32
      %227 = arith.index_cast %226 : i32 to index
      %c3 = arith.constant 3 : index
      %c0_157 = arith.constant 0 : index
      %228 = vector.load %arg15[%227, %c3, %c0_157] : memref<32x32x128xf32, #tpu.memory_space<vmem>>, vector<1x28x128xf32>
      %229 = vector.shape_cast %228 : vector<1x28x128xf32> to vector<28x128xf32>
      %c3_158 = arith.constant 3 : index
      %c0_159 = arith.constant 0 : index
      %c0_160 = arith.constant 0 : index
      %230 = vector.load %arg5[%c3_158, %c0_159, %c0_160] : memref<25x128x128xf32, #tpu.memory_space<vmem>>, vector<1x128x128xf32>
      %231 = vector.shape_cast %230 : vector<1x128x128xf32> to vector<128x128xf32>
      %cst_161 = arith.constant dense<0.000000e+00> : vector<28x128xf32>
      %232 = tpu.matmul %229, %231, %cst_161 {dimension_numbers = #tpu.dot_dimension_numbers<[1], [0], [0], [1], [0, 0, 1, 1], [], []>} : vector<28x128xf32>, vector<128x128xf32>, vector<28x128xf32> -> vector<28x128xf32>
      %233 = arith.addf %225, %232 : vector<28x128xf32>
      %c0_i32_162 = arith.constant 0 : i32
      %234 = arith.addi %arg17, %c0_i32_162 : i32
      %235 = arith.index_cast %234 : i32 to index
      %c4_163 = arith.constant 4 : index
      %c0_164 = arith.constant 0 : index
      %236 = vector.load %arg15[%235, %c4_163, %c0_164] : memref<32x32x128xf32, #tpu.memory_space<vmem>>, vector<1x28x128xf32>
      %237 = vector.shape_cast %236 : vector<1x28x128xf32> to vector<28x128xf32>
      %c4_165 = arith.constant 4 : index
      %c0_166 = arith.constant 0 : index
      %c0_167 = arith.constant 0 : index
      %238 = vector.load %arg5[%c4_165, %c0_166, %c0_167] : memref<25x128x128xf32, #tpu.memory_space<vmem>>, vector<1x128x128xf32>
      %239 = vector.shape_cast %238 : vector<1x128x128xf32> to vector<128x128xf32>
      %cst_168 = arith.constant dense<0.000000e+00> : vector<28x128xf32>
      %240 = tpu.matmul %237, %239, %cst_168 {dimension_numbers = #tpu.dot_dimension_numbers<[1], [0], [0], [1], [0, 0, 1, 1], [], []>} : vector<28x128xf32>, vector<128x128xf32>, vector<28x128xf32> -> vector<28x128xf32>
      %241 = arith.addf %233, %240 : vector<28x128xf32>
      %c1_i32_169 = arith.constant 1 : i32
      %242 = arith.addi %arg17, %c1_i32_169 : i32
      %243 = arith.index_cast %242 : i32 to index
      %c0_170 = arith.constant 0 : index
      %c0_171 = arith.constant 0 : index
      %244 = vector.load %arg15[%243, %c0_170, %c0_171] : memref<32x32x128xf32, #tpu.memory_space<vmem>>, vector<1x28x128xf32>
      %245 = vector.shape_cast %244 : vector<1x28x128xf32> to vector<28x128xf32>
      %c5 = arith.constant 5 : index
      %c0_172 = arith.constant 0 : index
      %c0_173 = arith.constant 0 : index
      %246 = vector.load %arg5[%c5, %c0_172, %c0_173] : memref<25x128x128xf32, #tpu.memory_space<vmem>>, vector<1x128x128xf32>
      %247 = vector.shape_cast %246 : vector<1x128x128xf32> to vector<128x128xf32>
      %cst_174 = arith.constant dense<0.000000e+00> : vector<28x128xf32>
      %248 = tpu.matmul %245, %247, %cst_174 {dimension_numbers = #tpu.dot_dimension_numbers<[1], [0], [0], [1], [0, 0, 1, 1], [], []>} : vector<28x128xf32>, vector<128x128xf32>, vector<28x128xf32> -> vector<28x128xf32>
      %249 = arith.addf %241, %248 : vector<28x128xf32>
      %c1_i32_175 = arith.constant 1 : i32
      %250 = arith.addi %arg17, %c1_i32_175 : i32
      %251 = arith.index_cast %250 : i32 to index
      %c1_176 = arith.constant 1 : index
      %c0_177 = arith.constant 0 : index
      %252 = vector.load %arg15[%251, %c1_176, %c0_177] : memref<32x32x128xf32, #tpu.memory_space<vmem>>, vector<1x28x128xf32>
      %253 = vector.shape_cast %252 : vector<1x28x128xf32> to vector<28x128xf32>
      %c6_178 = arith.constant 6 : index
      %c0_179 = arith.constant 0 : index
      %c0_180 = arith.constant 0 : index
      %254 = vector.load %arg5[%c6_178, %c0_179, %c0_180] : memref<25x128x128xf32, #tpu.memory_space<vmem>>, vector<1x128x128xf32>
      %255 = vector.shape_cast %254 : vector<1x128x128xf32> to vector<128x128xf32>
      %cst_181 = arith.constant dense<0.000000e+00> : vector<28x128xf32>
      %256 = tpu.matmul %253, %255, %cst_181 {dimension_numbers = #tpu.dot_dimension_numbers<[1], [0], [0], [1], [0, 0, 1, 1], [], []>} : vector<28x128xf32>, vector<128x128xf32>, vector<28x128xf32> -> vector<28x128xf32>
      %257 = arith.addf %249, %256 : vector<28x128xf32>
      %c1_i32_182 = arith.constant 1 : i32
      %258 = arith.addi %arg17, %c1_i32_182 : i32
      %259 = arith.index_cast %258 : i32 to index
      %c2_183 = arith.constant 2 : index
      %c0_184 = arith.constant 0 : index
      %260 = vector.load %arg15[%259, %c2_183, %c0_184] : memref<32x32x128xf32, #tpu.memory_space<vmem>>, vector<1x28x128xf32>
      %261 = vector.shape_cast %260 : vector<1x28x128xf32> to vector<28x128xf32>
      %c7 = arith.constant 7 : index
      %c0_185 = arith.constant 0 : index
      %c0_186 = arith.constant 0 : index
      %262 = vector.load %arg5[%c7, %c0_185, %c0_186] : memref<25x128x128xf32, #tpu.memory_space<vmem>>, vector<1x128x128xf32>
      %263 = vector.shape_cast %262 : vector<1x128x128xf32> to vector<128x128xf32>
      %cst_187 = arith.constant dense<0.000000e+00> : vector<28x128xf32>
      %264 = tpu.matmul %261, %263, %cst_187 {dimension_numbers = #tpu.dot_dimension_numbers<[1], [0], [0], [1], [0, 0, 1, 1], [], []>} : vector<28x128xf32>, vector<128x128xf32>, vector<28x128xf32> -> vector<28x128xf32>
      %265 = arith.addf %257, %264 : vector<28x128xf32>
      %c1_i32_188 = arith.constant 1 : i32
      %266 = arith.addi %arg17, %c1_i32_188 : i32
      %267 = arith.index_cast %266 : i32 to index
      %c3_189 = arith.constant 3 : index
      %c0_190 = arith.constant 0 : index
      %268 = vector.load %arg15[%267, %c3_189, %c0_190] : memref<32x32x128xf32, #tpu.memory_space<vmem>>, vector<1x28x128xf32>
      %269 = vector.shape_cast %268 : vector<1x28x128xf32> to vector<28x128xf32>
      %c8_191 = arith.constant 8 : index
      %c0_192 = arith.constant 0 : index
      %c0_193 = arith.constant 0 : index
      %270 = vector.load %arg5[%c8_191, %c0_192, %c0_193] : memref<25x128x128xf32, #tpu.memory_space<vmem>>, vector<1x128x128xf32>
      %271 = vector.shape_cast %270 : vector<1x128x128xf32> to vector<128x128xf32>
      %cst_194 = arith.constant dense<0.000000e+00> : vector<28x128xf32>
      %272 = tpu.matmul %269, %271, %cst_194 {dimension_numbers = #tpu.dot_dimension_numbers<[1], [0], [0], [1], [0, 0, 1, 1], [], []>} : vector<28x128xf32>, vector<128x128xf32>, vector<28x128xf32> -> vector<28x128xf32>
      %273 = arith.addf %265, %272 : vector<28x128xf32>
      %c1_i32_195 = arith.constant 1 : i32
      %274 = arith.addi %arg17, %c1_i32_195 : i32
      %275 = arith.index_cast %274 : i32 to index
      %c4_196 = arith.constant 4 : index
      %c0_197 = arith.constant 0 : index
      %276 = vector.load %arg15[%275, %c4_196, %c0_197] : memref<32x32x128xf32, #tpu.memory_space<vmem>>, vector<1x28x128xf32>
      %277 = vector.shape_cast %276 : vector<1x28x128xf32> to vector<28x128xf32>
      %c9 = arith.constant 9 : index
      %c0_198 = arith.constant 0 : index
      %c0_199 = arith.constant 0 : index
      %278 = vector.load %arg5[%c9, %c0_198, %c0_199] : memref<25x128x128xf32, #tpu.memory_space<vmem>>, vector<1x128x128xf32>
      %279 = vector.shape_cast %278 : vector<1x128x128xf32> to vector<128x128xf32>
      %cst_200 = arith.constant dense<0.000000e+00> : vector<28x128xf32>
      %280 = tpu.matmul %277, %279, %cst_200 {dimension_numbers = #tpu.dot_dimension_numbers<[1], [0], [0], [1], [0, 0, 1, 1], [], []>} : vector<28x128xf32>, vector<128x128xf32>, vector<28x128xf32> -> vector<28x128xf32>
      %281 = arith.addf %273, %280 : vector<28x128xf32>
      %c2_i32_201 = arith.constant 2 : i32
      %282 = arith.addi %arg17, %c2_i32_201 : i32
      %283 = arith.index_cast %282 : i32 to index
      %c0_202 = arith.constant 0 : index
      %c0_203 = arith.constant 0 : index
      %284 = vector.load %arg15[%283, %c0_202, %c0_203] : memref<32x32x128xf32, #tpu.memory_space<vmem>>, vector<1x28x128xf32>
      %285 = vector.shape_cast %284 : vector<1x28x128xf32> to vector<28x128xf32>
      %c10_204 = arith.constant 10 : index
      %c0_205 = arith.constant 0 : index
      %c0_206 = arith.constant 0 : index
      %286 = vector.load %arg5[%c10_204, %c0_205, %c0_206] : memref<25x128x128xf32, #tpu.memory_space<vmem>>, vector<1x128x128xf32>
      %287 = vector.shape_cast %286 : vector<1x128x128xf32> to vector<128x128xf32>
      %cst_207 = arith.constant dense<0.000000e+00> : vector<28x128xf32>
      %288 = tpu.matmul %285, %287, %cst_207 {dimension_numbers = #tpu.dot_dimension_numbers<[1], [0], [0], [1], [0, 0, 1, 1], [], []>} : vector<28x128xf32>, vector<128x128xf32>, vector<28x128xf32> -> vector<28x128xf32>
      %289 = arith.addf %281, %288 : vector<28x128xf32>
      %c2_i32_208 = arith.constant 2 : i32
      %290 = arith.addi %arg17, %c2_i32_208 : i32
      %291 = arith.index_cast %290 : i32 to index
      %c1_209 = arith.constant 1 : index
      %c0_210 = arith.constant 0 : index
      %292 = vector.load %arg15[%291, %c1_209, %c0_210] : memref<32x32x128xf32, #tpu.memory_space<vmem>>, vector<1x28x128xf32>
      %293 = vector.shape_cast %292 : vector<1x28x128xf32> to vector<28x128xf32>
      %c11 = arith.constant 11 : index
      %c0_211 = arith.constant 0 : index
      %c0_212 = arith.constant 0 : index
      %294 = vector.load %arg5[%c11, %c0_211, %c0_212] : memref<25x128x128xf32, #tpu.memory_space<vmem>>, vector<1x128x128xf32>
      %295 = vector.shape_cast %294 : vector<1x128x128xf32> to vector<128x128xf32>
      %cst_213 = arith.constant dense<0.000000e+00> : vector<28x128xf32>
      %296 = tpu.matmul %293, %295, %cst_213 {dimension_numbers = #tpu.dot_dimension_numbers<[1], [0], [0], [1], [0, 0, 1, 1], [], []>} : vector<28x128xf32>, vector<128x128xf32>, vector<28x128xf32> -> vector<28x128xf32>
      %297 = arith.addf %289, %296 : vector<28x128xf32>
      %c2_i32_214 = arith.constant 2 : i32
      %298 = arith.addi %arg17, %c2_i32_214 : i32
      %299 = arith.index_cast %298 : i32 to index
      %c2_215 = arith.constant 2 : index
      %c0_216 = arith.constant 0 : index
      %300 = vector.load %arg15[%299, %c2_215, %c0_216] : memref<32x32x128xf32, #tpu.memory_space<vmem>>, vector<1x28x128xf32>
      %301 = vector.shape_cast %300 : vector<1x28x128xf32> to vector<28x128xf32>
      %c12 = arith.constant 12 : index
      %c0_217 = arith.constant 0 : index
      %c0_218 = arith.constant 0 : index
      %302 = vector.load %arg5[%c12, %c0_217, %c0_218] : memref<25x128x128xf32, #tpu.memory_space<vmem>>, vector<1x128x128xf32>
      %303 = vector.shape_cast %302 : vector<1x128x128xf32> to vector<128x128xf32>
      %cst_219 = arith.constant dense<0.000000e+00> : vector<28x128xf32>
      %304 = tpu.matmul %301, %303, %cst_219 {dimension_numbers = #tpu.dot_dimension_numbers<[1], [0], [0], [1], [0, 0, 1, 1], [], []>} : vector<28x128xf32>, vector<128x128xf32>, vector<28x128xf32> -> vector<28x128xf32>
      %305 = arith.addf %297, %304 : vector<28x128xf32>
      %c2_i32_220 = arith.constant 2 : i32
      %306 = arith.addi %arg17, %c2_i32_220 : i32
      %307 = arith.index_cast %306 : i32 to index
      %c3_221 = arith.constant 3 : index
      %c0_222 = arith.constant 0 : index
      %308 = vector.load %arg15[%307, %c3_221, %c0_222] : memref<32x32x128xf32, #tpu.memory_space<vmem>>, vector<1x28x128xf32>
      %309 = vector.shape_cast %308 : vector<1x28x128xf32> to vector<28x128xf32>
      %c13 = arith.constant 13 : index
      %c0_223 = arith.constant 0 : index
      %c0_224 = arith.constant 0 : index
      %310 = vector.load %arg5[%c13, %c0_223, %c0_224] : memref<25x128x128xf32, #tpu.memory_space<vmem>>, vector<1x128x128xf32>
      %311 = vector.shape_cast %310 : vector<1x128x128xf32> to vector<128x128xf32>
      %cst_225 = arith.constant dense<0.000000e+00> : vector<28x128xf32>
      %312 = tpu.matmul %309, %311, %cst_225 {dimension_numbers = #tpu.dot_dimension_numbers<[1], [0], [0], [1], [0, 0, 1, 1], [], []>} : vector<28x128xf32>, vector<128x128xf32>, vector<28x128xf32> -> vector<28x128xf32>
      %313 = arith.addf %305, %312 : vector<28x128xf32>
      %c2_i32_226 = arith.constant 2 : i32
      %314 = arith.addi %arg17, %c2_i32_226 : i32
      %315 = arith.index_cast %314 : i32 to index
      %c4_227 = arith.constant 4 : index
      %c0_228 = arith.constant 0 : index
      %316 = vector.load %arg15[%315, %c4_227, %c0_228] : memref<32x32x128xf32, #tpu.memory_space<vmem>>, vector<1x28x128xf32>
      %317 = vector.shape_cast %316 : vector<1x28x128xf32> to vector<28x128xf32>
      %c14 = arith.constant 14 : index
      %c0_229 = arith.constant 0 : index
      %c0_230 = arith.constant 0 : index
      %318 = vector.load %arg5[%c14, %c0_229, %c0_230] : memref<25x128x128xf32, #tpu.memory_space<vmem>>, vector<1x128x128xf32>
      %319 = vector.shape_cast %318 : vector<1x128x128xf32> to vector<128x128xf32>
      %cst_231 = arith.constant dense<0.000000e+00> : vector<28x128xf32>
      %320 = tpu.matmul %317, %319, %cst_231 {dimension_numbers = #tpu.dot_dimension_numbers<[1], [0], [0], [1], [0, 0, 1, 1], [], []>} : vector<28x128xf32>, vector<128x128xf32>, vector<28x128xf32> -> vector<28x128xf32>
      %321 = arith.addf %313, %320 : vector<28x128xf32>
      %c3_i32 = arith.constant 3 : i32
      %322 = arith.addi %arg17, %c3_i32 : i32
      %323 = arith.index_cast %322 : i32 to index
      %c0_232 = arith.constant 0 : index
      %c0_233 = arith.constant 0 : index
      %324 = vector.load %arg15[%323, %c0_232, %c0_233] : memref<32x32x128xf32, #tpu.memory_space<vmem>>, vector<1x28x128xf32>
      %325 = vector.shape_cast %324 : vector<1x28x128xf32> to vector<28x128xf32>
      %c15 = arith.constant 15 : index
      %c0_234 = arith.constant 0 : index
      %c0_235 = arith.constant 0 : index
      %326 = vector.load %arg5[%c15, %c0_234, %c0_235] : memref<25x128x128xf32, #tpu.memory_space<vmem>>, vector<1x128x128xf32>
      %327 = vector.shape_cast %326 : vector<1x128x128xf32> to vector<128x128xf32>
      %cst_236 = arith.constant dense<0.000000e+00> : vector<28x128xf32>
      %328 = tpu.matmul %325, %327, %cst_236 {dimension_numbers = #tpu.dot_dimension_numbers<[1], [0], [0], [1], [0, 0, 1, 1], [], []>} : vector<28x128xf32>, vector<128x128xf32>, vector<28x128xf32> -> vector<28x128xf32>
      %329 = arith.addf %321, %328 : vector<28x128xf32>
      %c3_i32_237 = arith.constant 3 : i32
      %330 = arith.addi %arg17, %c3_i32_237 : i32
      %331 = arith.index_cast %330 : i32 to index
      %c1_238 = arith.constant 1 : index
      %c0_239 = arith.constant 0 : index
      %332 = vector.load %arg15[%331, %c1_238, %c0_239] : memref<32x32x128xf32, #tpu.memory_space<vmem>>, vector<1x28x128xf32>
      %333 = vector.shape_cast %332 : vector<1x28x128xf32> to vector<28x128xf32>
      %c16 = arith.constant 16 : index
      %c0_240 = arith.constant 0 : index
      %c0_241 = arith.constant 0 : index
      %334 = vector.load %arg5[%c16, %c0_240, %c0_241] : memref<25x128x128xf32, #tpu.memory_space<vmem>>, vector<1x128x128xf32>
      %335 = vector.shape_cast %334 : vector<1x128x128xf32> to vector<128x128xf32>
      %cst_242 = arith.constant dense<0.000000e+00> : vector<28x128xf32>
      %336 = tpu.matmul %333, %335, %cst_242 {dimension_numbers = #tpu.dot_dimension_numbers<[1], [0], [0], [1], [0, 0, 1, 1], [], []>} : vector<28x128xf32>, vector<128x128xf32>, vector<28x128xf32> -> vector<28x128xf32>
      %337 = arith.addf %329, %336 : vector<28x128xf32>
      %c3_i32_243 = arith.constant 3 : i32
      %338 = arith.addi %arg17, %c3_i32_243 : i32
      %339 = arith.index_cast %338 : i32 to index
      %c2_244 = arith.constant 2 : index
      %c0_245 = arith.constant 0 : index
      %340 = vector.load %arg15[%339, %c2_244, %c0_245] : memref<32x32x128xf32, #tpu.memory_space<vmem>>, vector<1x28x128xf32>
      %341 = vector.shape_cast %340 : vector<1x28x128xf32> to vector<28x128xf32>
      %c17 = arith.constant 17 : index
      %c0_246 = arith.constant 0 : index
      %c0_247 = arith.constant 0 : index
      %342 = vector.load %arg5[%c17, %c0_246, %c0_247] : memref<25x128x128xf32, #tpu.memory_space<vmem>>, vector<1x128x128xf32>
      %343 = vector.shape_cast %342 : vector<1x128x128xf32> to vector<128x128xf32>
      %cst_248 = arith.constant dense<0.000000e+00> : vector<28x128xf32>
      %344 = tpu.matmul %341, %343, %cst_248 {dimension_numbers = #tpu.dot_dimension_numbers<[1], [0], [0], [1], [0, 0, 1, 1], [], []>} : vector<28x128xf32>, vector<128x128xf32>, vector<28x128xf32> -> vector<28x128xf32>
      %345 = arith.addf %337, %344 : vector<28x128xf32>
      %c3_i32_249 = arith.constant 3 : i32
      %346 = arith.addi %arg17, %c3_i32_249 : i32
      %347 = arith.index_cast %346 : i32 to index
      %c3_250 = arith.constant 3 : index
      %c0_251 = arith.constant 0 : index
      %348 = vector.load %arg15[%347, %c3_250, %c0_251] : memref<32x32x128xf32, #tpu.memory_space<vmem>>, vector<1x28x128xf32>
      %349 = vector.shape_cast %348 : vector<1x28x128xf32> to vector<28x128xf32>
      %c18 = arith.constant 18 : index
      %c0_252 = arith.constant 0 : index
      %c0_253 = arith.constant 0 : index
      %350 = vector.load %arg5[%c18, %c0_252, %c0_253] : memref<25x128x128xf32, #tpu.memory_space<vmem>>, vector<1x128x128xf32>
      %351 = vector.shape_cast %350 : vector<1x128x128xf32> to vector<128x128xf32>
      %cst_254 = arith.constant dense<0.000000e+00> : vector<28x128xf32>
      %352 = tpu.matmul %349, %351, %cst_254 {dimension_numbers = #tpu.dot_dimension_numbers<[1], [0], [0], [1], [0, 0, 1, 1], [], []>} : vector<28x128xf32>, vector<128x128xf32>, vector<28x128xf32> -> vector<28x128xf32>
      %353 = arith.addf %345, %352 : vector<28x128xf32>
      %c3_i32_255 = arith.constant 3 : i32
      %354 = arith.addi %arg17, %c3_i32_255 : i32
      %355 = arith.index_cast %354 : i32 to index
      %c4_256 = arith.constant 4 : index
      %c0_257 = arith.constant 0 : index
      %356 = vector.load %arg15[%355, %c4_256, %c0_257] : memref<32x32x128xf32, #tpu.memory_space<vmem>>, vector<1x28x128xf32>
      %357 = vector.shape_cast %356 : vector<1x28x128xf32> to vector<28x128xf32>
      %c19 = arith.constant 19 : index
      %c0_258 = arith.constant 0 : index
      %c0_259 = arith.constant 0 : index
      %358 = vector.load %arg5[%c19, %c0_258, %c0_259] : memref<25x128x128xf32, #tpu.memory_space<vmem>>, vector<1x128x128xf32>
      %359 = vector.shape_cast %358 : vector<1x128x128xf32> to vector<128x128xf32>
      %cst_260 = arith.constant dense<0.000000e+00> : vector<28x128xf32>
      %360 = tpu.matmul %357, %359, %cst_260 {dimension_numbers = #tpu.dot_dimension_numbers<[1], [0], [0], [1], [0, 0, 1, 1], [], []>} : vector<28x128xf32>, vector<128x128xf32>, vector<28x128xf32> -> vector<28x128xf32>
      %361 = arith.addf %353, %360 : vector<28x128xf32>
      %c4_i32 = arith.constant 4 : i32
      %362 = arith.addi %arg17, %c4_i32 : i32
      %363 = arith.index_cast %362 : i32 to index
      %c0_261 = arith.constant 0 : index
      %c0_262 = arith.constant 0 : index
      %364 = vector.load %arg15[%363, %c0_261, %c0_262] : memref<32x32x128xf32, #tpu.memory_space<vmem>>, vector<1x28x128xf32>
      %365 = vector.shape_cast %364 : vector<1x28x128xf32> to vector<28x128xf32>
      %c20 = arith.constant 20 : index
      %c0_263 = arith.constant 0 : index
      %c0_264 = arith.constant 0 : index
      %366 = vector.load %arg5[%c20, %c0_263, %c0_264] : memref<25x128x128xf32, #tpu.memory_space<vmem>>, vector<1x128x128xf32>
      %367 = vector.shape_cast %366 : vector<1x128x128xf32> to vector<128x128xf32>
      %cst_265 = arith.constant dense<0.000000e+00> : vector<28x128xf32>
      %368 = tpu.matmul %365, %367, %cst_265 {dimension_numbers = #tpu.dot_dimension_numbers<[1], [0], [0], [1], [0, 0, 1, 1], [], []>} : vector<28x128xf32>, vector<128x128xf32>, vector<28x128xf32> -> vector<28x128xf32>
      %369 = arith.addf %361, %368 : vector<28x128xf32>
      %c4_i32_266 = arith.constant 4 : i32
      %370 = arith.addi %arg17, %c4_i32_266 : i32
      %371 = arith.index_cast %370 : i32 to index
      %c1_267 = arith.constant 1 : index
      %c0_268 = arith.constant 0 : index
      %372 = vector.load %arg15[%371, %c1_267, %c0_268] : memref<32x32x128xf32, #tpu.memory_space<vmem>>, vector<1x28x128xf32>
      %373 = vector.shape_cast %372 : vector<1x28x128xf32> to vector<28x128xf32>
      %c21 = arith.constant 21 : index
      %c0_269 = arith.constant 0 : index
      %c0_270 = arith.constant 0 : index
      %374 = vector.load %arg5[%c21, %c0_269, %c0_270] : memref<25x128x128xf32, #tpu.memory_space<vmem>>, vector<1x128x128xf32>
      %375 = vector.shape_cast %374 : vector<1x128x128xf32> to vector<128x128xf32>
      %cst_271 = arith.constant dense<0.000000e+00> : vector<28x128xf32>
      %376 = tpu.matmul %373, %375, %cst_271 {dimension_numbers = #tpu.dot_dimension_numbers<[1], [0], [0], [1], [0, 0, 1, 1], [], []>} : vector<28x128xf32>, vector<128x128xf32>, vector<28x128xf32> -> vector<28x128xf32>
      %377 = arith.addf %369, %376 : vector<28x128xf32>
      %c4_i32_272 = arith.constant 4 : i32
      %378 = arith.addi %arg17, %c4_i32_272 : i32
      %379 = arith.index_cast %378 : i32 to index
      %c2_273 = arith.constant 2 : index
      %c0_274 = arith.constant 0 : index
      %380 = vector.load %arg15[%379, %c2_273, %c0_274] : memref<32x32x128xf32, #tpu.memory_space<vmem>>, vector<1x28x128xf32>
      %381 = vector.shape_cast %380 : vector<1x28x128xf32> to vector<28x128xf32>
      %c22 = arith.constant 22 : index
      %c0_275 = arith.constant 0 : index
      %c0_276 = arith.constant 0 : index
      %382 = vector.load %arg5[%c22, %c0_275, %c0_276] : memref<25x128x128xf32, #tpu.memory_space<vmem>>, vector<1x128x128xf32>
      %383 = vector.shape_cast %382 : vector<1x128x128xf32> to vector<128x128xf32>
      %cst_277 = arith.constant dense<0.000000e+00> : vector<28x128xf32>
      %384 = tpu.matmul %381, %383, %cst_277 {dimension_numbers = #tpu.dot_dimension_numbers<[1], [0], [0], [1], [0, 0, 1, 1], [], []>} : vector<28x128xf32>, vector<128x128xf32>, vector<28x128xf32> -> vector<28x128xf32>
      %385 = arith.addf %377, %384 : vector<28x128xf32>
      %c4_i32_278 = arith.constant 4 : i32
      %386 = arith.addi %arg17, %c4_i32_278 : i32
      %387 = arith.index_cast %386 : i32 to index
      %c3_279 = arith.constant 3 : index
      %c0_280 = arith.constant 0 : index
      %388 = vector.load %arg15[%387, %c3_279, %c0_280] : memref<32x32x128xf32, #tpu.memory_space<vmem>>, vector<1x28x128xf32>
      %389 = vector.shape_cast %388 : vector<1x28x128xf32> to vector<28x128xf32>
      %c23 = arith.constant 23 : index
      %c0_281 = arith.constant 0 : index
      %c0_282 = arith.constant 0 : index
      %390 = vector.load %arg5[%c23, %c0_281, %c0_282] : memref<25x128x128xf32, #tpu.memory_space<vmem>>, vector<1x128x128xf32>
      %391 = vector.shape_cast %390 : vector<1x128x128xf32> to vector<128x128xf32>
      %cst_283 = arith.constant dense<0.000000e+00> : vector<28x128xf32>
      %392 = tpu.matmul %389, %391, %cst_283 {dimension_numbers = #tpu.dot_dimension_numbers<[1], [0], [0], [1], [0, 0, 1, 1], [], []>} : vector<28x128xf32>, vector<128x128xf32>, vector<28x128xf32> -> vector<28x128xf32>
      %393 = arith.addf %385, %392 : vector<28x128xf32>
      %c4_i32_284 = arith.constant 4 : i32
      %394 = arith.addi %arg17, %c4_i32_284 : i32
      %395 = arith.index_cast %394 : i32 to index
      %c4_285 = arith.constant 4 : index
      %c0_286 = arith.constant 0 : index
      %396 = vector.load %arg15[%395, %c4_285, %c0_286] : memref<32x32x128xf32, #tpu.memory_space<vmem>>, vector<1x28x128xf32>
      %397 = vector.shape_cast %396 : vector<1x28x128xf32> to vector<28x128xf32>
      %c24 = arith.constant 24 : index
      %c0_287 = arith.constant 0 : index
      %c0_288 = arith.constant 0 : index
      %398 = vector.load %arg5[%c24, %c0_287, %c0_288] : memref<25x128x128xf32, #tpu.memory_space<vmem>>, vector<1x128x128xf32>
      %399 = vector.shape_cast %398 : vector<1x128x128xf32> to vector<128x128xf32>
      %cst_289 = arith.constant dense<0.000000e+00> : vector<28x128xf32>
      %400 = tpu.matmul %397, %399, %cst_289 {dimension_numbers = #tpu.dot_dimension_numbers<[1], [0], [0], [1], [0, 0, 1, 1], [], []>} : vector<28x128xf32>, vector<128x128xf32>, vector<28x128xf32> -> vector<28x128xf32>
      %401 = arith.addf %393, %400 : vector<28x128xf32>
      %402 = vector.broadcast %200 : vector<1x128xf32> to vector<28x128xf32>
      %403 = arith.addf %401, %402 : vector<28x128xf32>
      %cst_290 = arith.constant 0.000000e+00 : f32
      %404 = vector.broadcast %cst_290 : f32 to vector<28x128xf32>
      %405 = arith.maximumf %403, %404 : vector<28x128xf32>
      %c4_i32_291 = arith.constant 4 : i32
      %406 = arith.addi %c4_i32_291, %arg17 : i32
      %407 = arith.index_cast %406 : i32 to index
      %c4_292 = arith.constant 4 : index
      %c0_293 = arith.constant 0 : index
      %408 = vector.load %arg16[%407, %c4_292, %c0_293] : memref<36x36x128xf32, #tpu.memory_space<vmem>>, vector<1x28x128xf32>
      %409 = vector.shape_cast %408 : vector<1x28x128xf32> to vector<28x128xf32>
      %410 = vector.shape_cast %405 : vector<28x128xf32> to vector<1x28x128xf32>
      tpu.vector_store %arg16[%407, %c4_292, %c0_293], %410 {strides = array<i32>} : memref<36x36x128xf32, #tpu.memory_space<vmem>>, vector<1x28x128xf32>,
    }
    %c28_i32_131 = arith.constant 28 : i32
    %c0_132 = arith.constant 0 : index
    %c0_133 = arith.constant 0 : index
    %202 = vector.load %arg11[%c0_132, %c0_133] : memref<1x128xf32, #tpu.memory_space<vmem>>, vector<1x128xf32>
    %c0_i32_134 = arith.constant 0 : i32
    %c32_i32 = arith.constant 32 : i32
    %203 = arith.addi %c0_i32_134, %c32_i32 : i32
    %c1_i32_135 = arith.constant 1 : i32
    scf.for %arg17 = %c0_i32_134 to %203 step %c1_i32_135  : i32 {
      %204 = arith.index_cast %arg17 : i32 to index
      %c0_137 = arith.constant 0 : index
      %c0_138 = arith.constant 0 : index
      %205 = vector.load %arg16[%204, %c0_137, %c0_138] : memref<36x36x128xf32, #tpu.memory_space<vmem>>, vector<1x32x128xf32>
      %206 = vector.shape_cast %205 : vector<1x32x128xf32> to vector<32x128xf32>
      %c0_139 = arith.constant 0 : index
      %c0_140 = arith.constant 0 : index
      %c0_141 = arith.constant 0 : index
      %207 = vector.load %arg6[%c0_139, %c0_140, %c0_141] : memref<25x128x128xf32, #tpu.memory_space<vmem>>, vector<1x128x128xf32>
      %208 = vector.shape_cast %207 : vector<1x128x128xf32> to vector<128x128xf32>
      %cst_142 = arith.constant dense<0.000000e+00> : vector<32x128xf32>
      %209 = tpu.matmul %206, %208, %cst_142 {dimension_numbers = #tpu.dot_dimension_numbers<[1], [0], [0], [1], [0, 0, 1, 1], [], []>} : vector<32x128xf32>, vector<128x128xf32>, vector<32x128xf32> -> vector<32x128xf32>
      %c0_i32_143 = arith.constant 0 : i32
      %210 = arith.addi %arg17, %c0_i32_143 : i32
      %211 = arith.index_cast %210 : i32 to index
      %c1 = arith.constant 1 : index
      %c0_144 = arith.constant 0 : index
      %212 = vector.load %arg16[%211, %c1, %c0_144] : memref<36x36x128xf32, #tpu.memory_space<vmem>>, vector<1x32x128xf32>
      %213 = vector.shape_cast %212 : vector<1x32x128xf32> to vector<32x128xf32>
      %c1_145 = arith.constant 1 : index
      %c0_146 = arith.constant 0 : index
      %c0_147 = arith.constant 0 : index
      %214 = vector.load %arg6[%c1_145, %c0_146, %c0_147] : memref<25x128x128xf32, #tpu.memory_space<vmem>>, vector<1x128x128xf32>
      %215 = vector.shape_cast %214 : vector<1x128x128xf32> to vector<128x128xf32>
      %cst_148 = arith.constant dense<0.000000e+00> : vector<32x128xf32>
      %216 = tpu.matmul %213, %215, %cst_148 {dimension_numbers = #tpu.dot_dimension_numbers<[1], [0], [0], [1], [0, 0, 1, 1], [], []>} : vector<32x128xf32>, vector<128x128xf32>, vector<32x128xf32> -> vector<32x128xf32>
      %217 = arith.addf %209, %216 : vector<32x128xf32>
      %c0_i32_149 = arith.constant 0 : i32
      %218 = arith.addi %arg17, %c0_i32_149 : i32
      %219 = arith.index_cast %218 : i32 to index
      %c2_150 = arith.constant 2 : index
      %c0_151 = arith.constant 0 : index
      %220 = vector.load %arg16[%219, %c2_150, %c0_151] : memref<36x36x128xf32, #tpu.memory_space<vmem>>, vector<1x32x128xf32>
      %221 = vector.shape_cast %220 : vector<1x32x128xf32> to vector<32x128xf32>
      %c2_152 = arith.constant 2 : index
      %c0_153 = arith.constant 0 : index
      %c0_154 = arith.constant 0 : index
      %222 = vector.load %arg6[%c2_152, %c0_153, %c0_154] : memref<25x128x128xf32, #tpu.memory_space<vmem>>, vector<1x128x128xf32>
      %223 = vector.shape_cast %222 : vector<1x128x128xf32> to vector<128x128xf32>
      %cst_155 = arith.constant dense<0.000000e+00> : vector<32x128xf32>
      %224 = tpu.matmul %221, %223, %cst_155 {dimension_numbers = #tpu.dot_dimension_numbers<[1], [0], [0], [1], [0, 0, 1, 1], [], []>} : vector<32x128xf32>, vector<128x128xf32>, vector<32x128xf32> -> vector<32x128xf32>
      %225 = arith.addf %217, %224 : vector<32x128xf32>
      %c0_i32_156 = arith.constant 0 : i32
      %226 = arith.addi %arg17, %c0_i32_156 : i32
      %227 = arith.index_cast %226 : i32 to index
      %c3 = arith.constant 3 : index
      %c0_157 = arith.constant 0 : index
      %228 = vector.load %arg16[%227, %c3, %c0_157] : memref<36x36x128xf32, #tpu.memory_space<vmem>>, vector<1x32x128xf32>
      %229 = vector.shape_cast %228 : vector<1x32x128xf32> to vector<32x128xf32>
      %c3_158 = arith.constant 3 : index
      %c0_159 = arith.constant 0 : index
      %c0_160 = arith.constant 0 : index
      %230 = vector.load %arg6[%c3_158, %c0_159, %c0_160] : memref<25x128x128xf32, #tpu.memory_space<vmem>>, vector<1x128x128xf32>
      %231 = vector.shape_cast %230 : vector<1x128x128xf32> to vector<128x128xf32>
      %cst_161 = arith.constant dense<0.000000e+00> : vector<32x128xf32>
      %232 = tpu.matmul %229, %231, %cst_161 {dimension_numbers = #tpu.dot_dimension_numbers<[1], [0], [0], [1], [0, 0, 1, 1], [], []>} : vector<32x128xf32>, vector<128x128xf32>, vector<32x128xf32> -> vector<32x128xf32>
      %233 = arith.addf %225, %232 : vector<32x128xf32>
      %c0_i32_162 = arith.constant 0 : i32
      %234 = arith.addi %arg17, %c0_i32_162 : i32
      %235 = arith.index_cast %234 : i32 to index
      %c4_163 = arith.constant 4 : index
      %c0_164 = arith.constant 0 : index
      %236 = vector.load %arg16[%235, %c4_163, %c0_164] : memref<36x36x128xf32, #tpu.memory_space<vmem>>, vector<1x32x128xf32>
      %237 = vector.shape_cast %236 : vector<1x32x128xf32> to vector<32x128xf32>
      %c4_165 = arith.constant 4 : index
      %c0_166 = arith.constant 0 : index
      %c0_167 = arith.constant 0 : index
      %238 = vector.load %arg6[%c4_165, %c0_166, %c0_167] : memref<25x128x128xf32, #tpu.memory_space<vmem>>, vector<1x128x128xf32>
      %239 = vector.shape_cast %238 : vector<1x128x128xf32> to vector<128x128xf32>
      %cst_168 = arith.constant dense<0.000000e+00> : vector<32x128xf32>
      %240 = tpu.matmul %237, %239, %cst_168 {dimension_numbers = #tpu.dot_dimension_numbers<[1], [0], [0], [1], [0, 0, 1, 1], [], []>} : vector<32x128xf32>, vector<128x128xf32>, vector<32x128xf32> -> vector<32x128xf32>
      %241 = arith.addf %233, %240 : vector<32x128xf32>
      %c1_i32_169 = arith.constant 1 : i32
      %242 = arith.addi %arg17, %c1_i32_169 : i32
      %243 = arith.index_cast %242 : i32 to index
      %c0_170 = arith.constant 0 : index
      %c0_171 = arith.constant 0 : index
      %244 = vector.load %arg16[%243, %c0_170, %c0_171] : memref<36x36x128xf32, #tpu.memory_space<vmem>>, vector<1x32x128xf32>
      %245 = vector.shape_cast %244 : vector<1x32x128xf32> to vector<32x128xf32>
      %c5 = arith.constant 5 : index
      %c0_172 = arith.constant 0 : index
      %c0_173 = arith.constant 0 : index
      %246 = vector.load %arg6[%c5, %c0_172, %c0_173] : memref<25x128x128xf32, #tpu.memory_space<vmem>>, vector<1x128x128xf32>
      %247 = vector.shape_cast %246 : vector<1x128x128xf32> to vector<128x128xf32>
      %cst_174 = arith.constant dense<0.000000e+00> : vector<32x128xf32>
      %248 = tpu.matmul %245, %247, %cst_174 {dimension_numbers = #tpu.dot_dimension_numbers<[1], [0], [0], [1], [0, 0, 1, 1], [], []>} : vector<32x128xf32>, vector<128x128xf32>, vector<32x128xf32> -> vector<32x128xf32>
      %249 = arith.addf %241, %248 : vector<32x128xf32>
      %c1_i32_175 = arith.constant 1 : i32
      %250 = arith.addi %arg17, %c1_i32_175 : i32
      %251 = arith.index_cast %250 : i32 to index
      %c1_176 = arith.constant 1 : index
      %c0_177 = arith.constant 0 : index
      %252 = vector.load %arg16[%251, %c1_176, %c0_177] : memref<36x36x128xf32, #tpu.memory_space<vmem>>, vector<1x32x128xf32>
      %253 = vector.shape_cast %252 : vector<1x32x128xf32> to vector<32x128xf32>
      %c6_178 = arith.constant 6 : index
      %c0_179 = arith.constant 0 : index
      %c0_180 = arith.constant 0 : index
      %254 = vector.load %arg6[%c6_178, %c0_179, %c0_180] : memref<25x128x128xf32, #tpu.memory_space<vmem>>, vector<1x128x128xf32>
      %255 = vector.shape_cast %254 : vector<1x128x128xf32> to vector<128x128xf32>
      %cst_181 = arith.constant dense<0.000000e+00> : vector<32x128xf32>
      %256 = tpu.matmul %253, %255, %cst_181 {dimension_numbers = #tpu.dot_dimension_numbers<[1], [0], [0], [1], [0, 0, 1, 1], [], []>} : vector<32x128xf32>, vector<128x128xf32>, vector<32x128xf32> -> vector<32x128xf32>
      %257 = arith.addf %249, %256 : vector<32x128xf32>
      %c1_i32_182 = arith.constant 1 : i32
      %258 = arith.addi %arg17, %c1_i32_182 : i32
      %259 = arith.index_cast %258 : i32 to index
      %c2_183 = arith.constant 2 : index
      %c0_184 = arith.constant 0 : index
      %260 = vector.load %arg16[%259, %c2_183, %c0_184] : memref<36x36x128xf32, #tpu.memory_space<vmem>>, vector<1x32x128xf32>
      %261 = vector.shape_cast %260 : vector<1x32x128xf32> to vector<32x128xf32>
      %c7 = arith.constant 7 : index
      %c0_185 = arith.constant 0 : index
      %c0_186 = arith.constant 0 : index
      %262 = vector.load %arg6[%c7, %c0_185, %c0_186] : memref<25x128x128xf32, #tpu.memory_space<vmem>>, vector<1x128x128xf32>
      %263 = vector.shape_cast %262 : vector<1x128x128xf32> to vector<128x128xf32>
      %cst_187 = arith.constant dense<0.000000e+00> : vector<32x128xf32>
      %264 = tpu.matmul %261, %263, %cst_187 {dimension_numbers = #tpu.dot_dimension_numbers<[1], [0], [0], [1], [0, 0, 1, 1], [], []>} : vector<32x128xf32>, vector<128x128xf32>, vector<32x128xf32> -> vector<32x128xf32>
      %265 = arith.addf %257, %264 : vector<32x128xf32>
      %c1_i32_188 = arith.constant 1 : i32
      %266 = arith.addi %arg17, %c1_i32_188 : i32
      %267 = arith.index_cast %266 : i32 to index
      %c3_189 = arith.constant 3 : index
      %c0_190 = arith.constant 0 : index
      %268 = vector.load %arg16[%267, %c3_189, %c0_190] : memref<36x36x128xf32, #tpu.memory_space<vmem>>, vector<1x32x128xf32>
      %269 = vector.shape_cast %268 : vector<1x32x128xf32> to vector<32x128xf32>
      %c8_191 = arith.constant 8 : index
      %c0_192 = arith.constant 0 : index
      %c0_193 = arith.constant 0 : index
      %270 = vector.load %arg6[%c8_191, %c0_192, %c0_193] : memref<25x128x128xf32, #tpu.memory_space<vmem>>, vector<1x128x128xf32>
      %271 = vector.shape_cast %270 : vector<1x128x128xf32> to vector<128x128xf32>
      %cst_194 = arith.constant dense<0.000000e+00> : vector<32x128xf32>
      %272 = tpu.matmul %269, %271, %cst_194 {dimension_numbers = #tpu.dot_dimension_numbers<[1], [0], [0], [1], [0, 0, 1, 1], [], []>} : vector<32x128xf32>, vector<128x128xf32>, vector<32x128xf32> -> vector<32x128xf32>
      %273 = arith.addf %265, %272 : vector<32x128xf32>
      %c1_i32_195 = arith.constant 1 : i32
      %274 = arith.addi %arg17, %c1_i32_195 : i32
      %275 = arith.index_cast %274 : i32 to index
      %c4_196 = arith.constant 4 : index
      %c0_197 = arith.constant 0 : index
      %276 = vector.load %arg16[%275, %c4_196, %c0_197] : memref<36x36x128xf32, #tpu.memory_space<vmem>>, vector<1x32x128xf32>
      %277 = vector.shape_cast %276 : vector<1x32x128xf32> to vector<32x128xf32>
      %c9 = arith.constant 9 : index
      %c0_198 = arith.constant 0 : index
      %c0_199 = arith.constant 0 : index
      %278 = vector.load %arg6[%c9, %c0_198, %c0_199] : memref<25x128x128xf32, #tpu.memory_space<vmem>>, vector<1x128x128xf32>
      %279 = vector.shape_cast %278 : vector<1x128x128xf32> to vector<128x128xf32>
      %cst_200 = arith.constant dense<0.000000e+00> : vector<32x128xf32>
      %280 = tpu.matmul %277, %279, %cst_200 {dimension_numbers = #tpu.dot_dimension_numbers<[1], [0], [0], [1], [0, 0, 1, 1], [], []>} : vector<32x128xf32>, vector<128x128xf32>, vector<32x128xf32> -> vector<32x128xf32>
      %281 = arith.addf %273, %280 : vector<32x128xf32>
      %c2_i32_201 = arith.constant 2 : i32
      %282 = arith.addi %arg17, %c2_i32_201 : i32
      %283 = arith.index_cast %282 : i32 to index
      %c0_202 = arith.constant 0 : index
      %c0_203 = arith.constant 0 : index
      %284 = vector.load %arg16[%283, %c0_202, %c0_203] : memref<36x36x128xf32, #tpu.memory_space<vmem>>, vector<1x32x128xf32>
      %285 = vector.shape_cast %284 : vector<1x32x128xf32> to vector<32x128xf32>
      %c10_204 = arith.constant 10 : index
      %c0_205 = arith.constant 0 : index
      %c0_206 = arith.constant 0 : index
      %286 = vector.load %arg6[%c10_204, %c0_205, %c0_206] : memref<25x128x128xf32, #tpu.memory_space<vmem>>, vector<1x128x128xf32>
      %287 = vector.shape_cast %286 : vector<1x128x128xf32> to vector<128x128xf32>
      %cst_207 = arith.constant dense<0.000000e+00> : vector<32x128xf32>
      %288 = tpu.matmul %285, %287, %cst_207 {dimension_numbers = #tpu.dot_dimension_numbers<[1], [0], [0], [1], [0, 0, 1, 1], [], []>} : vector<32x128xf32>, vector<128x128xf32>, vector<32x128xf32> -> vector<32x128xf32>
      %289 = arith.addf %281, %288 : vector<32x128xf32>
      %c2_i32_208 = arith.constant 2 : i32
      %290 = arith.addi %arg17, %c2_i32_208 : i32
      %291 = arith.index_cast %290 : i32 to index
      %c1_209 = arith.constant 1 : index
      %c0_210 = arith.constant 0 : index
      %292 = vector.load %arg16[%291, %c1_209, %c0_210] : memref<36x36x128xf32, #tpu.memory_space<vmem>>, vector<1x32x128xf32>
      %293 = vector.shape_cast %292 : vector<1x32x128xf32> to vector<32x128xf32>
      %c11 = arith.constant 11 : index
      %c0_211 = arith.constant 0 : index
      %c0_212 = arith.constant 0 : index
      %294 = vector.load %arg6[%c11, %c0_211, %c0_212] : memref<25x128x128xf32, #tpu.memory_space<vmem>>, vector<1x128x128xf32>
      %295 = vector.shape_cast %294 : vector<1x128x128xf32> to vector<128x128xf32>
      %cst_213 = arith.constant dense<0.000000e+00> : vector<32x128xf32>
      %296 = tpu.matmul %293, %295, %cst_213 {dimension_numbers = #tpu.dot_dimension_numbers<[1], [0], [0], [1], [0, 0, 1, 1], [], []>} : vector<32x128xf32>, vector<128x128xf32>, vector<32x128xf32> -> vector<32x128xf32>
      %297 = arith.addf %289, %296 : vector<32x128xf32>
      %c2_i32_214 = arith.constant 2 : i32
      %298 = arith.addi %arg17, %c2_i32_214 : i32
      %299 = arith.index_cast %298 : i32 to index
      %c2_215 = arith.constant 2 : index
      %c0_216 = arith.constant 0 : index
      %300 = vector.load %arg16[%299, %c2_215, %c0_216] : memref<36x36x128xf32, #tpu.memory_space<vmem>>, vector<1x32x128xf32>
      %301 = vector.shape_cast %300 : vector<1x32x128xf32> to vector<32x128xf32>
      %c12 = arith.constant 12 : index
      %c0_217 = arith.constant 0 : index
      %c0_218 = arith.constant 0 : index
      %302 = vector.load %arg6[%c12, %c0_217, %c0_218] : memref<25x128x128xf32, #tpu.memory_space<vmem>>, vector<1x128x128xf32>
      %303 = vector.shape_cast %302 : vector<1x128x128xf32> to vector<128x128xf32>
      %cst_219 = arith.constant dense<0.000000e+00> : vector<32x128xf32>
      %304 = tpu.matmul %301, %303, %cst_219 {dimension_numbers = #tpu.dot_dimension_numbers<[1], [0], [0], [1], [0, 0, 1, 1], [], []>} : vector<32x128xf32>, vector<128x128xf32>, vector<32x128xf32> -> vector<32x128xf32>
      %305 = arith.addf %297, %304 : vector<32x128xf32>
      %c2_i32_220 = arith.constant 2 : i32
      %306 = arith.addi %arg17, %c2_i32_220 : i32
      %307 = arith.index_cast %306 : i32 to index
      %c3_221 = arith.constant 3 : index
      %c0_222 = arith.constant 0 : index
      %308 = vector.load %arg16[%307, %c3_221, %c0_222] : memref<36x36x128xf32, #tpu.memory_space<vmem>>, vector<1x32x128xf32>
      %309 = vector.shape_cast %308 : vector<1x32x128xf32> to vector<32x128xf32>
      %c13 = arith.constant 13 : index
      %c0_223 = arith.constant 0 : index
      %c0_224 = arith.constant 0 : index
      %310 = vector.load %arg6[%c13, %c0_223, %c0_224] : memref<25x128x128xf32, #tpu.memory_space<vmem>>, vector<1x128x128xf32>
      %311 = vector.shape_cast %310 : vector<1x128x128xf32> to vector<128x128xf32>
      %cst_225 = arith.constant dense<0.000000e+00> : vector<32x128xf32>
      %312 = tpu.matmul %309, %311, %cst_225 {dimension_numbers = #tpu.dot_dimension_numbers<[1], [0], [0], [1], [0, 0, 1, 1], [], []>} : vector<32x128xf32>, vector<128x128xf32>, vector<32x128xf32> -> vector<32x128xf32>
      %313 = arith.addf %305, %312 : vector<32x128xf32>
      %c2_i32_226 = arith.constant 2 : i32
      %314 = arith.addi %arg17, %c2_i32_226 : i32
      %315 = arith.index_cast %314 : i32 to index
      %c4_227 = arith.constant 4 : index
      %c0_228 = arith.constant 0 : index
      %316 = vector.load %arg16[%315, %c4_227, %c0_228] : memref<36x36x128xf32, #tpu.memory_space<vmem>>, vector<1x32x128xf32>
      %317 = vector.shape_cast %316 : vector<1x32x128xf32> to vector<32x128xf32>
      %c14 = arith.constant 14 : index
      %c0_229 = arith.constant 0 : index
      %c0_230 = arith.constant 0 : index
      %318 = vector.load %arg6[%c14, %c0_229, %c0_230] : memref<25x128x128xf32, #tpu.memory_space<vmem>>, vector<1x128x128xf32>
      %319 = vector.shape_cast %318 : vector<1x128x128xf32> to vector<128x128xf32>
      %cst_231 = arith.constant dense<0.000000e+00> : vector<32x128xf32>
      %320 = tpu.matmul %317, %319, %cst_231 {dimension_numbers = #tpu.dot_dimension_numbers<[1], [0], [0], [1], [0, 0, 1, 1], [], []>} : vector<32x128xf32>, vector<128x128xf32>, vector<32x128xf32> -> vector<32x128xf32>
      %321 = arith.addf %313, %320 : vector<32x128xf32>
      %c3_i32 = arith.constant 3 : i32
      %322 = arith.addi %arg17, %c3_i32 : i32
      %323 = arith.index_cast %322 : i32 to index
      %c0_232 = arith.constant 0 : index
      %c0_233 = arith.constant 0 : index
      %324 = vector.load %arg16[%323, %c0_232, %c0_233] : memref<36x36x128xf32, #tpu.memory_space<vmem>>, vector<1x32x128xf32>
      %325 = vector.shape_cast %324 : vector<1x32x128xf32> to vector<32x128xf32>
      %c15 = arith.constant 15 : index
      %c0_234 = arith.constant 0 : index
      %c0_235 = arith.constant 0 : index
      %326 = vector.load %arg6[%c15, %c0_234, %c0_235] : memref<25x128x128xf32, #tpu.memory_space<vmem>>, vector<1x128x128xf32>
      %327 = vector.shape_cast %326 : vector<1x128x128xf32> to vector<128x128xf32>
      %cst_236 = arith.constant dense<0.000000e+00> : vector<32x128xf32>
      %328 = tpu.matmul %325, %327, %cst_236 {dimension_numbers = #tpu.dot_dimension_numbers<[1], [0], [0], [1], [0, 0, 1, 1], [], []>} : vector<32x128xf32>, vector<128x128xf32>, vector<32x128xf32> -> vector<32x128xf32>
      %329 = arith.addf %321, %328 : vector<32x128xf32>
      %c3_i32_237 = arith.constant 3 : i32
      %330 = arith.addi %arg17, %c3_i32_237 : i32
      %331 = arith.index_cast %330 : i32 to index
      %c1_238 = arith.constant 1 : index
      %c0_239 = arith.constant 0 : index
      %332 = vector.load %arg16[%331, %c1_238, %c0_239] : memref<36x36x128xf32, #tpu.memory_space<vmem>>, vector<1x32x128xf32>
      %333 = vector.shape_cast %332 : vector<1x32x128xf32> to vector<32x128xf32>
      %c16 = arith.constant 16 : index
      %c0_240 = arith.constant 0 : index
      %c0_241 = arith.constant 0 : index
      %334 = vector.load %arg6[%c16, %c0_240, %c0_241] : memref<25x128x128xf32, #tpu.memory_space<vmem>>, vector<1x128x128xf32>
      %335 = vector.shape_cast %334 : vector<1x128x128xf32> to vector<128x128xf32>
      %cst_242 = arith.constant dense<0.000000e+00> : vector<32x128xf32>
      %336 = tpu.matmul %333, %335, %cst_242 {dimension_numbers = #tpu.dot_dimension_numbers<[1], [0], [0], [1], [0, 0, 1, 1], [], []>} : vector<32x128xf32>, vector<128x128xf32>, vector<32x128xf32> -> vector<32x128xf32>
      %337 = arith.addf %329, %336 : vector<32x128xf32>
      %c3_i32_243 = arith.constant 3 : i32
      %338 = arith.addi %arg17, %c3_i32_243 : i32
      %339 = arith.index_cast %338 : i32 to index
      %c2_244 = arith.constant 2 : index
      %c0_245 = arith.constant 0 : index
      %340 = vector.load %arg16[%339, %c2_244, %c0_245] : memref<36x36x128xf32, #tpu.memory_space<vmem>>, vector<1x32x128xf32>
      %341 = vector.shape_cast %340 : vector<1x32x128xf32> to vector<32x128xf32>
      %c17 = arith.constant 17 : index
      %c0_246 = arith.constant 0 : index
      %c0_247 = arith.constant 0 : index
      %342 = vector.load %arg6[%c17, %c0_246, %c0_247] : memref<25x128x128xf32, #tpu.memory_space<vmem>>, vector<1x128x128xf32>
      %343 = vector.shape_cast %342 : vector<1x128x128xf32> to vector<128x128xf32>
      %cst_248 = arith.constant dense<0.000000e+00> : vector<32x128xf32>
      %344 = tpu.matmul %341, %343, %cst_248 {dimension_numbers = #tpu.dot_dimension_numbers<[1], [0], [0], [1], [0, 0, 1, 1], [], []>} : vector<32x128xf32>, vector<128x128xf32>, vector<32x128xf32> -> vector<32x128xf32>
      %345 = arith.addf %337, %344 : vector<32x128xf32>
      %c3_i32_249 = arith.constant 3 : i32
      %346 = arith.addi %arg17, %c3_i32_249 : i32
      %347 = arith.index_cast %346 : i32 to index
      %c3_250 = arith.constant 3 : index
      %c0_251 = arith.constant 0 : index
      %348 = vector.load %arg16[%347, %c3_250, %c0_251] : memref<36x36x128xf32, #tpu.memory_space<vmem>>, vector<1x32x128xf32>
      %349 = vector.shape_cast %348 : vector<1x32x128xf32> to vector<32x128xf32>
      %c18 = arith.constant 18 : index
      %c0_252 = arith.constant 0 : index
      %c0_253 = arith.constant 0 : index
      %350 = vector.load %arg6[%c18, %c0_252, %c0_253] : memref<25x128x128xf32, #tpu.memory_space<vmem>>, vector<1x128x128xf32>
      %351 = vector.shape_cast %350 : vector<1x128x128xf32> to vector<128x128xf32>
      %cst_254 = arith.constant dense<0.000000e+00> : vector<32x128xf32>
      %352 = tpu.matmul %349, %351, %cst_254 {dimension_numbers = #tpu.dot_dimension_numbers<[1], [0], [0], [1], [0, 0, 1, 1], [], []>} : vector<32x128xf32>, vector<128x128xf32>, vector<32x128xf32> -> vector<32x128xf32>
      %353 = arith.addf %345, %352 : vector<32x128xf32>
      %c3_i32_255 = arith.constant 3 : i32
      %354 = arith.addi %arg17, %c3_i32_255 : i32
      %355 = arith.index_cast %354 : i32 to index
      %c4_256 = arith.constant 4 : index
      %c0_257 = arith.constant 0 : index
      %356 = vector.load %arg16[%355, %c4_256, %c0_257] : memref<36x36x128xf32, #tpu.memory_space<vmem>>, vector<1x32x128xf32>
      %357 = vector.shape_cast %356 : vector<1x32x128xf32> to vector<32x128xf32>
      %c19 = arith.constant 19 : index
      %c0_258 = arith.constant 0 : index
      %c0_259 = arith.constant 0 : index
      %358 = vector.load %arg6[%c19, %c0_258, %c0_259] : memref<25x128x128xf32, #tpu.memory_space<vmem>>, vector<1x128x128xf32>
      %359 = vector.shape_cast %358 : vector<1x128x128xf32> to vector<128x128xf32>
      %cst_260 = arith.constant dense<0.000000e+00> : vector<32x128xf32>
      %360 = tpu.matmul %357, %359, %cst_260 {dimension_numbers = #tpu.dot_dimension_numbers<[1], [0], [0], [1], [0, 0, 1, 1], [], []>} : vector<32x128xf32>, vector<128x128xf32>, vector<32x128xf32> -> vector<32x128xf32>
      %361 = arith.addf %353, %360 : vector<32x128xf32>
      %c4_i32 = arith.constant 4 : i32
      %362 = arith.addi %arg17, %c4_i32 : i32
      %363 = arith.index_cast %362 : i32 to index
      %c0_261 = arith.constant 0 : index
      %c0_262 = arith.constant 0 : index
      %364 = vector.load %arg16[%363, %c0_261, %c0_262] : memref<36x36x128xf32, #tpu.memory_space<vmem>>, vector<1x32x128xf32>
      %365 = vector.shape_cast %364 : vector<1x32x128xf32> to vector<32x128xf32>
      %c20 = arith.constant 20 : index
      %c0_263 = arith.constant 0 : index
      %c0_264 = arith.constant 0 : index
      %366 = vector.load %arg6[%c20, %c0_263, %c0_264] : memref<25x128x128xf32, #tpu.memory_space<vmem>>, vector<1x128x128xf32>
      %367 = vector.shape_cast %366 : vector<1x128x128xf32> to vector<128x128xf32>
      %cst_265 = arith.constant dense<0.000000e+00> : vector<32x128xf32>
      %368 = tpu.matmul %365, %367, %cst_265 {dimension_numbers = #tpu.dot_dimension_numbers<[1], [0], [0], [1], [0, 0, 1, 1], [], []>} : vector<32x128xf32>, vector<128x128xf32>, vector<32x128xf32> -> vector<32x128xf32>
      %369 = arith.addf %361, %368 : vector<32x128xf32>
      %c4_i32_266 = arith.constant 4 : i32
      %370 = arith.addi %arg17, %c4_i32_266 : i32
      %371 = arith.index_cast %370 : i32 to index
      %c1_267 = arith.constant 1 : index
      %c0_268 = arith.constant 0 : index
      %372 = vector.load %arg16[%371, %c1_267, %c0_268] : memref<36x36x128xf32, #tpu.memory_space<vmem>>, vector<1x32x128xf32>
      %373 = vector.shape_cast %372 : vector<1x32x128xf32> to vector<32x128xf32>
      %c21 = arith.constant 21 : index
      %c0_269 = arith.constant 0 : index
      %c0_270 = arith.constant 0 : index
      %374 = vector.load %arg6[%c21, %c0_269, %c0_270] : memref<25x128x128xf32, #tpu.memory_space<vmem>>, vector<1x128x128xf32>
      %375 = vector.shape_cast %374 : vector<1x128x128xf32> to vector<128x128xf32>
      %cst_271 = arith.constant dense<0.000000e+00> : vector<32x128xf32>
      %376 = tpu.matmul %373, %375, %cst_271 {dimension_numbers = #tpu.dot_dimension_numbers<[1], [0], [0], [1], [0, 0, 1, 1], [], []>} : vector<32x128xf32>, vector<128x128xf32>, vector<32x128xf32> -> vector<32x128xf32>
      %377 = arith.addf %369, %376 : vector<32x128xf32>
      %c4_i32_272 = arith.constant 4 : i32
      %378 = arith.addi %arg17, %c4_i32_272 : i32
      %379 = arith.index_cast %378 : i32 to index
      %c2_273 = arith.constant 2 : index
      %c0_274 = arith.constant 0 : index
      %380 = vector.load %arg16[%379, %c2_273, %c0_274] : memref<36x36x128xf32, #tpu.memory_space<vmem>>, vector<1x32x128xf32>
      %381 = vector.shape_cast %380 : vector<1x32x128xf32> to vector<32x128xf32>
      %c22 = arith.constant 22 : index
      %c0_275 = arith.constant 0 : index
      %c0_276 = arith.constant 0 : index
      %382 = vector.load %arg6[%c22, %c0_275, %c0_276] : memref<25x128x128xf32, #tpu.memory_space<vmem>>, vector<1x128x128xf32>
      %383 = vector.shape_cast %382 : vector<1x128x128xf32> to vector<128x128xf32>
      %cst_277 = arith.constant dense<0.000000e+00> : vector<32x128xf32>
      %384 = tpu.matmul %381, %383, %cst_277 {dimension_numbers = #tpu.dot_dimension_numbers<[1], [0], [0], [1], [0, 0, 1, 1], [], []>} : vector<32x128xf32>, vector<128x128xf32>, vector<32x128xf32> -> vector<32x128xf32>
      %385 = arith.addf %377, %384 : vector<32x128xf32>
      %c4_i32_278 = arith.constant 4 : i32
      %386 = arith.addi %arg17, %c4_i32_278 : i32
      %387 = arith.index_cast %386 : i32 to index
      %c3_279 = arith.constant 3 : index
      %c0_280 = arith.constant 0 : index
      %388 = vector.load %arg16[%387, %c3_279, %c0_280] : memref<36x36x128xf32, #tpu.memory_space<vmem>>, vector<1x32x128xf32>
      %389 = vector.shape_cast %388 : vector<1x32x128xf32> to vector<32x128xf32>
      %c23 = arith.constant 23 : index
      %c0_281 = arith.constant 0 : index
      %c0_282 = arith.constant 0 : index
      %390 = vector.load %arg6[%c23, %c0_281, %c0_282] : memref<25x128x128xf32, #tpu.memory_space<vmem>>, vector<1x128x128xf32>
      %391 = vector.shape_cast %390 : vector<1x128x128xf32> to vector<128x128xf32>
      %cst_283 = arith.constant dense<0.000000e+00> : vector<32x128xf32>
      %392 = tpu.matmul %389, %391, %cst_283 {dimension_numbers = #tpu.dot_dimension_numbers<[1], [0], [0], [1], [0, 0, 1, 1], [], []>} : vector<32x128xf32>, vector<128x128xf32>, vector<32x128xf32> -> vector<32x128xf32>
      %393 = arith.addf %385, %392 : vector<32x128xf32>
      %c4_i32_284 = arith.constant 4 : i32
      %394 = arith.addi %arg17, %c4_i32_284 : i32
      %395 = arith.index_cast %394 : i32 to index
      %c4_285 = arith.constant 4 : index
      %c0_286 = arith.constant 0 : index
      %396 = vector.load %arg16[%395, %c4_285, %c0_286] : memref<36x36x128xf32, #tpu.memory_space<vmem>>, vector<1x32x128xf32>
      %397 = vector.shape_cast %396 : vector<1x32x128xf32> to vector<32x128xf32>
      %c24 = arith.constant 24 : index
      %c0_287 = arith.constant 0 : index
      %c0_288 = arith.constant 0 : index
      %398 = vector.load %arg6[%c24, %c0_287, %c0_288] : memref<25x128x128xf32, #tpu.memory_space<vmem>>, vector<1x128x128xf32>
      %399 = vector.shape_cast %398 : vector<1x128x128xf32> to vector<128x128xf32>
      %cst_289 = arith.constant dense<0.000000e+00> : vector<32x128xf32>
      %400 = tpu.matmul %397, %399, %cst_289 {dimension_numbers = #tpu.dot_dimension_numbers<[1], [0], [0], [1], [0, 0, 1, 1], [], []>} : vector<32x128xf32>, vector<128x128xf32>, vector<32x128xf32> -> vector<32x128xf32>
      %401 = arith.addf %393, %400 : vector<32x128xf32>
      %402 = vector.broadcast %202 : vector<1x128xf32> to vector<32x128xf32>
      %403 = arith.addf %401, %402 : vector<32x128xf32>
      %cst_290 = arith.constant 0.000000e+00 : f32
      %404 = vector.broadcast %cst_290 : f32 to vector<32x128xf32>
      %405 = arith.maximumf %403, %404 : vector<32x128xf32>
      %c0_291 = arith.constant 0 : index
      %406 = arith.index_cast %arg17 : i32 to index
      %c0_292 = arith.constant 0 : index
      %c0_293 = arith.constant 0 : index
      %407 = vector.load %arg12[%c0_291, %406, %c0_292, %c0_293] : memref<1x32x32x128xf32, #tpu.memory_space<vmem>>, vector<1x1x32x128xf32>
      %408 = vector.shape_cast %407 : vector<1x1x32x128xf32> to vector<32x128xf32>
      %409 = vector.shape_cast %405 : vector<32x128xf32> to vector<1x1x32x128xf32>
      tpu.vector_store %arg12[%c0_291, %406, %c0_292, %c0_293], %409 {strides = array<i32>} : memref<1x32x32x128xf32, #tpu.memory_space<vmem>>, vector<1x1x32x128xf32>,
    }
    %c32_i32_136 = arith.constant 32 : i32
    return
  }
  func.func @transform_0(%arg0: i32) -> (i32, i32, i32) {
    %c0_i32 = arith.constant 0 : i32
    %c0_i32_0 = arith.constant 0 : i32
    %c0_i32_1 = arith.constant 0 : i32
    return %arg0, %c0_i32, %c0_i32_0 : i32, i32, i32
  }
  func.func @transform_1(%arg0: i32) -> (i32, i32) {
    %c0_i32 = arith.constant 0 : i32
    %c0_i32_0 = arith.constant 0 : i32
    %c0_i32_1 = arith.constant 0 : i32
    return %c0_i32, %c0_i32_0 : i32, i32
  }
  func.func @transform_2(%arg0: i32) -> (i32, i32, i32) {
    %c0_i32 = arith.constant 0 : i32
    %c0_i32_0 = arith.constant 0 : i32
    %c0_i32_1 = arith.constant 0 : i32
    %c0_i32_2 = arith.constant 0 : i32
    return %c0_i32, %c0_i32_0, %c0_i32_1 : i32, i32, i32
  }
  func.func @transform_3(%arg0: i32) -> (i32, i32, i32) {
    %c0_i32 = arith.constant 0 : i32
    %c0_i32_0 = arith.constant 0 : i32
    %c0_i32_1 = arith.constant 0 : i32
    %c0_i32_2 = arith.constant 0 : i32
    return %c0_i32, %c0_i32_0, %c0_i32_1 : i32, i32, i32
  }
  func.func @transform_4(%arg0: i32) -> (i32, i32, i32) {
    %c0_i32 = arith.constant 0 : i32
    %c0_i32_0 = arith.constant 0 : i32
    %c0_i32_1 = arith.constant 0 : i32
    %c0_i32_2 = arith.constant 0 : i32
    return %c0_i32, %c0_i32_0, %c0_i32_1 : i32, i32, i32
  }
  func.func @transform_5(%arg0: i32) -> (i32, i32, i32) {
    %c0_i32 = arith.constant 0 : i32
    %c0_i32_0 = arith.constant 0 : i32
    %c0_i32_1 = arith.constant 0 : i32
    %c0_i32_2 = arith.constant 0 : i32
    return %c0_i32, %c0_i32_0, %c0_i32_1 : i32, i32, i32
  }
  func.func @transform_6(%arg0: i32) -> (i32, i32) {
    %c0_i32 = arith.constant 0 : i32
    %c0_i32_0 = arith.constant 0 : i32
    %c0_i32_1 = arith.constant 0 : i32
    return %c0_i32, %c0_i32_0 : i32, i32
  }
  func.func @transform_7(%arg0: i32) -> (i32, i32) {
    %c0_i32 = arith.constant 0 : i32
    %c0_i32_0 = arith.constant 0 : i32
    %c0_i32_1 = arith.constant 0 : i32
    return %c0_i32, %c0_i32_0 : i32, i32
  }
  func.func @transform_8(%arg0: i32) -> (i32, i32) {
    %c0_i32 = arith.constant 0 : i32
    %c0_i32_0 = arith.constant 0 : i32
    %c0_i32_1 = arith.constant 0 : i32
    return %c0_i32, %c0_i32_0 : i32, i32
  }
  func.func @transform_9(%arg0: i32) -> (i32, i32) {
    %c0_i32 = arith.constant 0 : i32
    %c0_i32_0 = arith.constant 0 : i32
    %c0_i32_1 = arith.constant 0 : i32
    return %c0_i32, %c0_i32_0 : i32, i32
  }
  func.func @transform_10(%arg0: i32) -> (i32, i32) {
    %c0_i32 = arith.constant 0 : i32
    %c0_i32_0 = arith.constant 0 : i32
    %c0_i32_1 = arith.constant 0 : i32
    return %c0_i32, %c0_i32_0 : i32, i32
  }
  func.func @transform_11(%arg0: i32) -> (i32, i32, i32, i32) {
    %c0_i32 = arith.constant 0 : i32
    %c0_i32_0 = arith.constant 0 : i32
    %c0_i32_1 = arith.constant 0 : i32
    %c0_i32_2 = arith.constant 0 : i32
    return %arg0, %c0_i32, %c0_i32_0, %c0_i32_1 : i32, i32, i32, i32
  }
}

</mosaic_0001>

<bundles_post_ra>
// kernel: decoder_forward.1
= control target key start
LH: loop header
LB: loop body
LE: loop exit
PB: predicated region body
PF: predicated region fallthrough
CT: control target
= control target key end

     0   :  { %16 = vsyncpa [#allocation7], 0  ;;  %s8098_s0 = inlined_call_operand.vmem [shape: f32[2,1,64], index: 0, kind: input, shape index: {}]   ;;  %s8099_s1 = inlined_call_operand.hbm [shape: f32[64,3200], index: 1, kind: input, shape index: {}]   ;;  %s8100_s2 = inlined_call_operand.hbm [shape: f32[9,128,128], index: 2, kind: input, shape index: {}]   ;;  %s8101_s3 = inlined_call_operand.hbm [shape: f32[16,128,128], index: 3, kind: input, shape index: {}]   ;;  %s8102_s4 = inlined_call_operand.hbm [shape: f32[25,128,128], index: 4, kind: input, shape index: {}]   ;;  %s8103_s5 = inlined_call_operand.hbm [shape: f32[25,128,128], index: 5, kind: input, shape index: {}]   ;;  %s8104_s6 = inlined_call_operand.hbm [shape: f32[1,128], index: 6, kind: input, shape index: {}]   ;;  %s8105_s7 = inlined_call_operand.hbm [shape: f32[1,128], index: 7, kind: input, shape index: {}]   ;;  %s8106_s8 = inlined_call_operand.hbm [shape: f32[1,128], index: 8, kind: input, shape index: {}]   ;;  %s8107_s9 = inlined_call_operand.hbm [shape: f32[1,128], index: 9, kind: input, shape index: {}]   ;;  %s8108_s10 = inlined_call_operand.hbm [shape: f32[1,128], index: 10, kind: input, shape index: {}]   ;;  %s8109_s11 = inlined_call_operand.vmem [shape: f32[2,32,32,128], index: 11, kind: output, shape index: {}]  }
   0x1   :  { %17 = vsyncpa [#allocation9], 0 }
   0x2   :  { %18 = vsyncpa [#allocation12], 0 }
   0x3   :  { %19 = vsyncpa [#allocation15], 0 }
   0x4   :  { %20 = vsyncpa [#allocation18], 0 }
   0x5   :  { %21 = vsyncpa [#allocation21], 0  ;;  %s7027_s17 = smov 0  }
   0x6 LB: > { %s319_s20 = sshll.u32 %s8100_s2, 4  ;;  %s7036_s21 = sadd.s32 4294967295, %s6934_s17   ;;  %s6934_s17 = sphi %s7027_s17, %s27_s17   ;;  %s320_s20 = int_to_ptr.hbm [resolvable:$true] %s319_s20 }
   0x7   : > { %p6037_p0 = scmp.ge.s32.totalorder %s6934_s17, 1  ;;  %p294_p1 = scmp.lt.s32.totalorder %s6934_s17, 3 }
   0x8   : > { %p6512_p2 = scmp.eq.s32.totalorder %s7036_s21, 0  ;;  %s6952_s23 = smov [#allocation8]  }
   0x9   : > { %p7041_p3 = pnand %p6037_p0, %p294_p1  ;;  %s321_s24 = sshll.u32 %s6952_s23, 4  ;;  %s322_s24 = int_to_ptr.vmem [resolvable:$true] %s321_s24 }
   0xa   : > { %s347_s27 = sshll.u32 %s8102_s4, 4  ;;  %s6953_s29 = smov [#allocation11]   ;;  %s348_s27 = int_to_ptr.hbm [resolvable:$true] %s347_s27 }
   0xb   : > { %p6481_p4 = pneg %p7041_p3  ;;  %s349_s30 = sshll.u32 %s6953_s29, 4  ;;  %s350_s30 = int_to_ptr.vmem [resolvable:$true] %s349_s30 }
   0xc   : > { %s376_s14 = sshll.u32 %s8104_s6, 4  ;;  %s8110_s15 = smov 128   ;;  %s377_s14 = int_to_ptr.hbm [resolvable:$true] %s376_s14 }
   0xd   : > { %p7052_p5 = pnand %p6512_p2, %p6481_p4  ;;  %s6955_s16 = smov 8  }
   0xe   : > { %s6956_s18 = smov [#allocation14]   ;;  %s400_s26 = sshll.u32 %s8106_s8, 4  ;;  %s401_s26 = int_to_ptr.hbm [resolvable:$true] %s400_s26 }
   0xf   : > { %6487 = dma.hbm_to_vmem [thread:$0]  (!%p7052_p5), %s320_s20, 18432, %s322_s24, [#allocation9], %s8110_s15, %s8110_s15, %s6955_s16  }
  0x10   : > { %6493 = dma.hbm_to_vmem [thread:$0]  (!%p7052_p5), %s348_s27, 51200, %s350_s30, [#allocation12], %s8110_s15, %s8110_s15, %s6955_s16  }
  0x11   : > { %s378_s19 = sshll.u32 %s6956_s18, 4  ;;  %s305_s20 = sshll.u32 %s8099_s1, 4  ;;  %s379_s19 = int_to_ptr.vmem [resolvable:$true] %s378_s19  ;;  %s306_s20 = int_to_ptr.hbm [resolvable:$true] %s305_s20 }
  0x12   : > { %6499 = dma.hbm_to_vmem [thread:$0]  (!%p7052_p5), %s377_s14, 16, %s379_s19, [#allocation15]  }
  0x13   : > { %s6957_s24 = smov [#allocation17]   ;;  %s6958_s27 = smov [#allocation6]  }
  0x14   : > { %s402_s13 = sshll.u32 %s6957_s24, 4  ;;  %s307_s30 = sshll.u32 %s6958_s27, 4  ;;  %s403_s13 = int_to_ptr.vmem [resolvable:$true] %s402_s13  ;;  %s308_s30 = int_to_ptr.vmem [resolvable:$true] %s307_s30 }
  0x15   : > { %6505 = dma.hbm_to_vmem [thread:$0]  (!%p7052_p5), %s401_s26, 16, %s403_s13, [#allocation18]  }
  0x16   : > { %s6959_s18 = smov 3200   ;;  %s6960_s23 = smov 200  }
  0x17   : > { %6484 = dma.hbm_to_vmem [thread:$0]  (!%p7052_p5), %s306_s20, 25600, %s308_s30, [#allocation7], %s6959_s18, %s6959_s18, %s6960_s23  }
  0x18   : > { %s333_s25 = sshll.u32 %s8101_s3, 4  ;;  %s6961_s29 = smov [#allocation10]   ;;  %s334_s25 = int_to_ptr.hbm [resolvable:$true] %s333_s25 }
  0x19   : > { %s335_s12 = sshll.u32 %s6961_s29, 4  ;;  %s361_s26 = sshll.u32 %s8103_s5, 4  ;;  %s336_s12 = int_to_ptr.vmem [resolvable:$true] %s335_s12  ;;  %s362_s26 = int_to_ptr.hbm [resolvable:$true] %s361_s26 }
  0x1a   : > { %s8114_s13 = smov 128   ;;  %s6962_s20 = smov [#allocation13]  }
  0x1b   : > { %6490 = dma.hbm_to_vmem [thread:$0]  (!%p7052_p5), %s334_s25, 32768, %s336_s12, [#allocation9], %s8114_s13, %s8114_s13, %s6955_s16  }
  0x1c   : > { %s363_s27 = sshll.u32 %s6962_s20, 4  ;;  %s388_s23 = sshll.u32 %s8105_s7, 4  ;;  %s364_s27 = int_to_ptr.vmem [resolvable:$true] %s363_s27  ;;  %s389_s23 = int_to_ptr.hbm [resolvable:$true] %s388_s23 }
  0x1d   : > { %6496 = dma.hbm_to_vmem [thread:$0]  (!%p7052_p5), %s362_s26, 51200, %s364_s27, [#allocation12], %s8114_s13, %s8114_s13, %s6955_s16  }
  0x1e   : > { %s412_s19 = sshll.u32 %s8107_s9, 4  ;;  %s6963_s25 = smov [#allocation16]   ;;  %s413_s19 = int_to_ptr.hbm [resolvable:$true] %s412_s19 }
  0x1f   : > { %s390_s29 = sshll.u32 %s6963_s25, 4  ;;  %s6964_s12 = smov [#allocation19]   ;;  %s391_s29 = int_to_ptr.vmem [resolvable:$true] %s390_s29 }
  0x20   : > { %6502 = dma.hbm_to_vmem [thread:$0]  (!%p7052_p5), %s389_s23, 16, %s391_s29, [#allocation15]  }
  0x21   : > { %s414_s24 = sshll.u32 %s6964_s12, 4  ;;  %s424_s18 = sshll.u32 %s8108_s10, 4  ;;  %s415_s24 = int_to_ptr.vmem [resolvable:$true] %s414_s24  ;;  %s425_s18 = int_to_ptr.hbm [resolvable:$true] %s424_s18 }
  0x22   : > { %6508 = dma.hbm_to_vmem [thread:$0]  (!%p7052_p5), %s413_s19, 16, %s415_s24, [#allocation18]  }
  0x23   : > { %s6965_s16 = smov [#allocation20]   ;;  %445 = sbr.rel (%p7041_p3) target bundleno = 2092 (0x82c), region = 64 }
  0x24   : > { %s426_s26 = sshll.u32 %s6965_s16, 4  ;;  %s427_s26 = int_to_ptr.vmem [resolvable:$true] %s426_s26 }
  0x25   : > { %6511 = dma.hbm_to_vmem [thread:$0]  (!%p7052_p5), %s425_s18, 16, %s427_s26, [#allocation21]  }
  0x28   : > { %6909 = dma.done.wait (%p6512_p2), [#allocation7], 25600  }
  0x29   : > { %6911 = vsyncadd (%p6512_p2), [#allocation7], 4294941696 }
  0x2a   : > { %6913 = dma.done.wait (%p6512_p2), [#allocation9], 51200  }
  0x2b   : > { %6915 = vsyncadd (%p6512_p2), [#allocation9], 4294916096 }
  0x2c   : > { %6917 = dma.done.wait (%p6512_p2), [#allocation12], 102400  }
  0x2d   : > { %6919 = vsyncadd (%p6512_p2), [#allocation12], 4294864896 }
  0x2e   : > { %6921 = dma.done.wait (%p6512_p2), [#allocation15], 32  }
  0x2f   : > { %6923 = vsyncadd (%p6512_p2), [#allocation15], 4294967264 }
  0x30   : > { %6925 = dma.done.wait (%p6512_p2), [#allocation18], 32  }
  0x31   : > { %6927 = vsyncadd (%p6512_p2), [#allocation18], 4294967264 }
  0x32   : > { %6929 = dma.done.wait (%p6512_p2), [#allocation21], 16  }
  0x33   : > { %6931 = vsyncadd (%p6512_p2), [#allocation21], 4294967280  ;;  %p529_p6 = scmp.lt.s32.totalorder %s7036_s21, 1  ;;  %v7148_v0 = vld [vmem:[#allocation16] sm:$0x1]  ;;  %v1168_v1 = vld [vmem:[#allocation6 + $0x578] sm:$0xff] }
  0x34   : > { %v1143_v2 = vld [vmem:[#allocation6 + $0x4b0] sm:$0xff]  ;;  %1205 = vmatpush.msra.mxu0 %v1168_v1  ;;  %v1118_v3 = vld [vmem:[#allocation6 + $0x3e8] sm:$0xff]  ;;  %v1145_v6 = vld [vmem:[#allocation6 + $0x4c0] sm:$0xff]  ;;  %vm1193_vm0 = vcmask 523264  }
  0x35   : > { %s8116_s21 = smov (!%p529_p6, %s7036_s21), 1  ;;  %v1170_v4 = vld [vmem:[#allocation6 + $0x588] sm:$0xff]  ;;  %v1171_v5 = vld [vmem:[#allocation6 + $0x590] sm:$0xff]  ;;  %v1093_v8 = vld [vmem:[#allocation6 + $0x320] sm:$0xff] }
  0x36   : > { %s6327_s22 = sshll.u32 %s8116_s21, 10  ;;  %1206 = vmatpush.msra.mxu0 %v1143_v2  ;;  %1245 = vmatpush.msra.mxu2 %v1170_v4  ;;  %v1146_v7 = vld [vmem:[#allocation6 + $0x4c8] sm:$0xff]  ;;  %v1120_v9 = vld [vmem:[#allocation6 + $0x3f8] sm:$0xff]  ;;  %v1121_v10 = vld [vmem:[#allocation6 + $0x400] sm:$0xff]  ;;  %s531_s14 = scalar_lea.vmem %s8098_s0, %s8116_s21 }
  0x37   : > { %s7146_s27 = scalar_lea.vmem %s8109_s11, %s6327_s22  ;;  %1265 = vmatpush.msra.mxu3 %v1171_v5  ;;  %v1169_v11 = vld [vmem:[#allocation6 + $0x580] sm:$0xff]  ;;  %v1068_v12 = vld [vmem:[#allocation6 + $0x258] sm:$0xff]  ;;  %v1095_v13 = vld [vmem:[#allocation6 + $0x330] sm:$0xff]  ;;  %s7686_s21 = smov 0  }
  0x38   : > { %1207 = vmatpush.msra.mxu0 %v1118_v3  ;;  %1246 = vmatpush.msra.mxu2 %v1145_v6  ;;  %v1144_v14 = vld [vmem:[#allocation6 + $0x4b8] sm:$0xff]  ;;  %v1119_v16 = vld [vmem:[#allocation6 + $0x3f0] sm:$0xff]  ;;  %v1070_v18 = vld [vmem:[#allocation6 + $0x268] sm:$0xff] }
  0x39   : > { %1266 = vmatpush.msra.mxu3 %v1146_v7  ;;  %1225 = vmatpush.msra.mxu1 %v1169_v11  ;;  %v1096_v15 = vld [vmem:[#allocation6 + $0x338] sm:$0xff]  ;;  %v1043_v17 = vld [vmem:[#allocation6 + $0x190] sm:$0xff]  ;;  %v1094_v20 = vld [vmem:[#allocation6 + $0x328] sm:$0xff] }
  0x3a   : > { %1208 = vmatpush.msra.mxu0 %v1093_v8  ;;  %1247 = vmatpush.msra.mxu2 %v1120_v9  ;;  %v1071_v19 = vld [vmem:[#allocation6 + $0x270] sm:$0xff]  ;;  %v1018_v21 = vld [vmem:[#allocation6 + $0xc8] sm:$0xff]  ;;  %v1045_v22 = vld [vmem:[#allocation6 + $0x1a0] sm:$0xff] }
  0x3b   : > { %1267 = vmatpush.msra.mxu3 %v1121_v10  ;;  %1226 = vmatpush.msra.mxu1 %v1144_v14  ;;  %v1046_v23 = vld [vmem:[#allocation6 + $0x1a8] sm:$0xff]  ;;  %v1069_v24 = vld [vmem:[#allocation6 + $0x260] sm:$0xff]  ;;  %v1020_v26 = vld [vmem:[#allocation6 + $0xd8] sm:$0xff] }
  0x3c   : > { %1209 = vmatpush.msra.mxu0 %v1068_v12  ;;  %1248 = vmatpush.msra.mxu2 %v1095_v13  ;;  %v993_v25 = vld [vmem:[#allocation6] sm:$0xff]  ;;  %v1172_v27 = vld [vmem:[#allocation6 + $0x598] sm:$0xff]  ;;  %v995_v29 = vld [vmem:[#allocation6 + $0x10] sm:$0xff] }
  0x3d   : > { %1268 = vmatpush.msra.mxu3 %v1096_v15  ;;  %1227 = vmatpush.msra.mxu1 %v1119_v16  ;;  %v1021_v28 = vld [vmem:[#allocation6 + $0xe0] sm:$0xff]  ;;  %v1044_v30 = vld [vmem:[#allocation6 + $0x198] sm:$0xff]  ;;  %v1147_v31 = vld [vmem:[#allocation6 + $0x4d0] sm:$0xff] }
  0x3e   : > { %1210 = vmatpush.msra.mxu0 %v1043_v17  ;;  %1249 = vmatpush.msra.mxu2 %v1070_v18  ;;  %v996_v32 = vld [vmem:[#allocation6 + $0x18] sm:$0xff]  ;;  %v1174_v33 = vld [vmem:[#allocation6 + $0x5a8] sm:$0xff]  ;;  %v1175_v34 = vld [vmem:[#allocation6 + $0x5b0] sm:$0xff] }
  0x3f   : > { %1269 = vmatpush.msra.mxu3 %v1071_v19  ;;  %1228 = vmatpush.msra.mxu1 %v1094_v20  ;;  %v1122_v35 = vld [vmem:[#allocation6 + $0x408] sm:$0xff]  ;;  %v1019_v36 = vld [vmem:[#allocation6 + $0xd0] sm:$0xff]  ;;  %v1149_v37 = vld [vmem:[#allocation6 + $0x4e0] sm:$0xff] }
  0x40   : > { %1211 = vmatpush.msra.mxu0 %v1018_v21  ;;  %1250 = vmatpush.msra.mxu2 %v1045_v22  ;;  %v1150_v38 = vld [vmem:[#allocation6 + $0x4e8] sm:$0xff]  ;;  %v1097_v39 = vld [vmem:[#allocation6 + $0x340] sm:$0xff]  ;;  %v1124_v41 = vld [vmem:[#allocation6 + $0x418] sm:$0xff] }
  0x41   : > { %1270 = vmatpush.msra.mxu3 %v1046_v23  ;;  %1229 = vmatpush.msra.mxu1 %v1069_v24  ;;  %v994_v40 = vld [vmem:[#allocation6 + $0x8] sm:$0xff]  ;;  %v1125_v42 = vld [vmem:[#allocation6 + $0x420] sm:$0xff]  ;;  %v1072_v43 = vld [vmem:[#allocation6 + $0x278] sm:$0xff] }
  0x42   : > { %1212 = vmatpush.msra.mxu0 %v993_v25  ;;  %1251 = vmatpush.msra.mxu2 %v1020_v26  ;;  %v1173_v44 = vld [vmem:[#allocation6 + $0x5a0] sm:$0xff]  ;;  %v7154_v45 = vld [vmem:[%s531_s14] sm:$0x1]  ;;  %v1100_v48 = vld [vmem:[#allocation6 + $0x358] sm:$0xff] }
  0x43   : > { %1271 = vmatpush.msra.mxu3 %v1021_v28  ;;  %1230 = vmatpush.msra.mxu1 %v1044_v30  ;;  %v1099_v46 = vld [vmem:[#allocation6 + $0x350] sm:$0xff]  ;;  %v1148_v49 = vld [vmem:[#allocation6 + $0x4d8] sm:$0xff]  ;;  %v1074_v50 = vld [vmem:[#allocation6 + $0x288] sm:$0xff] }
  0x44   : > { %1285 = vmatpush.msrb.mxu0 %v1172_v27  ;;  %1252 = vmatpush.msra.mxu2 %v995_v29  ;;  %v1047_v47 = vld [vmem:[#allocation6 + $0x1b0] sm:$0xff]  ;;  %v1022_v51 = vld [vmem:[#allocation6 + $0xe8] sm:$0xff]  ;;  %v1049_v54 = vld [vmem:[#allocation6 + $0x1c0] sm:$0xff] }
  0x45   : > { %1272 = vmatpush.msra.mxu3 %v996_v32  ;;  %1231 = vmatpush.msra.mxu1 %v1019_v36  ;;  %v1075_v52 = vld [vmem:[#allocation6 + $0x290] sm:$0xff]  ;;  %v997_v55 = vld [vmem:[#allocation6 + $0x20] sm:$0xff]  ;;  %v1050_v56 = vld [vmem:[#allocation6 + $0x1c8] sm:$0xff] }
  0x46   : > { %1286 = vmatpush.msrb.mxu0 %v1147_v31  ;;  %1325 = vmatpush.msrb.mxu2 %v1174_v33  ;;  %v1123_v53 = vld [vmem:[#allocation6 + $0x410] sm:$0xff]  ;;  %v1176_v57 = vld [vmem:[#allocation6 + $0x5b8] sm:$0xff]  ;;  %v1098_v58 = vld [vmem:[#allocation6 + $0x348] sm:$0xff] }
  0x47   : > { %1345 = vmatpush.msrb.mxu3 %v1175_v34  ;;  %1232 = vmatpush.msra.mxu1 %v994_v40  ;;  %v1024_v59 = vld [vmem:[#allocation6 + $0xf8] sm:$0xff]  ;;  %v1025_v60 = vld [vmem:[#allocation6 + $0x100] sm:$0xff]  ;;  %v1151_v61 = vld [vmem:[#allocation6 + $0x4f0] sm:$0xff] }
  0x48   : > { %1287 = vmatpush.msrb.mxu0 %v1122_v35  ;;  %1326 = vmatpush.msrb.mxu2 %v1149_v37  ;;  %v1073_v62 = vld [vmem:[#allocation6 + $0x280] sm:$0xff]  ;;  %v999_v63 = vld [vmem:[#allocation6 + $0x30] sm:$0xff]  ;;  %v1000_v1 = vld [vmem:[#allocation6 + $0x38] sm:$0xff] }
  0x49   : > { %1346 = vmatpush.msrb.mxu3 %v1150_v38  ;;  %1305 = vmatpush.msrb.mxu1 %v1173_v44  ;;  %v1126_v2 = vld [vmem:[#allocation6 + $0x428] sm:$0xff]  ;;  %v1101_v4 = vld [vmem:[#allocation6 + $0x360] sm:$0xff]  ;;  %v1179_v5 = vld [vmem:[#allocation6 + $0x5d0] sm:$0xff] }
  0x4a   : > { %1288 = vmatpush.msrb.mxu0 %v1097_v39  ;;  %1327 = vmatpush.msrb.mxu2 %v1124_v41  ;;  %v1178_v3 = vld [vmem:[#allocation6 + $0x5c8] sm:$0xff]  ;;  %v1048_v6 = vld [vmem:[#allocation6 + $0x1b8] sm:$0xff]  ;;  %v1153_v7 = vld [vmem:[#allocation6 + $0x500] sm:$0xff] }
  0x4b   : > { %1347 = vmatpush.msrb.mxu3 %v1125_v42  ;;  %6062 = vmatmul.msk.f32.vlgmr.msra.gmra.mxu0 %vm1193_vm0, %v7154_v45  ;;  %v1076_v8 = vld [vmem:[#allocation6 + $0x298] sm:$0xff]  ;;  %v1154_v9 = vld [vmem:[#allocation6 + $0x508] sm:$0xff]  ;;  %v1023_v10 = vld [vmem:[#allocation6 + $0xf0] sm:$0xff] }
  0x4c   : > { %1289 = vmatpush.msrb.mxu0 %v1072_v43  ;;  %1328 = vmatpush.msrb.mxu2 %v1099_v46  ;;  %v1128_v11 = vld [vmem:[#allocation6 + $0x438] sm:$0xff]  ;;  %v1051_v12 = vld [vmem:[#allocation6 + $0x1d0] sm:$0xff]  ;;  %v1129_v13 = vld [vmem:[#allocation6 + $0x440] sm:$0xff] }
  0x4d   : > { %1348 = vmatpush.msrb.mxu3 %v1100_v48  ;;  %1306 = vmatpush.msrb.mxu1 %v1148_v49  ;;  %v998_v14 = vld [vmem:[#allocation6 + $0x28] sm:$0xff]  ;;  %v1177_v16 = vld [vmem:[#allocation6 + $0x5c0] sm:$0xff]  ;;  %v1103_v17 = vld [vmem:[#allocation6 + $0x370] sm:$0xff] }
  0x4e   : > { %1290 = vmatpush.msrb.mxu0 %v1047_v47  ;;  %1329 = vmatpush.msrb.mxu2 %v1074_v50  ;;  %v1026_v15 = vld [vmem:[#allocation6 + $0x108] sm:$0xff]  ;;  %v1001_v18 = vld [vmem:[#allocation6 + $0x40] sm:$0xff]  ;;  %v1104_v19 = vld [vmem:[#allocation6 + $0x378] sm:$0xff] }
  0x4f   : > { %1349 = vmatpush.msrb.mxu3 %v1075_v52  ;;  %1307 = vmatpush.msrb.mxu1 %v1123_v53  ;;  %v1180_v20 = vld [vmem:[#allocation6 + $0x5d8] sm:$0xff]  ;;  %v1078_v22 = vld [vmem:[#allocation6 + $0x2a8] sm:$0xff]  ;;  %v1079_v23 = vld [vmem:[#allocation6 + $0x2b0] sm:$0xff] }
  0x50   : > { %1291 = vmatpush.msrb.mxu0 %v1022_v51  ;;  %1330 = vmatpush.msrb.mxu2 %v1049_v54  ;;  %v1152_v21 = vld [vmem:[#allocation6 + $0x4f8] sm:$0xff]  ;;  %v1155_v24 = vld [vmem:[#allocation6 + $0x510] sm:$0xff]  ;;  %v1053_v26 = vld [vmem:[#allocation6 + $0x1e0] sm:$0xff] }
  0x51   : > { %1350 = vmatpush.msrb.mxu3 %v1050_v56  ;;  %1308 = vmatpush.msrb.mxu1 %v1098_v58  ;;  %v1127_v25 = vld [vmem:[#allocation6 + $0x430] sm:$0xff]  ;;  %v1054_v27 = vld [vmem:[#allocation6 + $0x1e8] sm:$0xff]  ;;  %v1028_v30 = vld [vmem:[#allocation6 + $0x118] sm:$0xff] }
  0x52   : > { %1292 = vmatpush.msrb.mxu0 %v997_v55  ;;  %1331 = vmatpush.msrb.mxu2 %v1024_v59  ;;  %v1130_v28 = vld [vmem:[#allocation6 + $0x448] sm:$0xff]  ;;  %v1029_v31 = vld [vmem:[#allocation6 + $0x120] sm:$0xff]  ;;  %v1003_v34 = vld [vmem:[#allocation6 + $0x50] sm:$0xff] }
  0x53   : > { %1351 = vmatpush.msrb.mxu3 %v1025_v60  ;;  %1309 = vmatpush.msrb.mxu1 %v1073_v62  ;;  %v1102_v29 = vld [vmem:[#allocation6 + $0x368] sm:$0xff]  ;;  %v1105_v32 = vld [vmem:[#allocation6 + $0x380] sm:$0xff]  ;;  %v1004_v35 = vld [vmem:[#allocation6 + $0x58] sm:$0xff] }
  0x54   : > { %1365 = vmatpush.msra.mxu0 %v1176_v57  ;;  %1332 = vmatpush.msrb.mxu2 %v999_v63  ;;  %v1077_v33 = vld [vmem:[#allocation6 + $0x2a0] sm:$0xff]  ;;  %v1080_v36 = vld [vmem:[#allocation6 + $0x2b8] sm:$0xff]  ;;  %v1182_v37 = vld [vmem:[#allocation6 + $0x5e8] sm:$0xff] }
  0x55   : > { %1352 = vmatpush.msrb.mxu3 %v1000_v1  ;;  %6064 = vmatmul.msk.f32.vlgmr.msra.gmra.mxu2 %vm1193_vm0, %v7154_v45  ;;  %v1183_v38 = vld [vmem:[#allocation6 + $0x5f0] sm:$0xff]  ;;  %v1052_v39 = vld [vmem:[#allocation6 + $0x1d8] sm:$0xff]  ;;  %v1157_v41 = vld [vmem:[#allocation6 + $0x520] sm:$0xff] }
  0x56   : > { %1366 = vmatpush.msra.mxu0 %v1151_v61  ;;  %6065 = vmatmul.msk.f32.vlgmr.msra.gmra.mxu3 %vm1193_vm0, %v7154_v45  ;;  %v1055_v40 = vld [vmem:[#allocation6 + $0x1f0] sm:$0xff]  ;;  %v1158_v42 = vld [vmem:[#allocation6 + $0x528] sm:$0xff]  ;;  %v1132_v46 = vld [vmem:[#allocation6 + $0x458] sm:$0xff] }
  0x57   : > { %1405 = vmatpush.msra.mxu2 %v1178_v3  ;;  %1425 = vmatpush.msra.mxu3 %v1179_v5  ;;  %v1027_v43 = vld [vmem:[#allocation6 + $0x110] sm:$0xff]  ;;  %v1030_v44 = vld [vmem:[#allocation6 + $0x128] sm:$0xff]  ;;  %v1133_v47 = vld [vmem:[#allocation6 + $0x460] sm:$0xff] }
  0x58   : > { %1367 = vmatpush.msra.mxu0 %v1126_v2  ;;  %1310 = vmatpush.msrb.mxu1 %v1048_v6  ;;  %v1002_v48 = vld [vmem:[#allocation6 + $0x48] sm:$0xff]  ;;  %v1005_v49 = vld [vmem:[#allocation6 + $0x60] sm:$0xff]  ;;  %v1107_v51 = vld [vmem:[#allocation6 + $0x390] sm:$0xff] }
  0x59   : > { %1406 = vmatpush.msra.mxu2 %v1153_v7  ;;  %1426 = vmatpush.msra.mxu3 %v1154_v9  ;;  %v1181_v50 = vld [vmem:[#allocation6 + $0x5e0] sm:$0xff]  ;;  %v1108_v52 = vld [vmem:[#allocation6 + $0x398] sm:$0xff]  ;;  %v1082_v55 = vld [vmem:[#allocation6 + $0x2c8] sm:$0xff] }
  0x5a   : > { %1368 = vmatpush.msra.mxu0 %v1101_v4  ;;  %1311 = vmatpush.msrb.mxu1 %v1023_v10  ;;  %v1184_v53 = vld [vmem:[#allocation6 + $0x5f8] sm:$0xff]  ;;  %v1083_v56 = vld [vmem:[#allocation6 + $0x2d0] sm:$0xff]  ;;  %v1057_v59 = vld [vmem:[#allocation6 + $0x200] sm:$0xff] }
  0x5b   : > { %1407 = vmatpush.msra.mxu2 %v1128_v11  ;;  %1427 = vmatpush.msra.mxu3 %v1129_v13  ;;  %v1156_v54 = vld [vmem:[#allocation6 + $0x518] sm:$0xff]  ;;  %v1159_v57 = vld [vmem:[#allocation6 + $0x530] sm:$0xff]  ;;  %v1058_v60 = vld [vmem:[#allocation6 + $0x208] sm:$0xff] }
  0x5c   : > { %1369 = vmatpush.msra.mxu0 %v1076_v8  ;;  %1312 = vmatpush.msrb.mxu1 %v998_v14  ;;  %v1131_v58 = vld [vmem:[#allocation6 + $0x450] sm:$0xff]  ;;  %v1134_v61 = vld [vmem:[#allocation6 + $0x468] sm:$0xff]  ;;  %v1032_v63 = vld [vmem:[#allocation6 + $0x138] sm:$0xff] }
  0x5d   : > { %6066 = vmatmul.msk.f32.vlgmr.msrb.gmra.mxu0 %vm1193_vm0, %v7154_v45  ;;  %6063 = vmatmul.msk.f32.vlgmr.msra.gmra.mxu1 %vm1193_vm0, %v7154_v45  ;;  %v1106_v62 = vld [vmem:[#allocation6 + $0x388] sm:$0xff]  ;;  %v1033_v1 = vld [vmem:[#allocation6 + $0x140] sm:$0xff]  ;;  %v1007_v4 = vld [vmem:[#allocation6 + $0x70] sm:$0xff] }
  0x5e   : > { %1370 = vmatpush.msra.mxu0 %v1051_v12  ;;  %1385 = vmatpush.msra.mxu1 %v1177_v16  ;;  %v1109_v2 = vld [vmem:[#allocation6 + $0x3a0] sm:$0xff]  ;;  %v1008_v5 = vld [vmem:[#allocation6 + $0x78] sm:$0xff]  ;;  %v1186_v7 = vld [vmem:[#allocation6 + $0x608] sm:$0xff] }
  0x5f   : > { %1408 = vmatpush.msra.mxu2 %v1103_v17  ;;  %1428 = vmatpush.msra.mxu3 %v1104_v19  ;;  %v1081_v3 = vld [vmem:[#allocation6 + $0x2c0] sm:$0xff]  ;;  %v1084_v6 = vld [vmem:[#allocation6 + $0x2d8] sm:$0xff]  ;;  %v1187_v8 = vld [vmem:[#allocation6 + $0x610] sm:$0xff] }
  0x60   : > { %1371 = vmatpush.msra.mxu0 %v1026_v15  ;;  %1386 = vmatpush.msra.mxu1 %v1152_v21  ;;  %v1056_v9 = vld [vmem:[#allocation6 + $0x1f8] sm:$0xff]  ;;  %v1059_v10 = vld [vmem:[#allocation6 + $0x210] sm:$0xff]  ;;  %v1161_v11 = vld [vmem:[#allocation6 + $0x540] sm:$0xff] }
  0x61   : > { %1409 = vmatpush.msra.mxu2 %v1078_v22  ;;  %1429 = vmatpush.msra.mxu3 %v1079_v23  ;;  %v1162_v12 = vld [vmem:[#allocation6 + $0x548] sm:$0xff]  ;;  %v1031_v13 = vld [vmem:[#allocation6 + $0x130] sm:$0xff]  ;;  %v1136_v15 = vld [vmem:[#allocation6 + $0x478] sm:$0xff] }
  0x62   : > { %1372 = vmatpush.msra.mxu0 %v1001_v18  ;;  %1387 = vmatpush.msra.mxu1 %v1127_v25  ;;  %v1034_v14 = vld [vmem:[#allocation6 + $0x148] sm:$0xff]  ;;  %v1137_v16 = vld [vmem:[#allocation6 + $0x480] sm:$0xff]  ;;  %v1112_v21 = vld [vmem:[#allocation6 + $0x3b8] sm:$0xff] }
  0x63   : > { %1410 = vmatpush.msra.mxu2 %v1053_v26  ;;  %1430 = vmatpush.msra.mxu3 %v1054_v27  ;;  %v1006_v17 = vld [vmem:[#allocation6 + $0x68] sm:$0xff]  ;;  %v1009_v18 = vld [vmem:[#allocation6 + $0x80] sm:$0xff]  ;;  %v1188_v22 = vld [vmem:[#allocation6 + $0x618] sm:$0xff] }
  0x64   : > { %1445 = vmatpush.msrb.mxu0 %v1180_v20  ;;  %1388 = vmatpush.msra.mxu1 %v1102_v29  ;;  %v1185_v19 = vld [vmem:[#allocation6 + $0x600] sm:$0xff]  ;;  %v1111_v20 = vld [vmem:[#allocation6 + $0x3b0] sm:$0xff]  ;;  %v1160_v23 = vld [vmem:[#allocation6 + $0x538] sm:$0xff] }
  0x65   : > { %1411 = vmatpush.msra.mxu2 %v1028_v30  ;;  %1431 = vmatpush.msra.mxu3 %v1029_v31  ;;  %v1087_v25 = vld [vmem:[#allocation6 + $0x2f0] sm:$0xff]  ;;  %v1062_v29 = vld [vmem:[#allocation6 + $0x228] sm:$0xff] }
  0x66   : > { %1446 = vmatpush.msrb.mxu0 %v1155_v24  ;;  %1389 = vmatpush.msra.mxu1 %v1077_v33  ;;  %v1086_v24 = vld [vmem:[#allocation6 + $0x2e8] sm:$0xff]  ;;  %v1163_v26 = vld [vmem:[#allocation6 + $0x550] sm:$0xff]  ;;  %v1037_v33 = vld [vmem:[#allocation6 + $0x160] sm:$0xff] }
  0x67   : > { %1412 = vmatpush.msra.mxu2 %v1003_v34  ;;  %1432 = vmatpush.msra.mxu3 %v1004_v35  ;;  %v1135_v27 = vld [vmem:[#allocation6 + $0x470] sm:$0xff]  ;;  %v1138_v30 = vld [vmem:[#allocation6 + $0x488] sm:$0xff]  ;;  %v1113_v34 = vld [vmem:[#allocation6 + $0x3c0] sm:$0xff] }
  0x68   : > { %1447 = vmatpush.msrb.mxu0 %v1130_v28  ;;  %6068 = vmatmul.msk.f32.vlgmr.msrb.gmra.mxu2 %vm1193_vm0, %v7154_v45  ;;  %v1061_v28 = vld [vmem:[#allocation6 + $0x220] sm:$0xff]  ;;  %v1110_v31 = vld [vmem:[#allocation6 + $0x3a8] sm:$0xff] }
  0x69   : > { %6069 = vmatmul.msk.f32.vlgmr.msrb.gmra.mxu3 %vm1193_vm0, %v7154_v45  ;;  %1485 = vmatpush.msrb.mxu2 %v1182_v37  ;;  %v1085_v35 = vld [vmem:[#allocation6 + $0x2e0] sm:$0xff]  ;;  %v1011_v37 = vld [vmem:[#allocation6 + $0x90] sm:$0xff] }
  0x6a   : > { %1448 = vmatpush.msrb.mxu0 %v1105_v32  ;;  %1505 = vmatpush.msrb.mxu3 %v1183_v38  ;;  %v1036_v32 = vld [vmem:[#allocation6 + $0x158] sm:$0xff] }
  0x6b   : > { %1390 = vmatpush.msra.mxu1 %v1052_v39  ;;  %1486 = vmatpush.msrb.mxu2 %v1157_v41  ;;  %v1012_v38 = vld [vmem:[#allocation6 + $0x98] sm:$0xff]  ;;  %v1191_v41 = vld [vmem:[#allocation6 + $0x630] sm:$0xff] }
  0x6c   : > { %1449 = vmatpush.msrb.mxu0 %v1080_v36  ;;  %1506 = vmatpush.msrb.mxu3 %v1158_v42  ;;  %v6966_v36 = vmov 0.0   ;;  %v1088_v39 = vld [vmem:[#allocation6 + $0x2f8] sm:$0xff] }
  0x6d   : > { %1391 = vmatpush.msra.mxu1 %v1027_v43  ;;  %1487 = vmatpush.msrb.mxu2 %v1132_v46  ;;  %537 = vst [vmem:[#allocation2] sm:$0xff] %v6966_v36  ;;  %v1060_v42 = vld [vmem:[#allocation6 + $0x218] sm:$0xff]  ;;  %v1063_v43 = vld [vmem:[#allocation6 + $0x230] sm:$0xff]  ;;  %v1166_v46 = vld [vmem:[#allocation6 + $0x568] sm:$0xff] }
  0x6e   : > { %1450 = vmatpush.msrb.mxu0 %v1055_v40  ;;  %1507 = vmatpush.msrb.mxu3 %v1133_v47  ;;  %538 = vst [vmem:[#allocation2 + $0x8] sm:$0x1f] %v6966_v36  ;;  %v1190_v40 = vld [vmem:[#allocation6 + $0x628] sm:$0xff]  ;;  %v1035_v47 = vld [vmem:[#allocation6 + $0x150] sm:$0xff] }
  0x6f   : > { %1392 = vmatpush.msra.mxu1 %v1002_v48  ;;  %6070 = vmatmul.msk.f32.vlgmr.msra.gmra.mxu0 %vm1193_vm0, %v7154_v45  ;;  %539 = vst [vmem:[#allocation2 + $0x10] sm:$0xff] %v6966_v36  ;;  %v1038_v48 = vld [vmem:[#allocation6 + $0x168] sm:$0xff] }
  0x70   : > { %1451 = vmatpush.msrb.mxu0 %v1030_v44  ;;  %6067 = vmatmul.msk.f32.vlgmr.msrb.gmra.mxu1 %vm1193_vm0, %v7154_v45  ;;  %540 = vst [vmem:[#allocation2 + $0x18] sm:$0x1f] %v6966_v36  ;;  %v1165_v44 = vld [vmem:[#allocation6 + $0x560] sm:$0xff] }
  0x71   : > { %1465 = vmatpush.msrb.mxu1 %v1181_v50  ;;  %1488 = vmatpush.msrb.mxu2 %v1107_v51  ;;  %541 = vst [vmem:[#allocation2 + $0x20] sm:$0xff] %v6966_v36  ;;  %v1141_v50 = vld [vmem:[#allocation6 + $0x4a0] sm:$0xff]  ;;  %v1010_v51 = vld [vmem:[#allocation6 + $0x88] sm:$0xff] }
  0x72   : > { %1452 = vmatpush.msrb.mxu0 %v1005_v49  ;;  %1508 = vmatpush.msrb.mxu3 %v1108_v52  ;;  %543 = vst [vmem:[#allocation2 + $0x30] sm:$0xff] %v6966_v36  ;;  %v1140_v49 = vld [vmem:[#allocation6 + $0x498] sm:$0xff]  ;;  %v1013_v52 = vld [vmem:[#allocation6 + $0xa0] sm:$0xff] }
  0x73   : > { %1466 = vmatpush.msrb.mxu1 %v1156_v54  ;;  %1489 = vmatpush.msrb.mxu2 %v1082_v55  ;;  %544 = vst [vmem:[#allocation2 + $0x38] sm:$0x1f] %v6966_v36  ;;  %v1115_v54 = vld [vmem:[#allocation6 + $0x3d0] sm:$0xff]  ;;  %v1116_v55 = vld [vmem:[#allocation6 + $0x3d8] sm:$0xff] }
  0x74   : > { %1525 = vmatpush.msra.mxu0 %v1184_v53  ;;  %1509 = vmatpush.msrb.mxu3 %v1083_v56  ;;  %547 = vst [vmem:[#allocation2 + $0x50] sm:$0xff] %v6966_v36  ;;  %v1189_v53 = vld [vmem:[#allocation6 + $0x620] sm:$0xff]  ;;  %v1192_v56 = vld [vmem:[#allocation6 + $0x638] sm:$0xff] }
  0x75   : > { %1467 = vmatpush.msrb.mxu1 %v1131_v58  ;;  %1490 = vmatpush.msrb.mxu2 %v1057_v59  ;;  %548 = vst [vmem:[#allocation2 + $0x58] sm:$0x1f] %v6966_v36  ;;  %v1090_v58 = vld [vmem:[#allocation6 + $0x308] sm:$0xff]  ;;  %v1091_v59 = vld [vmem:[#allocation6 + $0x310] sm:$0xff] }
  0x76   : > { %1526 = vmatpush.msra.mxu0 %v1159_v57  ;;  %1510 = vmatpush.msrb.mxu3 %v1058_v60  ;;  %551 = vst [vmem:[#allocation2 + $0x70] sm:$0xff] %v6966_v36  ;;  %v1164_v57 = vld [vmem:[#allocation6 + $0x558] sm:$0xff]  ;;  %v1167_v60 = vld [vmem:[#allocation6 + $0x570] sm:$0xff] }
  0x77   : > { %1468 = vmatpush.msrb.mxu1 %v1106_v62  ;;  %1491 = vmatpush.msrb.mxu2 %v1032_v63  ;;  %552 = vst [vmem:[#allocation2 + $0x78] sm:$0x1f] %v6966_v36  ;;  %v1065_v62 = vld [vmem:[#allocation6 + $0x240] sm:$0xff]  ;;  %v1066_v63 = vld [vmem:[#allocation6 + $0x248] sm:$0xff] }
  0x78   : > { %1527 = vmatpush.msra.mxu0 %v1134_v61  ;;  %1511 = vmatpush.msrb.mxu3 %v1033_v1  ;;  %555 = vst [vmem:[#allocation2 + $0x90] sm:$0xff] %v6966_v36  ;;  %v1139_v61 = vld [vmem:[#allocation6 + $0x490] sm:$0xff]  ;;  %v1142_v1 = vld [vmem:[#allocation6 + $0x4a8] sm:$0xff] }
  0x79   : > { %1469 = vmatpush.msrb.mxu1 %v1081_v3  ;;  %1492 = vmatpush.msrb.mxu2 %v1007_v4  ;;  %556 = vst [vmem:[#allocation2 + $0x98] sm:$0x1f] %v6966_v36  ;;  %v1040_v3 = vld [vmem:[#allocation6 + $0x178] sm:$0xff]  ;;  %v1041_v4 = vld [vmem:[#allocation6 + $0x180] sm:$0xff] }
  0x7a   : > { %1528 = vmatpush.msra.mxu0 %v1109_v2  ;;  %1512 = vmatpush.msrb.mxu3 %v1008_v5  ;;  %559 = vst [vmem:[#allocation2 + $0xb0] sm:$0xff] %v6966_v36  ;;  %v1114_v2 = vld [vmem:[#allocation6 + $0x3c8] sm:$0xff]  ;;  %v1117_v5 = vld [vmem:[#allocation6 + $0x3e0] sm:$0xff] }
  0x7b   : > { %6072 = vmatmul.msk.f32.vlgmr.msra.gmra.mxu2 %vm1193_vm0, %v7154_v45  ;;  %6073 = vmatmul.msk.f32.vlgmr.msra.gmra.mxu3 %vm1193_vm0, %v7154_v45  ;;  %560 = vst [vmem:[#allocation2 + $0xb8] sm:$0x1f] %v6966_v36 }
  0x7c   : > { %1529 = vmatpush.msra.mxu0 %v1084_v6  ;;  %1565 = vmatpush.msra.mxu2 %v1186_v7  ;;  %561 = vst [vmem:[#allocation2 + $0xc0] sm:$0xff] %v6966_v36  ;;  %v1089_v6 = vld [vmem:[#allocation6 + $0x300] sm:$0xff]  ;;  %v1015_v7 = vld [vmem:[#allocation6 + $0xb0] sm:$0xff] }
  0x7d   : > { %1585 = vmatpush.msra.mxu3 %v1187_v8  ;;  %1470 = vmatpush.msrb.mxu1 %v1056_v9  ;;  %562 = vst [vmem:[#allocation2 + $0xc8] sm:$0x1f] %v6966_v36  ;;  %v1016_v8 = vld [vmem:[#allocation6 + $0xb8] sm:$0xff] }
  0x7e   : > { %1530 = vmatpush.msra.mxu0 %v1059_v10  ;;  %1566 = vmatpush.msra.mxu2 %v1161_v11  ;;  %563 = vst [vmem:[#allocation3] sm:$0xff] %v6966_v36  ;;  %v1092_v9 = vld [vmem:[#allocation6 + $0x318] sm:$0xff]  ;;  %v1067_v11 = vld [vmem:[#allocation6 + $0x250] sm:$0xff] }
  0x7f   : > { %1586 = vmatpush.msra.mxu3 %v1162_v12  ;;  %1471 = vmatpush.msrb.mxu1 %v1031_v13  ;;  %564 = vst [vmem:[#allocation3 + $0x8] sm:$0xff] %v6966_v36  ;;  %v1064_v10 = vld [vmem:[#allocation6 + $0x238] sm:$0xff]  ;;  %v1039_v12 = vld [vmem:[#allocation6 + $0x170] sm:$0xff]  ;;  %v1042_v13 = vld [vmem:[#allocation6 + $0x188] sm:$0xff] }
  0x80   : > { %1531 = vmatpush.msra.mxu0 %v1034_v14  ;;  %1567 = vmatpush.msra.mxu2 %v1136_v15  ;;  %565 = vst [vmem:[#allocation3 + $0x10] sm:$0xff] %v6966_v36  ;;  %v1014_v14 = vld [vmem:[#allocation6 + $0xa8] sm:$0xff]  ;;  %v1017_v15 = vld [vmem:[#allocation6 + $0xc0] sm:$0xff] }
  0x81   : > { %1587 = vmatpush.msra.mxu3 %v1137_v16  ;;  %1472 = vmatpush.msrb.mxu1 %v1006_v17  ;;  %566 = vst [vmem:[#allocation3 + $0x18] sm:$0x7] %v6966_v36 }
  0x82   : > { %1532 = vmatpush.msra.mxu0 %v1009_v18  ;;  %6071 = vmatmul.msk.f32.vlgmr.msra.gmra.mxu1 %vm1193_vm0, %v7154_v45  ;;  %567 = vst [vmem:[#allocation3 + $0x20] sm:$0xff] %v6966_v36 }
  0x83   : > { %6074 = vmatmul.msk.f32.vlgmr.msrb.gmra.mxu0 %vm1193_vm0, %v7154_v45  ;;  %1545 = vmatpush.msra.mxu1 %v1185_v19  ;;  %568 = vst [vmem:[#allocation3 + $0x28] sm:$0xff] %v6966_v36 }
  0x84   : > { %1568 = vmatpush.msra.mxu2 %v1111_v20  ;;  %1588 = vmatpush.msra.mxu3 %v1112_v21  ;;  %569 = vst [vmem:[#allocation3 + $0x30] sm:$0xff] %v6966_v36 }
  0x85   : > { %1605 = vmatpush.msrb.mxu0 %v1188_v22  ;;  %1546 = vmatpush.msra.mxu1 %v1160_v23  ;;  %570 = vst [vmem:[#allocation3 + $0x38] sm:$0x7] %v6966_v36 }
  0x86   : > { %1569 = vmatpush.msra.mxu2 %v1086_v24  ;;  %1589 = vmatpush.msra.mxu3 %v1087_v25  ;;  %571 = vst [vmem:[#allocation3 + $0x40] sm:$0xff] %v6966_v36  ;;  %v7617_v24 = vld [vmem:[#allocation2] sm:$0xff] }
  0x87   : > { %1606 = vmatpush.msrb.mxu0 %v1163_v26  ;;  %1547 = vmatpush.msra.mxu1 %v1135_v27  ;;  %572 = vst [vmem:[#allocation3 + $0x48] sm:$0xff] %v6966_v36 }
  0x88   : > { %1570 = vmatpush.msra.mxu2 %v1061_v28  ;;  %1590 = vmatpush.msra.mxu3 %v1062_v29  ;;  %573 = vst [vmem:[#allocation3 + $0x50] sm:$0xff] %v6966_v36 }
  0x89   : > { %1607 = vmatpush.msrb.mxu0 %v1138_v30  ;;  %1548 = vmatpush.msra.mxu1 %v1110_v31  ;;  %574 = vst [vmem:[#allocation3 + $0x58] sm:$0x7] %v6966_v36 }
  0x8a   : > { %1571 = vmatpush.msra.mxu2 %v1036_v32  ;;  %1591 = vmatpush.msra.mxu3 %v1037_v33  ;;  %575 = vst [vmem:[#allocation3 + $0x60] sm:$0xff] %v6966_v36 }
  0x8b   : > { %1608 = vmatpush.msrb.mxu0 %v1113_v34  ;;  %6076 = vmatmul.msk.f32.vlgmr.msrb.gmra.mxu2 %vm1193_vm0, %v7154_v45  ;;  %576 = vst [vmem:[#allocation3 + $0x68] sm:$0xff] %v6966_v36  ;;  %v7640_v34 = vld [vmem:[#allocation14] sm:$0x1] }
  0x8c   : > { %6077 = vmatmul.msk.f32.vlgmr.msrb.gmra.mxu3 %vm1193_vm0, %v7154_v45  ;;  %1549 = vmatpush.msra.mxu1 %v1085_v35  ;;  %577 = vst [vmem:[#allocation3 + $0x70] sm:$0xff] %v6966_v36 }
  0x8d   : > { %1572 = vmatpush.msra.mxu2 %v1011_v37  ;;  %1592 = vmatpush.msra.mxu3 %v1012_v38  ;;  %578 = vst [vmem:[#allocation3 + $0x78] sm:$0x7] %v6966_v36 }
  0x8e   : > { %1609 = vmatpush.msrb.mxu0 %v1088_v39  ;;  %1550 = vmatpush.msra.mxu1 %v1060_v42  ;;  %579 = vst [vmem:[#allocation3 + $0x80] sm:$0xff] %v6966_v36 }
  0x8f   : > { %1645 = vmatpush.msrb.mxu2 %v1190_v40  ;;  %1665 = vmatpush.msrb.mxu3 %v1191_v41  ;;  %580 = vst [vmem:[#allocation3 + $0x88] sm:$0xff] %v6966_v36 }
  0x90   : > { %1610 = vmatpush.msrb.mxu0 %v1063_v43  ;;  %1551 = vmatpush.msra.mxu1 %v1035_v47  ;;  %581 = vst [vmem:[#allocation3 + $0x90] sm:$0xff] %v6966_v36 }
  0x91   : > { %1646 = vmatpush.msrb.mxu2 %v1165_v44  ;;  %1666 = vmatpush.msrb.mxu3 %v1166_v46  ;;  %582 = vst [vmem:[#allocation3 + $0x98] sm:$0x7] %v6966_v36 }
  0x92   : > { %1611 = vmatpush.msrb.mxu0 %v1038_v48  ;;  %6075 = vmatmul.msk.f32.vlgmr.msrb.gmra.mxu1 %vm1193_vm0, %v7154_v45  ;;  %583 = vst [vmem:[#allocation3 + $0xa0] sm:$0xff] %v6966_v36 }
  0x93   : > { %1647 = vmatpush.msrb.mxu2 %v1140_v49  ;;  %1667 = vmatpush.msrb.mxu3 %v1141_v50  ;;  %584 = vst [vmem:[#allocation3 + $0xa8] sm:$0xff] %v6966_v36 }
  0x94   : > { %6078 = vmatmul.msk.f32.vlgmr.msra.gmra.mxu0 %vm1193_vm0, %v7154_v45  ;;  %1552 = vmatpush.msra.mxu1 %v1010_v51  ;;  %585 = vst [vmem:[#allocation3 + $0xb0] sm:$0xff] %v6966_v36 }
  0x95   : > { %1612 = vmatpush.msrb.mxu0 %v1013_v52  ;;  %1648 = vmatpush.msrb.mxu2 %v1115_v54  ;;  %586 = vst [vmem:[#allocation3 + $0xb8] sm:$0x7] %v6966_v36 }
  0x96   : > { %1625 = vmatpush.msrb.mxu1 %v1189_v53  ;;  %1668 = vmatpush.msrb.mxu3 %v1116_v55  ;;  %587 = vst [vmem:[#allocation3 + $0xc0] sm:$0xff] %v6966_v36 }
  0x97   : > { %1685 = vmatpush.msra.mxu0 %v1192_v56  ;;  %6080 = vmatmul.msk.f32.vlgmr.msra.gmra.mxu2 %vm1193_vm0, %v7154_v45  ;;  %588 = vst [vmem:[#allocation3 + $0xc8] sm:$0xff] %v6966_v36 }
  0x98   : > { %6081 = vmatmul.msk.f32.vlgmr.msra.gmra.mxu3 %vm1193_vm0, %v7154_v45  ;;  %1626 = vmatpush.msrb.mxu1 %v1164_v57  ;;  %589 = vst [vmem:[#allocation3 + $0xd0] sm:$0xff] %v6966_v36 }
  0x99   : > { %1649 = vmatpush.msrb.mxu2 %v1090_v58  ;;  %1669 = vmatpush.msrb.mxu3 %v1091_v59  ;;  %590 = vst [vmem:[#allocation3 + $0xd8] sm:$0x7] %v6966_v36 }
  0x9a   : > { %1686 = vmatpush.msra.mxu0 %v1167_v60  ;;  %1627 = vmatpush.msrb.mxu1 %v1139_v61  ;;  %591 = vst [vmem:[#allocation3 + $0xe0] sm:$0xff] %v6966_v36 }
  0x9b   : > { %1650 = vmatpush.msrb.mxu2 %v1065_v62  ;;  %1670 = vmatpush.msrb.mxu3 %v1066_v63  ;;  %592 = vst [vmem:[#allocation3 + $0xe8] sm:$0xff] %v6966_v36 }
  0x9c   : > { %1687 = vmatpush.msra.mxu0 %v1142_v1  ;;  %1628 = vmatpush.msrb.mxu1 %v1114_v2  ;;  %593 = vst [vmem:[#allocation3 + $0xf0] sm:$0xff] %v6966_v36 }
  0x9d   : > { %1651 = vmatpush.msrb.mxu2 %v1040_v3  ;;  %1671 = vmatpush.msrb.mxu3 %v1041_v4  ;;  %594 = vst [vmem:[#allocation3 + $0xf8] sm:$0x7] %v6966_v36 }
  0x9e   : > { %1688 = vmatpush.msra.mxu0 %v1117_v5  ;;  %6079 = vmatmul.msk.f32.vlgmr.msra.gmra.mxu1 %vm1193_vm0, %v7154_v45  ;;  %595 = vst [vmem:[#allocation3 + $0x100] sm:$0xff] %v6966_v36 }
  0x9f   : > { %6082 = vmatmul.msk.f32.vlgmr.msrb.gmra.mxu0 %vm1193_vm0, %v7154_v45  ;;  %1629 = vmatpush.msrb.mxu1 %v1089_v6  ;;  %596 = vst [vmem:[#allocation3 + $0x108] sm:$0xff] %v6966_v36 }
  0xa0   : > { %1652 = vmatpush.msrb.mxu2 %v1015_v7  ;;  %1672 = vmatpush.msrb.mxu3 %v1016_v8  ;;  %597 = vst [vmem:[#allocation3 + $0x110] sm:$0xff] %v6966_v36 }
  0xa1   : > { %1689 = vmatpush.msra.mxu0 %v1092_v9  ;;  %6084 = vmatmul.msk.f32.vlgmr.msrb.gmra.mxu2 %vm1193_vm0, %v7154_v45  ;;  %598 = vst [vmem:[#allocation3 + $0x118] sm:$0x7] %v6966_v36 }
  0xa2   : > { %6085 = vmatmul.msk.f32.vlgmr.msrb.gmra.mxu3 %vm1193_vm0, %v7154_v45  ;;  %1630 = vmatpush.msrb.mxu1 %v1064_v10  ;;  %599 = vst [vmem:[#allocation3 + $0x120] sm:$0xff] %v6966_v36 }
  0xa3   : > { %1690 = vmatpush.msra.mxu0 %v1067_v11  ;;  %600 = vst [vmem:[#allocation3 + $0x128] sm:$0xff] %v6966_v36 }
  0xa4   : > { %1631 = vmatpush.msrb.mxu1 %v1039_v12  ;;  %601 = vst [vmem:[#allocation3 + $0x130] sm:$0xff] %v6966_v36 }
  0xa5   : > { %1691 = vmatpush.msra.mxu0 %v1042_v13  ;;  %602 = vst [vmem:[#allocation3 + $0x138] sm:$0x7] %v6966_v36 }
  0xa6   : > { %1632 = vmatpush.msrb.mxu1 %v1014_v14  ;;  %603 = vst [vmem:[#allocation3 + $0x140] sm:$0xff] %v6966_v36 }
  0xa7   : > { %1692 = vmatpush.msra.mxu0 %v1017_v15  ;;  %6083 = vmatmul.msk.f32.vlgmr.msrb.gmra.mxu1 %vm1193_vm0, %v7154_v45  ;;  %604 = vst [vmem:[#allocation3 + $0x148] sm:$0xff] %v6966_v36 }
  0xa8   : > { %6086 = vmatmul.msk.f32.vlgmr.msra.gmra.mxu0 %vm1193_vm0, %v7154_v45  ;;  %605 = vst [vmem:[#allocation3 + $0x150] sm:$0xff] %v6966_v36  ;;  %v979_v45 = vlaneseq }
  0xa9   : > { %606 = vst [vmem:[#allocation3 + $0x158] sm:$0x7] %v6966_v36 }
  0xaa   : > { %607 = vst [vmem:[#allocation3 + $0x160] sm:$0xff] %v6966_v36  ;;  %v980_v16 = vshrl.u32 %v979_v45, 7  ;;  %v984_v17 = vand.u32 127, %v979_v45 }
  0xab   : > { %608 = vst [vmem:[#allocation3 + $0x168] sm:$0xff] %v6966_v36 }
  0xac   : > { %609 = vst [vmem:[#allocation3 + $0x170] sm:$0xff] %v6966_v36  ;;  %v981_v18 = vadd.s32 8, %v980_v16  ;;  %v982_v19 = vadd.s32 16, %v980_v16  ;;  %v985_v20 = vmul.u32 2, %v984_v17 }
  0xad   : > { %610 = vst [vmem:[#allocation3 + $0x178] sm:$0x7] %v6966_v36 }
  0xae   : > { %611 = vst [vmem:[#allocation3 + $0x180] sm:$0xff] %v6966_v36  ;;  %vm986_vm1 = vcmp.eq.s32.totalorder %v980_v16, %v985_v20  ;;  %vm987_vm2 = vcmp.eq.s32.totalorder %v981_v18, %v985_v20  ;;  %vm988_vm3 = vcmp.eq.s32.totalorder %v982_v19, %v985_v20 }
  0xaf   : > { %612 = vst [vmem:[#allocation3 + $0x188] sm:$0xff] %v6966_v36  ;;  %v7608_v21 = vsel %vm986_vm1, 1.0, %v6966_v36  ;;  %v7611_v22 = vsel %vm987_vm2, 1.0, %v6966_v36  ;;  %v7614_v23 = vsel %vm988_vm3, 1.0, %v6966_v36 }
  0xb0   : > { %613 = vst [vmem:[#allocation3 + $0x190] sm:$0xff] %v6966_v36 }
  0xb1   : > { %614 = vst [vmem:[#allocation3 + $0x198] sm:$0x7] %v6966_v36 }
  0xb2   : > { %615 = vst [vmem:[#allocation3 + $0x1a0] sm:$0xff] %v6966_v36 }
  0xb3   : > { %616 = vst [vmem:[#allocation3 + $0x1a8] sm:$0xff] %v6966_v36 }
  0xb4   : > { %617 = vst [vmem:[#allocation3 + $0x1b0] sm:$0xff] %v6966_v36 }
  0xb5   : > { %618 = vst [vmem:[#allocation3 + $0x1b8] sm:$0x7] %v6966_v36 }
  0xb6   : > { %619 = vst [vmem:[#allocation3 + $0x1c0] sm:$0xff] %v6966_v36 }
  0xb7   : > { %620 = vst [vmem:[#allocation3 + $0x1c8] sm:$0xff] %v6966_v36 }
  0xb8   : > { %621 = vst [vmem:[#allocation3 + $0x1d0] sm:$0xff] %v6966_v36 }
  0xb9   : > { %622 = vst [vmem:[#allocation3 + $0x1d8] sm:$0x7] %v6966_v36 }
  0xba   : > { %623 = vst [vmem:[#allocation3 + $0x1e0] sm:$0xff] %v6966_v36 }
  0xbb   : > { %624 = vst [vmem:[#allocation3 + $0x1e8] sm:$0xff] %v6966_v36 }
  0xbc   : > { %625 = vst [vmem:[#allocation3 + $0x1f0] sm:$0xff] %v6966_v36 }
  0xbd   : > { %626 = vst [vmem:[#allocation3 + $0x1f8] sm:$0x7] %v6966_v36 }
  0xbe   : > { %627 = vst [vmem:[#allocation3 + $0x200] sm:$0xff] %v6966_v36 }
  0xbf   : > { %628 = vst [vmem:[#allocation3 + $0x208] sm:$0xff] %v6966_v36 }
  0xc0   : > { %629 = vst [vmem:[#allocation3 + $0x210] sm:$0xff] %v6966_v36 }
  0xc1   : > { %630 = vst [vmem:[#allocation3 + $0x218] sm:$0x7] %v6966_v36 }
  0xc2   : > { %631 = vst [vmem:[#allocation3 + $0x220] sm:$0xff] %v6966_v36 }
  0xc3   : > { %632 = vst [vmem:[#allocation3 + $0x228] sm:$0xff] %v6966_v36 }
  0xc4   : > { %633 = vst [vmem:[#allocation3 + $0x230] sm:$0xff] %v6966_v36 }
  0xc5   : > { %634 = vst [vmem:[#allocation3 + $0x238] sm:$0x7] %v6966_v36 }
  0xc6   : > { %635 = vst [vmem:[#allocation3 + $0x240] sm:$0xff] %v6966_v36 }
  0xc7   : > { %636 = vst [vmem:[#allocation3 + $0x248] sm:$0xff] %v6966_v36 }
  0xc8   : > { %637 = vst [vmem:[#allocation3 + $0x250] sm:$0xff] %v6966_v36  ;;  %v1214_v25 = vpop.f32.mrf.mxu0 }
  0xc9   : > { %638 = vst [vmem:[#allocation3 + $0x258] sm:$0x7] %v6966_v36  ;;  %v1698_v35 = vadd.f32 %v7640_v34, %v1214_v25 }
  0xca   : > { %639 = vst [vmem:[#allocation3 + $0x260] sm:$0xff] %v6966_v36 }
  0xcb   : > { %640 = vst [vmem:[#allocation3 + $0x268] sm:$0xff] %v6966_v36  ;;  %v1699_v40 = vmax.f32 %v1698_v35, 0.0 }
  0xcc   : > { %641 = vst [vmem:[#allocation3 + $0x270] sm:$0xff] %v6966_v36 }
  0xcd   : > { %642 = vst [vmem:[#allocation3 + $0x278] sm:$0x7] %v6966_v36 }
  0xce   : > { %643 = vst [vmem:[#allocation3 + $0x280] sm:$0xff] %v6966_v36 }
  0xcf   : > { %644 = vst [vmem:[#allocation3 + $0x288] sm:$0xff] %v6966_v36 }
  0xd0   : > { %645 = vst [vmem:[#allocation3 + $0x290] sm:$0xff] %v6966_v36 }
  0xd1   : > { %646 = vst [vmem:[#allocation3 + $0x298] sm:$0x7] %v6966_v36 }
  0xd2   : > { %647 = vst [vmem:[#allocation3 + $0x2a0] sm:$0xff] %v6966_v36 }
  0xd3   : > { %648 = vst [vmem:[#allocation3 + $0x2a8] sm:$0xff] %v6966_v36 }
  0xd4   : > { %649 = vst [vmem:[#allocation3 + $0x2b0] sm:$0xff] %v6966_v36 }
  0xd5   : > { %650 = vst [vmem:[#allocation3 + $0x2b8] sm:$0x7] %v6966_v36 }
  0xd6   : > { %651 = vst [vmem:[#allocation3 + $0x2c0] sm:$0xff] %v6966_v36 }
  0xd7   : > { %652 = vst [vmem:[#allocation3 + $0x2c8] sm:$0xff] %v6966_v36 }
  0xd8   : > { %653 = vst [vmem:[#allocation3 + $0x2d0] sm:$0xff] %v6966_v36  ;;  %v1254_v27 = vpop.f32.mrf.mxu2 }
  0xd9   : > { %654 = vst [vmem:[#allocation3 + $0x2d8] sm:$0x7] %v6966_v36  ;;  %v1274_v28 = vpop.f32.mrf.mxu3  ;;  %v1705_v46 = vadd.f32 %v7640_v34, %v1254_v27 }
  0xda   : > { %655 = vst [vmem:[#allocation3 + $0x2e0] sm:$0xff] %v6966_v36  ;;  %v1234_v26 = vpop.f32.mrf.mxu1  ;;  %v1294_v29 = vpop.f32.mrf.mxu0  ;;  %v1708_v48 = vadd.f32 %v7640_v34, %v1274_v28 }
  0xdb   : > { %656 = vst [vmem:[#allocation3 + $0x2e8] sm:$0xff] %v6966_v36  ;;  %v1702_v42 = vadd.f32 %v7640_v34, %v1234_v26  ;;  %v1711_v49 = vadd.f32 %v7640_v34, %v1294_v29  ;;  %v1706_v52 = vmax.f32 %v1705_v46, 0.0 }
  0xdc   : > { %657 = vst [vmem:[#allocation3 + $0x2f0] sm:$0xff] %v6966_v36  ;;  %v1709_v54 = vmax.f32 %v1708_v48, 0.0 }
  0xdd   : > { %658 = vst [vmem:[#allocation3 + $0x2f8] sm:$0x7] %v6966_v36  ;;  %v1703_v50 = vmax.f32 %v1702_v42, 0.0  ;;  %v1712_v56 = vmax.f32 %v1711_v49, 0.0 }
  0xde   : > { %659 = vst [vmem:[#allocation3 + $0x300] sm:$0xff] %v6966_v36 }
  0xdf   : > { %660 = vst [vmem:[#allocation3 + $0x308] sm:$0xff] %v6966_v36 }
  0xe0   : > { %661 = vst [vmem:[#allocation3 + $0x310] sm:$0xff] %v6966_v36 }
  0xe1   : > { %662 = vst [vmem:[#allocation3 + $0x318] sm:$0x7] %v6966_v36 }
  0xe2   : > { %663 = vst [vmem:[#allocation3 + $0x320] sm:$0xff] %v6966_v36 }
  0xe3   : > { %664 = vst [vmem:[#allocation3 + $0x328] sm:$0xff] %v6966_v36 }
  0xe4   : > { %665 = vst [vmem:[#allocation3 + $0x330] sm:$0xff] %v6966_v36 }
  0xe5   : > { %666 = vst [vmem:[#allocation3 + $0x338] sm:$0x7] %v6966_v36 }
  0xe6   : > { %667 = vst [vmem:[#allocation3 + $0x340] sm:$0xff] %v6966_v36 }
  0xe7   : > { %668 = vst [vmem:[#allocation3 + $0x348] sm:$0xff] %v6966_v36 }
  0xe8   : > { %669 = vst [vmem:[#allocation3 + $0x350] sm:$0xff] %v6966_v36 }
  0xe9   : > { %670 = vst [vmem:[#allocation3 + $0x358] sm:$0x7] %v6966_v36 }
  0xea   : > { %671 = vst [vmem:[#allocation4] sm:$0xff] %v6966_v36 }
  0xeb   : > { %672 = vst [vmem:[#allocation4 + $0x8] sm:$0xff] %v6966_v36  ;;  %v1334_v31 = vpop.f32.mrf.mxu2 }
  0xec   : > { %673 = vst [vmem:[#allocation4 + $0x10] sm:$0xff] %v6966_v36  ;;  %v1354_v32 = vpop.f32.mrf.mxu3  ;;  %v1374_v33 = vpop.f32.mrf.mxu0  ;;  %v1718_v53 = vadd.f32 %v7640_v34, %v1334_v31 }
  0xed   : > { %674 = vst [vmem:[#allocation4 + $0x18] sm:$0xff] %v6966_v36  ;;  %v1314_v30 = vpop.f32.mrf.mxu1  ;;  %v1721_v55 = vadd.f32 %v7640_v34, %v1354_v32  ;;  %v1724_v57 = vadd.f32 %v7640_v34, %v1374_v33 }
  0xee   : > { %675 = vst [vmem:[#allocation4 + $0x20] sm:$0xff] %v6966_v36  ;;  %v1714_v51 = vadd.f32 %v7640_v34, %v1314_v30  ;;  %v1719_v62 = vmax.f32 %v1718_v53, 0.0 }
  0xef   : > { %676 = vst [vmem:[#allocation4 + $0x28] sm:$0xff] %v6966_v36  ;;  %v1722_v2 = vmax.f32 %v1721_v55, 0.0  ;;  %v1725_v5 = vmax.f32 %v1724_v57, 0.0 }
  0xf0   : > { %677 = vst [vmem:[#allocation4 + $0x30] sm:$0xff] %v6966_v36  ;;  %v1715_v59 = vmax.f32 %v1714_v51, 0.0 }
  0xf1   : > { %678 = vst [vmem:[#allocation4 + $0x38] sm:$0xff] %v6966_v36 }
  0xf2   : > { %679 = vst [vmem:[#allocation4 + $0x40] sm:$0xff] %v6966_v36 }
  0xf3   : > { %680 = vst [vmem:[#allocation4 + $0x48] sm:$0xff] %v6966_v36 }
  0xf4   : > { %681 = vst [vmem:[#allocation4 + $0x50] sm:$0xff] %v6966_v36 }
  0xf5   : > { %682 = vst [vmem:[#allocation4 + $0x58] sm:$0xff] %v6966_v36 }
  0xf6   : > { %683 = vst [vmem:[#allocation4 + $0x60] sm:$0xff] %v6966_v36 }
  0xf7   : > { %684 = vst [vmem:[#allocation4 + $0x68] sm:$0xff] %v6966_v36 }
  0xf8   : > { %685 = vst [vmem:[#allocation4 + $0x70] sm:$0xff] %v6966_v36 }
  0xf9   : > { %686 = vst [vmem:[#allocation4 + $0x78] sm:$0xff] %v6966_v36 }
  0xfa   : > { %687 = vst [vmem:[#allocation4 + $0x80] sm:$0xff] %v6966_v36 }
  0xfb   : > { %688 = vst [vmem:[#allocation4 + $0x88] sm:$0xff] %v6966_v36 }
  0xfc   : > { %689 = vst [vmem:[#allocation4 + $0x90] sm:$0xff] %v6966_v36 }
  0xfd   : > { %690 = vst [vmem:[#allocation4 + $0x98] sm:$0xff] %v6966_v36 }
  0xfe   : > { %691 = vst [vmem:[#allocation4 + $0xa0] sm:$0xff] %v6966_v36  ;;  %v1414_v37 = vpop.f32.mrf.mxu2  ;;  %v1434_v38 = vpop.f32.mrf.mxu3 }
  0xff   : > { %692 = vst [vmem:[#allocation4 + $0xa8] sm:$0xff] %v6966_v36  ;;  %v1730_v63 = vadd.f32 %v7640_v34, %v1414_v37  ;;  %v1734_v3 = vadd.f32 %v7640_v34, %v1434_v38 }
 0x100   : > { %693 = vst [vmem:[#allocation4 + $0xb0] sm:$0xff] %v6966_v36  ;;  %v1454_v39 = vpop.f32.mrf.mxu0 }
 0x101   : > { %694 = vst [vmem:[#allocation4 + $0xb8] sm:$0xff] %v6966_v36  ;;  %v1737_v6 = vadd.f32 %v7640_v34, %v1454_v39  ;;  %v1731_v9 = vmax.f32 %v1730_v63, 0.0  ;;  %v1735_v11 = vmax.f32 %v1734_v3, 0.0 }
 0x102   : > { %695 = vst [vmem:[#allocation4 + $0xc0] sm:$0xff] %v6966_v36 }
 0x103   : > { %696 = vst [vmem:[#allocation4 + $0xc8] sm:$0xff] %v6966_v36  ;;  %v1738_v13 = vmax.f32 %v1737_v6, 0.0 }
 0x104   : > { %697 = vst [vmem:[#allocation4 + $0xd0] sm:$0xff] %v6966_v36 }
 0x105   : > { %698 = vst [vmem:[#allocation4 + $0xd8] sm:$0xff] %v6966_v36 }
 0x106   : > { %699 = vst [vmem:[#allocation4 + $0xe0] sm:$0xff] %v6966_v36 }
 0x107   : > { %700 = vst [vmem:[#allocation4 + $0xe8] sm:$0xff] %v6966_v36 }
 0x108   : > { %701 = vst [vmem:[#allocation4 + $0xf0] sm:$0xff] %v6966_v36 }
 0x109   : > { %702 = vst [vmem:[#allocation4 + $0xf8] sm:$0xff] %v6966_v36 }
 0x10a   : > { %703 = vst [vmem:[#allocation4 + $0x100] sm:$0xff] %v6966_v36 }
 0x10b   : > { %704 = vst [vmem:[#allocation4 + $0x108] sm:$0xff] %v6966_v36 }
 0x10c   : > { %705 = vst [vmem:[#allocation4 + $0x110] sm:$0xff] %v6966_v36 }
 0x10d   : > { %706 = vst [vmem:[#allocation4 + $0x118] sm:$0xff] %v6966_v36 }
 0x10e   : > { %707 = vst [vmem:[#allocation4 + $0x120] sm:$0xff] %v6966_v36  ;;  %v1494_v43 = vpop.f32.mrf.mxu2 }
 0x10f   : > { %708 = vst [vmem:[#allocation4 + $0x128] sm:$0xff] %v6966_v36  ;;  %v1514_v44 = vpop.f32.mrf.mxu3  ;;  %v1743_v10 = vadd.f32 %v7640_v34, %v1494_v43 }
 0x110   : > { %709 = vst [vmem:[#allocation4 + $0x130] sm:$0xff] %v6966_v36  ;;  %v1746_v12 = vadd.f32 %v7640_v34, %v1514_v44 }
 0x111   : > { %710 = vst [vmem:[#allocation4 + $0x138] sm:$0xff] %v6966_v36  ;;  %v1534_v47 = vpop.f32.mrf.mxu0  ;;  %v1744_v16 = vmax.f32 %v1743_v10, 0.0 }
 0x112   : > { %711 = vst [vmem:[#allocation4 + $0x140] sm:$0xff] %v6966_v36  ;;  %v1750_v14 = vadd.f32 %v7640_v34, %v1534_v47  ;;  %v1747_v19 = vmax.f32 %v1746_v12, 0.0 }
 0x113   : > { %712 = vst [vmem:[#allocation4 + $0x148] sm:$0xff] %v6966_v36 }
 0x114   : > { %713 = vst [vmem:[#allocation4 + $0x150] sm:$0xff] %v6966_v36  ;;  %v1751_v25 = vmax.f32 %v1750_v14, 0.0 }
 0x115   : > { %714 = vst [vmem:[#allocation4 + $0x158] sm:$0xff] %v6966_v36 }
 0x116   : > { %715 = vst [vmem:[#allocation4 + $0x160] sm:$0xff] %v6966_v36 }
 0x117   : > { %716 = vst [vmem:[#allocation4 + $0x168] sm:$0xff] %v6966_v36 }
 0x118   : > { %717 = vst [vmem:[#allocation4 + $0x170] sm:$0xff] %v6966_v36 }
 0x119   : > { %718 = vst [vmem:[#allocation4 + $0x178] sm:$0xff] %v6966_v36 }
 0x11a   : > { %719 = vst [vmem:[#allocation4 + $0x180] sm:$0xff] %v6966_v36  ;;  %v1574_v61 = vpop.f32.mrf.mxu2 }
 0x11b   : > { %720 = vst [vmem:[#allocation4 + $0x188] sm:$0xff] %v6966_v36  ;;  %v1594_v1 = vpop.f32.mrf.mxu3  ;;  %v1756_v17 = vadd.f32 %v7640_v34, %v1574_v61 }
 0x11c   : > { %721 = vst [vmem:[#allocation4 + $0x190] sm:$0xff] %v6966_v36  ;;  %v1614_v4 = vpop.f32.mrf.mxu0  ;;  %v1759_v20 = vadd.f32 %v7640_v34, %v1594_v1 }
 0x11d   : > { %722 = vst [vmem:[#allocation4 + $0x198] sm:$0xff] %v6966_v36  ;;  %v1762_v26 = vadd.f32 %v7640_v34, %v1614_v4  ;;  %v1757_v31 = vmax.f32 %v1756_v17, 0.0 }
 0x11e   : > { %723 = vst [vmem:[#allocation4 + $0x1a0] sm:$0xff] %v6966_v36  ;;  %v1760_v33 = vmax.f32 %v1759_v20, 0.0 }
 0x11f   : > { %724 = vst [vmem:[#allocation4 + $0x1a8] sm:$0xff] %v6966_v36 }
 0x120   : > { %725 = vst [vmem:[#allocation4 + $0x1b0] sm:$0xff] %v6966_v36 }
 0x121   : > { %726 = vst [vmem:[#allocation4 + $0x1b8] sm:$0xff] %v6966_v36 }
 0x122   : > { %727 = vst [vmem:[#allocation4 + $0x1c0] sm:$0xff] %v6966_v36 }
 0x123   : > { %728 = vst [vmem:[#allocation4 + $0x1c8] sm:$0xff] %v6966_v36 }
 0x124   : > { %729 = vst [vmem:[#allocation4 + $0x1d0] sm:$0xff] %v6966_v36 }
 0x125   : > { %730 = vst [vmem:[#allocation4 + $0x1d8] sm:$0xff] %v6966_v36  ;;  %v1674_v27 = vpop.f32.mrf.mxu3  ;;  %v1694_v30 = vpop.f32.mrf.mxu0 }
 0x126   : > { %731 = vst [vmem:[#allocation4 + $0x1e0] sm:$0xff] %v6966_v36  ;;  %v1772_v35 = vadd.f32 %v7640_v34, %v1674_v27  ;;  %v1775_v37 = vadd.f32 %v7640_v34, %v1694_v30 }
 0x127   : > { %732 = vst [vmem:[#allocation4 + $0x1e8] sm:$0xff] %v6966_v36 }
 0x128   : > { %733 = vst [vmem:[#allocation4 + $0x1f0] sm:$0xff] %v6966_v36 }
 0x129   : > { %734 = vst [vmem:[#allocation4 + $0x1f8] sm:$0xff] %v6966_v36 }
 0x12a   : > { %735 = vst [vmem:[#allocation4 + $0x200] sm:$0xff] %v6966_v36 }
 0x12b   : > { %736 = vst [vmem:[#allocation4 + $0x208] sm:$0xff] %v6966_v36 }
 0x12c   : > { %737 = vst [vmem:[#allocation4 + $0x210] sm:$0xff] %v6966_v36 }
 0x12d   : > { %738 = vst [vmem:[#allocation4 + $0x218] sm:$0xff] %v6966_v36 }
 0x12e   : > { %739 = vst [vmem:[#allocation4 + $0x220] sm:$0xff] %v6966_v36 }
 0x12f   : > { %740 = vst [vmem:[#allocation4 + $0x228] sm:$0xff] %v6966_v36 }
 0x130   : > { %741 = vst [vmem:[#allocation4 + $0x230] sm:$0xff] %v6966_v36 }
 0x131   : > { %742 = vst [vmem:[#allocation4 + $0x238] sm:$0xff] %v6966_v36 }
 0x132   : > { %743 = vst [vmem:[#allocation4 + $0x240] sm:$0xff] %v6966_v36 }
 0x133   : > { %744 = vst [vmem:[#allocation4 + $0x248] sm:$0xff] %v6966_v36 }
 0x134   : > { %745 = vst [vmem:[#allocation4 + $0x250] sm:$0xff] %v6966_v36 }
 0x135   : > { %746 = vst [vmem:[#allocation4 + $0x258] sm:$0xff] %v6966_v36 }
 0x136   : > { %747 = vst [vmem:[#allocation4 + $0x260] sm:$0xff] %v6966_v36 }
 0x137   : > { %748 = vst [vmem:[#allocation4 + $0x268] sm:$0xff] %v6966_v36 }
 0x138   : > { %749 = vst [vmem:[#allocation4 + $0x270] sm:$0xff] %v6966_v36 }
 0x139   : > { %750 = vst [vmem:[#allocation4 + $0x278] sm:$0xff] %v6966_v36 }
 0x13a   : > { %751 = vst [vmem:[#allocation4 + $0x280] sm:$0xff] %v6966_v36 }
 0x13b   : > { %752 = vst [vmem:[#allocation4 + $0x288] sm:$0xff] %v6966_v36 }
 0x13c   : > { %753 = vst [vmem:[#allocation4 + $0x290] sm:$0xff] %v6966_v36 }
 0x13d   : > { %754 = vst [vmem:[#allocation4 + $0x298] sm:$0xff] %v6966_v36 }
 0x13e   : > { %755 = vst [vmem:[#allocation4 + $0x2a0] sm:$0xff] %v6966_v36 }
 0x13f   : > { %756 = vst [vmem:[#allocation4 + $0x2a8] sm:$0xff] %v6966_v36 }
 0x140   : > { %757 = vst [vmem:[#allocation4 + $0x2b0] sm:$0xff] %v6966_v36 }
 0x141   : > { %758 = vst [vmem:[#allocation4 + $0x2b8] sm:$0xff] %v6966_v36 }
 0x142   : > { %759 = vst [vmem:[#allocation4 + $0x2c0] sm:$0xff] %v6966_v36 }
 0x143   : > { %760 = vst [vmem:[#allocation4 + $0x2c8] sm:$0xff] %v6966_v36 }
 0x144   : > { %761 = vst [vmem:[#allocation4 + $0x2d0] sm:$0xff] %v6966_v36 }
 0x145   : > { %762 = vst [vmem:[#allocation4 + $0x2d8] sm:$0xff] %v6966_v36 }
 0x146   : > { %763 = vst [vmem:[#allocation4 + $0x2e0] sm:$0xff] %v6966_v36 }
 0x147   : > { %764 = vst [vmem:[#allocation4 + $0x2e8] sm:$0xff] %v6966_v36 }
 0x148   : > { %765 = vst [vmem:[#allocation4 + $0x2f0] sm:$0xff] %v6966_v36 }
 0x149   : > { %766 = vst [vmem:[#allocation4 + $0x2f8] sm:$0xff] %v6966_v36 }
 0x14a   : > { %767 = vst [vmem:[#allocation4 + $0x300] sm:$0xff] %v6966_v36 }
 0x14b   : > { %768 = vst [vmem:[#allocation4 + $0x308] sm:$0xff] %v6966_v36 }
 0x14c   : > { %769 = vst [vmem:[#allocation4 + $0x310] sm:$0xff] %v6966_v36 }
 0x14d   : > { %770 = vst [vmem:[#allocation4 + $0x318] sm:$0xff] %v6966_v36 }
 0x14e   : > { %771 = vst [vmem:[#allocation4 + $0x320] sm:$0xff] %v6966_v36 }
 0x14f   : > { %772 = vst [vmem:[#allocation4 + $0x328] sm:$0xff] %v6966_v36 }
 0x150   : > { %773 = vst [vmem:[#allocation4 + $0x330] sm:$0xff] %v6966_v36 }
 0x151   : > { %774 = vst [vmem:[#allocation4 + $0x338] sm:$0xff] %v6966_v36 }
 0x152   : > { %775 = vst [vmem:[#allocation4 + $0x340] sm:$0xff] %v6966_v36 }
 0x153   : > { %776 = vst [vmem:[#allocation4 + $0x348] sm:$0xff] %v6966_v36 }
 0x154   : > { %777 = vst [vmem:[#allocation4 + $0x350] sm:$0xff] %v6966_v36 }
 0x155   : > { %778 = vst [vmem:[#allocation4 + $0x358] sm:$0xff] %v6966_v36 }
 0x156   : > { %779 = vst [vmem:[#allocation4 + $0x360] sm:$0xff] %v6966_v36 }
 0x157   : > { %780 = vst [vmem:[#allocation4 + $0x368] sm:$0xff] %v6966_v36 }
 0x158   : > { %781 = vst [vmem:[#allocation4 + $0x370] sm:$0xff] %v6966_v36 }
 0x159   : > { %782 = vst [vmem:[#allocation4 + $0x378] sm:$0xff] %v6966_v36 }
 0x15a   : > { %783 = vst [vmem:[#allocation4 + $0x380] sm:$0xff] %v6966_v36 }
 0x15b   : > { %784 = vst [vmem:[#allocation4 + $0x388] sm:$0xff] %v6966_v36 }
 0x15c   : > { %785 = vst [vmem:[#allocation4 + $0x390] sm:$0xff] %v6966_v36 }
 0x15d   : > { %786 = vst [vmem:[#allocation4 + $0x398] sm:$0xff] %v6966_v36 }
 0x15e   : > { %787 = vst [vmem:[#allocation4 + $0x3a0] sm:$0xff] %v6966_v36 }
 0x15f   : > { %788 = vst [vmem:[#allocation4 + $0x3a8] sm:$0xff] %v6966_v36 }
 0x160   : > { %789 = vst [vmem:[#allocation4 + $0x3b0] sm:$0xff] %v6966_v36 }
 0x161   : > { %790 = vst [vmem:[#allocation4 + $0x3b8] sm:$0xff] %v6966_v36 }
 0x162   : > { %791 = vst [vmem:[#allocation4 + $0x3c0] sm:$0xff] %v6966_v36 }
 0x163   : > { %792 = vst [vmem:[#allocation4 + $0x3c8] sm:$0xff] %v6966_v36 }
 0x164   : > { %793 = vst [vmem:[#allocation4 + $0x3d0] sm:$0xff] %v6966_v36 }
 0x165   : > { %794 = vst [vmem:[#allocation4 + $0x3d8] sm:$0xff] %v6966_v36 }
 0x166   : > { %795 = vst [vmem:[#allocation4 + $0x3e0] sm:$0xff] %v6966_v36 }
 0x167   : > { %796 = vst [vmem:[#allocation4 + $0x3e8] sm:$0xff] %v6966_v36 }
 0x168   : > { %797 = vst [vmem:[#allocation4 + $0x3f0] sm:$0xff] %v6966_v36 }
 0x169   : > { %798 = vst [vmem:[#allocation4 + $0x3f8] sm:$0xff] %v6966_v36 }
 0x16a   : > { %799 = vst [vmem:[#allocation5] sm:$0xff] %v6966_v36 }
 0x16b   : > { %800 = vst [vmem:[#allocation5 + $0x8] sm:$0xff] %v6966_v36 }
 0x16c   : > { %801 = vst [vmem:[#allocation5 + $0x10] sm:$0xff] %v6966_v36 }
 0x16d   : > { %802 = vst [vmem:[#allocation5 + $0x18] sm:$0xff] %v6966_v36 }
 0x16e   : > { %803 = vst [vmem:[#allocation5 + $0x20] sm:$0xf] %v6966_v36 }
 0x16f   : > { %804 = vst [vmem:[#allocation5 + $0x28] sm:$0xff] %v6966_v36 }
 0x170   : > { %805 = vst [vmem:[#allocation5 + $0x30] sm:$0xff] %v6966_v36 }
 0x171   : > { %806 = vst [vmem:[#allocation5 + $0x38] sm:$0xff] %v6966_v36 }
 0x172   : > { %807 = vst [vmem:[#allocation5 + $0x40] sm:$0xff] %v6966_v36 }
 0x173   : > { %808 = vst [vmem:[#allocation5 + $0x48] sm:$0xf] %v6966_v36 }
 0x174   : > { %809 = vst [vmem:[#allocation5 + $0x50] sm:$0xff] %v6966_v36 }
 0x175   : > { %810 = vst [vmem:[#allocation5 + $0x58] sm:$0xff] %v6966_v36 }
 0x176   : > { %811 = vst [vmem:[#allocation5 + $0x60] sm:$0xff] %v6966_v36 }
 0x177   : > { %812 = vst [vmem:[#allocation5 + $0x68] sm:$0xff] %v6966_v36 }
 0x178   : > { %813 = vst [vmem:[#allocation5 + $0x70] sm:$0xf] %v6966_v36 }
 0x179   : > { %814 = vst [vmem:[#allocation5 + $0x78] sm:$0xff] %v6966_v36 }
 0x17a   : > { %815 = vst [vmem:[#allocation5 + $0x80] sm:$0xff] %v6966_v36 }
 0x17b   : > { %816 = vst [vmem:[#allocation5 + $0x88] sm:$0xff] %v6966_v36 }
 0x17c   : > { %817 = vst [vmem:[#allocation5 + $0x90] sm:$0xff] %v6966_v36 }
 0x17d   : > { %818 = vst [vmem:[#allocation5 + $0x98] sm:$0xf] %v6966_v36 }
 0x17e   : > { %819 = vst [vmem:[#allocation5 + $0xa0] sm:$0xff] %v6966_v36 }
 0x17f   : > { %820 = vst [vmem:[#allocation5 + $0xa8] sm:$0xff] %v6966_v36 }
 0x180   : > { %821 = vst [vmem:[#allocation5 + $0xb0] sm:$0xff] %v6966_v36 }
 0x181   : > { %822 = vst [vmem:[#allocation5 + $0xb8] sm:$0xff] %v6966_v36 }
 0x182   : > { %823 = vst [vmem:[#allocation5 + $0xc0] sm:$0xf] %v6966_v36 }
 0x183   : > { %824 = vst [vmem:[#allocation5 + $0xc8] sm:$0xff] %v6966_v36 }
 0x184   : > { %825 = vst [vmem:[#allocation5 + $0xd0] sm:$0xff] %v6966_v36 }
 0x185   : > { %826 = vst [vmem:[#allocation5 + $0xd8] sm:$0xff] %v6966_v36 }
 0x186   : > { %827 = vst [vmem:[#allocation5 + $0xe0] sm:$0xff] %v6966_v36 }
 0x187   : > { %828 = vst [vmem:[#allocation5 + $0xe8] sm:$0xf] %v6966_v36 }
 0x188   : > { %829 = vst [vmem:[#allocation5 + $0xf0] sm:$0xff] %v6966_v36 }
 0x189   : > { %830 = vst [vmem:[#allocation5 + $0xf8] sm:$0xff] %v6966_v36 }
 0x18a   : > { %831 = vst [vmem:[#allocation5 + $0x100] sm:$0xff] %v6966_v36 }
 0x18b   : > { %832 = vst [vmem:[#allocation5 + $0x108] sm:$0xff] %v6966_v36 }
 0x18c   : > { %833 = vst [vmem:[#allocation5 + $0x110] sm:$0xf] %v6966_v36 }
 0x18d   : > { %834 = vst [vmem:[#allocation5 + $0x118] sm:$0xff] %v6966_v36 }
 0x18e   : > { %835 = vst [vmem:[#allocation5 + $0x120] sm:$0xff] %v6966_v36 }
 0x18f   : > { %836 = vst [vmem:[#allocation5 + $0x128] sm:$0xff] %v6966_v36 }
 0x190   : > { %837 = vst [vmem:[#allocation5 + $0x130] sm:$0xff] %v6966_v36 }
 0x191   : > { %838 = vst [vmem:[#allocation5 + $0x138] sm:$0xf] %v6966_v36 }
 0x192   : > { %839 = vst [vmem:[#allocation5 + $0x140] sm:$0xff] %v6966_v36 }
 0x193   : > { %840 = vst [vmem:[#allocation5 + $0x148] sm:$0xff] %v6966_v36 }
 0x194   : > { %841 = vst [vmem:[#allocation5 + $0x150] sm:$0xff] %v6966_v36 }
 0x195   : > { %842 = vst [vmem:[#allocation5 + $0x158] sm:$0xff] %v6966_v36 }
 0x196   : > { %843 = vst [vmem:[#allocation5 + $0x160] sm:$0xf] %v6966_v36 }
 0x197   : > { %844 = vst [vmem:[#allocation5 + $0x168] sm:$0xff] %v6966_v36 }
 0x198   : > { %845 = vst [vmem:[#allocation5 + $0x170] sm:$0xff] %v6966_v36 }
 0x199   : > { %846 = vst [vmem:[#allocation5 + $0x178] sm:$0xff] %v6966_v36 }
 0x19a   : > { %847 = vst [vmem:[#allocation5 + $0x180] sm:$0xff] %v6966_v36 }
 0x19b   : > { %848 = vst [vmem:[#allocation5 + $0x188] sm:$0xf] %v6966_v36 }
 0x19c   : > { %849 = vst [vmem:[#allocation5 + $0x190] sm:$0xff] %v6966_v36 }
 0x19d   : > { %850 = vst [vmem:[#allocation5 + $0x198] sm:$0xff] %v6966_v36 }
 0x19e   : > { %851 = vst [vmem:[#allocation5 + $0x1a0] sm:$0xff] %v6966_v36 }
 0x19f   : > { %852 = vst [vmem:[#allocation5 + $0x1a8] sm:$0xff] %v6966_v36 }
 0x1a0   : > { %853 = vst [vmem:[#allocation5 + $0x1b0] sm:$0xf] %v6966_v36 }
 0x1a1   : > { %854 = vst [vmem:[#allocation5 + $0x1b8] sm:$0xff] %v6966_v36 }
 0x1a2   : > { %855 = vst [vmem:[#allocation5 + $0x1c0] sm:$0xff] %v6966_v36 }
 0x1a3   : > { %856 = vst [vmem:[#allocation5 + $0x1c8] sm:$0xff] %v6966_v36 }
 0x1a4   : > { %857 = vst [vmem:[#allocation5 + $0x1d0] sm:$0xff] %v6966_v36 }
 0x1a5   : > { %858 = vst [vmem:[#allocation5 + $0x1d8] sm:$0xf] %v6966_v36 }
 0x1a6   : > { %859 = vst [vmem:[#allocation5 + $0x1e0] sm:$0xff] %v6966_v36 }
 0x1a7   : > { %860 = vst [vmem:[#allocation5 + $0x1e8] sm:$0xff] %v6966_v36 }
 0x1a8   : > { %861 = vst [vmem:[#allocation5 + $0x1f0] sm:$0xff] %v6966_v36 }
 0x1a9   : > { %862 = vst [vmem:[#allocation5 + $0x1f8] sm:$0xff] %v6966_v36 }
 0x1aa   : > { %863 = vst [vmem:[#allocation5 + $0x200] sm:$0xf] %v6966_v36 }
 0x1ab   : > { %864 = vst [vmem:[#allocation5 + $0x208] sm:$0xff] %v6966_v36 }
 0x1ac   : > { %865 = vst [vmem:[#allocation5 + $0x210] sm:$0xff] %v6966_v36 }
 0x1ad   : > { %866 = vst [vmem:[#allocation5 + $0x218] sm:$0xff] %v6966_v36 }
 0x1ae   : > { %867 = vst [vmem:[#allocation5 + $0x220] sm:$0xff] %v6966_v36 }
 0x1af   : > { %868 = vst [vmem:[#allocation5 + $0x228] sm:$0xf] %v6966_v36 }
 0x1b0   : > { %869 = vst [vmem:[#allocation5 + $0x230] sm:$0xff] %v6966_v36 }
 0x1b1   : > { %870 = vst [vmem:[#allocation5 + $0x238] sm:$0xff] %v6966_v36 }
 0x1b2   : > { %871 = vst [vmem:[#allocation5 + $0x240] sm:$0xff] %v6966_v36 }
 0x1b3   : > { %872 = vst [vmem:[#allocation5 + $0x248] sm:$0xff] %v6966_v36 }
 0x1b4   : > { %873 = vst [vmem:[#allocation5 + $0x250] sm:$0xf] %v6966_v36 }
 0x1b5   : > { %874 = vst [vmem:[#allocation5 + $0x258] sm:$0xff] %v6966_v36 }
 0x1b6   : > { %875 = vst [vmem:[#allocation5 + $0x260] sm:$0xff] %v6966_v36 }
 0x1b7   : > { %876 = vst [vmem:[#allocation5 + $0x268] sm:$0xff] %v6966_v36 }
 0x1b8   : > { %877 = vst [vmem:[#allocation5 + $0x270] sm:$0xff] %v6966_v36 }
 0x1b9   : > { %878 = vst [vmem:[#allocation5 + $0x278] sm:$0xf] %v6966_v36 }
 0x1ba   : > { %879 = vst [vmem:[#allocation5 + $0x280] sm:$0xff] %v6966_v36 }
 0x1bb   : > { %880 = vst [vmem:[#allocation5 + $0x288] sm:$0xff] %v6966_v36 }
 0x1bc   : > { %881 = vst [vmem:[#allocation5 + $0x290] sm:$0xff] %v6966_v36 }
 0x1bd   : > { %882 = vst [vmem:[#allocation5 + $0x298] sm:$0xff] %v6966_v36 }
 0x1be   : > { %883 = vst [vmem:[#allocation5 + $0x2a0] sm:$0xf] %v6966_v36 }
 0x1bf   : > { %884 = vst [vmem:[#allocation5 + $0x2a8] sm:$0xff] %v6966_v36 }
 0x1c0   : > { %885 = vst [vmem:[#allocation5 + $0x2b0] sm:$0xff] %v6966_v36 }
 0x1c1   : > { %886 = vst [vmem:[#allocation5 + $0x2b8] sm:$0xff] %v6966_v36 }
 0x1c2   : > { %887 = vst [vmem:[#allocation5 + $0x2c0] sm:$0xff] %v6966_v36 }
 0x1c3   : > { %888 = vst [vmem:[#allocation5 + $0x2c8] sm:$0xf] %v6966_v36 }
 0x1c4   : > { %889 = vst [vmem:[#allocation5 + $0x2d0] sm:$0xff] %v6966_v36 }
 0x1c5   : > { %890 = vst [vmem:[#allocation5 + $0x2d8] sm:$0xff] %v6966_v36 }
 0x1c6   : > { %891 = vst [vmem:[#allocation5 + $0x2e0] sm:$0xff] %v6966_v36 }
 0x1c7   : > { %892 = vst [vmem:[#allocation5 + $0x2e8] sm:$0xff] %v6966_v36 }
 0x1c8   : > { %893 = vst [vmem:[#allocation5 + $0x2f0] sm:$0xf] %v6966_v36 }
 0x1c9   : > { %894 = vst [vmem:[#allocation5 + $0x2f8] sm:$0xff] %v6966_v36 }
 0x1ca   : > { %895 = vst [vmem:[#allocation5 + $0x300] sm:$0xff] %v6966_v36 }
 0x1cb   : > { %896 = vst [vmem:[#allocation5 + $0x308] sm:$0xff] %v6966_v36 }
 0x1cc   : > { %897 = vst [vmem:[#allocation5 + $0x310] sm:$0xff] %v6966_v36 }
 0x1cd   : > { %898 = vst [vmem:[#allocation5 + $0x318] sm:$0xf] %v6966_v36 }
 0x1ce   : > { %899 = vst [vmem:[#allocation5 + $0x320] sm:$0xff] %v6966_v36 }
 0x1cf   : > { %900 = vst [vmem:[#allocation5 + $0x328] sm:$0xff] %v6966_v36 }
 0x1d0   : > { %901 = vst [vmem:[#allocation5 + $0x330] sm:$0xff] %v6966_v36 }
 0x1d1   : > { %902 = vst [vmem:[#allocation5 + $0x338] sm:$0xff] %v6966_v36 }
 0x1d2   : > { %903 = vst [vmem:[#allocation5 + $0x340] sm:$0xf] %v6966_v36 }
 0x1d3   : > { %904 = vst [vmem:[#allocation5 + $0x348] sm:$0xff] %v6966_v36 }
 0x1d4   : > { %905 = vst [vmem:[#allocation5 + $0x350] sm:$0xff] %v6966_v36 }
 0x1d5   : > { %906 = vst [vmem:[#allocation5 + $0x358] sm:$0xff] %v6966_v36 }
 0x1d6   : > { %907 = vst [vmem:[#allocation5 + $0x360] sm:$0xff] %v6966_v36 }
 0x1d7   : > { %908 = vst [vmem:[#allocation5 + $0x368] sm:$0xf] %v6966_v36 }
 0x1d8   : > { %909 = vst [vmem:[#allocation5 + $0x370] sm:$0xff] %v6966_v36 }
 0x1d9   : > { %910 = vst [vmem:[#allocation5 + $0x378] sm:$0xff] %v6966_v36 }
 0x1da   : > { %911 = vst [vmem:[#allocation5 + $0x380] sm:$0xff] %v6966_v36 }
 0x1db   : > { %912 = vst [vmem:[#allocation5 + $0x388] sm:$0xff] %v6966_v36 }
 0x1dc   : > { %913 = vst [vmem:[#allocation5 + $0x390] sm:$0xf] %v6966_v36 }
 0x1dd   : > { %914 = vst [vmem:[#allocation5 + $0x398] sm:$0xff] %v6966_v36 }
 0x1de   : > { %915 = vst [vmem:[#allocation5 + $0x3a0] sm:$0xff] %v6966_v36 }
 0x1df   : > { %916 = vst [vmem:[#allocation5 + $0x3a8] sm:$0xff] %v6966_v36 }
 0x1e0   : > { %917 = vst [vmem:[#allocation5 + $0x3b0] sm:$0xff] %v6966_v36 }
 0x1e1   : > { %918 = vst [vmem:[#allocation5 + $0x3b8] sm:$0xf] %v6966_v36 }
 0x1e2   : > { %919 = vst [vmem:[#allocation5 + $0x3c0] sm:$0xff] %v6966_v36 }
 0x1e3   : > { %920 = vst [vmem:[#allocation5 + $0x3c8] sm:$0xff] %v6966_v36 }
 0x1e4   : > { %921 = vst [vmem:[#allocation5 + $0x3d0] sm:$0xff] %v6966_v36 }
 0x1e5   : > { %922 = vst [vmem:[#allocation5 + $0x3d8] sm:$0xff] %v6966_v36 }
 0x1e6   : > { %923 = vst [vmem:[#allocation5 + $0x3e0] sm:$0xf] %v6966_v36 }
 0x1e7   : > { %924 = vst [vmem:[#allocation5 + $0x3e8] sm:$0xff] %v6966_v36 }
 0x1e8   : > { %925 = vst [vmem:[#allocation5 + $0x3f0] sm:$0xff] %v6966_v36 }
 0x1e9   : > { %926 = vst [vmem:[#allocation5 + $0x3f8] sm:$0xff] %v6966_v36 }
 0x1ea   : > { %927 = vst [vmem:[#allocation5 + $0x400] sm:$0xff] %v6966_v36 }
 0x1eb   : > { %928 = vst [vmem:[#allocation5 + $0x408] sm:$0xf] %v6966_v36 }
 0x1ec   : > { %929 = vst [vmem:[#allocation5 + $0x410] sm:$0xff] %v6966_v36 }
 0x1ed   : > { %930 = vst [vmem:[#allocation5 + $0x418] sm:$0xff] %v6966_v36 }
 0x1ee   : > { %931 = vst [vmem:[#allocation5 + $0x420] sm:$0xff] %v6966_v36 }
 0x1ef   : > { %932 = vst [vmem:[#allocation5 + $0x428] sm:$0xff] %v6966_v36 }
 0x1f0   : > { %933 = vst [vmem:[#allocation5 + $0x430] sm:$0xf] %v6966_v36 }
 0x1f1   : > { %934 = vst [vmem:[#allocation5 + $0x438] sm:$0xff] %v6966_v36 }
 0x1f2   : > { %935 = vst [vmem:[#allocation5 + $0x440] sm:$0xff] %v6966_v36 }
 0x1f3   : > { %936 = vst [vmem:[#allocation5 + $0x448] sm:$0xff] %v6966_v36 }
 0x1f4   : > { %937 = vst [vmem:[#allocation5 + $0x450] sm:$0xff] %v6966_v36 }
 0x1f5   : > { %938 = vst [vmem:[#allocation5 + $0x458] sm:$0xf] %v6966_v36 }
 0x1f6   : > { %939 = vst [vmem:[#allocation5 + $0x460] sm:$0xff] %v6966_v36 }
 0x1f7   : > { %940 = vst [vmem:[#allocation5 + $0x468] sm:$0xff] %v6966_v36 }
 0x1f8   : > { %941 = vst [vmem:[#allocation5 + $0x470] sm:$0xff] %v6966_v36 }
 0x1f9   : > { %942 = vst [vmem:[#allocation5 + $0x478] sm:$0xff] %v6966_v36 }
 0x1fa   : > { %943 = vst [vmem:[#allocation5 + $0x480] sm:$0xf] %v6966_v36 }
 0x1fb   : > { %944 = vst [vmem:[#allocation5 + $0x488] sm:$0xff] %v6966_v36 }
 0x1fc   : > { %945 = vst [vmem:[#allocation5 + $0x490] sm:$0xff] %v6966_v36 }
 0x1fd   : > { %946 = vst [vmem:[#allocation5 + $0x498] sm:$0xff] %v6966_v36 }
 0x1fe   : > { %947 = vst [vmem:[#allocation5 + $0x4a0] sm:$0xff] %v6966_v36  ;;  %v1394_v36 = vpop.f32.mrf.mxu1 }
 0x1ff   : > { %948 = vst [vmem:[#allocation5 + $0x4a8] sm:$0xf] %v7617_v24  ;;  %v1727_v60 = vadd.f32 %v7640_v34, %v1394_v36  ;;  %v1763_v36 = vmax.f32 %v1762_v26, 0.0 }
 0x200   : > { %949 = vst [vmem:[#allocation5 + $0x4b0] sm:$0xff] %v7617_v24 }
 0x201   : > { %950 = vst [vmem:[#allocation5 + $0x4b8] sm:$0xff] %v7617_v24  ;;  %v1728_v7 = vmax.f32 %v1727_v60, 0.0 }
 0x202   : > { %951 = vst [vmem:[#allocation5 + $0x4c0] sm:$0xff] %v7617_v24 }
 0x203   : > { %952 = vst [vmem:[#allocation5 + $0x4c8] sm:$0xff] %v7617_v24 }
 0x204   : > { %953 = vst [vmem:[#allocation5 + $0x4d0] sm:$0xf] %v7617_v24 }
 0x205   : > { %954 = vst [vmem:[#allocation5 + $0x4d8] sm:$0xff] %v7617_v24 }
 0x206   : > { %955 = vst [vmem:[#allocation5 + $0x4e0] sm:$0xff] %v7617_v24  ;;  %v1474_v41 = vpop.f32.mrf.mxu1 }
 0x207   : > { %956 = vst [vmem:[#allocation5 + $0x4e8] sm:$0xff] %v7617_v24  ;;  %v1740_v8 = vadd.f32 %v7640_v34, %v1474_v41  ;;  %v1776_v41 = vmax.f32 %v1775_v37, 0.0 }
 0x208   : > { %957 = vst [vmem:[#allocation5 + $0x4f0] sm:$0xff] %v7617_v24 }
 0x209   : > { %958 = vst [vmem:[#allocation5 + $0x4f8] sm:$0xf] %v7617_v24  ;;  %v1741_v15 = vmax.f32 %v1740_v8, 0.0 }
 0x20a   : > { %959 = vst [vmem:[#allocation5 + $0x500] sm:$0xff] %v7617_v24 }
 0x20b   : > { %960 = vst [vmem:[#allocation5 + $0x508] sm:$0xff] %v7617_v24 }
 0x20c   : > { %961 = vst [vmem:[#allocation5 + $0x510] sm:$0xff] %v7617_v24 }
 0x20d   : > { %962 = vst [vmem:[#allocation5 + $0x518] sm:$0xff] %v7617_v24 }
 0x20e   : > { %963 = vst [vmem:[#allocation5 + $0x520] sm:$0xf] %v7617_v24  ;;  %v1554_v58 = vpop.f32.mrf.mxu1 }
 0x20f   : > { %964 = vst [vmem:[#allocation5 + $0x528] sm:$0xff] %v7617_v24  ;;  %v1753_v45 = vadd.f32 %v7640_v34, %v1554_v58 }
 0x210   : > { %965 = vst [vmem:[#allocation5 + $0x530] sm:$0xff] %v7617_v24 }
 0x211   : > { %966 = vst [vmem:[#allocation5 + $0x538] sm:$0xff] %v7617_v24  ;;  %v1754_v28 = vmax.f32 %v1753_v45, 0.0 }
 0x212   : > { %967 = vst [vmem:[#allocation5 + $0x540] sm:$0xff] %v7617_v24 }
 0x213   : > { %968 = vst [vmem:[#allocation5 + $0x548] sm:$0xf] %v7617_v24 }
 0x214   : > { %969 = vst [vmem:[#allocation5 + $0x550] sm:$0xff] %v7617_v24 }
 0x215   : > { %970 = vst [vmem:[#allocation5 + $0x558] sm:$0xff] %v7617_v24 }
 0x216   : > { %971 = vst [vmem:[#allocation5 + $0x560] sm:$0xff] %v7617_v24  ;;  %v1634_v18 = vpop.f32.mrf.mxu1 }
 0x217   : > { %972 = vst [vmem:[#allocation5 + $0x568] sm:$0xff] %v7617_v24  ;;  %v1766_v29 = vadd.f32 %v7640_v34, %v1634_v18 }
 0x218   : > { %973 = vst [vmem:[#allocation5 + $0x570] sm:$0xf] %v7617_v24 }
 0x219   : > { %974 = vst [vmem:[#allocation5 + $0x578] sm:$0xff] %v7617_v24  ;;  %v1767_v38 = vmax.f32 %v1766_v29, 0.0 }
 0x21a   : > { %975 = vst [vmem:[#allocation5 + $0x580] sm:$0xff] %v7617_v24 }
 0x21b   : > { %976 = vst [vmem:[#allocation5 + $0x588] sm:$0xff] %v7617_v24 }
 0x21c   : > { %977 = vst [vmem:[#allocation5 + $0x590] sm:$0xff] %v7617_v24 }
 0x21d   : > { %978 = vst [vmem:[#allocation5 + $0x598] sm:$0xf] %v7617_v24 }
 0x21e   : > { %1701 = vst [vmem:[#allocation2 + $0x22] sm:$0x1] %v1699_v40  ;;  %v1773_v40 = vmax.f32 %v1772_v35, 0.0 }
 0x21f   : > { %542 = vst [vmem:[#allocation2 + $0x28] sm:$0x1f] %v7617_v24 }
 0x220   : > { %545 = vst [vmem:[#allocation2 + $0x40] sm:$0xff] %v7617_v24 }
 0x221   : > { %546 = vst [vmem:[#allocation2 + $0x48] sm:$0x1f] %v7617_v24 }
 0x222   : > { %549 = vst [vmem:[#allocation2 + $0x60] sm:$0xff] %v7617_v24 }
 0x223   : > { %550 = vst [vmem:[#allocation2 + $0x68] sm:$0x1f] %v7617_v24 }
 0x224   : > { %553 = vst [vmem:[#allocation2 + $0x80] sm:$0xff] %v7617_v24 }
 0x225   : > { %554 = vst [vmem:[#allocation2 + $0x88] sm:$0x1f] %v7617_v24 }
 0x226   : > { %557 = vst [vmem:[#allocation2 + $0xa0] sm:$0xff] %v7617_v24 }
 0x227   : > { %558 = vst [vmem:[#allocation2 + $0xa8] sm:$0x1f] %v7617_v24  ;;  %v1654_v24 = vpop.f32.mrf.mxu2 }
 0x228   : > { %1704 = vst [vmem:[#allocation2 + $0x24] sm:$0x1] %v1703_v50  ;;  %v1769_v32 = vadd.f32 %v7640_v34, %v1654_v24 }
 0x229   : > { %1707 = vst [vmem:[#allocation2 + $0x26] sm:$0x1] %v1706_v52 }
 0x22a   : > { %1710 = vst [vmem:[#allocation2 + $0x28] sm:$0x1] %v1709_v54  ;;  %v1770_v39 = vmax.f32 %v1769_v32, 0.0 }
 0x22b   : > { %1713 = vst [vmem:[#allocation2 + $0x2a] sm:$0x1] %v1712_v56 }
 0x22c   : > { %1717 = vst [vmem:[#allocation2 + $0x42] sm:$0x1] %v1715_v59 }
 0x22d   : > { %1720 = vst [vmem:[#allocation2 + $0x44] sm:$0x1] %v1719_v62 }
 0x22e   : > { %1723 = vst [vmem:[#allocation2 + $0x46] sm:$0x1] %v1722_v2 }
 0x22f   : > { %1726 = vst [vmem:[#allocation2 + $0x48] sm:$0x1] %v1725_v5 }
 0x230   : > { %1729 = vst [vmem:[#allocation2 + $0x4a] sm:$0x1] %v1728_v7 }
 0x231   : > { %1733 = vst [vmem:[#allocation2 + $0x62] sm:$0x1] %v1731_v9 }
 0x232   : > { %1736 = vst [vmem:[#allocation2 + $0x64] sm:$0x1] %v1735_v11 }
 0x233   : > { %1739 = vst [vmem:[#allocation2 + $0x66] sm:$0x1] %v1738_v13 }
 0x234   : > { %1742 = vst [vmem:[#allocation2 + $0x68] sm:$0x1] %v1741_v15 }
 0x235   : > { %1745 = vst [vmem:[#allocation2 + $0x6a] sm:$0x1] %v1744_v16 }
 0x236   : > { %1749 = vst [vmem:[#allocation2 + $0x82] sm:$0x1] %v1747_v19 }
 0x237   : > { %1752 = vst [vmem:[#allocation2 + $0x84] sm:$0x1] %v1751_v25 }
 0x238   : > { %1755 = vst [vmem:[#allocation2 + $0x86] sm:$0x1] %v1754_v28 }
 0x239   : > { %1758 = vst [vmem:[#allocation2 + $0x88] sm:$0x1] %v1757_v31 }
 0x23a   : > { %1761 = vst [vmem:[#allocation2 + $0x8a] sm:$0x1] %v1760_v33 }
 0x23b   : > { %1765 = vst [vmem:[#allocation2 + $0xa2] sm:$0x1] %v1763_v36 }
 0x23c   : > { %1768 = vst [vmem:[#allocation2 + $0xa4] sm:$0x1] %v1767_v38 }
 0x23d   : > { %1771 = vst [vmem:[#allocation2 + $0xa6] sm:$0x1] %v1770_v39 }
 0x23e   : > { %1774 = vst [vmem:[#allocation2 + $0xa8] sm:$0x1] %v1773_v40 }
 0x23f   : > { %1777 = vst [vmem:[#allocation2 + $0xaa] sm:$0x1] %v1776_v41 }
 0x240 LB: >> { %v1823_v34 = vld [vmem:[#allocation8 + $0xf8] sm:$0xff]  ;;  %v1822_v43 = vld [vmem:[#allocation8 + $0xf0] sm:$0xff]  ;;  %v1821_v46 = vld [vmem:[#allocation8 + $0xe8] sm:$0xff]  ;;  %s6087_s19 = sshll.u32 %s6938_s21, 4  ;;  %vm2201_vm4 = vcmask 1042432   ;;  %vm2191_vm5 = vcmask 89088   ;;  %s6938_s21 = sphi %s7686_s21, %s1784_s21  }
 0x241   : >> { %v1888_v42 = vld [vmem:[#allocation8 + $0x178] sm:$0xff]  ;;  %1824 = vmatpush.msra.mxu0 %v1823_v34  ;;  %v1887_v44 = vld [vmem:[#allocation8 + $0x170] sm:$0xff]  ;;  %v1886_v47 = vld [vmem:[#allocation8 + $0x168] sm:$0xff]  ;;  %s7692_s25 = scalar_lea.vmem [#allocation2], %s6087_s19  ;;  %s6328_s29 = sshll.u32 %s6938_s21, 6 }
 0x242   : >> { %1889 = vmatpush.msra.mxu2 %v1888_v42  ;;  %v1820_v48 = vld [vmem:[#allocation8 + $0xe0] sm:$0xff]  ;;  %v1935_v49 = vld [vmem:[#allocation8 + $0x1f8] sm:$0xff]  ;;  %v1934_v52 = vld [vmem:[#allocation8 + $0x1f0] sm:$0xff]  ;;  %s5852_s12 = scalar_lea.vmem [#allocation3], %s6328_s29  ;;  %s1784_s21 = sadd.s32 1, %s6938_s21  }
 0x243   : >> { %1825 = vmatpush.msra.mxu0 %v1822_v43  ;;  %v1885_v50 = vld [vmem:[#allocation8 + $0x160] sm:$0xff]  ;;  %1936 = vmatpush.msra.mxu3 %v1935_v49  ;;  %v1804_v51 = vld [vmem:[#allocation8 + $0x78] sm:$0xff]  ;;  %v1803_v53 = vld [vmem:[#allocation8 + $0x70] sm:$0xff]  ;;  %p1781_p7 = scmp.ge.s32.totalorder %s1784_s21, 11  }
 0x244   : >> { %1890 = vmatpush.msra.mxu2 %v1887_v44  ;;  %v1819_v54 = vld [vmem:[#allocation8 + $0xd8] sm:$0xff]  ;;  %1847 = vmatpush.msra.mxu1 %v1804_v51  ;;  %v1933_v56 = vld [vmem:[#allocation8 + $0x1e8] sm:$0xff]  ;;  %v1932_v58 = vld [vmem:[#allocation8 + $0x1e0] sm:$0xff]  ;;  %s7722_s24 = smov (%p1781_p7), 0  }
 0x245   : >> { %1826 = vmatpush.msra.mxu0 %v1821_v46  ;;  %v1884_v55 = vld [vmem:[#allocation8 + $0x158] sm:$0xff]  ;;  %1937 = vmatpush.msra.mxu3 %v1934_v52  ;;  %v1802_v57 = vld [vmem:[#allocation8 + $0x68] sm:$0xff]  ;;  %v1818_v59 = vld [vmem:[#allocation8 + $0xd0] sm:$0xff] }
 0x246   : >> { %1891 = vmatpush.msra.mxu2 %v1886_v47  ;;  %v1883_v60 = vld [vmem:[#allocation8 + $0x150] sm:$0xff]  ;;  %1848 = vmatpush.msra.mxu1 %v1803_v53  ;;  %v1801_v61 = vld [vmem:[#allocation8 + $0x60] sm:$0xff]  ;;  %v1931_v62 = vld [vmem:[#allocation8 + $0x1d8] sm:$0xff] }
 0x247   : >> { %1827 = vmatpush.msra.mxu0 %v1820_v48  ;;  %1938 = vmatpush.msra.mxu3 %v1933_v56  ;;  %v1817_v63 = vld [vmem:[#allocation8 + $0xc8] sm:$0xff]  ;;  %v1800_v2 = vld [vmem:[#allocation8 + $0x58] sm:$0xff]  ;;  %v1930_v3 = vld [vmem:[#allocation8 + $0x1d0] sm:$0xff] }
 0x248   : >> { %1892 = vmatpush.msra.mxu2 %v1885_v50  ;;  %v1882_v1 = vld [vmem:[#allocation8 + $0x148] sm:$0xff]  ;;  %1849 = vmatpush.msra.mxu1 %v1802_v57  ;;  %v1816_v4 = vld [vmem:[#allocation8 + $0xc0] sm:$0xff]  ;;  %v1799_v6 = vld [vmem:[#allocation8 + $0x50] sm:$0xff] }
 0x249   : >> { %1828 = vmatpush.msra.mxu0 %v1819_v54  ;;  %1939 = vmatpush.msra.mxu3 %v1932_v58  ;;  %v1881_v5 = vld [vmem:[#allocation8 + $0x140] sm:$0xff]  ;;  %v1929_v7 = vld [vmem:[#allocation8 + $0x1c8] sm:$0xff]  ;;  %v1815_v8 = vld [vmem:[#allocation8 + $0xb8] sm:$0xff] }
 0x24a   : >> { %1893 = vmatpush.msra.mxu2 %v1884_v55  ;;  %1850 = vmatpush.msra.mxu1 %v1801_v61  ;;  %v1880_v9 = vld [vmem:[#allocation8 + $0x138] sm:$0xff]  ;;  %v1798_v10 = vld [vmem:[#allocation8 + $0x48] sm:$0xff]  ;;  %v1928_v11 = vld [vmem:[#allocation8 + $0x1c0] sm:$0xff] }
 0x24b   : >> { %1829 = vmatpush.msra.mxu0 %v1818_v59  ;;  %1940 = vmatpush.msra.mxu3 %v1931_v62  ;;  %v1814_v12 = vld [vmem:[#allocation8 + $0xb0] sm:$0xff]  ;;  %v1797_v14 = vld [vmem:[#allocation8 + $0x40] sm:$0xff]  ;;  %v1927_v15 = vld [vmem:[#allocation8 + $0x1b8] sm:$0xff] }
 0x24c   : >> { %1894 = vmatpush.msra.mxu2 %v1883_v60  ;;  %1851 = vmatpush.msra.mxu1 %v1800_v2  ;;  %v1879_v13 = vld [vmem:[#allocation8 + $0x130] sm:$0xff]  ;;  %v1813_v45 = vld [vmem:[#allocation8 + $0xa8] sm:$0xff]  ;;  %v1796_v17 = vld [vmem:[#allocation8 + $0x38] sm:$0xff] }
 0x24d   : >> { %1830 = vmatpush.msra.mxu0 %v1817_v63  ;;  %1941 = vmatpush.msra.mxu3 %v1930_v3  ;;  %v1878_v16 = vld [vmem:[#allocation8 + $0x128] sm:$0xff]  ;;  %v1926_v18 = vld [vmem:[#allocation8 + $0x1b0] sm:$0xff]  ;;  %v1812_v19 = vld [vmem:[#allocation8 + $0xa0] sm:$0xff] }
 0x24e   : >> { %1895 = vmatpush.msra.mxu2 %v1882_v1  ;;  %1852 = vmatpush.msra.mxu1 %v1799_v6  ;;  %v1877_v20 = vld [vmem:[#allocation8 + $0x120] sm:$0xff]  ;;  %v1795_v24 = vld [vmem:[#allocation8 + $0x30] sm:$0xff]  ;;  %v1925_v25 = vld [vmem:[#allocation8 + $0x1a8] sm:$0xff] }
 0x24f   : >> { %1831 = vmatpush.msra.mxu0 %v1816_v4  ;;  %1942 = vmatpush.msra.mxu3 %v1929_v7  ;;  %v1811_v26 = vld [vmem:[#allocation8 + $0x98] sm:$0xff]  ;;  %v1794_v28 = vld [vmem:[#allocation8 + $0x28] sm:$0xff]  ;;  %v1924_v29 = vld [vmem:[#allocation8 + $0x1a0] sm:$0xff] }
 0x250   : >> { %1896 = vmatpush.msra.mxu2 %v1881_v5  ;;  %1853 = vmatpush.msra.mxu1 %v1798_v10  ;;  %v1876_v27 = vld [vmem:[#allocation8 + $0x118] sm:$0xff]  ;;  %v1810_v30 = vld [vmem:[#allocation8 + $0x90] sm:$0xff]  ;;  %v1793_v32 = vld [vmem:[#allocation8 + $0x20] sm:$0xff] }
 0x251   : >> { %1832 = vmatpush.msra.mxu0 %v1815_v8  ;;  %1943 = vmatpush.msra.mxu3 %v1928_v11  ;;  %v1875_v31 = vld [vmem:[#allocation8 + $0x110] sm:$0xff]  ;;  %v1923_v33 = vld [vmem:[#allocation8 + $0x198] sm:$0xff]  ;;  %v1809_v35 = vld [vmem:[#allocation8 + $0x88] sm:$0xff] }
 0x252   : >> { %1897 = vmatpush.msra.mxu2 %v1880_v9  ;;  %1854 = vmatpush.msra.mxu1 %v1797_v14  ;;  %v1874_v36 = vld [vmem:[#allocation8 + $0x108] sm:$0xff]  ;;  %v1792_v37 = vld [vmem:[#allocation8 + $0x18] sm:$0xff]  ;;  %v1922_v38 = vld [vmem:[#allocation8 + $0x190] sm:$0xff] }
 0x253   : >> { %1833 = vmatpush.msra.mxu0 %v1814_v12  ;;  %1944 = vmatpush.msra.mxu3 %v1927_v15  ;;  %v1808_v39 = vld [vmem:[#allocation8 + $0x80] sm:$0xff]  ;;  %v1979_v41 = vld [vmem:[#allocation8 + $0x278] sm:$0xff]  ;;  %v1791_v42 = vld [vmem:[#allocation8 + $0x10] sm:$0xff] }
 0x254   : >> { %1898 = vmatpush.msra.mxu2 %v1879_v13  ;;  %1855 = vmatpush.msra.mxu1 %v1796_v17  ;;  %v1873_v40 = vld [vmem:[#allocation8 + $0x100] sm:$0xff]  ;;  %v2070_v34 = vld [vmem:[#allocation8 + $0x378] sm:$0xff]  ;;  %v1921_v43 = vld [vmem:[#allocation8 + $0x188] sm:$0xff] }
 0x255   : >> { %1834 = vmatpush.msra.mxu0 %v1813_v45  ;;  %1945 = vmatpush.msra.mxu3 %v1926_v18  ;;  %v1978_v44 = vld [vmem:[#allocation8 + $0x270] sm:$0xff]  ;;  %v1790_v47 = vld [vmem:[#allocation8 + $0x8] sm:$0xff]  ;;  %v1920_v48 = vld [vmem:[#allocation8 + $0x180] sm:$0xff] }
 0x256   : >> { %1899 = vmatpush.msra.mxu2 %v1878_v16  ;;  %1856 = vmatpush.msra.mxu1 %v1795_v24  ;;  %v2069_v46 = vld [vmem:[#allocation8 + $0x370] sm:$0xff]  ;;  %v1977_v49 = vld [vmem:[#allocation8 + $0x268] sm:$0xff]  ;;  %v2114_v51 = vld [vmem:[#allocation8 + $0x3f8] sm:$0xff] }
 0x257   : >> { %1835 = vmatpush.msra.mxu0 %v1812_v19  ;;  %1946 = vmatpush.msra.mxu3 %v1925_v25  ;;  %v2068_v50 = vld [vmem:[#allocation8 + $0x368] sm:$0xff]  ;;  %v1789_v52 = vld [vmem:[#allocation8] sm:$0xff]  ;;  %v2023_v55 = vld [vmem:[#allocation8 + $0x2f8] sm:$0xff] }
 0x258   : >> { %1900 = vmatpush.msra.mxu2 %v1877_v20  ;;  %1857 = vmatpush.msra.mxu1 %v1794_v28  ;;  %v1976_v53 = vld [vmem:[#allocation8 + $0x260] sm:$0xff]  ;;  %v2113_v56 = vld [vmem:[#allocation8 + $0x3f0] sm:$0xff]  ;;  %v1975_v57 = vld [vmem:[#allocation8 + $0x258] sm:$0xff] }
 0x259   : >> { %1836 = vmatpush.msra.mxu0 %v1811_v26  ;;  %1947 = vmatpush.msra.mxu3 %v1924_v29  ;;  %v2067_v54 = vld [vmem:[#allocation8 + $0x360] sm:$0xff]  ;;  %v2066_v58 = vld [vmem:[#allocation8 + $0x358] sm:$0xff]  ;;  %v2022_v59 = vld [vmem:[#allocation8 + $0x2f0] sm:$0xff] }
 0x25a   : >> { %1901 = vmatpush.msra.mxu2 %v1876_v27  ;;  %1858 = vmatpush.msra.mxu1 %v1793_v32  ;;  %v2112_v60 = vld [vmem:[#allocation8 + $0x3e8] sm:$0xff]  ;;  %v1974_v61 = vld [vmem:[#allocation8 + $0x250] sm:$0xff]  ;;  %v2111_v1 = vld [vmem:[#allocation8 + $0x3e0] sm:$0xff] }
 0x25b   : >> { %1837 = vmatpush.msra.mxu0 %v1810_v30  ;;  %1948 = vmatpush.msra.mxu3 %v1923_v33  ;;  %v2065_v62 = vld [vmem:[#allocation8 + $0x350] sm:$0xff]  ;;  %v2021_v63 = vld [vmem:[#allocation8 + $0x2e8] sm:$0xff]  ;;  %v2020_v4 = vld [vmem:[#allocation8 + $0x2e0] sm:$0xff] }
 0x25c   : >> { %1902 = vmatpush.msra.mxu2 %v1875_v31  ;;  %1859 = vmatpush.msra.mxu1 %v1792_v37  ;;  %v1973_v2 = vld [vmem:[#allocation8 + $0x248] sm:$0xff]  ;;  %v2110_v5 = vld [vmem:[#allocation8 + $0x3d8] sm:$0xff]  ;;  %v1972_v6 = vld [vmem:[#allocation8 + $0x240] sm:$0xff] }
 0x25d   : >> { %1838 = vmatpush.msra.mxu0 %v1809_v35  ;;  %1949 = vmatpush.msra.mxu3 %v1922_v38  ;;  %v2064_v3 = vld [vmem:[#allocation8 + $0x348] sm:$0xff]  ;;  %v2063_v7 = vld [vmem:[#allocation8 + $0x340] sm:$0xff]  ;;  %v2019_v8 = vld [vmem:[#allocation8 + $0x2d8] sm:$0xff] }
 0x25e   : >> { %1903 = vmatpush.msra.mxu2 %v1874_v36  ;;  %1860 = vmatpush.msra.mxu1 %v1791_v42  ;;  %v2109_v9 = vld [vmem:[#allocation8 + $0x3d0] sm:$0xff]  ;;  %v1971_v10 = vld [vmem:[#allocation8 + $0x238] sm:$0xff]  ;;  %v2108_v13 = vld [vmem:[#allocation8 + $0x3c8] sm:$0xff] }
 0x25f   : >> { %1839 = vmatpush.msra.mxu0 %v1808_v39  ;;  %1950 = vmatpush.msra.mxu3 %v1921_v43  ;;  %v2062_v11 = vld [vmem:[#allocation8 + $0x338] sm:$0xff]  ;;  %v2018_v12 = vld [vmem:[#allocation8 + $0x2d0] sm:$0xff]  ;;  %v2017_v16 = vld [vmem:[#allocation8 + $0x2c8] sm:$0xff] }
 0x260   : >> { %1904 = vmatpush.msra.mxu2 %v1873_v40  ;;  %1861 = vmatpush.msra.mxu1 %v1790_v47  ;;  %v1970_v14 = vld [vmem:[#allocation8 + $0x230] sm:$0xff]  ;;  %v1969_v17 = vld [vmem:[#allocation8 + $0x228] sm:$0xff]  ;;  %v2107_v19 = vld [vmem:[#allocation8 + $0x3c0] sm:$0xff] }
 0x261   : >> { %1980 = vmatpush.msrb.mxu0 %v1979_v41  ;;  %1951 = vmatpush.msra.mxu3 %v1920_v48  ;;  %v2061_v15 = vld [vmem:[#allocation8 + $0x330] sm:$0xff]  ;;  %v2060_v18 = vld [vmem:[#allocation8 + $0x328] sm:$0xff]  ;;  %v1968_v24 = vld [vmem:[#allocation8 + $0x220] sm:$0xff] }
 0x262   : >> { %2071 = vmatpush.msrb.mxu2 %v2070_v34  ;;  %1862 = vmatpush.msra.mxu1 %v1789_v52  ;;  %v1870_v45 = vld [vmem:[%s7692_s25 + $0x2] sm:$0xff]  ;;  %v2059_v25 = vld [vmem:[#allocation8 + $0x320] sm:$0xff]  ;;  %v1965_v37 = vld [vmem:[#allocation8 + $0x208] sm:$0xff] }
 0x263   : >> { %1981 = vmatpush.msrb.mxu0 %v1978_v44  ;;  %2115 = vmatpush.msrb.mxu3 %v2114_v51  ;;  %v1805_v20 = vld [vmem:[%s7692_s25 + $0x1] sm:$0xff]  ;;  %v6089_v26 = vld [vmem:[%s7692_s25 + $0x10] sm:$0xff]  ;;  %v2056_v38 = vld [vmem:[#allocation8 + $0x308] sm:$0xff] }
 0x264   : >> { %2072 = vmatpush.msrb.mxu2 %v2069_v46  ;;  %2024 = vmatpush.msrb.mxu1 %v2023_v55  ;;  %v2016_v27 = vld [vmem:[#allocation8 + $0x2c0] sm:$0xff]  ;;  %v1967_v28 = vld [vmem:[#allocation8 + $0x218] sm:$0xff]  ;;  %v1787_v31 = vld [vmem:[%s7692_s25] sm:$0xff] }
 0x265   : >> { %1982 = vmatpush.msrb.mxu0 %v1977_v49  ;;  %2116 = vmatpush.msrb.mxu3 %v2113_v56  ;;  %v2058_v29 = vld [vmem:[#allocation8 + $0x318] sm:$0xff]  ;;  %v1966_v32 = vld [vmem:[#allocation8 + $0x210] sm:$0xff]  ;;  %v2104_v40 = vld [vmem:[#allocation8 + $0x3a8] sm:$0xff] }
 0x266   : >> { %2073 = vmatpush.msrb.mxu2 %v2068_v50  ;;  %2025 = vmatpush.msrb.mxu1 %v2022_v59  ;;  %v2106_v30 = vld [vmem:[#allocation8 + $0x3b8] sm:$0xff]  ;;  %v2057_v33 = vld [vmem:[#allocation8 + $0x310] sm:$0xff]  ;;  %v1964_v34 = vld [vmem:[#allocation8 + $0x200] sm:$0xff] }
 0x267   : >> { %1983 = vmatpush.msrb.mxu0 %v1976_v53  ;;  %2117 = vmatpush.msrb.mxu3 %v2112_v60  ;;  %v2015_v35 = vld [vmem:[#allocation8 + $0x2b8] sm:$0xff]  ;;  %v2105_v36 = vld [vmem:[#allocation8 + $0x3b0] sm:$0xff]  ;;  %v2055_v42 = vld [vmem:[#allocation8 + $0x300] sm:$0xff] }
 0x268   : >> { %2074 = vmatpush.msrb.mxu2 %v2067_v54  ;;  %2026 = vmatpush.msrb.mxu1 %v2021_v63  ;;  %v2014_v39 = vld [vmem:[#allocation8 + $0x2b0] sm:$0xff]  ;;  %v1871_v41 = vld [vmem:[%s7692_s25 + $0xa] sm:$0x7]  ;;  %v2013_v43 = vld [vmem:[#allocation8 + $0x2a8] sm:$0xff] }
 0x269   : >> { %1984 = vmatpush.msrb.mxu0 %v1975_v57  ;;  %2118 = vmatpush.msrb.mxu3 %v2111_v1  ;;  %v2103_v44 = vld [vmem:[#allocation8 + $0x3a0] sm:$0xff]  ;;  %v2158_v46 = vld [vmem:[#allocation8 + $0x478] sm:$0xff]  ;;  %v6090_v48 = vld [vmem:[%s7692_s25 + $0x18] sm:$0x7] }
 0x26a   : >> { %2075 = vmatpush.msrb.mxu2 %v2066_v58  ;;  %2027 = vmatpush.msrb.mxu1 %v2020_v4  ;;  %v1806_v47 = vld [vmem:[%s7692_s25 + $0x9] sm:$0x7]  ;;  %v2012_v49 = vld [vmem:[#allocation8 + $0x2a0] sm:$0xff]  ;;  %v2157_v51 = vld [vmem:[#allocation8 + $0x470] sm:$0xff] }
 0x26b   : >> { %1985 = vmatpush.msrb.mxu0 %v1974_v61  ;;  %2119 = vmatpush.msrb.mxu3 %v2110_v5  ;;  %v2102_v50 = vld [vmem:[#allocation8 + $0x398] sm:$0xff]  ;;  %v2101_v54 = vld [vmem:[#allocation8 + $0x390] sm:$0xff]  ;;  %v2156_v55 = vld [vmem:[#allocation8 + $0x468] sm:$0xff] }
 0x26c   : >> { %2076 = vmatpush.msrb.mxu2 %v2065_v62  ;;  %2028 = vmatpush.msrb.mxu1 %v2019_v8  ;;  %v1788_v52 = vld [vmem:[%s7692_s25 + $0x8] sm:$0x7]  ;;  %v2010_v56 = vld [vmem:[#allocation8 + $0x290] sm:$0xff]  ;;  %v2100_v57 = vld [vmem:[#allocation8 + $0x388] sm:$0xff] }
 0x26d   : >> { %1986 = vmatpush.msrb.mxu0 %v1973_v2  ;;  %2120 = vmatpush.msrb.mxu3 %v2109_v9  ;;  %v2011_v53 = vld [vmem:[#allocation8 + $0x298] sm:$0xff]  ;;  %v2155_v58 = vld [vmem:[#allocation8 + $0x460] sm:$0xff]  ;;  %v6096_v59 = vld [vmem:[%s7692_s25 + $0x20] sm:$0xff] }
 0x26e   : >> { %2077 = vmatpush.msrb.mxu2 %v2064_v3  ;;  %2029 = vmatpush.msrb.mxu1 %v2018_v12  ;;  %v2009_v60 = vld [vmem:[#allocation8 + $0x288] sm:$0xff]  ;;  %v2099_v61 = vld [vmem:[#allocation8 + $0x380] sm:$0xff]  ;;  %v2154_v62 = vld [vmem:[#allocation8 + $0x458] sm:$0xff] }
 0x26f   : >> { %1987 = vmatpush.msrb.mxu0 %v1972_v6  ;;  %2121 = vmatpush.msrb.mxu3 %v2108_v13  ;;  %v6091_v63 = vld [vmem:[%s7692_s25 + $0x11] sm:$0xff]  ;;  %v6098_v1 = vld [vmem:[%s7692_s25 + $0x21] sm:$0xff]  ;;  %v6092_v9 = vld [vmem:[%s7692_s25 + $0x19] sm:$0x7] }
 0x270   : >> { %2078 = vmatpush.msrb.mxu2 %v2063_v7  ;;  %2030 = vmatpush.msrb.mxu1 %v2017_v16  ;;  %v2008_v2 = vld [vmem:[#allocation8 + $0x280] sm:$0xff]  ;;  %v2153_v3 = vld [vmem:[#allocation8 + $0x450] sm:$0xff]  ;;  %v2152_v5 = vld [vmem:[#allocation8 + $0x448] sm:$0xff] }
 0x271   : >> { %1988 = vmatpush.msrb.mxu0 %v1971_v10  ;;  %1905 = vmatmul.f32.vlgmr.msra.gmra.mxu2 %v1870_v45  ;;  %v6093_v4 = vld [vmem:[%s7692_s25 + $0x12] sm:$0xff]  ;;  %v6097_v7 = vld [vmem:[%s7692_s25 + $0x28] sm:$0x7]  ;;  %v6094_v12 = vld [vmem:[%s7692_s25 + $0x1a] sm:$0x7] }
 0x272   : >> { %2079 = vmatpush.msrb.mxu2 %v2062_v11  ;;  %2122 = vmatpush.msrb.mxu3 %v2107_v19  ;;  %v2151_v6 = vld [vmem:[#allocation8 + $0x440] sm:$0xff]  ;;  %v2150_v8 = vld [vmem:[#allocation8 + $0x438] sm:$0xff]  ;;  %v2149_v11 = vld [vmem:[#allocation8 + $0x430] sm:$0xff] }
 0x273   : >> { %1989 = vmatpush.msrb.mxu0 %v1970_v14  ;;  %1952 = vmatmul.f32.vlgmr.msra.gmra.mxu3 %v6089_v26  ;;  %v6099_v10 = vld [vmem:[%s7692_s25 + $0x29] sm:$0x7]  ;;  %v2148_v13 = vld [vmem:[#allocation8 + $0x428] sm:$0xff]  ;;  %v2147_v14 = vld [vmem:[#allocation8 + $0x420] sm:$0xff] }
 0x274   : >> { %2080 = vmatpush.msrb.mxu2 %v2061_v15  ;;  %1840 = vmatmul.f32.vlgmr.msra.gmra.mxu0 %v1805_v20  ;;  %v2146_v15 = vld [vmem:[#allocation8 + $0x418] sm:$0xff]  ;;  %v2145_v45 = vld [vmem:[#allocation8 + $0x410] sm:$0xff]  ;;  %v2144_v16 = vld [vmem:[#allocation8 + $0x408] sm:$0xff] }
 0x275   : >> { %1990 = vmatpush.msrb.mxu0 %v1969_v17  ;;  %2031 = vmatpush.msrb.mxu1 %v2016_v27  ;;  %v2143_v17 = vld [vmem:[#allocation8 + $0x400] sm:$0xff]  ;;  %v6101_v19 = vld [vmem:[%s7692_s25 + $0x2a] sm:$0x7] }
 0x276   : >> { %2081 = vmatpush.msrb.mxu2 %v2060_v18  ;;  %2123 = vmatpush.msrb.mxu3 %v2106_v30  ;;  %v6100_v18 = vld [vmem:[%s7692_s25 + $0x22] sm:$0xff] }
 0x277   : >> { %1991 = vmatpush.msrb.mxu0 %v1968_v24  ;;  %1863 = vmatmul.f32.vlgmr.msra.gmra.mxu1 %v1787_v31 }
 0x278   : >> { %2082 = vmatpush.msrb.mxu2 %v2059_v25  ;;  %2032 = vmatpush.msrb.mxu1 %v2015_v35 }
 0x279   : >> { %1992 = vmatpush.msrb.mxu0 %v1967_v28  ;;  %2124 = vmatpush.msrb.mxu3 %v2105_v36 }
 0x27a   : >> { %2083 = vmatpush.msrb.mxu2 %v2058_v29  ;;  %2033 = vmatpush.msrb.mxu1 %v2014_v39 }
 0x27b   : >> { %1993 = vmatpush.msrb.mxu0 %v1966_v32  ;;  %2125 = vmatpush.msrb.mxu3 %v2104_v40 }
 0x27c   : >> { %2084 = vmatpush.msrb.mxu2 %v2057_v33  ;;  %2034 = vmatpush.msrb.mxu1 %v2013_v43 }
 0x27d   : >> { %1994 = vmatpush.msrb.mxu0 %v1965_v37  ;;  %1908 = vmatmul.f32.gmra.mxu2 %v1871_v41 }
 0x27e   : >> { %2085 = vmatpush.msrb.mxu2 %v2056_v38  ;;  %2126 = vmatpush.msrb.mxu3 %v2103_v44 }
 0x27f   : >> { %1995 = vmatpush.msrb.mxu0 %v1964_v34  ;;  %1955 = vmatmul.f32.gmra.mxu3 %v6090_v48 }
 0x280   : >> { %2086 = vmatpush.msrb.mxu2 %v2055_v42  ;;  %1843 = vmatmul.f32.gmra.mxu0 %v1806_v47 }
 0x281   : >> { %2159 = vmatpush.msra.mxu0 %v2158_v46  ;;  %2035 = vmatpush.msrb.mxu1 %v2012_v49 }
 0x282   : >> { %6329 = vmatpush.msra.mxu2 %v2158_v46  ;;  %2127 = vmatpush.msrb.mxu3 %v2102_v50 }
 0x283   : >> { %2160 = vmatpush.msra.mxu0 %v2157_v51  ;;  %1866 = vmatmul.f32.gmra.mxu1 %v1788_v52 }
 0x284   : >> { %6330 = vmatpush.msra.mxu2 %v2157_v51  ;;  %2036 = vmatpush.msrb.mxu1 %v2011_v53 }
 0x285   : >> { %2128 = vmatpush.msrb.mxu3 %v2101_v54  ;;  %2161 = vmatpush.msra.mxu0 %v2156_v55 }
 0x286   : >> { %6331 = vmatpush.msra.mxu2 %v2156_v55  ;;  %2037 = vmatpush.msrb.mxu1 %v2010_v56  ;;  %v2185_v56 = vperm.slane %v7148_v0, 0 }
 0x287   : >> { %2129 = vmatpush.msrb.mxu3 %v2100_v57  ;;  %2162 = vmatpush.msra.mxu0 %v2155_v58 }
 0x288   : >> { %6332 = vmatpush.msra.mxu2 %v2155_v58  ;;  %2038 = vmatpush.msrb.mxu1 %v2009_v60 }
 0x289   : >> { %2087 = vmatmul.f32.vlgmr.msrb.gmra.mxu2 %v6096_v59  ;;  %2130 = vmatpush.msrb.mxu3 %v2099_v61 }
 0x28a   : >> { %2163 = vmatpush.msra.mxu0 %v2154_v62  ;;  %6333 = vmatpush.msra.mxu2 %v2154_v62 }
 0x28b   : >> { %1996 = vmatmul.f32.vlgmr.msrb.gmra.mxu0 %v6091_v63  ;;  %2131 = vmatmul.f32.vlgmr.msrb.gmra.mxu3 %v6098_v1 }
 0x28c   : >> { %2039 = vmatpush.msrb.mxu1 %v2008_v2  ;;  %2164 = vmatpush.msra.mxu0 %v2153_v3 }
 0x28d   : >> { %6334 = vmatpush.msra.mxu2 %v2153_v3  ;;  %2040 = vmatmul.f32.vlgmr.msrb.gmra.mxu1 %v6093_v4  ;;  %v7720_v3 = vld [vmem:[#allocation17] sm:$0x1] (%p1781_p7) }
 0x28e   : >> { %2165 = vmatpush.msra.mxu0 %v2152_v5 }
 0x28f   : >> { %6335 = vmatpush.msra.mxu2 %v2152_v5 }
 0x290   : >> { %2166 = vmatpush.msra.mxu0 %v2151_v6 }
 0x291   : >> { %6336 = vmatpush.msra.mxu2 %v2151_v6 }
 0x292   : >> { %2090 = vmatmul.f32.gmra.mxu2 %v6097_v7  ;;  %2167 = vmatpush.msra.mxu0 %v2150_v8 }
 0x293   : >> { %6337 = vmatpush.msra.mxu2 %v2150_v8  ;;  %1999 = vmatmul.f32.gmra.mxu0 %v6092_v9 }
 0x294   : >> { %2134 = vmatmul.f32.gmra.mxu3 %v6099_v10  ;;  %2168 = vmatpush.msra.mxu0 %v2149_v11 }
 0x295   : >> { %6338 = vmatpush.msra.mxu2 %v2149_v11  ;;  %2043 = vmatmul.f32.gmra.mxu1 %v6094_v12 }
 0x296   : >> { %2169 = vmatpush.msra.mxu0 %v2148_v13 }
 0x297   : >> { %6339 = vmatpush.msra.mxu2 %v2148_v13 }
 0x298   : >> { %2170 = vmatpush.msra.mxu0 %v2147_v14 }
 0x299   : >> { %6340 = vmatpush.msra.mxu2 %v2147_v14 }
 0x29a   : >> { %2171 = vmatpush.msra.mxu0 %v2146_v15 }
 0x29b   : >> { %6341 = vmatpush.msra.mxu2 %v2146_v15 }
 0x29c   : >> { %2172 = vmatpush.msra.mxu0 %v2145_v45 }
 0x29d   : >> { %6342 = vmatpush.msra.mxu2 %v2145_v45 }
 0x29e   : >> { %2173 = vmatpush.msra.mxu0 %v2144_v16 }
 0x29f   : >> { %6343 = vmatpush.msra.mxu2 %v2144_v16 }
 0x2a0   : >> { %2174 = vmatpush.msra.mxu0 %v2143_v17 }
 0x2a1   : >> { %6344 = vmatpush.msra.mxu2 %v2143_v17  ;;  %2175 = vmatmul.f32.vlgmr.msra.gmra.mxu0 %v6100_v18 }
 0x2a2   : >> { %2178 = vmatmul.f32.vlgmr.msra.gmra.mxu2 %v6101_v19 }
 0x2f1   : >> { %v1841_v20 = vpop.f32.mrf.mxu0 }
 0x2f4   : >> { %v1864_v24 = vpop.f32.mrf.mxu1  ;;  %v1906_v25 = vpop.f32.mrf.mxu2 }
 0x2f5   : >> { %v1865_v30 = vadd.f32 %v1864_v24, %v1841_v20 }
 0x2f6   : >> { %v1953_v27 = vpop.f32.mrf.mxu3 }
 0x2f7   : >> { %v1912_v35 = vadd.f32 %v1906_v25, %v1865_v30 }
 0x2f9   : >> { %v1959_v38 = vadd.f32 %v1953_v27, %v1912_v35 }
 0x2fd   : >> { %v1844_v26 = vpop.f32.mrf.mxu0 }
 0x300   : >> { %v1867_v28 = vpop.f32.mrf.mxu1  ;;  %v1909_v29 = vpop.f32.mrf.mxu2 }
 0x301   : >> { %v1868_v32 = vadd.f32 %v1867_v28, %v1844_v26 }
 0x302   : >> { %v1956_v33 = vpop.f32.mrf.mxu3 }
 0x303   : >> { %v1913_v37 = vadd.f32 %v1909_v29, %v1868_v32 }
 0x305   : >> { %v1960_v40 = vadd.f32 %v1956_v33, %v1913_v37 }
 0x308   : >> { %v1997_v31 = vpop.f32.mrf.mxu0 }
 0x309   : >> { %v2003_v34 = vadd.f32 %v1997_v31, %v1959_v38 }
 0x30a   : >> { %v2041_v36 = vpop.f32.mrf.mxu1 }
 0x30b   : >> { %v2047_v46 = vadd.f32 %v2041_v36, %v2003_v34 }
 0x30c   : >> { %v2088_v39 = vpop.f32.mrf.mxu2 }
 0x30d   : >> { %v2094_v49 = vadd.f32 %v2088_v39, %v2047_v46 }
 0x30e   : >> { %v2132_v42 = vpop.f32.mrf.mxu3 }
 0x30f   : >> { %v2138_v53 = vadd.f32 %v2132_v42, %v2094_v49 }
 0x310   : >> { %v2000_v41 = vpop.f32.mrf.mxu0 }
 0x311   : >> { %v2004_v43 = vadd.f32 %v2000_v41, %v1960_v40 }
 0x312   : >> { %v2044_v44 = vpop.f32.mrf.mxu1 }
 0x313   : >> { %v2048_v47 = vadd.f32 %v2044_v44, %v2004_v43 }
 0x315   : >> { %v2091_v48 = vpop.f32.mrf.mxu2 }
 0x316   : >> { %v2095_v50 = vadd.f32 %v2091_v48, %v2048_v47 }
 0x317   : >> { %v2135_v51 = vpop.f32.mrf.mxu3 }
 0x318   : >> { %v2139_v54 = vadd.f32 %v2135_v51, %v2095_v50 }
 0x31e   : >> { %v2176_v52 = vpop.f32.mrf.mxu0 }
 0x31f   : >> { %v2182_v55 = vadd.f32 %v2176_v52, %v2138_v53 }
 0x321   : >> { %v2187_v59 = vadd.f32 %v2185_v56, %v2182_v55 }
 0x323   : >> { %v2189_v62 = vmax.f32 %v2187_v59, 0.0 }
 0x325   : >> { %v2179_v57 = vpop.f32.mrf.mxu2 }
 0x326   : >> { %v2183_v58 = vadd.f32 %v2179_v57, %v2139_v54 }
 0x328   : >> { %v2188_v60 = vadd.f32 %v2185_v56, %v2183_v58 }
 0x32a   : >> { %v2190_v61 = vmax.f32 %v2188_v60, 0.0 }
 0x32c   : >> { %6102 = vmatpush.msk.msra.mxu1 %vm2201_vm4, %v2190_v61 }
 0x32e   : >> { %2220 = vmatpush.msra.mxu1 %v2189_v62 }
 0x32f   : >> { %6103 = vmatmul.msk.f32.vlgmr.msra.gmra.mxu1 %vm2191_vm5, %v7608_v21 }
 0x337   : >> { %6104 = vmatmul.msk.f32.gmra.mxu1 %vm2191_vm5, %v7611_v22 }
 0x33f   : >> { %6105 = vmatmul.msk.f32.gmra.mxu1 %vm2191_vm5, %v7614_v23 }
 0x3ac   : >> { %v2222_v63 = vpop.f32.mrf.mxu1 }
 0x3ad   : >> { %6108 = vst [vmem:[%s5852_s12 + $0x63] sm:$0xff] %v2222_v63 }
 0x3b4   : >> { %v2225_v1 = vpop.f32.mrf.mxu1 }
 0x3b5   : >> { %6109 = vst [vmem:[%s5852_s12 + $0x6b] sm:$0xff] %v2225_v1 }
 0x3b9   : > { %1783 = sbr.rel (!%p1781_p7) target bundleno = 576 (0x240), region = 260 }
 0x3bc   : >> { %v2228_v2 = vpop.f32.mrf.mxu1 }
 0x3bd   : >> { %6110 = vst [vmem:[%s5852_s12 + $0x73] sm:$0x1f] %v2228_v2 }
 0x3be LB: >> { %v2285_v4 = vld [vmem:[#allocation10 + $0xf8] sm:$0xff]  ;;  %v2284_v6 = vld [vmem:[#allocation10 + $0xf0] sm:$0xff]  ;;  %v2283_v10 = vld [vmem:[#allocation10 + $0xe8] sm:$0xff]  ;;  %s6111_s20 = sshll.u32 %s6942_s24, 5  ;;  %s2244_s24 = sadd.s32 1, %s6942_s24   ;;  %s6942_s24 = sphi %s7722_s24, %s2244_s24  }
 0x3bf   : >> { %v2357_v5 = vld [vmem:[#allocation10 + $0x178] sm:$0xff]  ;;  %2286 = vmatpush.msra.mxu0 %v2285_v4  ;;  %v2356_v8 = vld [vmem:[#allocation10 + $0x170] sm:$0xff]  ;;  %v2355_v21 = vld [vmem:[#allocation10 + $0x168] sm:$0xff]  ;;  %s7730_s30 = scalar_lea.vmem [#allocation3], %s6111_s20  ;;  %s5866_s18 = scalar_lea.vmem [#allocation4], %s6111_s20 }
 0x3c0   : >> { %2358 = vmatpush.msra.mxu2 %v2357_v5  ;;  %v2265_v7 = vld [vmem:[#allocation10 + $0x78] sm:$0xff]  ;;  %v2264_v0 = vld [vmem:[#allocation10 + $0x70] sm:$0xff]  ;;  %v2263_v23 = vld [vmem:[#allocation10 + $0x68] sm:$0xff]  ;;  %p2241_p8 = scmp.ge.s32.totalorder %s2244_s24, 24  }
 0x3c1   : >> { %v2406_v9 = vld [vmem:[#allocation10 + $0x1f8] sm:$0xff]  ;;  %2312 = vmatpush.msra.mxu1 %v2265_v7  ;;  %2287 = vmatpush.msra.mxu0 %v2284_v6  ;;  %v2405_v22 = vld [vmem:[#allocation10 + $0x1f0] sm:$0xff]  ;;  %v2282_v11 = vld [vmem:[#allocation10 + $0xe0] sm:$0xff]  ;;  %s7788_s16 = smov (%p2241_p8), 0  }
 0x3c2   : >> { %2407 = vmatpush.msra.mxu3 %v2406_v9  ;;  %2359 = vmatpush.msra.mxu2 %v2356_v8  ;;  %v2354_v12 = vld [vmem:[#allocation10 + $0x160] sm:$0xff]  ;;  %v2404_v13 = vld [vmem:[#allocation10 + $0x1e8] sm:$0xff]  ;;  %v2281_v45 = vld [vmem:[#allocation10 + $0xd8] sm:$0xff] }
 0x3c3   : >> { %2313 = vmatpush.msra.mxu1 %v2264_v0  ;;  %2288 = vmatpush.msra.mxu0 %v2283_v10  ;;  %v2262_v14 = vld [vmem:[#allocation10 + $0x60] sm:$0xff]  ;;  %v2353_v16 = vld [vmem:[#allocation10 + $0x158] sm:$0xff]  ;;  %v2280_v19 = vld [vmem:[#allocation10 + $0xd0] sm:$0xff] }
 0x3c4   : >> { %2408 = vmatpush.msra.mxu3 %v2405_v22  ;;  %2360 = vmatpush.msra.mxu2 %v2355_v21  ;;  %v2403_v15 = vld [vmem:[#allocation10 + $0x1e0] sm:$0xff]  ;;  %v2261_v17 = vld [vmem:[#allocation10 + $0x58] sm:$0xff]  ;;  %v2352_v20 = vld [vmem:[#allocation10 + $0x150] sm:$0xff] }
 0x3c5   : >> { %2314 = vmatpush.msra.mxu1 %v2263_v23  ;;  %2289 = vmatpush.msra.mxu0 %v2282_v11  ;;  %v2402_v18 = vld [vmem:[#allocation10 + $0x1d8] sm:$0xff]  ;;  %v2260_v24 = vld [vmem:[#allocation10 + $0x50] sm:$0xff]  ;;  %v2279_v26 = vld [vmem:[#allocation10 + $0xc8] sm:$0xff] }
 0x3c6   : >> { %2409 = vmatpush.msra.mxu3 %v2404_v13  ;;  %2361 = vmatpush.msra.mxu2 %v2354_v12  ;;  %v2401_v25 = vld [vmem:[#allocation10 + $0x1d0] sm:$0xff]  ;;  %v2351_v27 = vld [vmem:[#allocation10 + $0x148] sm:$0xff]  ;;  %v2278_v30 = vld [vmem:[#allocation10 + $0xc0] sm:$0xff] }
 0x3c7   : >> { %2315 = vmatpush.msra.mxu1 %v2262_v14  ;;  %2290 = vmatpush.msra.mxu0 %v2281_v45  ;;  %v2259_v28 = vld [vmem:[#allocation10 + $0x48] sm:$0xff]  ;;  %v2350_v31 = vld [vmem:[#allocation10 + $0x140] sm:$0xff]  ;;  %v2277_v35 = vld [vmem:[#allocation10 + $0xb8] sm:$0xff] }
 0x3c8   : >> { %2410 = vmatpush.msra.mxu3 %v2403_v15  ;;  %2362 = vmatpush.msra.mxu2 %v2353_v16  ;;  %v2400_v29 = vld [vmem:[#allocation10 + $0x1c8] sm:$0xff]  ;;  %v2258_v32 = vld [vmem:[#allocation10 + $0x40] sm:$0xff]  ;;  %v2349_v36 = vld [vmem:[#allocation10 + $0x138] sm:$0xff] }
 0x3c9   : >> { %2316 = vmatpush.msra.mxu1 %v2261_v17  ;;  %2291 = vmatpush.msra.mxu0 %v2280_v19  ;;  %v2399_v33 = vld [vmem:[#allocation10 + $0x1c0] sm:$0xff]  ;;  %v2257_v37 = vld [vmem:[#allocation10 + $0x38] sm:$0xff]  ;;  %v2276_v39 = vld [vmem:[#allocation10 + $0xb0] sm:$0xff] }
 0x3ca   : >> { %2411 = vmatpush.msra.mxu3 %v2402_v18  ;;  %2363 = vmatpush.msra.mxu2 %v2352_v20  ;;  %v2398_v38 = vld [vmem:[#allocation10 + $0x1b8] sm:$0xff]  ;;  %v2348_v40 = vld [vmem:[#allocation10 + $0x130] sm:$0xff]  ;;  %v2275_v42 = vld [vmem:[#allocation10 + $0xa8] sm:$0xff] }
 0x3cb   : >> { %2317 = vmatpush.msra.mxu1 %v2260_v24  ;;  %2292 = vmatpush.msra.mxu0 %v2279_v26  ;;  %v2256_v41 = vld [vmem:[#allocation10 + $0x30] sm:$0xff]  ;;  %v2347_v43 = vld [vmem:[#allocation10 + $0x128] sm:$0xff]  ;;  %v2274_v47 = vld [vmem:[#allocation10 + $0xa0] sm:$0xff] }
 0x3cc   : >> { %2412 = vmatpush.msra.mxu3 %v2401_v25  ;;  %2364 = vmatpush.msra.mxu2 %v2351_v27  ;;  %v2397_v34 = vld [vmem:[#allocation10 + $0x1b0] sm:$0xff]  ;;  %v2255_v44 = vld [vmem:[#allocation10 + $0x28] sm:$0xff]  ;;  %v2346_v48 = vld [vmem:[#allocation10 + $0x120] sm:$0xff] }
 0x3cd   : >> { %2318 = vmatpush.msra.mxu1 %v2259_v28  ;;  %2293 = vmatpush.msra.mxu0 %v2278_v30  ;;  %v2396_v46 = vld [vmem:[#allocation10 + $0x1a8] sm:$0xff]  ;;  %v2254_v49 = vld [vmem:[#allocation10 + $0x20] sm:$0xff]  ;;  %v2273_v51 = vld [vmem:[#allocation10 + $0x98] sm:$0xff] }
 0x3ce   : >> { %2413 = vmatpush.msra.mxu3 %v2400_v29  ;;  %2365 = vmatpush.msra.mxu2 %v2350_v31  ;;  %v2395_v50 = vld [vmem:[#allocation10 + $0x1a0] sm:$0xff]  ;;  %v2345_v52 = vld [vmem:[#allocation10 + $0x118] sm:$0xff]  ;;  %v2272_v55 = vld [vmem:[#allocation10 + $0x90] sm:$0xff] }
 0x3cf   : >> { %2319 = vmatpush.msra.mxu1 %v2258_v32  ;;  %2294 = vmatpush.msra.mxu0 %v2277_v35  ;;  %v2253_v53 = vld [vmem:[#allocation10 + $0x18] sm:$0xff]  ;;  %v2344_v56 = vld [vmem:[#allocation10 + $0x110] sm:$0xff]  ;;  %v2271_v59 = vld [vmem:[#allocation10 + $0x88] sm:$0xff] }
 0x3d0   : >> { %2414 = vmatpush.msra.mxu3 %v2399_v33  ;;  %2366 = vmatpush.msra.mxu2 %v2349_v36  ;;  %v2394_v54 = vld [vmem:[#allocation10 + $0x198] sm:$0xff]  ;;  %v2252_v57 = vld [vmem:[#allocation10 + $0x10] sm:$0xff]  ;;  %v2343_v60 = vld [vmem:[#allocation10 + $0x108] sm:$0xff] }
 0x3d1   : >> { %2320 = vmatpush.msra.mxu1 %v2257_v37  ;;  %2295 = vmatpush.msra.mxu0 %v2276_v39  ;;  %v2393_v58 = vld [vmem:[#allocation10 + $0x190] sm:$0xff]  ;;  %v2251_v61 = vld [vmem:[#allocation10 + $0x8] sm:$0xff]  ;;  %v2270_v63 = vld [vmem:[#allocation10 + $0x80] sm:$0xff] }
 0x3d2   : >> { %2415 = vmatpush.msra.mxu3 %v2398_v38  ;;  %2367 = vmatpush.msra.mxu2 %v2348_v40  ;;  %v2392_v62 = vld [vmem:[#allocation10 + $0x188] sm:$0xff]  ;;  %v2342_v1 = vld [vmem:[#allocation10 + $0x100] sm:$0xff]  ;;  %v2458_v2 = vld [vmem:[#allocation10 + $0x278] sm:$0xff] }
 0x3d3   : >> { %2321 = vmatpush.msra.mxu1 %v2256_v41  ;;  %2296 = vmatpush.msra.mxu0 %v2275_v42  ;;  %v2556_v4 = vld [vmem:[#allocation10 + $0x378] sm:$0xff]  ;;  %v2250_v5 = vld [vmem:[#allocation10] sm:$0xff]  ;;  %v2457_v7 = vld [vmem:[#allocation10 + $0x270] sm:$0xff] }
 0x3d4   : >> { %2416 = vmatpush.msra.mxu3 %v2397_v34  ;;  %2368 = vmatpush.msra.mxu2 %v2347_v43  ;;  %v2391_v6 = vld [vmem:[#allocation10 + $0x180] sm:$0xff]  ;;  %v2507_v8 = vld [vmem:[#allocation10 + $0x2f8] sm:$0xff]  ;;  %v2555_v9 = vld [vmem:[#allocation10 + $0x370] sm:$0xff] }
 0x3d5   : >> { %2322 = vmatpush.msra.mxu1 %v2255_v44  ;;  %2297 = vmatpush.msra.mxu0 %v2274_v47  ;;  %v2605_v10 = vld [vmem:[#allocation10 + $0x3f8] sm:$0xff]  ;;  %v2456_v0 = vld [vmem:[#allocation10 + $0x268] sm:$0xff]  ;;  %v2506_v21 = vld [vmem:[#allocation10 + $0x2f0] sm:$0xff] }
 0x3d6   : >> { %2417 = vmatpush.msra.mxu3 %v2396_v46  ;;  %2369 = vmatpush.msra.mxu2 %v2346_v48  ;;  %v2554_v22 = vld [vmem:[#allocation10 + $0x368] sm:$0xff]  ;;  %v2604_v23 = vld [vmem:[#allocation10 + $0x3f0] sm:$0xff]  ;;  %v2455_v11 = vld [vmem:[#allocation10 + $0x260] sm:$0xff] }
 0x3d7   : >> { %2323 = vmatpush.msra.mxu1 %v2254_v49  ;;  %2298 = vmatpush.msra.mxu0 %v2273_v51  ;;  %v2505_v12 = vld [vmem:[#allocation10 + $0x2e8] sm:$0xff]  ;;  %v2553_v13 = vld [vmem:[#allocation10 + $0x360] sm:$0xff]  ;;  %v2266_v15 = vld [vmem:[%s7730_s30 + $0x1] sm:$0xff] }
 0x3d8   : >> { %2418 = vmatpush.msra.mxu3 %v2395_v50  ;;  %2370 = vmatpush.msra.mxu2 %v2345_v52  ;;  %v2603_v14 = vld [vmem:[#allocation10 + $0x3e8] sm:$0xff]  ;;  %v2338_v45 = vld [vmem:[%s7730_s30 + $0x2] sm:$0xff]  ;;  %v2504_v17 = vld [vmem:[#allocation10 + $0x2e0] sm:$0xff] }
 0x3d9   : >> { %2324 = vmatpush.msra.mxu1 %v2253_v53  ;;  %2299 = vmatpush.msra.mxu0 %v2272_v55  ;;  %v2454_v16 = vld [vmem:[#allocation10 + $0x258] sm:$0xff]  ;;  %v2602_v19 = vld [vmem:[#allocation10 + $0x3e0] sm:$0xff]  ;;  %v2247_v20 = vld [vmem:[%s7730_s30] sm:$0xff] }
 0x3da   : >> { %2419 = vmatpush.msra.mxu3 %v2394_v54  ;;  %2371 = vmatpush.msra.mxu2 %v2344_v56  ;;  %v2552_v18 = vld [vmem:[#allocation10 + $0x358] sm:$0xff]  ;;  %v2453_v25 = vld [vmem:[#allocation10 + $0x250] sm:$0xff]  ;;  %v2452_v29 = vld [vmem:[#allocation10 + $0x248] sm:$0xff] }
 0x3db   : >> { %2325 = vmatpush.msra.mxu1 %v2252_v57  ;;  %2300 = vmatpush.msra.mxu0 %v2271_v59  ;;  %v2387_v24 = vld [vmem:[%s7730_s30 + $0x3] sm:$0xff]  ;;  %v2550_v31 = vld [vmem:[#allocation10 + $0x348] sm:$0xff]  ;;  %v2451_v33 = vld [vmem:[#allocation10 + $0x240] sm:$0xff] }
 0x3dc   : >> { %2420 = vmatpush.msra.mxu3 %v2393_v58  ;;  %2372 = vmatpush.msra.mxu2 %v2343_v60  ;;  %v2503_v26 = vld [vmem:[#allocation10 + $0x2d8] sm:$0xff]  ;;  %v2551_v27 = vld [vmem:[#allocation10 + $0x350] sm:$0xff]  ;;  %v2501_v35 = vld [vmem:[#allocation10 + $0x2c8] sm:$0xff] }
 0x3dd   : >> { %2326 = vmatpush.msra.mxu1 %v2251_v61  ;;  %2301 = vmatpush.msra.mxu0 %v2270_v63  ;;  %v2601_v28 = vld [vmem:[#allocation10 + $0x3d8] sm:$0xff]  ;;  %v2502_v30 = vld [vmem:[#allocation10 + $0x2d0] sm:$0xff]  ;;  %v2549_v36 = vld [vmem:[#allocation10 + $0x340] sm:$0xff] }
 0x3de   : >> { %2421 = vmatpush.msra.mxu3 %v2392_v62  ;;  %2373 = vmatpush.msra.mxu2 %v2342_v1  ;;  %v2600_v32 = vld [vmem:[#allocation10 + $0x3d0] sm:$0xff]  ;;  %v2599_v37 = vld [vmem:[#allocation10 + $0x3c8] sm:$0xff]  ;;  %v2267_v38 = vld [vmem:[%s7730_s30 + $0x9] sm:$0xff] }
 0x3df   : >> { %2459 = vmatpush.msrb.mxu0 %v2458_v2  ;;  %2327 = vmatpush.msra.mxu1 %v2250_v5  ;;  %v2339_v39 = vld [vmem:[%s7730_s30 + $0xa] sm:$0xff]  ;;  %v2449_v46 = vld [vmem:[#allocation10 + $0x230] sm:$0xff]  ;;  %v2448_v50 = vld [vmem:[#allocation10 + $0x228] sm:$0xff] }
 0x3e0   : >> { %2557 = vmatpush.msrb.mxu2 %v2556_v4  ;;  %2422 = vmatpush.msra.mxu3 %v2391_v6  ;;  %v2450_v40 = vld [vmem:[#allocation10 + $0x238] sm:$0xff]  ;;  %v2500_v41 = vld [vmem:[#allocation10 + $0x2c0] sm:$0xff]  ;;  %v2547_v48 = vld [vmem:[#allocation10 + $0x330] sm:$0xff] }
 0x3e1   : >> { %2460 = vmatpush.msrb.mxu0 %v2457_v7  ;;  %2508 = vmatpush.msrb.mxu1 %v2507_v8  ;;  %v2548_v34 = vld [vmem:[#allocation10 + $0x338] sm:$0xff]  ;;  %v2598_v42 = vld [vmem:[#allocation10 + $0x3c0] sm:$0xff]  ;;  %v2498_v51 = vld [vmem:[#allocation10 + $0x2b0] sm:$0xff] }
 0x3e2   : >> { %2558 = vmatpush.msrb.mxu2 %v2555_v9  ;;  %2606 = vmatpush.msrb.mxu3 %v2605_v10  ;;  %v2248_v43 = vld [vmem:[%s7730_s30 + $0x8] sm:$0xff]  ;;  %v2546_v52 = vld [vmem:[#allocation10 + $0x328] sm:$0xff]  ;;  %v2596_v53 = vld [vmem:[#allocation10 + $0x3b0] sm:$0xff] }
 0x3e3   : >> { %2461 = vmatpush.msrb.mxu0 %v2456_v0  ;;  %2509 = vmatpush.msrb.mxu1 %v2506_v21  ;;  %v2388_v44 = vld [vmem:[%s7730_s30 + $0xb] sm:$0xff]  ;;  %v2497_v55 = vld [vmem:[#allocation10 + $0x2a8] sm:$0xff]  ;;  %v2445_v4 = vld [vmem:[#allocation10 + $0x210] sm:$0xff] }
 0x3e4   : >> { %2559 = vmatpush.msrb.mxu2 %v2554_v22  ;;  %2607 = vmatpush.msrb.mxu3 %v2604_v23  ;;  %v2499_v47 = vld [vmem:[#allocation10 + $0x2b8] sm:$0xff]  ;;  %v2447_v54 = vld [vmem:[#allocation10 + $0x220] sm:$0xff]  ;;  %v2595_v57 = vld [vmem:[#allocation10 + $0x3a8] sm:$0xff] }
 0x3e5   : >> { %2462 = vmatpush.msrb.mxu0 %v2455_v11  ;;  %2510 = vmatpush.msrb.mxu1 %v2505_v12  ;;  %v2597_v49 = vld [vmem:[#allocation10 + $0x3b8] sm:$0xff]  ;;  %v2545_v56 = vld [vmem:[#allocation10 + $0x320] sm:$0xff]  ;;  %v2543_v6 = vld [vmem:[#allocation10 + $0x310] sm:$0xff] }
 0x3e6   : >> { %2560 = vmatpush.msrb.mxu2 %v2553_v13  ;;  %2608 = vmatpush.msrb.mxu3 %v2603_v14  ;;  %v2268_v58 = vld [vmem:[%s7730_s30 + $0x11] sm:$0xff]  ;;  %v2446_v60 = vld [vmem:[#allocation10 + $0x218] sm:$0xff]  ;;  %v2494_v9 = vld [vmem:[#allocation10 + $0x290] sm:$0xff] }
 0x3e7   : >> { %2302 = vmatmul.f32.vlgmr.msra.gmra.mxu0 %v2266_v15  ;;  %2374 = vmatmul.f32.vlgmr.msra.gmra.mxu2 %v2338_v45  ;;  %v2340_v59 = vld [vmem:[%s7730_s30 + $0x12] sm:$0xff]  ;;  %v2544_v62 = vld [vmem:[#allocation10 + $0x318] sm:$0xff]  ;;  %v2592_v0 = vld [vmem:[#allocation10 + $0x390] sm:$0xff] }
 0x3e8   : >> { %2463 = vmatpush.msrb.mxu0 %v2454_v16  ;;  %2511 = vmatpush.msrb.mxu1 %v2504_v17  ;;  %v2496_v61 = vld [vmem:[#allocation10 + $0x2a0] sm:$0xff]  ;;  %v2495_v5 = vld [vmem:[#allocation10 + $0x298] sm:$0xff]  ;;  %v2444_v8 = vld [vmem:[#allocation10 + $0x208] sm:$0xff] }
 0x3e9   : >> { %2561 = vmatpush.msrb.mxu2 %v2552_v18  ;;  %2609 = vmatpush.msrb.mxu3 %v2602_v19  ;;  %v2594_v63 = vld [vmem:[#allocation10 + $0x3a0] sm:$0xff]  ;;  %v2593_v7 = vld [vmem:[#allocation10 + $0x398] sm:$0xff]  ;;  %v2542_v10 = vld [vmem:[#allocation10 + $0x308] sm:$0xff] }
 0x3ea   : >> { %2328 = vmatmul.f32.vlgmr.msra.gmra.mxu1 %v2247_v20  ;;  %2423 = vmatmul.f32.vlgmr.msra.gmra.mxu3 %v2387_v24  ;;  %v2249_v1 = vld [vmem:[%s7730_s30 + $0x10] sm:$0xff]  ;;  %v2493_v22 = vld [vmem:[#allocation10 + $0x288] sm:$0xff]  ;;  %v6113_v12 = vld [vmem:[%s7730_s30 + $0x20] sm:$0xff] }
 0x3eb   : >> { %2464 = vmatpush.msrb.mxu0 %v2453_v25  ;;  %2512 = vmatpush.msrb.mxu1 %v2503_v26  ;;  %v2389_v2 = vld [vmem:[%s7730_s30 + $0x13] sm:$0xff]  ;;  %v6119_v13 = vld [vmem:[%s7730_s30 + $0x22] sm:$0xff] }
 0x3ec   : >> { %2562 = vmatpush.msrb.mxu2 %v2551_v27  ;;  %2610 = vmatpush.msrb.mxu3 %v2601_v28  ;;  %v2443_v21 = vld [vmem:[#allocation10 + $0x200] sm:$0xff]  ;;  %v2591_v11 = vld [vmem:[#allocation10 + $0x388] sm:$0xff]  ;;  %v2657_v14 = vld [vmem:[#allocation10 + $0x478] sm:$0xff] }
 0x3ed   : >> { %2465 = vmatpush.msrb.mxu0 %v2452_v29  ;;  %2513 = vmatpush.msrb.mxu1 %v2502_v30  ;;  %v2541_v23 = vld [vmem:[#allocation10 + $0x300] sm:$0xff]  ;;  %v2755_v15 = vld [vmem:[#allocation10 + $0x578] sm:$0xff]  ;;  %v2656_v19 = vld [vmem:[#allocation10 + $0x470] sm:$0xff] }
 0x3ee   : >> { %2563 = vmatpush.msrb.mxu2 %v2550_v31  ;;  %2611 = vmatpush.msrb.mxu3 %v2600_v32  ;;  %v2492_v45 = vld [vmem:[#allocation10 + $0x280] sm:$0xff]  ;;  %v6116_v17 = vld [vmem:[%s7730_s30 + $0x21] sm:$0xff]  ;;  %v2655_v26 = vld [vmem:[#allocation10 + $0x468] sm:$0xff] }
 0x3ef   : >> { %2466 = vmatpush.msrb.mxu0 %v2451_v33  ;;  %2514 = vmatpush.msrb.mxu1 %v2501_v35  ;;  %v2590_v16 = vld [vmem:[#allocation10 + $0x380] sm:$0xff]  ;;  %v6122_v18 = vld [vmem:[%s7730_s30 + $0x23] sm:$0xff]  ;;  %v2753_v28 = vld [vmem:[#allocation10 + $0x568] sm:$0xff] }
 0x3f0   : >> { %2564 = vmatpush.msrb.mxu2 %v2549_v36  ;;  %2612 = vmatpush.msrb.mxu3 %v2599_v37  ;;  %v2706_v20 = vld [vmem:[#allocation10 + $0x4f8] sm:$0xff]  ;;  %v2754_v24 = vld [vmem:[#allocation10 + $0x570] sm:$0xff]  ;;  %v2654_v30 = vld [vmem:[#allocation10 + $0x460] sm:$0xff] }
 0x3f1   : >> { %2305 = vmatmul.f32.gmra.mxu0 %v2267_v38  ;;  %2377 = vmatmul.f32.gmra.mxu2 %v2339_v39  ;;  %v2804_v25 = vld [vmem:[#allocation10 + $0x5f8] sm:$0xff]  ;;  %v2705_v27 = vld [vmem:[#allocation10 + $0x4f0] sm:$0xff]  ;;  %v2704_v31 = vld [vmem:[#allocation10 + $0x4e8] sm:$0xff] }
 0x3f2   : >> { %2467 = vmatpush.msrb.mxu0 %v2450_v40  ;;  %2515 = vmatpush.msrb.mxu1 %v2500_v41  ;;  %v2803_v29 = vld [vmem:[#allocation10 + $0x5f0] sm:$0xff]  ;;  %v2752_v32 = vld [vmem:[#allocation10 + $0x560] sm:$0xff]  ;;  %v2802_v33 = vld [vmem:[#allocation10 + $0x5e8] sm:$0xff] }
 0x3f3   : >> { %2565 = vmatpush.msrb.mxu2 %v2548_v34  ;;  %2613 = vmatpush.msrb.mxu3 %v2598_v42  ;;  %v6114_v35 = vld [vmem:[%s7730_s30 + $0x28] sm:$0xff]  ;;  %v2703_v38 = vld [vmem:[#allocation10 + $0x4e0] sm:$0xff]  ;;  %v2652_v42 = vld [vmem:[#allocation10 + $0x450] sm:$0xff] }
 0x3f4   : >> { %2331 = vmatmul.f32.gmra.mxu1 %v2248_v43  ;;  %2426 = vmatmul.f32.gmra.mxu3 %v2388_v44  ;;  %v6120_v36 = vld [vmem:[%s7730_s30 + $0x2a] sm:$0xff]  ;;  %v2750_v44 = vld [vmem:[#allocation10 + $0x550] sm:$0xff] }
 0x3f5   : >> { %2468 = vmatpush.msrb.mxu0 %v2449_v46  ;;  %2516 = vmatpush.msrb.mxu1 %v2499_v47  ;;  %v2653_v37 = vld [vmem:[#allocation10 + $0x458] sm:$0xff]  ;;  %v2801_v40 = vld [vmem:[#allocation10 + $0x5e0] sm:$0xff]  ;;  %v2651_v47 = vld [vmem:[#allocation10 + $0x448] sm:$0xff] }
 0x3f6   : >> { %2566 = vmatpush.msrb.mxu2 %v2547_v48  ;;  %2614 = vmatpush.msrb.mxu3 %v2597_v49  ;;  %v2751_v39 = vld [vmem:[#allocation10 + $0x558] sm:$0xff]  ;;  %v2701_v48 = vld [vmem:[#allocation10 + $0x4d0] sm:$0xff]  ;;  %v2749_v49 = vld [vmem:[#allocation10 + $0x548] sm:$0xff] }
 0x3f7   : >> { %2469 = vmatpush.msrb.mxu0 %v2448_v50  ;;  %2517 = vmatpush.msrb.mxu1 %v2498_v51  ;;  %v6117_v41 = vld [vmem:[%s7730_s30 + $0x29] sm:$0xff]  ;;  %v2799_v50 = vld [vmem:[#allocation10 + $0x5d0] sm:$0xff] }
 0x3f8   : >> { %2567 = vmatpush.msrb.mxu2 %v2546_v52  ;;  %2615 = vmatpush.msrb.mxu3 %v2596_v53  ;;  %v6123_v34 = vld [vmem:[%s7730_s30 + $0x2b] sm:$0xff]  ;;  %v2700_v52 = vld [vmem:[#allocation10 + $0x4c8] sm:$0xff] }
 0x3f9   : >> { %2470 = vmatpush.msrb.mxu0 %v2447_v54  ;;  %2518 = vmatpush.msrb.mxu1 %v2497_v55  ;;  %v2702_v43 = vld [vmem:[#allocation10 + $0x4d8] sm:$0xff]  ;;  %v2650_v51 = vld [vmem:[#allocation10 + $0x440] sm:$0xff]  ;;  %v2798_v54 = vld [vmem:[#allocation10 + $0x5c8] sm:$0xff] }
 0x3fa   : >> { %2568 = vmatpush.msrb.mxu2 %v2545_v56  ;;  %2616 = vmatpush.msrb.mxu3 %v2595_v57  ;;  %v2800_v46 = vld [vmem:[#allocation10 + $0x5d8] sm:$0xff]  ;;  %v2748_v53 = vld [vmem:[#allocation10 + $0x540] sm:$0xff] }
 0x3fb   : >> { %2308 = vmatmul.f32.gmra.mxu0 %v2268_v58  ;;  %2380 = vmatmul.f32.gmra.mxu2 %v2340_v59  ;;  %v6115_v55 = vld [vmem:[%s7730_s30 + $0x30] sm:$0xff]  ;;  %v2649_v57 = vld [vmem:[#allocation10 + $0x438] sm:$0xff] }
 0x3fc   : >> { %2471 = vmatpush.msrb.mxu0 %v2446_v60  ;;  %2519 = vmatpush.msrb.mxu1 %v2496_v61  ;;  %v6121_v56 = vld [vmem:[%s7730_s30 + $0x32] sm:$0xff]  ;;  %v2747_v59 = vld [vmem:[#allocation10 + $0x538] sm:$0xff] }
 0x3fd   : >> { %2569 = vmatpush.msrb.mxu2 %v2544_v62  ;;  %2617 = vmatpush.msrb.mxu3 %v2594_v63  ;;  %v2699_v58 = vld [vmem:[#allocation10 + $0x4c0] sm:$0xff]  ;;  %v2648_v63 = vld [vmem:[#allocation10 + $0x430] sm:$0xff] }
 0x3fe   : >> { %2334 = vmatmul.f32.gmra.mxu1 %v2249_v1  ;;  %2429 = vmatmul.f32.gmra.mxu3 %v2389_v2  ;;  %v2797_v60 = vld [vmem:[#allocation10 + $0x5c0] sm:$0xff]  ;;  %v2698_v1 = vld [vmem:[#allocation10 + $0x4b8] sm:$0xff]  ;;  %v2746_v2 = vld [vmem:[#allocation10 + $0x530] sm:$0xff] }
 0x3ff   : >> { %2472 = vmatpush.msrb.mxu0 %v2445_v4  ;;  %2520 = vmatpush.msrb.mxu1 %v2495_v5  ;;  %v6118_v61 = vld [vmem:[%s7730_s30 + $0x31] sm:$0xff]  ;;  %v2796_v4 = vld [vmem:[#allocation10 + $0x5b8] sm:$0xff] }
 0x400   : >> { %2570 = vmatpush.msrb.mxu2 %v2543_v6  ;;  %2618 = vmatpush.msrb.mxu3 %v2593_v7  ;;  %v6124_v62 = vld [vmem:[%s7730_s30 + $0x33] sm:$0xff]  ;;  %v2697_v6 = vld [vmem:[#allocation10 + $0x4b0] sm:$0xff] }
 0x401   : >> { %2473 = vmatpush.msrb.mxu0 %v2444_v8  ;;  %2521 = vmatpush.msrb.mxu1 %v2494_v9  ;;  %v2647_v5 = vld [vmem:[#allocation10 + $0x428] sm:$0xff]  ;;  %v2795_v8 = vld [vmem:[#allocation10 + $0x5b0] sm:$0xff]  ;;  %v2646_v9 = vld [vmem:[#allocation10 + $0x420] sm:$0xff] }
 0x402   : >> { %2571 = vmatpush.msrb.mxu2 %v2542_v10  ;;  %2619 = vmatpush.msrb.mxu3 %v2592_v0  ;;  %v2745_v7 = vld [vmem:[#allocation10 + $0x528] sm:$0xff]  ;;  %v2744_v0 = vld [vmem:[#allocation10 + $0x520] sm:$0xff] }
 0x403   : >> { %2474 = vmatpush.msrb.mxu0 %v2443_v21  ;;  %2522 = vmatpush.msrb.mxu1 %v2493_v22  ;;  %v2696_v10 = vld [vmem:[#allocation10 + $0x4a8] sm:$0xff]  ;;  %v2645_v22 = vld [vmem:[#allocation10 + $0x418] sm:$0xff] }
 0x404   : >> { %2572 = vmatpush.msrb.mxu2 %v2541_v23  ;;  %2620 = vmatpush.msrb.mxu3 %v2591_v11  ;;  %v2794_v21 = vld [vmem:[#allocation10 + $0x5a8] sm:$0xff]  ;;  %v2695_v23 = vld [vmem:[#allocation10 + $0x4a0] sm:$0xff]  ;;  %v2743_v11 = vld [vmem:[#allocation10 + $0x518] sm:$0xff] }
 0x405   : >> { %2475 = vmatmul.f32.vlgmr.msrb.gmra.mxu0 %v6113_v12  ;;  %2573 = vmatmul.f32.vlgmr.msrb.gmra.mxu2 %v6119_v13  ;;  %v2793_v12 = vld [vmem:[#allocation10 + $0x5a0] sm:$0xff]  ;;  %v2644_v13 = vld [vmem:[#allocation10 + $0x410] sm:$0xff] }
 0x406   : >> { %2658 = vmatpush.msra.mxu0 %v2657_v14  ;;  %2756 = vmatpush.msra.mxu2 %v2755_v15  ;;  %v2694_v14 = vld [vmem:[#allocation10 + $0x498] sm:$0xff]  ;;  %v2742_v15 = vld [vmem:[#allocation10 + $0x510] sm:$0xff] }
 0x407   : >> { %2523 = vmatpush.msrb.mxu1 %v2492_v45  ;;  %2621 = vmatpush.msrb.mxu3 %v2590_v16  ;;  %v2792_v45 = vld [vmem:[#allocation10 + $0x598] sm:$0xff]  ;;  %v2643_v16 = vld [vmem:[#allocation10 + $0x408] sm:$0xff] }
 0x408   : >> { %2524 = vmatmul.f32.vlgmr.msrb.gmra.mxu1 %v6116_v17  ;;  %2622 = vmatmul.f32.vlgmr.msrb.gmra.mxu3 %v6122_v18  ;;  %v2693_v17 = vld [vmem:[#allocation10 + $0x490] sm:$0xff]  ;;  %v2741_v18 = vld [vmem:[#allocation10 + $0x508] sm:$0xff] }
 0x409   : >> { %2659 = vmatpush.msra.mxu0 %v2656_v19  ;;  %2707 = vmatpush.msra.mxu1 %v2706_v20  ;;  %v2791_v19 = vld [vmem:[#allocation10 + $0x590] sm:$0xff]  ;;  %v2642_v20 = vld [vmem:[#allocation10 + $0x400] sm:$0xff] }
 0x40a   : >> { %2757 = vmatpush.msra.mxu2 %v2754_v24  ;;  %2805 = vmatpush.msra.mxu3 %v2804_v25  ;;  %v2692_v24 = vld [vmem:[#allocation10 + $0x488] sm:$0xff]  ;;  %v2740_v25 = vld [vmem:[#allocation10 + $0x500] sm:$0xff] }
 0x40b   : >> { %2660 = vmatpush.msra.mxu0 %v2655_v26  ;;  %2708 = vmatpush.msra.mxu1 %v2705_v27  ;;  %v2790_v26 = vld [vmem:[#allocation10 + $0x588] sm:$0xff]  ;;  %v6126_v27 = vld [vmem:[%s7730_s30 + $0x40] sm:$0xff] }
 0x40c   : >> { %2758 = vmatpush.msra.mxu2 %v2753_v28  ;;  %2806 = vmatpush.msra.mxu3 %v2803_v29  ;;  %v6132_v28 = vld [vmem:[%s7730_s30 + $0x42] sm:$0xff] }
 0x40d   : >> { %2661 = vmatpush.msra.mxu0 %v2654_v30  ;;  %2709 = vmatpush.msra.mxu1 %v2704_v31  ;;  %v2856_v29 = vld [vmem:[#allocation10 + $0x678] sm:$0xff]  ;;  %v2691_v31 = vld [vmem:[#allocation10 + $0x480] sm:$0xff] }
 0x40e   : >> { %2759 = vmatpush.msra.mxu2 %v2752_v32  ;;  %2807 = vmatpush.msra.mxu3 %v2802_v33  ;;  %v2954_v30 = vld [vmem:[#allocation10 + $0x778] sm:$0xff]  ;;  %v2789_v32 = vld [vmem:[#allocation10 + $0x580] sm:$0xff] }
 0x40f   : >> { %2478 = vmatmul.f32.gmra.mxu0 %v6114_v35  ;;  %2576 = vmatmul.f32.gmra.mxu2 %v6120_v36  ;;  %v6129_v33 = vld [vmem:[%s7730_s30 + $0x41] sm:$0xff] }
 0x410   : >> { %2662 = vmatpush.msra.mxu0 %v2653_v37  ;;  %2710 = vmatpush.msra.mxu1 %v2703_v38  ;;  %v6135_v35 = vld [vmem:[%s7730_s30 + $0x43] sm:$0xff] }
 0x411   : >> { %2760 = vmatpush.msra.mxu2 %v2751_v39  ;;  %2808 = vmatpush.msra.mxu3 %v2801_v40  ;;  %v2855_v36 = vld [vmem:[#allocation10 + $0x670] sm:$0xff]  ;;  %v2905_v37 = vld [vmem:[#allocation10 + $0x6f8] sm:$0xff]  ;;  %v2854_v40 = vld [vmem:[#allocation10 + $0x668] sm:$0xff] }
 0x412   : >> { %2527 = vmatmul.f32.gmra.mxu1 %v6117_v41  ;;  %2625 = vmatmul.f32.gmra.mxu3 %v6123_v34  ;;  %v2953_v38 = vld [vmem:[#allocation10 + $0x770] sm:$0xff]  ;;  %v3003_v39 = vld [vmem:[#allocation10 + $0x7f8] sm:$0xff]  ;;  %v2952_v34 = vld [vmem:[#allocation10 + $0x768] sm:$0xff] }
 0x413   : >> { %2663 = vmatpush.msra.mxu0 %v2652_v42  ;;  %2711 = vmatpush.msra.mxu1 %v2702_v43  ;;  %v2904_v41 = vld [vmem:[#allocation10 + $0x6f0] sm:$0xff]  ;;  %v2853_v43 = vld [vmem:[#allocation10 + $0x660] sm:$0xff] }
 0x414   : >> { %2761 = vmatpush.msra.mxu2 %v2750_v44  ;;  %2809 = vmatpush.msra.mxu3 %v2800_v46  ;;  %v3002_v42 = vld [vmem:[#allocation10 + $0x7f0] sm:$0xff]  ;;  %v2903_v44 = vld [vmem:[#allocation10 + $0x6e8] sm:$0xff]  ;;  %v2951_v46 = vld [vmem:[#allocation10 + $0x760] sm:$0xff] }
 0x415   : >> { %2664 = vmatpush.msra.mxu0 %v2651_v47  ;;  %2712 = vmatpush.msra.mxu1 %v2701_v48  ;;  %v3001_v47 = vld [vmem:[#allocation10 + $0x7e8] sm:$0xff]  ;;  %v6127_v48 = vld [vmem:[%s7730_s30 + $0x48] sm:$0xff] }
 0x416   : >> { %2762 = vmatpush.msra.mxu2 %v2749_v49  ;;  %2810 = vmatpush.msra.mxu3 %v2799_v50  ;;  %v6133_v49 = vld [vmem:[%s7730_s30 + $0x4a] sm:$0xff] }
 0x417   : >> { %2665 = vmatpush.msra.mxu0 %v2650_v51  ;;  %2713 = vmatpush.msra.mxu1 %v2700_v52  ;;  %v2852_v50 = vld [vmem:[#allocation10 + $0x658] sm:$0xff]  ;;  %v2902_v51 = vld [vmem:[#allocation10 + $0x6e0] sm:$0xff] }
 0x418   : >> { %2763 = vmatpush.msra.mxu2 %v2748_v53  ;;  %2811 = vmatpush.msra.mxu3 %v2798_v54  ;;  %v2950_v52 = vld [vmem:[#allocation10 + $0x758] sm:$0xff]  ;;  %v3000_v53 = vld [vmem:[#allocation10 + $0x7e0] sm:$0xff] }
 0x419   : >> { %2481 = vmatmul.f32.gmra.mxu0 %v6115_v55  ;;  %2579 = vmatmul.f32.gmra.mxu2 %v6121_v56  ;;  %v6130_v54 = vld [vmem:[%s7730_s30 + $0x49] sm:$0xff]  ;;  %v2851_v56 = vld [vmem:[#allocation10 + $0x650] sm:$0xff] }
 0x41a   : >> { %2666 = vmatpush.msra.mxu0 %v2649_v57  ;;  %2714 = vmatpush.msra.mxu1 %v2699_v58  ;;  %v6136_v55 = vld [vmem:[%s7730_s30 + $0x4b] sm:$0xff]  ;;  %v2949_v58 = vld [vmem:[#allocation10 + $0x750] sm:$0xff] }
 0x41b   : >> { %2764 = vmatpush.msra.mxu2 %v2747_v59  ;;  %2812 = vmatpush.msra.mxu3 %v2797_v60  ;;  %v2901_v57 = vld [vmem:[#allocation10 + $0x6d8] sm:$0xff]  ;;  %v2850_v60 = vld [vmem:[#allocation10 + $0x648] sm:$0xff] }
 0x41c   : >> { %2530 = vmatmul.f32.gmra.mxu1 %v6118_v61  ;;  %2628 = vmatmul.f32.gmra.mxu3 %v6124_v62  ;;  %v2999_v59 = vld [vmem:[#allocation10 + $0x7d8] sm:$0xff]  ;;  %v2900_v61 = vld [vmem:[#allocation10 + $0x6d0] sm:$0xff]  ;;  %v2948_v62 = vld [vmem:[#allocation10 + $0x748] sm:$0xff] }
 0x41d   : >> { %2667 = vmatpush.msra.mxu0 %v2648_v63  ;;  %2715 = vmatpush.msra.mxu1 %v2698_v1  ;;  %v2998_v63 = vld [vmem:[#allocation10 + $0x7d0] sm:$0xff]  ;;  %v2849_v1 = vld [vmem:[#allocation10 + $0x640] sm:$0xff] }
 0x41e   : >> { %2765 = vmatpush.msra.mxu2 %v2746_v2  ;;  %2813 = vmatpush.msra.mxu3 %v2796_v4  ;;  %v2899_v2 = vld [vmem:[#allocation10 + $0x6c8] sm:$0xff]  ;;  %v2947_v4 = vld [vmem:[#allocation10 + $0x740] sm:$0xff] }
 0x41f   : >> { %2668 = vmatpush.msra.mxu0 %v2647_v5  ;;  %2716 = vmatpush.msra.mxu1 %v2697_v6  ;;  %v2997_v5 = vld [vmem:[#allocation10 + $0x7c8] sm:$0xff]  ;;  %v6128_v6 = vld [vmem:[%s7730_s30 + $0x50] sm:$0xff] }
 0x420   : >> { %2766 = vmatpush.msra.mxu2 %v2745_v7  ;;  %2814 = vmatpush.msra.mxu3 %v2795_v8  ;;  %v6134_v7 = vld [vmem:[%s7730_s30 + $0x52] sm:$0xff]  ;;  %v2848_v8 = vld [vmem:[#allocation10 + $0x638] sm:$0xff] }
 0x421   : >> { %2669 = vmatpush.msra.mxu0 %v2646_v9  ;;  %2717 = vmatpush.msra.mxu1 %v2696_v10  ;;  %v2898_v9 = vld [vmem:[#allocation10 + $0x6c0] sm:$0xff]  ;;  %v2946_v10 = vld [vmem:[#allocation10 + $0x738] sm:$0xff] }
 0x422   : >> { %2767 = vmatpush.msra.mxu2 %v2744_v0  ;;  %2815 = vmatpush.msra.mxu3 %v2794_v21  ;;  %v2996_v0 = vld [vmem:[#allocation10 + $0x7c0] sm:$0xff] }
 0x423   : >> { %2670 = vmatpush.msra.mxu0 %v2645_v22  ;;  %2718 = vmatpush.msra.mxu1 %v2695_v23  ;;  %v6131_v21 = vld [vmem:[%s7730_s30 + $0x51] sm:$0xff]  ;;  %v2847_v23 = vld [vmem:[#allocation10 + $0x630] sm:$0xff] }
 0x424   : >> { %2768 = vmatpush.msra.mxu2 %v2743_v11  ;;  %2816 = vmatpush.msra.mxu3 %v2793_v12  ;;  %v6137_v22 = vld [vmem:[%s7730_s30 + $0x53] sm:$0xff]  ;;  %v2897_v11 = vld [vmem:[#allocation10 + $0x6b8] sm:$0xff]  ;;  %v2945_v12 = vld [vmem:[#allocation10 + $0x730] sm:$0xff] }
 0x425   : >> { %2671 = vmatpush.msra.mxu0 %v2644_v13  ;;  %2719 = vmatpush.msra.mxu1 %v2694_v14  ;;  %v2995_v13 = vld [vmem:[#allocation10 + $0x7b8] sm:$0xff]  ;;  %v2846_v14 = vld [vmem:[#allocation10 + $0x628] sm:$0xff] }
 0x426   : >> { %2769 = vmatpush.msra.mxu2 %v2742_v15  ;;  %2817 = vmatpush.msra.mxu3 %v2792_v45  ;;  %v2896_v15 = vld [vmem:[#allocation10 + $0x6b0] sm:$0xff]  ;;  %v2944_v45 = vld [vmem:[#allocation10 + $0x728] sm:$0xff] }
 0x427   : >> { %2672 = vmatpush.msra.mxu0 %v2643_v16  ;;  %2720 = vmatpush.msra.mxu1 %v2693_v17  ;;  %v2994_v16 = vld [vmem:[#allocation10 + $0x7b0] sm:$0xff]  ;;  %v2845_v17 = vld [vmem:[#allocation10 + $0x620] sm:$0xff] }
 0x428   : >> { %2770 = vmatpush.msra.mxu2 %v2741_v18  ;;  %2818 = vmatpush.msra.mxu3 %v2791_v19  ;;  %v2895_v18 = vld [vmem:[#allocation10 + $0x6a8] sm:$0xff]  ;;  %v2943_v19 = vld [vmem:[#allocation10 + $0x720] sm:$0xff] }
 0x429   : >> { %2673 = vmatpush.msra.mxu0 %v2642_v20  ;;  %2721 = vmatpush.msra.mxu1 %v2692_v24  ;;  %v2993_v20 = vld [vmem:[#allocation10 + $0x7a8] sm:$0xff]  ;;  %v2844_v24 = vld [vmem:[#allocation10 + $0x618] sm:$0xff] }
 0x42a   : >> { %2771 = vmatpush.msra.mxu2 %v2740_v25  ;;  %2819 = vmatpush.msra.mxu3 %v2790_v26  ;;  %v2894_v25 = vld [vmem:[#allocation10 + $0x6a0] sm:$0xff]  ;;  %v2942_v26 = vld [vmem:[#allocation10 + $0x718] sm:$0xff] }
 0x42b   : >> { %2674 = vmatmul.f32.vlgmr.msra.gmra.mxu0 %v6126_v27  ;;  %2772 = vmatmul.f32.vlgmr.msra.gmra.mxu2 %v6132_v28  ;;  %v2992_v27 = vld [vmem:[#allocation10 + $0x7a0] sm:$0xff]  ;;  %v2843_v28 = vld [vmem:[#allocation10 + $0x610] sm:$0xff] }
 0x42c   : >> { %2857 = vmatpush.msrb.mxu0 %v2856_v29  ;;  %2955 = vmatpush.msrb.mxu2 %v2954_v30  ;;  %v2893_v29 = vld [vmem:[#allocation10 + $0x698] sm:$0xff]  ;;  %v2941_v30 = vld [vmem:[#allocation10 + $0x710] sm:$0xff] }
 0x42d   : >> { %2722 = vmatpush.msra.mxu1 %v2691_v31  ;;  %2820 = vmatpush.msra.mxu3 %v2789_v32  ;;  %v2991_v31 = vld [vmem:[#allocation10 + $0x798] sm:$0xff]  ;;  %v2842_v32 = vld [vmem:[#allocation10 + $0x608] sm:$0xff] }
 0x42e   : >> { %2723 = vmatmul.f32.vlgmr.msra.gmra.mxu1 %v6129_v33  ;;  %2821 = vmatmul.f32.vlgmr.msra.gmra.mxu3 %v6135_v35  ;;  %v2892_v33 = vld [vmem:[#allocation10 + $0x690] sm:$0xff]  ;;  %v2940_v35 = vld [vmem:[#allocation10 + $0x708] sm:$0xff] }
 0x42f   : >> { %2858 = vmatpush.msrb.mxu0 %v2855_v36  ;;  %2906 = vmatpush.msrb.mxu1 %v2905_v37  ;;  %v2990_v36 = vld [vmem:[#allocation10 + $0x790] sm:$0xff]  ;;  %v2841_v37 = vld [vmem:[#allocation10 + $0x600] sm:$0xff] }
 0x430   : >> { %2956 = vmatpush.msrb.mxu2 %v2953_v38  ;;  %3004 = vmatpush.msrb.mxu3 %v3003_v39  ;;  %v2891_v38 = vld [vmem:[#allocation10 + $0x688] sm:$0xff]  ;;  %v2939_v39 = vld [vmem:[#allocation10 + $0x700] sm:$0xff] }
 0x431   : >> { %2859 = vmatpush.msrb.mxu0 %v2854_v40  ;;  %2907 = vmatpush.msrb.mxu1 %v2904_v41  ;;  %v2989_v40 = vld [vmem:[#allocation10 + $0x788] sm:$0xff]  ;;  %v6139_v41 = vld [vmem:[%s7730_s30 + $0x60] sm:$0xff] }
 0x432   : >> { %2957 = vmatpush.msrb.mxu2 %v2952_v34  ;;  %3005 = vmatpush.msrb.mxu3 %v3002_v42  ;;  %v6145_v34 = vld [vmem:[%s7730_s30 + $0x62] sm:$0xff]  ;;  %v2890_v42 = vld [vmem:[#allocation10 + $0x680] sm:$0xff] }
 0x433   : >> { %2860 = vmatpush.msrb.mxu0 %v2853_v43  ;;  %2908 = vmatpush.msrb.mxu1 %v2903_v44  ;;  %v2988_v43 = vld [vmem:[#allocation10 + $0x780] sm:$0xff]  ;;  %v6142_v44 = vld [vmem:[%s7730_s30 + $0x61] sm:$0xff] }
 0x434   : >> { %2958 = vmatpush.msrb.mxu2 %v2951_v46  ;;  %3006 = vmatpush.msrb.mxu3 %v3001_v47  ;;  %v6148_v46 = vld [vmem:[%s7730_s30 + $0x63] sm:$0xff] }
 0x435   : >> { %2677 = vmatmul.f32.gmra.mxu0 %v6127_v48  ;;  %2775 = vmatmul.f32.gmra.mxu2 %v6133_v49  ;;  %v6140_v47 = vld [vmem:[%s7730_s30 + $0x68] sm:$0xff] }
 0x436   : >> { %2861 = vmatpush.msrb.mxu0 %v2852_v50  ;;  %2909 = vmatpush.msrb.mxu1 %v2902_v51  ;;  %v6146_v48 = vld [vmem:[%s7730_s30 + $0x6a] sm:$0xff] }
 0x437   : >> { %2959 = vmatpush.msrb.mxu2 %v2950_v52  ;;  %3007 = vmatpush.msrb.mxu3 %v3000_v53  ;;  %v6143_v49 = vld [vmem:[%s7730_s30 + $0x69] sm:$0xff]  ;;  %v6147_v52 = vld [vmem:[%s7730_s30 + $0x72] sm:$0xff] }
 0x438   : >> { %2726 = vmatmul.f32.gmra.mxu1 %v6130_v54  ;;  %2824 = vmatmul.f32.gmra.mxu3 %v6136_v55  ;;  %v6149_v50 = vld [vmem:[%s7730_s30 + $0x6b] sm:$0xff]  ;;  %v6150_v54 = vld [vmem:[%s7730_s30 + $0x73] sm:$0xff] }
 0x439   : >> { %2862 = vmatpush.msrb.mxu0 %v2851_v56  ;;  %2910 = vmatpush.msrb.mxu1 %v2901_v57  ;;  %v6141_v51 = vld [vmem:[%s7730_s30 + $0x70] sm:$0xff] }
 0x43a   : >> { %2960 = vmatpush.msrb.mxu2 %v2949_v58  ;;  %3008 = vmatpush.msrb.mxu3 %v2999_v59  ;;  %v6144_v53 = vld [vmem:[%s7730_s30 + $0x71] sm:$0xff] }
 0x43b   : >> { %2863 = vmatpush.msrb.mxu0 %v2850_v60  ;;  %2911 = vmatpush.msrb.mxu1 %v2900_v61 }
 0x43c   : >> { %2961 = vmatpush.msrb.mxu2 %v2948_v62  ;;  %3009 = vmatpush.msrb.mxu3 %v2998_v63 }
 0x43d   : >> { %2864 = vmatpush.msrb.mxu0 %v2849_v1  ;;  %2912 = vmatpush.msrb.mxu1 %v2899_v2 }
 0x43e   : >> { %2962 = vmatpush.msrb.mxu2 %v2947_v4  ;;  %3010 = vmatpush.msrb.mxu3 %v2997_v5 }
 0x43f   : >> { %2680 = vmatmul.f32.gmra.mxu0 %v6128_v6  ;;  %2778 = vmatmul.f32.gmra.mxu2 %v6134_v7 }
 0x440   : >> { %2865 = vmatpush.msrb.mxu0 %v2848_v8  ;;  %2913 = vmatpush.msrb.mxu1 %v2898_v9 }
 0x441   : >> { %2963 = vmatpush.msrb.mxu2 %v2946_v10  ;;  %3011 = vmatpush.msrb.mxu3 %v2996_v0 }
 0x442   : >> { %2729 = vmatmul.f32.gmra.mxu1 %v6131_v21  ;;  %2827 = vmatmul.f32.gmra.mxu3 %v6137_v22 }
 0x443   : >> { %2866 = vmatpush.msrb.mxu0 %v2847_v23  ;;  %2914 = vmatpush.msrb.mxu1 %v2897_v11 }
 0x444   : >> { %2964 = vmatpush.msrb.mxu2 %v2945_v12  ;;  %3012 = vmatpush.msrb.mxu3 %v2995_v13 }
 0x445   : >> { %2867 = vmatpush.msrb.mxu0 %v2846_v14  ;;  %2915 = vmatpush.msrb.mxu1 %v2896_v15 }
 0x446   : >> { %2965 = vmatpush.msrb.mxu2 %v2944_v45  ;;  %3013 = vmatpush.msrb.mxu3 %v2994_v16 }
 0x447   : >> { %2868 = vmatpush.msrb.mxu0 %v2845_v17  ;;  %2916 = vmatpush.msrb.mxu1 %v2895_v18 }
 0x448   : >> { %2966 = vmatpush.msrb.mxu2 %v2943_v19  ;;  %3014 = vmatpush.msrb.mxu3 %v2993_v20 }
 0x449   : >> { %2869 = vmatpush.msrb.mxu0 %v2844_v24  ;;  %2917 = vmatpush.msrb.mxu1 %v2894_v25 }
 0x44a   : >> { %2967 = vmatpush.msrb.mxu2 %v2942_v26  ;;  %3015 = vmatpush.msrb.mxu3 %v2992_v27 }
 0x44b   : >> { %2870 = vmatpush.msrb.mxu0 %v2843_v28  ;;  %2918 = vmatpush.msrb.mxu1 %v2893_v29 }
 0x44c   : >> { %2968 = vmatpush.msrb.mxu2 %v2941_v30  ;;  %3016 = vmatpush.msrb.mxu3 %v2991_v31 }
 0x44d   : >> { %2871 = vmatpush.msrb.mxu0 %v2842_v32  ;;  %2919 = vmatpush.msrb.mxu1 %v2892_v33 }
 0x44e   : >> { %2969 = vmatpush.msrb.mxu2 %v2940_v35  ;;  %3017 = vmatpush.msrb.mxu3 %v2990_v36 }
 0x44f   : >> { %2872 = vmatpush.msrb.mxu0 %v2841_v37  ;;  %2920 = vmatpush.msrb.mxu1 %v2891_v38 }
 0x450   : >> { %2970 = vmatpush.msrb.mxu2 %v2939_v39  ;;  %3018 = vmatpush.msrb.mxu3 %v2989_v40 }
 0x451   : >> { %2873 = vmatmul.f32.vlgmr.msrb.gmra.mxu0 %v6139_v41  ;;  %2971 = vmatmul.f32.vlgmr.msrb.gmra.mxu2 %v6145_v34 }
 0x452   : >> { %2921 = vmatpush.msrb.mxu1 %v2890_v42  ;;  %3019 = vmatpush.msrb.mxu3 %v2988_v43 }
 0x453   : >> { %2922 = vmatmul.f32.vlgmr.msrb.gmra.mxu1 %v6142_v44  ;;  %3020 = vmatmul.f32.vlgmr.msrb.gmra.mxu3 %v6148_v46 }
 0x459   : >> { %2876 = vmatmul.f32.gmra.mxu0 %v6140_v47  ;;  %2974 = vmatmul.f32.gmra.mxu2 %v6146_v48 }
 0x45b   : >> { %2925 = vmatmul.f32.gmra.mxu1 %v6143_v49  ;;  %3023 = vmatmul.f32.gmra.mxu3 %v6149_v50 }
 0x461   : >> { %2879 = vmatmul.f32.gmra.mxu0 %v6141_v51  ;;  %2977 = vmatmul.f32.gmra.mxu2 %v6147_v52 }
 0x463   : >> { %2928 = vmatmul.f32.gmra.mxu1 %v6144_v53  ;;  %3026 = vmatmul.f32.gmra.mxu3 %v6150_v54 }
 0x464   : >> { %v2303_v55 = vpop.f32.mrf.mxu0 }
 0x467   : >> { %v2329_v56 = vpop.f32.mrf.mxu1 }
 0x468   : >> { %v2330_v11 = vadd.f32 %v2329_v56, %v2303_v55 }
 0x46a   : >> { %v2375_v57 = vpop.f32.mrf.mxu2 }
 0x46b   : >> { %v2384_v13 = vadd.f32 %v2375_v57, %v2330_v11 }
 0x46d   : >> { %v2424_v58 = vpop.f32.mrf.mxu3 }
 0x46e   : >> { %v2306_v59 = vpop.f32.mrf.mxu0  ;;  %v2433_v16 = vadd.f32 %v2424_v58, %v2384_v13 }
 0x471   : >> { %v2332_v60 = vpop.f32.mrf.mxu1 }
 0x472   : >> { %v2333_v17 = vadd.f32 %v2332_v60, %v2306_v59 }
 0x474   : >> { %v2378_v61 = vpop.f32.mrf.mxu2 }
 0x475   : >> { %v2385_v20 = vadd.f32 %v2378_v61, %v2333_v17 }
 0x477   : >> { %v2427_v62 = vpop.f32.mrf.mxu3 }
 0x478   : >> { %v2309_v63 = vpop.f32.mrf.mxu0  ;;  %v2434_v27 = vadd.f32 %v2427_v62, %v2385_v20 }
 0x47b   : >> { %v2335_v1 = vpop.f32.mrf.mxu1 }
 0x47c   : >> { %v2336_v28 = vadd.f32 %v2335_v1, %v2309_v63  ;;  %v3034_v1 = vperm.slane %v7720_v3, 0 }
 0x47e   : >> { %v2381_v2 = vpop.f32.mrf.mxu2 }
 0x47f   : >> { %v2386_v32 = vadd.f32 %v2381_v2, %v2336_v28  ;;  %v7786_v28 = vld [vmem:[#allocation19] sm:$0x1] (%p2241_p8) }
 0x481   : >> { %v2430_v4 = vpop.f32.mrf.mxu3 }
 0x482   : >> { %v2476_v5 = vpop.f32.mrf.mxu0  ;;  %v2435_v39 = vadd.f32 %v2430_v4, %v2386_v32 }
 0x483   : >> { %v2485_v18 = vadd.f32 %v2476_v5, %v2433_v16 }
 0x485   : >> { %v2525_v6 = vpop.f32.mrf.mxu1 }
 0x486   : >> { %v2534_v25 = vadd.f32 %v2525_v6, %v2485_v18 }
 0x488   : >> { %v2574_v7 = vpop.f32.mrf.mxu2 }
 0x489   : >> { %v2583_v29 = vadd.f32 %v2574_v7, %v2534_v25 }
 0x48b   : >> { %v2623_v8 = vpop.f32.mrf.mxu3 }
 0x48c   : >> { %v2479_v9 = vpop.f32.mrf.mxu0  ;;  %v2632_v33 = vadd.f32 %v2623_v8, %v2583_v29 }
 0x48d   : >> { %v2486_v31 = vadd.f32 %v2479_v9, %v2434_v27 }
 0x48f   : >> { %v2528_v10 = vpop.f32.mrf.mxu1 }
 0x490   : >> { %v2535_v36 = vadd.f32 %v2528_v10, %v2486_v31 }
 0x492   : >> { %v2577_v0 = vpop.f32.mrf.mxu2 }
 0x493   : >> { %v2584_v40 = vadd.f32 %v2577_v0, %v2535_v36 }
 0x495   : >> { %v2626_v21 = vpop.f32.mrf.mxu3 }
 0x496   : >> { %v2482_v22 = vpop.f32.mrf.mxu0  ;;  %v2633_v44 = vadd.f32 %v2626_v21, %v2584_v40 }
 0x497   : >> { %v2487_v34 = vadd.f32 %v2482_v22, %v2435_v39 }
 0x499   : >> { %v2531_v23 = vpop.f32.mrf.mxu1 }
 0x49a   : >> { %v2536_v47 = vadd.f32 %v2531_v23, %v2487_v34 }
 0x49c   : >> { %v2580_v12 = vpop.f32.mrf.mxu2 }
 0x49d   : >> { %v2585_v50 = vadd.f32 %v2580_v12, %v2536_v47 }
 0x49f   : >> { %v2629_v14 = vpop.f32.mrf.mxu3 }
 0x4a0   : >> { %v2634_v57 = vadd.f32 %v2629_v14, %v2585_v50 }
 0x4a8   : >> { %v2675_v15 = vpop.f32.mrf.mxu0 }
 0x4a9   : >> { %v2684_v37 = vadd.f32 %v2675_v15, %v2632_v33 }
 0x4ab   : >> { %v2724_v45 = vpop.f32.mrf.mxu1 }
 0x4ac   : >> { %v2733_v42 = vadd.f32 %v2724_v45, %v2684_v37 }
 0x4ae   : >> { %v2773_v19 = vpop.f32.mrf.mxu2 }
 0x4af   : >> { %v2782_v46 = vadd.f32 %v2773_v19, %v2733_v42 }
 0x4b1   : >> { %v2822_v24 = vpop.f32.mrf.mxu3 }
 0x4b2   : >> { %v2678_v26 = vpop.f32.mrf.mxu0  ;;  %v2831_v51 = vadd.f32 %v2822_v24, %v2782_v46 }
 0x4b3   : >> { %v2685_v48 = vadd.f32 %v2678_v26, %v2633_v44 }
 0x4b5   : >> { %v2727_v30 = vpop.f32.mrf.mxu1 }
 0x4b6   : >> { %v2734_v54 = vadd.f32 %v2727_v30, %v2685_v48 }
 0x4b8   : >> { %v2776_v35 = vpop.f32.mrf.mxu2 }
 0x4b9   : >> { %v2783_v58 = vadd.f32 %v2776_v35, %v2734_v54 }
 0x4bb   : >> { %v2825_v38 = vpop.f32.mrf.mxu3 }
 0x4bc   : >> { %v2681_v41 = vpop.f32.mrf.mxu0  ;;  %v2832_v62 = vadd.f32 %v2825_v38, %v2783_v58 }
 0x4bd   : >> { %v2686_v59 = vadd.f32 %v2681_v41, %v2634_v57 }
 0x4bf   : >> { %v2730_v43 = vpop.f32.mrf.mxu1 }
 0x4c0   : >> { %v2735_v5 = vadd.f32 %v2730_v43, %v2686_v59 }
 0x4c2   : >> { %v2779_v49 = vpop.f32.mrf.mxu2 }
 0x4c3   : >> { %v2784_v9 = vadd.f32 %v2779_v49, %v2735_v5 }
 0x4c5   : >> { %v2828_v52 = vpop.f32.mrf.mxu3 }
 0x4c6   : >> { %v2833_v23 = vadd.f32 %v2828_v52, %v2784_v9 }
 0x4ce   : >> { %v2874_v53 = vpop.f32.mrf.mxu0 }
 0x4cf   : >> { %v2883_v55 = vadd.f32 %v2874_v53, %v2831_v51 }
 0x4d0   : >> { %v2923_v56 = vpop.f32.mrf.mxu1 }
 0x4d1   : >> { %v2932_v60 = vadd.f32 %v2923_v56, %v2883_v55 }
 0x4d4   : >> { %v2972_v61 = vpop.f32.mrf.mxu2 }
 0x4d5   : >> { %v2981_v63 = vadd.f32 %v2972_v61, %v2932_v60 }
 0x4d6   : >> { %v2877_v2 = vpop.f32.mrf.mxu0  ;;  %v3021_v4 = vpop.f32.mrf.mxu3 }
 0x4d7   : >> { %v2884_v6 = vadd.f32 %v2877_v2, %v2832_v62  ;;  %v3030_v7 = vadd.f32 %v3021_v4, %v2981_v63 }
 0x4d8   : >> { %v2926_v8 = vpop.f32.mrf.mxu1 }
 0x4d9   : >> { %v3036_v10 = vadd.f32 %v3034_v1, %v3030_v7  ;;  %v2933_v21 = vadd.f32 %v2926_v8, %v2884_v6 }
 0x4db   : >> { %v3039_v0 = vmax.f32 %v3036_v10, 0.0 }
 0x4dc   : >> { %v2975_v22 = vpop.f32.mrf.mxu2 }
 0x4dd   : >> { %6152 = vst [vmem:[%s5866_s18 + $0x84] sm:$0xff] %v3039_v0  ;;  %v2982_v11 = vadd.f32 %v2975_v22, %v2933_v21 }
 0x4de   : >> { %v2880_v12 = vpop.f32.mrf.mxu0  ;;  %v3024_v13 = vpop.f32.mrf.mxu3 }
 0x4df   : >> { %v2885_v14 = vadd.f32 %v2880_v12, %v2833_v23  ;;  %v3031_v15 = vadd.f32 %v3024_v13, %v2982_v11 }
 0x4e0   : >> { %v2929_v45 = vpop.f32.mrf.mxu1 }
 0x4e1   : >> { %v3037_v16 = vadd.f32 %v3034_v1, %v3031_v15  ;;  %v2934_v18 = vadd.f32 %v2929_v45, %v2885_v14 }
 0x4e3   : >> { %v3040_v17 = vmax.f32 %v3037_v16, 0.0 }
 0x4e4   : >> { %v2978_v19 = vpop.f32.mrf.mxu2 }
 0x4e5   : >> { %6153 = vst [vmem:[%s5866_s18 + $0x8c] sm:$0xff] %v3040_v17  ;;  %v2983_v20 = vadd.f32 %v2978_v19, %v2934_v18 }
 0x4e6   : >> { %v3027_v24 = vpop.f32.mrf.mxu3 }
 0x4e7   : >> { %v3032_v25 = vadd.f32 %v3027_v24, %v2983_v20 }
 0x4e9   : >> { %v3038_v26 = vadd.f32 %v3034_v1, %v3032_v25  ;;  %2243 = sbr.rel (!%p2241_p8) target bundleno = 958 (0x3be), region = 271 }
 0x4eb   : >> { %v3041_v27 = vmax.f32 %v3038_v26, 0.0 }
 0x4ed   : >> { %6154 = vst [vmem:[%s5866_s18 + $0x94] sm:$0xff] %v3041_v27 }
 0x4ee LB: >> { %v3097_v29 = vld [vmem:[#allocation11 + $0xf8] sm:$0xff]  ;;  %v3096_v33 = vld [vmem:[#allocation11 + $0xf0] sm:$0xff]  ;;  %v3095_v37 = vld [vmem:[#allocation11 + $0xe8] sm:$0xff]  ;;  %s6155_s26 = sshll.u32 %s6946_s16, 5  ;;  %s5882_s28 = smul.u32 40, %s6946_s16  ;;  %s6946_s16 = sphi %s7788_s16, %s3054_s16  }
 0x4ef   : >> { %v3076_v30 = vld [vmem:[#allocation11 + $0x78] sm:$0xff]  ;;  %3098 = vmatpush.msra.mxu0 %v3097_v29  ;;  %v3075_v35 = vld [vmem:[#allocation11 + $0x70] sm:$0xff]  ;;  %v3074_v38 = vld [vmem:[#allocation11 + $0x68] sm:$0xff]  ;;  %s7794_s22 = scalar_lea.vmem [#allocation4], %s6155_s26  ;;  %s3054_s16 = sadd.s32 1, %s6946_s16  }
 0x4f0   : >> { %v3176_v31 = vld [vmem:[#allocation11 + $0x178] sm:$0xff]  ;;  %3127 = vmatpush.msra.mxu1 %v3076_v30  ;;  %v3175_v36 = vld [vmem:[#allocation11 + $0x170] sm:$0xff]  ;;  %v3174_v39 = vld [vmem:[#allocation11 + $0x168] sm:$0xff]  ;;  %s5883_s13 = scalar_lea.vmem [#allocation5], %s5882_s28  ;;  %p3051_p9 = scmp.ge.s32.totalorder %s3054_s16, 28  }
 0x4f1   : >> { %v3230_v32 = vld [vmem:[#allocation11 + $0x1f8] sm:$0xff]  ;;  %3177 = vmatpush.msra.mxu2 %v3176_v31  ;;  %v3229_v3 = vld [vmem:[#allocation11 + $0x1f0] sm:$0xff]  ;;  %3099 = vmatpush.msra.mxu0 %v3096_v33  ;;  %v3228_v40 = vld [vmem:[#allocation11 + $0x1e8] sm:$0xff]  ;;  %s7942_s23 = smov (%p3051_p9), 0  }
 0x4f2   : >> { %3231 = vmatpush.msra.mxu3 %v3230_v32  ;;  %3128 = vmatpush.msra.mxu1 %v3075_v35  ;;  %v3094_v41 = vld [vmem:[#allocation11 + $0xe0] sm:$0xff]  ;;  %v3093_v44 = vld [vmem:[#allocation11 + $0xd8] sm:$0xff]  ;;  %v3092_v49 = vld [vmem:[#allocation11 + $0xd0] sm:$0xff] }
 0x4f3   : >> { %3178 = vmatpush.msra.mxu2 %v3175_v36  ;;  %v3073_v34 = vld [vmem:[#allocation11 + $0x60] sm:$0xff]  ;;  %3100 = vmatpush.msra.mxu0 %v3095_v37  ;;  %v3072_v46 = vld [vmem:[#allocation11 + $0x58] sm:$0xff]  ;;  %v3071_v50 = vld [vmem:[#allocation11 + $0x50] sm:$0xff] }
 0x4f4   : >> { %3232 = vmatpush.msra.mxu3 %v3229_v3  ;;  %3129 = vmatpush.msra.mxu1 %v3074_v38  ;;  %v3173_v42 = vld [vmem:[#allocation11 + $0x160] sm:$0xff]  ;;  %v3172_v47 = vld [vmem:[#allocation11 + $0x158] sm:$0xff]  ;;  %v3171_v51 = vld [vmem:[#allocation11 + $0x150] sm:$0xff] }
 0x4f5   : >> { %v3227_v43 = vld [vmem:[#allocation11 + $0x1e0] sm:$0xff]  ;;  %3179 = vmatpush.msra.mxu2 %v3174_v39  ;;  %3101 = vmatpush.msra.mxu0 %v3094_v41  ;;  %v3226_v48 = vld [vmem:[#allocation11 + $0x1d8] sm:$0xff]  ;;  %v3225_v52 = vld [vmem:[#allocation11 + $0x1d0] sm:$0xff] }
 0x4f6   : >> { %3233 = vmatpush.msra.mxu3 %v3228_v40  ;;  %3130 = vmatpush.msra.mxu1 %v3073_v34  ;;  %v3091_v53 = vld [vmem:[#allocation11 + $0xc8] sm:$0xff]  ;;  %v3090_v57 = vld [vmem:[#allocation11 + $0xc0] sm:$0xff]  ;;  %v3089_v61 = vld [vmem:[#allocation11 + $0xb8] sm:$0xff] }
 0x4f7   : >> { %3180 = vmatpush.msra.mxu2 %v3173_v42  ;;  %3102 = vmatpush.msra.mxu0 %v3093_v44  ;;  %v3070_v54 = vld [vmem:[#allocation11 + $0x48] sm:$0xff]  ;;  %v3069_v58 = vld [vmem:[#allocation11 + $0x40] sm:$0xff]  ;;  %v3068_v62 = vld [vmem:[#allocation11 + $0x38] sm:$0xff] }
 0x4f8   : >> { %3234 = vmatpush.msra.mxu3 %v3227_v43  ;;  %3131 = vmatpush.msra.mxu1 %v3072_v46  ;;  %v3170_v55 = vld [vmem:[#allocation11 + $0x148] sm:$0xff]  ;;  %v3169_v59 = vld [vmem:[#allocation11 + $0x140] sm:$0xff]  ;;  %v3168_v63 = vld [vmem:[#allocation11 + $0x138] sm:$0xff] }
 0x4f9   : >> { %3181 = vmatpush.msra.mxu2 %v3172_v47  ;;  %3103 = vmatpush.msra.mxu0 %v3092_v49  ;;  %v3224_v56 = vld [vmem:[#allocation11 + $0x1c8] sm:$0xff]  ;;  %v3223_v60 = vld [vmem:[#allocation11 + $0x1c0] sm:$0xff]  ;;  %v3222_v1 = vld [vmem:[#allocation11 + $0x1b8] sm:$0xff] }
 0x4fa   : >> { %3235 = vmatpush.msra.mxu3 %v3226_v48  ;;  %3132 = vmatpush.msra.mxu1 %v3071_v50  ;;  %v3088_v2 = vld [vmem:[#allocation11 + $0xb0] sm:$0xff]  ;;  %v3087_v7 = vld [vmem:[#allocation11 + $0xa8] sm:$0xff]  ;;  %v3086_v0 = vld [vmem:[#allocation11 + $0xa0] sm:$0xff] }
 0x4fb   : >> { %3182 = vmatpush.msra.mxu2 %v3171_v51  ;;  %3104 = vmatpush.msra.mxu0 %v3091_v53  ;;  %v3067_v4 = vld [vmem:[#allocation11 + $0x30] sm:$0xff]  ;;  %v3066_v8 = vld [vmem:[#allocation11 + $0x28] sm:$0xff]  ;;  %v3065_v21 = vld [vmem:[#allocation11 + $0x20] sm:$0xff] }
 0x4fc   : >> { %3236 = vmatpush.msra.mxu3 %v3225_v52  ;;  %3133 = vmatpush.msra.mxu1 %v3070_v54  ;;  %v3167_v5 = vld [vmem:[#allocation11 + $0x130] sm:$0xff]  ;;  %v3166_v9 = vld [vmem:[#allocation11 + $0x128] sm:$0xff]  ;;  %v3165_v22 = vld [vmem:[#allocation11 + $0x120] sm:$0xff] }
 0x4fd   : >> { %3183 = vmatpush.msra.mxu2 %v3170_v55  ;;  %3105 = vmatpush.msra.mxu0 %v3090_v57  ;;  %v3221_v6 = vld [vmem:[#allocation11 + $0x1b0] sm:$0xff]  ;;  %v3220_v10 = vld [vmem:[#allocation11 + $0x1a8] sm:$0xff]  ;;  %v3219_v23 = vld [vmem:[#allocation11 + $0x1a0] sm:$0xff] }
 0x4fe   : >> { %3237 = vmatpush.msra.mxu3 %v3224_v56  ;;  %3134 = vmatpush.msra.mxu1 %v3069_v58  ;;  %v3085_v11 = vld [vmem:[#allocation11 + $0x98] sm:$0xff]  ;;  %v3084_v15 = vld [vmem:[#allocation11 + $0x90] sm:$0xff]  ;;  %v3083_v18 = vld [vmem:[#allocation11 + $0x88] sm:$0xff] }
 0x4ff   : >> { %3184 = vmatpush.msra.mxu2 %v3169_v59  ;;  %3106 = vmatpush.msra.mxu0 %v3089_v61  ;;  %v3064_v12 = vld [vmem:[#allocation11 + $0x18] sm:$0xff]  ;;  %v3063_v45 = vld [vmem:[#allocation11 + $0x10] sm:$0xff]  ;;  %v3062_v19 = vld [vmem:[#allocation11 + $0x8] sm:$0xff] }
 0x500   : >> { %3238 = vmatpush.msra.mxu3 %v3223_v60  ;;  %3135 = vmatpush.msra.mxu1 %v3068_v62  ;;  %v3164_v13 = vld [vmem:[#allocation11 + $0x118] sm:$0xff]  ;;  %v3163_v16 = vld [vmem:[#allocation11 + $0x110] sm:$0xff]  ;;  %v3162_v20 = vld [vmem:[#allocation11 + $0x108] sm:$0xff] }
 0x501   : >> { %3185 = vmatpush.msra.mxu2 %v3168_v63  ;;  %3107 = vmatpush.msra.mxu0 %v3088_v2  ;;  %v3218_v14 = vld [vmem:[#allocation11 + $0x198] sm:$0xff]  ;;  %v3217_v17 = vld [vmem:[#allocation11 + $0x190] sm:$0xff]  ;;  %v3216_v24 = vld [vmem:[#allocation11 + $0x188] sm:$0xff] }
 0x502   : >> { %3239 = vmatpush.msra.mxu3 %v3222_v1  ;;  %3136 = vmatpush.msra.mxu1 %v3067_v4  ;;  %v3082_v25 = vld [vmem:[#allocation11 + $0x80] sm:$0xff]  ;;  %v3077_v30 = vld [vmem:[%s7794_s22 + $0x1] sm:$0xff]  ;;  %v3393_v34 = vld [vmem:[#allocation11 + $0x368] sm:$0xff] }
 0x503   : >> { %3186 = vmatpush.msra.mxu2 %v3167_v5  ;;  %3108 = vmatpush.msra.mxu0 %v3087_v7  ;;  %v3061_v26 = vld [vmem:[#allocation11] sm:$0xff]  ;;  %v3057_v31 = vld [vmem:[%s7794_s22] sm:$0xff]  ;;  %v3395_v35 = vld [vmem:[#allocation11 + $0x378] sm:$0xff] }
 0x504   : >> { %3240 = vmatpush.msra.mxu3 %v3221_v6  ;;  %3137 = vmatpush.msra.mxu1 %v3066_v8  ;;  %v3161_v27 = vld [vmem:[#allocation11 + $0x100] sm:$0xff]  ;;  %v3156_v32 = vld [vmem:[%s7794_s22 + $0x2] sm:$0xff]  ;;  %v3447_v42 = vld [vmem:[#allocation11 + $0x3e8] sm:$0xff] }
 0x505   : >> { %3187 = vmatpush.msra.mxu2 %v3166_v9  ;;  %3109 = vmatpush.msra.mxu0 %v3086_v0  ;;  %v3215_v29 = vld [vmem:[#allocation11 + $0x180] sm:$0xff]  ;;  %v3210_v33 = vld [vmem:[%s7794_s22 + $0x3] sm:$0xff]  ;;  %v3282_v43 = vld [vmem:[#allocation11 + $0x268] sm:$0xff] }
 0x506   : >> { %3241 = vmatpush.msra.mxu3 %v3220_v10  ;;  %3138 = vmatpush.msra.mxu1 %v3065_v21  ;;  %v3449_v36 = vld [vmem:[#allocation11 + $0x3f8] sm:$0xff]  ;;  %v3394_v38 = vld [vmem:[#allocation11 + $0x370] sm:$0xff]  ;;  %v3339_v44 = vld [vmem:[#allocation11 + $0x2e8] sm:$0xff] }
 0x507   : >> { %3188 = vmatpush.msra.mxu2 %v3165_v22  ;;  %3110 = vmatpush.msra.mxu0 %v3085_v11  ;;  %v3284_v3 = vld [vmem:[#allocation11 + $0x278] sm:$0xff]  ;;  %v3448_v39 = vld [vmem:[#allocation11 + $0x3f0] sm:$0xff]  ;;  %v3392_v46 = vld [vmem:[#allocation11 + $0x360] sm:$0xff] }
 0x508   : >> { %3242 = vmatpush.msra.mxu3 %v3219_v23  ;;  %3139 = vmatpush.msra.mxu1 %v3064_v12  ;;  %v3341_v37 = vld [vmem:[#allocation11 + $0x2f8] sm:$0xff]  ;;  %v3283_v40 = vld [vmem:[#allocation11 + $0x270] sm:$0xff]  ;;  %v3446_v47 = vld [vmem:[#allocation11 + $0x3e0] sm:$0xff] }
 0x509   : >> { %3189 = vmatpush.msra.mxu2 %v3164_v13  ;;  %3111 = vmatpush.msra.mxu0 %v3084_v15  ;;  %v3340_v41 = vld [vmem:[#allocation11 + $0x2f0] sm:$0xff]  ;;  %v3281_v48 = vld [vmem:[#allocation11 + $0x260] sm:$0xff]  ;;  %v3058_v51 = vld [vmem:[%s7794_s22 + $0x8] sm:$0xff] }
 0x50a   : >> { %3243 = vmatpush.msra.mxu3 %v3218_v14  ;;  %3140 = vmatpush.msra.mxu1 %v3063_v45  ;;  %v3338_v49 = vld [vmem:[#allocation11 + $0x2e0] sm:$0xff]  ;;  %v3391_v54 = vld [vmem:[#allocation11 + $0x358] sm:$0xff]  ;;  %v3390_v58 = vld [vmem:[#allocation11 + $0x350] sm:$0xff] }
 0x50b   : >> { %3190 = vmatpush.msra.mxu2 %v3163_v16  ;;  %3112 = vmatpush.msra.mxu0 %v3083_v18  ;;  %v3078_v50 = vld [vmem:[%s7794_s22 + $0x9] sm:$0xff]  ;;  %v3444_v59 = vld [vmem:[#allocation11 + $0x3d0] sm:$0xff]  ;;  %v3389_v62 = vld [vmem:[#allocation11 + $0x348] sm:$0xff] }
 0x50c   : >> { %3244 = vmatpush.msra.mxu3 %v3217_v17  ;;  %3141 = vmatpush.msra.mxu1 %v3062_v19  ;;  %v3157_v52 = vld [vmem:[%s7794_s22 + $0xa] sm:$0xff]  ;;  %v3279_v60 = vld [vmem:[#allocation11 + $0x250] sm:$0xff]  ;;  %v3443_v63 = vld [vmem:[#allocation11 + $0x3c8] sm:$0xff] }
 0x50d   : >> { %3191 = vmatpush.msra.mxu2 %v3162_v20  ;;  %3113 = vmatpush.msra.mxu0 %v3082_v25  ;;  %v3211_v53 = vld [vmem:[%s7794_s22 + $0xb] sm:$0xff]  ;;  %v3336_v61 = vld [vmem:[#allocation11 + $0x2d0] sm:$0xff]  ;;  %v3278_v1 = vld [vmem:[#allocation11 + $0x248] sm:$0xff] }
 0x50e   : >> { %3245 = vmatpush.msra.mxu3 %v3216_v24  ;;  %3142 = vmatpush.msra.mxu1 %v3061_v26  ;;  %v3445_v55 = vld [vmem:[#allocation11 + $0x3d8] sm:$0xff]  ;;  %v3335_v2 = vld [vmem:[#allocation11 + $0x2c8] sm:$0xff]  ;;  %v3388_v4 = vld [vmem:[#allocation11 + $0x340] sm:$0xff] }
 0x50f   : >> { %3192 = vmatpush.msra.mxu2 %v3161_v27  ;;  %3114 = vmatmul.f32.vlgmr.msra.gmra.mxu0 %v3077_v30  ;;  %v3280_v56 = vld [vmem:[#allocation11 + $0x258] sm:$0xff]  ;;  %v3442_v5 = vld [vmem:[#allocation11 + $0x3c0] sm:$0xff]  ;;  %v3386_v12 = vld [vmem:[#allocation11 + $0x330] sm:$0xff] }
 0x510   : >> { %3246 = vmatpush.msra.mxu3 %v3215_v29  ;;  %3143 = vmatmul.f32.vlgmr.msra.gmra.mxu1 %v3057_v31  ;;  %v3337_v57 = vld [vmem:[#allocation11 + $0x2d8] sm:$0xff]  ;;  %v3277_v6 = vld [vmem:[#allocation11 + $0x240] sm:$0xff]  ;;  %v3440_v13 = vld [vmem:[#allocation11 + $0x3b0] sm:$0xff] }
 0x511   : >> { %3193 = vmatmul.f32.vlgmr.msra.gmra.mxu2 %v3156_v32  ;;  %3247 = vmatmul.f32.vlgmr.msra.gmra.mxu3 %v3210_v33  ;;  %v3334_v7 = vld [vmem:[#allocation11 + $0x2c0] sm:$0xff]  ;;  %v3387_v21 = vld [vmem:[#allocation11 + $0x338] sm:$0xff]  ;;  %v3275_v14 = vld [vmem:[#allocation11 + $0x230] sm:$0xff] }
 0x512   : >> { %3396 = vmatpush.msrb.mxu2 %v3395_v35  ;;  %3450 = vmatpush.msrb.mxu3 %v3449_v36  ;;  %v3079_v8 = vld [vmem:[%s7794_s22 + $0x11] sm:$0xff]  ;;  %v3441_v22 = vld [vmem:[#allocation11 + $0x3b8] sm:$0xff]  ;;  %v3332_v15 = vld [vmem:[#allocation11 + $0x2b0] sm:$0xff] }
 0x513   : >> { %3285 = vmatpush.msrb.mxu0 %v3284_v3  ;;  %3342 = vmatpush.msrb.mxu1 %v3341_v37  ;;  %v3059_v9 = vld [vmem:[%s7794_s22 + $0x10] sm:$0xff]  ;;  %v3276_v23 = vld [vmem:[#allocation11 + $0x238] sm:$0xff]  ;;  %v3385_v45 = vld [vmem:[#allocation11 + $0x328] sm:$0xff] }
 0x514   : >> { %3397 = vmatpush.msrb.mxu2 %v3394_v38  ;;  %3451 = vmatpush.msrb.mxu3 %v3448_v39  ;;  %v3158_v10 = vld [vmem:[%s7794_s22 + $0x12] sm:$0xff]  ;;  %v3333_v11 = vld [vmem:[#allocation11 + $0x2b8] sm:$0xff]  ;;  %v3159_v29 = vld [vmem:[%s7794_s22 + $0x1a] sm:$0xf] }
 0x515   : >> { %3286 = vmatpush.msrb.mxu0 %v3283_v40  ;;  %3343 = vmatpush.msrb.mxu1 %v3340_v41  ;;  %v3212_v0 = vld [vmem:[%s7794_s22 + $0x13] sm:$0xff]  ;;  %v3213_v30 = vld [vmem:[%s7794_s22 + $0x1b] sm:$0xf]  ;;  %v3383_v31 = vld [vmem:[#allocation11 + $0x318] sm:$0xff] }
 0x516   : >> { %3398 = vmatpush.msrb.mxu2 %v3393_v34  ;;  %3452 = vmatpush.msrb.mxu3 %v3447_v42  ;;  %v3439_v16 = vld [vmem:[#allocation11 + $0x3a8] sm:$0xff]  ;;  %v3384_v19 = vld [vmem:[#allocation11 + $0x320] sm:$0xff]  ;;  %v3437_v32 = vld [vmem:[#allocation11 + $0x398] sm:$0xff] }
 0x517   : >> { %3287 = vmatpush.msrb.mxu0 %v3282_v43  ;;  %3344 = vmatpush.msrb.mxu1 %v3339_v44  ;;  %v3274_v17 = vld [vmem:[#allocation11 + $0x228] sm:$0xff]  ;;  %v3438_v20 = vld [vmem:[#allocation11 + $0x3a0] sm:$0xff]  ;;  %v3272_v33 = vld [vmem:[#allocation11 + $0x218] sm:$0xff] }
 0x518   : >> { %3399 = vmatpush.msrb.mxu2 %v3392_v46  ;;  %3453 = vmatpush.msrb.mxu3 %v3446_v47  ;;  %v3331_v18 = vld [vmem:[#allocation11 + $0x2a8] sm:$0xff]  ;;  %v3273_v24 = vld [vmem:[#allocation11 + $0x220] sm:$0xff]  ;;  %v3329_v35 = vld [vmem:[#allocation11 + $0x298] sm:$0xff] }
 0x519   : >> { %3288 = vmatpush.msrb.mxu0 %v3281_v48  ;;  %3345 = vmatpush.msrb.mxu1 %v3338_v49  ;;  %v3330_v25 = vld [vmem:[#allocation11 + $0x2a0] sm:$0xff]  ;;  %v3080_v26 = vld [vmem:[%s7794_s22 + $0x19] sm:$0xf]  ;;  %v3382_v36 = vld [vmem:[#allocation11 + $0x310] sm:$0xff] }
 0x51a   : >> { %3117 = vmatmul.f32.gmra.mxu0 %v3078_v50  ;;  %3146 = vmatmul.f32.gmra.mxu1 %v3058_v51  ;;  %v3060_v27 = vld [vmem:[%s7794_s22 + $0x18] sm:$0xf]  ;;  %v3436_v3 = vld [vmem:[#allocation11 + $0x390] sm:$0xff]  ;;  %v3380_v42 = vld [vmem:[#allocation11 + $0x300] sm:$0xff] }
 0x51b   : >> { %3196 = vmatmul.f32.gmra.mxu2 %v3157_v52  ;;  %3250 = vmatmul.f32.gmra.mxu3 %v3211_v53  ;;  %v3271_v37 = vld [vmem:[#allocation11 + $0x210] sm:$0xff]  ;;  %v3381_v39 = vld [vmem:[#allocation11 + $0x308] sm:$0xff]  ;;  %v3434_v43 = vld [vmem:[#allocation11 + $0x380] sm:$0xff] }
 0x51c   : >> { %3400 = vmatpush.msrb.mxu2 %v3391_v54  ;;  %3454 = vmatpush.msrb.mxu3 %v3445_v55  ;;  %v3328_v38 = vld [vmem:[#allocation11 + $0x290] sm:$0xff]  ;;  %v3435_v40 = vld [vmem:[#allocation11 + $0x388] sm:$0xff]  ;;  %v3269_v44 = vld [vmem:[#allocation11 + $0x200] sm:$0xff] }
 0x51d   : >> { %3289 = vmatpush.msrb.mxu0 %v3280_v56  ;;  %3346 = vmatpush.msrb.mxu1 %v3337_v57  ;;  %v3270_v41 = vld [vmem:[#allocation11 + $0x208] sm:$0xff]  ;;  %v3326_v46 = vld [vmem:[#allocation11 + $0x280] sm:$0xff]  ;;  %v3264_v47 = vld [vmem:[%s7794_s22 + $0x4] sm:$0xff] }
 0x51e   : >> { %3401 = vmatpush.msrb.mxu2 %v3390_v58  ;;  %3455 = vmatpush.msrb.mxu3 %v3444_v59  ;;  %v3327_v34 = vld [vmem:[#allocation11 + $0x288] sm:$0xff]  ;;  %v6157_v48 = vld [vmem:[%s7794_s22 + $0x20] sm:$0xff]  ;;  %v3614_v51 = vld [vmem:[#allocation11 + $0x578] sm:$0xff] }
 0x51f   : >> { %3290 = vmatpush.msrb.mxu0 %v3279_v60  ;;  %3347 = vmatpush.msrb.mxu1 %v3336_v61  ;;  %v6161_v49 = vld [vmem:[%s7794_s22 + $0x21] sm:$0xff]  ;;  %v3612_v59 = vld [vmem:[#allocation11 + $0x568] sm:$0xff] }
 0x520   : >> { %3402 = vmatpush.msrb.mxu2 %v3389_v62  ;;  %3456 = vmatpush.msrb.mxu3 %v3443_v63  ;;  %v6165_v50 = vld [vmem:[%s7794_s22 + $0x22] sm:$0xff]  ;;  %v3666_v60 = vld [vmem:[#allocation11 + $0x5e8] sm:$0xff]  ;;  %v3611_v63 = vld [vmem:[#allocation11 + $0x560] sm:$0xff] }
 0x521   : >> { %3291 = vmatpush.msrb.mxu0 %v3278_v1  ;;  %3348 = vmatpush.msrb.mxu1 %v3335_v2  ;;  %v3668_v52 = vld [vmem:[#allocation11 + $0x5f8] sm:$0xff]  ;;  %v3613_v55 = vld [vmem:[#allocation11 + $0x570] sm:$0xff]  ;;  %v3501_v61 = vld [vmem:[#allocation11 + $0x468] sm:$0xff] }
 0x522   : >> { %3403 = vmatpush.msrb.mxu2 %v3388_v4  ;;  %3457 = vmatpush.msrb.mxu3 %v3442_v5  ;;  %v3503_v53 = vld [vmem:[#allocation11 + $0x478] sm:$0xff]  ;;  %v3667_v56 = vld [vmem:[#allocation11 + $0x5f0] sm:$0xff]  ;;  %v3555_v62 = vld [vmem:[#allocation11 + $0x4e8] sm:$0xff] }
 0x523   : >> { %3292 = vmatpush.msrb.mxu0 %v3277_v6  ;;  %3349 = vmatpush.msrb.mxu1 %v3334_v7  ;;  %v3557_v54 = vld [vmem:[#allocation11 + $0x4f8] sm:$0xff]  ;;  %v3502_v57 = vld [vmem:[#allocation11 + $0x470] sm:$0xff]  ;;  %v3665_v1 = vld [vmem:[#allocation11 + $0x5e0] sm:$0xff] }
 0x524   : >> { %3120 = vmatmul.f32.gmra.mxu0 %v3079_v8  ;;  %3149 = vmatmul.f32.gmra.mxu1 %v3059_v9  ;;  %v3556_v58 = vld [vmem:[#allocation11 + $0x4f0] sm:$0xff]  ;;  %v3500_v2 = vld [vmem:[#allocation11 + $0x460] sm:$0xff]  ;;  %v6158_v6 = vld [vmem:[%s7794_s22 + $0x28] sm:$0xff] }
 0x525   : >> { %3199 = vmatmul.f32.gmra.mxu2 %v3158_v10  ;;  %3253 = vmatmul.f32.gmra.mxu3 %v3212_v0  ;;  %v3554_v4 = vld [vmem:[#allocation11 + $0x4e0] sm:$0xff]  ;;  %v3610_v9 = vld [vmem:[#allocation11 + $0x558] sm:$0xff] }
 0x526   : >> { %3404 = vmatpush.msrb.mxu2 %v3387_v21  ;;  %3458 = vmatpush.msrb.mxu3 %v3441_v22  ;;  %v3265_v5 = vld [vmem:[%s7794_s22 + $0xc] sm:$0xff]  ;;  %v3609_v22 = vld [vmem:[#allocation11 + $0x550] sm:$0xff] }
 0x527   : >> { %3293 = vmatpush.msrb.mxu0 %v3276_v23  ;;  %3350 = vmatpush.msrb.mxu1 %v3333_v11  ;;  %v6162_v7 = vld [vmem:[%s7794_s22 + $0x29] sm:$0xff]  ;;  %v3663_v23 = vld [vmem:[#allocation11 + $0x5d0] sm:$0xff] }
 0x528   : >> { %3405 = vmatpush.msrb.mxu2 %v3386_v12  ;;  %3459 = vmatpush.msrb.mxu3 %v3440_v13  ;;  %v6166_v8 = vld [vmem:[%s7794_s22 + $0x2a] sm:$0xff]  ;;  %v3498_v11 = vld [vmem:[#allocation11 + $0x450] sm:$0xff]  ;;  %v3608_v13 = vld [vmem:[#allocation11 + $0x548] sm:$0xff] }
 0x529   : >> { %3294 = vmatpush.msrb.mxu0 %v3275_v14  ;;  %3351 = vmatpush.msrb.mxu1 %v3332_v15  ;;  %v3664_v10 = vld [vmem:[#allocation11 + $0x5d8] sm:$0xff]  ;;  %v3552_v12 = vld [vmem:[#allocation11 + $0x4d0] sm:$0xff]  ;;  %v3662_v14 = vld [vmem:[#allocation11 + $0x5c8] sm:$0xff] }
 0x52a   : >> { %3406 = vmatpush.msrb.mxu2 %v3385_v45  ;;  %3460 = vmatpush.msrb.mxu3 %v3439_v16  ;;  %v3499_v0 = vld [vmem:[#allocation11 + $0x458] sm:$0xff]  ;;  %v3497_v15 = vld [vmem:[#allocation11 + $0x448] sm:$0xff]  ;;  %v3607_v16 = vld [vmem:[#allocation11 + $0x540] sm:$0xff] }
 0x52b   : >> { %3295 = vmatpush.msrb.mxu0 %v3274_v17  ;;  %3352 = vmatpush.msrb.mxu1 %v3331_v18  ;;  %v3553_v21 = vld [vmem:[#allocation11 + $0x4d8] sm:$0xff]  ;;  %v3551_v45 = vld [vmem:[#allocation11 + $0x4c8] sm:$0xff]  ;;  %v3661_v17 = vld [vmem:[#allocation11 + $0x5c0] sm:$0xff] }
 0x52c   : >> { %3407 = vmatpush.msrb.mxu2 %v3384_v19  ;;  %3461 = vmatpush.msrb.mxu3 %v3438_v20  ;;  %v3496_v18 = vld [vmem:[#allocation11 + $0x440] sm:$0xff] }
 0x52d   : >> { %3296 = vmatpush.msrb.mxu0 %v3273_v24  ;;  %3353 = vmatpush.msrb.mxu1 %v3330_v25  ;;  %v3550_v19 = vld [vmem:[#allocation11 + $0x4c0] sm:$0xff] }
 0x52e   : >> { %3123 = vmatmul.f32.gmra.mxu0 %v3080_v26  ;;  %3152 = vmatmul.f32.gmra.mxu1 %v3060_v27  ;;  %v3266_v20 = vld [vmem:[%s7794_s22 + $0x14] sm:$0xff]  ;;  %v3606_v27 = vld [vmem:[#allocation11 + $0x538] sm:$0xff] }
 0x52f   : >> { %3202 = vmatmul.f32.gmra.mxu2 %v3159_v29  ;;  %3256 = vmatmul.f32.gmra.mxu3 %v3213_v30  ;;  %v6159_v24 = vld [vmem:[%s7794_s22 + $0x30] sm:$0xff]  ;;  %v3660_v29 = vld [vmem:[#allocation11 + $0x5b8] sm:$0xff] }
 0x530   : >> { %3408 = vmatpush.msrb.mxu2 %v3383_v31  ;;  %3462 = vmatpush.msrb.mxu3 %v3437_v32  ;;  %v6163_v25 = vld [vmem:[%s7794_s22 + $0x31] sm:$0xff]  ;;  %v3495_v30 = vld [vmem:[#allocation11 + $0x438] sm:$0xff]  ;;  %v3605_v32 = vld [vmem:[#allocation11 + $0x530] sm:$0xff] }
 0x531   : >> { %3297 = vmatpush.msrb.mxu0 %v3272_v33  ;;  %3354 = vmatpush.msrb.mxu1 %v3329_v35  ;;  %v6167_v26 = vld [vmem:[%s7794_s22 + $0x32] sm:$0xff]  ;;  %v3549_v31 = vld [vmem:[#allocation11 + $0x4b8] sm:$0xff]  ;;  %v3659_v33 = vld [vmem:[#allocation11 + $0x5b0] sm:$0xff] }
 0x532   : >> { %3409 = vmatpush.msrb.mxu2 %v3382_v36  ;;  %3463 = vmatpush.msrb.mxu3 %v3436_v3  ;;  %v3494_v35 = vld [vmem:[#allocation11 + $0x430] sm:$0xff]  ;;  %v3604_v3 = vld [vmem:[#allocation11 + $0x528] sm:$0xff] }
 0x533   : >> { %3298 = vmatpush.msrb.mxu0 %v3271_v37  ;;  %3355 = vmatpush.msrb.mxu1 %v3328_v38  ;;  %v3548_v36 = vld [vmem:[#allocation11 + $0x4b0] sm:$0xff]  ;;  %v3658_v37 = vld [vmem:[#allocation11 + $0x5a8] sm:$0xff] }
 0x534   : >> { %3410 = vmatpush.msrb.mxu2 %v3381_v39  ;;  %3464 = vmatpush.msrb.mxu3 %v3435_v40  ;;  %v3493_v38 = vld [vmem:[#allocation11 + $0x428] sm:$0xff]  ;;  %v3603_v40 = vld [vmem:[#allocation11 + $0x520] sm:$0xff] }
 0x535   : >> { %3299 = vmatpush.msrb.mxu0 %v3270_v41  ;;  %3356 = vmatpush.msrb.mxu1 %v3327_v34  ;;  %v3547_v39 = vld [vmem:[#allocation11 + $0x4a8] sm:$0xff]  ;;  %v3657_v41 = vld [vmem:[#allocation11 + $0x5a0] sm:$0xff] }
 0x536   : >> { %3411 = vmatpush.msrb.mxu2 %v3380_v42  ;;  %3465 = vmatpush.msrb.mxu3 %v3434_v43  ;;  %v3492_v34 = vld [vmem:[#allocation11 + $0x420] sm:$0xff]  ;;  %v3267_v43 = vld [vmem:[%s7794_s22 + $0x1c] sm:$0xf] }
 0x537   : >> { %3300 = vmatpush.msrb.mxu0 %v3269_v44  ;;  %3357 = vmatpush.msrb.mxu1 %v3326_v46  ;;  %v3546_v42 = vld [vmem:[#allocation11 + $0x4a0] sm:$0xff]  ;;  %v6160_v44 = vld [vmem:[%s7794_s22 + $0x38] sm:$0xf] }
 0x538   : >> { %3301 = vmatmul.f32.vlgmr.msrb.gmra.mxu0 %v3264_v47  ;;  %3358 = vmatmul.f32.vlgmr.msrb.gmra.mxu1 %v6157_v48  ;;  %v6164_v46 = vld [vmem:[%s7794_s22 + $0x39] sm:$0xf]  ;;  %v3602_v48 = vld [vmem:[#allocation11 + $0x518] sm:$0xff] }
 0x539   : >> { %3412 = vmatmul.f32.vlgmr.msrb.gmra.mxu2 %v6161_v49  ;;  %3466 = vmatmul.f32.vlgmr.msrb.gmra.mxu3 %v6165_v50  ;;  %v6168_v47 = vld [vmem:[%s7794_s22 + $0x3a] sm:$0xf]  ;;  %v3656_v49 = vld [vmem:[#allocation11 + $0x598] sm:$0xff] }
 0x53a   : >> { %3615 = vmatpush.msra.mxu2 %v3614_v51  ;;  %3669 = vmatpush.msra.mxu3 %v3668_v52  ;;  %v3491_v50 = vld [vmem:[#allocation11 + $0x418] sm:$0xff]  ;;  %v3601_v52 = vld [vmem:[#allocation11 + $0x510] sm:$0xff] }
 0x53b   : >> { %3504 = vmatpush.msra.mxu0 %v3503_v53  ;;  %3558 = vmatpush.msra.mxu1 %v3557_v54  ;;  %v3545_v51 = vld [vmem:[#allocation11 + $0x498] sm:$0xff]  ;;  %v3655_v53 = vld [vmem:[#allocation11 + $0x590] sm:$0xff] }
 0x53c   : >> { %3616 = vmatpush.msra.mxu2 %v3613_v55  ;;  %3670 = vmatpush.msra.mxu3 %v3667_v56  ;;  %v3490_v54 = vld [vmem:[#allocation11 + $0x410] sm:$0xff]  ;;  %v3600_v56 = vld [vmem:[#allocation11 + $0x508] sm:$0xff] }
 0x53d   : >> { %3505 = vmatpush.msra.mxu0 %v3502_v57  ;;  %3559 = vmatpush.msra.mxu1 %v3556_v58  ;;  %v3544_v55 = vld [vmem:[#allocation11 + $0x490] sm:$0xff]  ;;  %v3654_v57 = vld [vmem:[#allocation11 + $0x588] sm:$0xff] }
 0x53e   : >> { %3617 = vmatpush.msra.mxu2 %v3612_v59  ;;  %3671 = vmatpush.msra.mxu3 %v3666_v60  ;;  %v3489_v58 = vld [vmem:[#allocation11 + $0x408] sm:$0xff]  ;;  %v3599_v60 = vld [vmem:[#allocation11 + $0x500] sm:$0xff] }
 0x53f   : >> { %3506 = vmatpush.msra.mxu0 %v3501_v61  ;;  %3560 = vmatpush.msra.mxu1 %v3555_v62  ;;  %v3543_v59 = vld [vmem:[#allocation11 + $0x488] sm:$0xff]  ;;  %v3653_v61 = vld [vmem:[#allocation11 + $0x580] sm:$0xff] }
 0x540   : >> { %3618 = vmatpush.msra.mxu2 %v3611_v63  ;;  %3672 = vmatpush.msra.mxu3 %v3665_v1  ;;  %v3488_v62 = vld [vmem:[#allocation11 + $0x400] sm:$0xff]  ;;  %v6169_v1 = vld [vmem:[%s7794_s22 + $0x23] sm:$0xff] }
 0x541   : >> { %3507 = vmatpush.msra.mxu0 %v3500_v2  ;;  %3561 = vmatpush.msra.mxu1 %v3554_v4  ;;  %v3542_v63 = vld [vmem:[#allocation11 + $0x480] sm:$0xff]  ;;  %v6173_v2 = vld [vmem:[%s7794_s22 + $0x24] sm:$0xff] }
 0x542   : >> { %3304 = vmatmul.f32.gmra.mxu0 %v3265_v5  ;;  %3361 = vmatmul.f32.gmra.mxu1 %v6158_v6  ;;  %v6178_v4 = vld [vmem:[%s7794_s22 + $0x40] sm:$0xff]  ;;  %v3830_v6 = vld [vmem:[#allocation11 + $0x778] sm:$0xff] }
 0x543   : >> { %3415 = vmatmul.f32.gmra.mxu2 %v6162_v7  ;;  %3469 = vmatmul.f32.gmra.mxu3 %v6166_v8  ;;  %v6182_v5 = vld [vmem:[%s7794_s22 + $0x41] sm:$0xff] }
 0x544   : >> { %3619 = vmatpush.msra.mxu2 %v3610_v9  ;;  %3673 = vmatpush.msra.mxu3 %v3664_v10  ;;  %v3887_v7 = vld [vmem:[#allocation11 + $0x7f8] sm:$0xff]  ;;  %v3829_v10 = vld [vmem:[#allocation11 + $0x770] sm:$0xff] }
 0x545   : >> { %3508 = vmatpush.msra.mxu0 %v3499_v0  ;;  %3562 = vmatpush.msra.mxu1 %v3553_v21  ;;  %v3722_v8 = vld [vmem:[#allocation11 + $0x678] sm:$0xff]  ;;  %v3886_v0 = vld [vmem:[#allocation11 + $0x7f0] sm:$0xff] }
 0x546   : >> { %3620 = vmatpush.msra.mxu2 %v3609_v22  ;;  %3674 = vmatpush.msra.mxu3 %v3663_v23  ;;  %v3776_v9 = vld [vmem:[#allocation11 + $0x6f8] sm:$0xff]  ;;  %v3721_v21 = vld [vmem:[#allocation11 + $0x670] sm:$0xff]  ;;  %v3828_v23 = vld [vmem:[#allocation11 + $0x768] sm:$0xff] }
 0x547   : >> { %3509 = vmatpush.msra.mxu0 %v3498_v11  ;;  %3563 = vmatpush.msra.mxu1 %v3552_v12  ;;  %v3775_v22 = vld [vmem:[#allocation11 + $0x6f0] sm:$0xff]  ;;  %v3885_v11 = vld [vmem:[#allocation11 + $0x7e8] sm:$0xff] }
 0x548   : >> { %3621 = vmatpush.msra.mxu2 %v3608_v13  ;;  %3675 = vmatpush.msra.mxu3 %v3662_v14  ;;  %v3720_v12 = vld [vmem:[#allocation11 + $0x668] sm:$0xff]  ;;  %v3827_v14 = vld [vmem:[#allocation11 + $0x760] sm:$0xff] }
 0x549   : >> { %3510 = vmatpush.msra.mxu0 %v3497_v15  ;;  %3564 = vmatpush.msra.mxu1 %v3551_v45  ;;  %v3774_v13 = vld [vmem:[#allocation11 + $0x6e8] sm:$0xff]  ;;  %v3884_v15 = vld [vmem:[#allocation11 + $0x7e0] sm:$0xff] }
 0x54a   : >> { %3622 = vmatpush.msra.mxu2 %v3607_v16  ;;  %3676 = vmatpush.msra.mxu3 %v3661_v17  ;;  %v3719_v45 = vld [vmem:[#allocation11 + $0x660] sm:$0xff] }
 0x54b   : >> { %3511 = vmatpush.msra.mxu0 %v3496_v18  ;;  %3565 = vmatpush.msra.mxu1 %v3550_v19  ;;  %v3773_v16 = vld [vmem:[#allocation11 + $0x6e0] sm:$0xff]  ;;  %v6179_v19 = vld [vmem:[%s7794_s22 + $0x48] sm:$0xff] }
 0x54c   : >> { %3307 = vmatmul.f32.gmra.mxu0 %v3266_v20  ;;  %3364 = vmatmul.f32.gmra.mxu1 %v6159_v24  ;;  %v6170_v17 = vld [vmem:[%s7794_s22 + $0x2b] sm:$0xff] }
 0x54d   : >> { %3418 = vmatmul.f32.gmra.mxu2 %v6163_v25  ;;  %3472 = vmatmul.f32.gmra.mxu3 %v6167_v26  ;;  %v6174_v18 = vld [vmem:[%s7794_s22 + $0x2c] sm:$0xff] }
 0x54e   : >> { %3623 = vmatpush.msra.mxu2 %v3606_v27  ;;  %3677 = vmatpush.msra.mxu3 %v3660_v29  ;;  %v6183_v20 = vld [vmem:[%s7794_s22 + $0x49] sm:$0xff]  ;;  %v3825_v29 = vld [vmem:[#allocation11 + $0x750] sm:$0xff] }
 0x54f   : >> { %3512 = vmatpush.msra.mxu0 %v3495_v30  ;;  %3566 = vmatpush.msra.mxu1 %v3549_v31  ;;  %v3826_v24 = vld [vmem:[#allocation11 + $0x758] sm:$0xff]  ;;  %v3882_v30 = vld [vmem:[#allocation11 + $0x7d0] sm:$0xff] }
 0x550   : >> { %3624 = vmatpush.msra.mxu2 %v3605_v32  ;;  %3678 = vmatpush.msra.mxu3 %v3659_v33  ;;  %v3883_v25 = vld [vmem:[#allocation11 + $0x7d8] sm:$0xff]  ;;  %v3717_v31 = vld [vmem:[#allocation11 + $0x650] sm:$0xff]  ;;  %v3824_v33 = vld [vmem:[#allocation11 + $0x748] sm:$0xff] }
 0x551   : >> { %3513 = vmatpush.msra.mxu0 %v3494_v35  ;;  %3567 = vmatpush.msra.mxu1 %v3548_v36  ;;  %v3718_v26 = vld [vmem:[#allocation11 + $0x658] sm:$0xff]  ;;  %v3771_v32 = vld [vmem:[#allocation11 + $0x6d0] sm:$0xff]  ;;  %v3881_v35 = vld [vmem:[#allocation11 + $0x7c8] sm:$0xff] }
 0x552   : >> { %3625 = vmatpush.msra.mxu2 %v3604_v3  ;;  %3679 = vmatpush.msra.mxu3 %v3658_v37  ;;  %v3772_v27 = vld [vmem:[#allocation11 + $0x6d8] sm:$0xff]  ;;  %v3716_v36 = vld [vmem:[#allocation11 + $0x648] sm:$0xff]  ;;  %v3823_v37 = vld [vmem:[#allocation11 + $0x740] sm:$0xff] }
 0x553   : >> { %3514 = vmatpush.msra.mxu0 %v3493_v38  ;;  %3568 = vmatpush.msra.mxu1 %v3547_v39  ;;  %v3770_v3 = vld [vmem:[#allocation11 + $0x6c8] sm:$0xff]  ;;  %v3880_v38 = vld [vmem:[#allocation11 + $0x7c0] sm:$0xff] }
 0x554   : >> { %3626 = vmatpush.msra.mxu2 %v3603_v40  ;;  %3680 = vmatpush.msra.mxu3 %v3657_v41  ;;  %v3715_v39 = vld [vmem:[#allocation11 + $0x640] sm:$0xff] }
 0x555   : >> { %3515 = vmatpush.msra.mxu0 %v3492_v34  ;;  %3569 = vmatpush.msra.mxu1 %v3546_v42  ;;  %v3769_v40 = vld [vmem:[#allocation11 + $0x6c0] sm:$0xff] }
 0x556   : >> { %3310 = vmatmul.f32.gmra.mxu0 %v3267_v43  ;;  %3367 = vmatmul.f32.gmra.mxu1 %v6160_v44  ;;  %v6171_v41 = vld [vmem:[%s7794_s22 + $0x33] sm:$0xff]  ;;  %v3822_v44 = vld [vmem:[#allocation11 + $0x738] sm:$0xff] }
 0x557   : >> { %3421 = vmatmul.f32.gmra.mxu2 %v6164_v46  ;;  %3475 = vmatmul.f32.gmra.mxu3 %v6168_v47  ;;  %v6175_v34 = vld [vmem:[%s7794_s22 + $0x34] sm:$0xff]  ;;  %v3879_v46 = vld [vmem:[#allocation11 + $0x7b8] sm:$0xff] }
 0x558   : >> { %3627 = vmatpush.msra.mxu2 %v3602_v48  ;;  %3681 = vmatpush.msra.mxu3 %v3656_v49  ;;  %v6180_v42 = vld [vmem:[%s7794_s22 + $0x50] sm:$0xff]  ;;  %v3714_v47 = vld [vmem:[#allocation11 + $0x638] sm:$0xff]  ;;  %v3821_v49 = vld [vmem:[#allocation11 + $0x730] sm:$0xff] }
 0x559   : >> { %3516 = vmatpush.msra.mxu0 %v3491_v50  ;;  %3570 = vmatpush.msra.mxu1 %v3545_v51  ;;  %v6184_v43 = vld [vmem:[%s7794_s22 + $0x51] sm:$0xff]  ;;  %v3768_v48 = vld [vmem:[#allocation11 + $0x6b8] sm:$0xff]  ;;  %v3878_v50 = vld [vmem:[#allocation11 + $0x7b0] sm:$0xff] }
 0x55a   : >> { %3628 = vmatpush.msra.mxu2 %v3601_v52  ;;  %3682 = vmatpush.msra.mxu3 %v3655_v53  ;;  %v3713_v51 = vld [vmem:[#allocation11 + $0x630] sm:$0xff]  ;;  %v3820_v53 = vld [vmem:[#allocation11 + $0x728] sm:$0xff] }
 0x55b   : >> { %3517 = vmatpush.msra.mxu0 %v3490_v54  ;;  %3571 = vmatpush.msra.mxu1 %v3544_v55  ;;  %v3767_v52 = vld [vmem:[#allocation11 + $0x6b0] sm:$0xff]  ;;  %v3877_v54 = vld [vmem:[#allocation11 + $0x7a8] sm:$0xff] }
 0x55c   : >> { %3629 = vmatpush.msra.mxu2 %v3600_v56  ;;  %3683 = vmatpush.msra.mxu3 %v3654_v57  ;;  %v3712_v55 = vld [vmem:[#allocation11 + $0x628] sm:$0xff]  ;;  %v3819_v57 = vld [vmem:[#allocation11 + $0x720] sm:$0xff] }
 0x55d   : >> { %3518 = vmatpush.msra.mxu0 %v3489_v58  ;;  %3572 = vmatpush.msra.mxu1 %v3543_v59  ;;  %v3766_v56 = vld [vmem:[#allocation11 + $0x6a8] sm:$0xff]  ;;  %v3876_v58 = vld [vmem:[#allocation11 + $0x7a0] sm:$0xff] }
 0x55e   : >> { %3630 = vmatpush.msra.mxu2 %v3599_v60  ;;  %3684 = vmatpush.msra.mxu3 %v3653_v61  ;;  %v3711_v59 = vld [vmem:[#allocation11 + $0x620] sm:$0xff]  ;;  %v6172_v61 = vld [vmem:[%s7794_s22 + $0x3b] sm:$0xf] }
 0x55f   : >> { %3519 = vmatpush.msra.mxu0 %v3488_v62  ;;  %3573 = vmatpush.msra.mxu1 %v3542_v63  ;;  %v3765_v60 = vld [vmem:[#allocation11 + $0x6a0] sm:$0xff]  ;;  %v6176_v62 = vld [vmem:[%s7794_s22 + $0x3c] sm:$0xf]  ;;  %v6181_v63 = vld [vmem:[%s7794_s22 + $0x58] sm:$0xf] }
 0x560   : >> { %3520 = vmatmul.f32.vlgmr.msra.gmra.mxu0 %v6169_v1  ;;  %3574 = vmatmul.f32.vlgmr.msra.gmra.mxu1 %v6173_v2  ;;  %v6185_v1 = vld [vmem:[%s7794_s22 + $0x59] sm:$0xf]  ;;  %v3818_v2 = vld [vmem:[#allocation11 + $0x718] sm:$0xff] }
 0x561   : >> { %3631 = vmatmul.f32.vlgmr.msra.gmra.mxu2 %v6178_v4  ;;  %3685 = vmatmul.f32.vlgmr.msra.gmra.mxu3 %v6182_v5  ;;  %v3875_v4 = vld [vmem:[#allocation11 + $0x798] sm:$0xff] }
 0x562   : >> { %3831 = vmatpush.msrb.mxu2 %v3830_v6  ;;  %3888 = vmatpush.msrb.mxu3 %v3887_v7  ;;  %v3710_v5 = vld [vmem:[#allocation11 + $0x618] sm:$0xff]  ;;  %v3817_v7 = vld [vmem:[#allocation11 + $0x710] sm:$0xff] }
 0x563   : >> { %3723 = vmatpush.msrb.mxu0 %v3722_v8  ;;  %3777 = vmatpush.msrb.mxu1 %v3776_v9  ;;  %v3764_v6 = vld [vmem:[#allocation11 + $0x698] sm:$0xff]  ;;  %v3874_v8 = vld [vmem:[#allocation11 + $0x790] sm:$0xff] }
 0x564   : >> { %3832 = vmatpush.msrb.mxu2 %v3829_v10  ;;  %3889 = vmatpush.msrb.mxu3 %v3886_v0  ;;  %v3709_v9 = vld [vmem:[#allocation11 + $0x610] sm:$0xff]  ;;  %v3816_v0 = vld [vmem:[#allocation11 + $0x708] sm:$0xff] }
 0x565   : >> { %3724 = vmatpush.msrb.mxu0 %v3721_v21  ;;  %3778 = vmatpush.msrb.mxu1 %v3775_v22  ;;  %v3763_v10 = vld [vmem:[#allocation11 + $0x690] sm:$0xff]  ;;  %v3873_v21 = vld [vmem:[#allocation11 + $0x788] sm:$0xff] }
 0x566   : >> { %3833 = vmatpush.msrb.mxu2 %v3828_v23  ;;  %3890 = vmatpush.msrb.mxu3 %v3885_v11  ;;  %v3708_v22 = vld [vmem:[#allocation11 + $0x608] sm:$0xff]  ;;  %v3815_v11 = vld [vmem:[#allocation11 + $0x700] sm:$0xff] }
 0x567   : >> { %3725 = vmatpush.msrb.mxu0 %v3720_v12  ;;  %3779 = vmatpush.msrb.mxu1 %v3774_v13  ;;  %v3762_v23 = vld [vmem:[#allocation11 + $0x688] sm:$0xff]  ;;  %v3872_v12 = vld [vmem:[#allocation11 + $0x780] sm:$0xff] }
 0x568   : >> { %3834 = vmatpush.msrb.mxu2 %v3827_v14  ;;  %3891 = vmatpush.msrb.mxu3 %v3884_v15  ;;  %v3707_v13 = vld [vmem:[#allocation11 + $0x600] sm:$0xff]  ;;  %v6186_v15 = vld [vmem:[%s7794_s22 + $0x42] sm:$0xff] }
 0x569   : >> { %3726 = vmatpush.msrb.mxu0 %v3719_v45  ;;  %3780 = vmatpush.msrb.mxu1 %v3773_v16  ;;  %v3761_v14 = vld [vmem:[#allocation11 + $0x680] sm:$0xff]  ;;  %v6190_v45 = vld [vmem:[%s7794_s22 + $0x43] sm:$0xff] }
 0x56a   : >> { %3523 = vmatmul.f32.gmra.mxu0 %v6170_v17  ;;  %3577 = vmatmul.f32.gmra.mxu1 %v6174_v18  ;;  %v6194_v16 = vld [vmem:[%s7794_s22 + $0x44] sm:$0xff] }
 0x56b   : >> { %3634 = vmatmul.f32.gmra.mxu2 %v6179_v19  ;;  %3688 = vmatmul.f32.gmra.mxu3 %v6183_v20  ;;  %v6199_v17 = vld [vmem:[%s7794_s22 + $0x60] sm:$0xff]  ;;  %v4049_v18 = vld [vmem:[#allocation11 + $0x978] sm:$0xff] }
 0x56c   : >> { %3835 = vmatpush.msrb.mxu2 %v3826_v24  ;;  %3892 = vmatpush.msrb.mxu3 %v3883_v25  ;;  %v4103_v19 = vld [vmem:[#allocation11 + $0x9f8] sm:$0xff]  ;;  %v4048_v25 = vld [vmem:[#allocation11 + $0x970] sm:$0xff] }
 0x56d   : >> { %3727 = vmatpush.msrb.mxu0 %v3718_v26  ;;  %3781 = vmatpush.msrb.mxu1 %v3772_v27  ;;  %v3941_v20 = vld [vmem:[#allocation11 + $0x878] sm:$0xff]  ;;  %v4102_v26 = vld [vmem:[#allocation11 + $0x9f0] sm:$0xff] }
 0x56e   : >> { %3836 = vmatpush.msrb.mxu2 %v3825_v29  ;;  %3893 = vmatpush.msrb.mxu3 %v3882_v30  ;;  %v3995_v24 = vld [vmem:[#allocation11 + $0x8f8] sm:$0xff]  ;;  %v3940_v27 = vld [vmem:[#allocation11 + $0x870] sm:$0xff]  ;;  %v4047_v30 = vld [vmem:[#allocation11 + $0x968] sm:$0xff] }
 0x56f   : >> { %3728 = vmatpush.msrb.mxu0 %v3717_v31  ;;  %3782 = vmatpush.msrb.mxu1 %v3771_v32  ;;  %v3994_v29 = vld [vmem:[#allocation11 + $0x8f0] sm:$0xff]  ;;  %v4101_v31 = vld [vmem:[#allocation11 + $0x9e8] sm:$0xff] }
 0x570   : >> { %3837 = vmatpush.msrb.mxu2 %v3824_v33  ;;  %3894 = vmatpush.msrb.mxu3 %v3881_v35  ;;  %v3939_v32 = vld [vmem:[#allocation11 + $0x868] sm:$0xff]  ;;  %v4046_v35 = vld [vmem:[#allocation11 + $0x960] sm:$0xff] }
 0x571   : >> { %3729 = vmatpush.msrb.mxu0 %v3716_v36  ;;  %3783 = vmatpush.msrb.mxu1 %v3770_v3  ;;  %v3993_v33 = vld [vmem:[#allocation11 + $0x8e8] sm:$0xff]  ;;  %v4100_v36 = vld [vmem:[#allocation11 + $0x9e0] sm:$0xff] }
 0x572   : >> { %3838 = vmatpush.msrb.mxu2 %v3823_v37  ;;  %3895 = vmatpush.msrb.mxu3 %v3880_v38  ;;  %v3938_v38 = vld [vmem:[#allocation11 + $0x860] sm:$0xff] }
 0x573   : >> { %3730 = vmatpush.msrb.mxu0 %v3715_v39  ;;  %3784 = vmatpush.msrb.mxu1 %v3769_v40  ;;  %v3992_v39 = vld [vmem:[#allocation11 + $0x8e0] sm:$0xff] }
 0x574   : >> { %3526 = vmatmul.f32.gmra.mxu0 %v6171_v41  ;;  %3580 = vmatmul.f32.gmra.mxu1 %v6175_v34  ;;  %v6187_v40 = vld [vmem:[%s7794_s22 + $0x4a] sm:$0xff] }
 0x575   : >> { %3637 = vmatmul.f32.gmra.mxu2 %v6180_v42  ;;  %3691 = vmatmul.f32.gmra.mxu3 %v6184_v43  ;;  %v6191_v41 = vld [vmem:[%s7794_s22 + $0x4b] sm:$0xff] }
 0x576   : >> { %3839 = vmatpush.msrb.mxu2 %v3822_v44  ;;  %3896 = vmatpush.msrb.mxu3 %v3879_v46  ;;  %v6195_v34 = vld [vmem:[%s7794_s22 + $0x4c] sm:$0xff] }
 0x577   : >> { %3731 = vmatpush.msrb.mxu0 %v3714_v47  ;;  %3785 = vmatpush.msrb.mxu1 %v3768_v48  ;;  %v6200_v42 = vld [vmem:[%s7794_s22 + $0x68] sm:$0xff]  ;;  %v4044_v48 = vld [vmem:[#allocation11 + $0x950] sm:$0xff] }
 0x578   : >> { %3840 = vmatpush.msrb.mxu2 %v3821_v49  ;;  %3897 = vmatpush.msrb.mxu3 %v3878_v50  ;;  %v4045_v43 = vld [vmem:[#allocation11 + $0x958] sm:$0xff]  ;;  %v4098_v49 = vld [vmem:[#allocation11 + $0x9d0] sm:$0xff] }
 0x579   : >> { %3732 = vmatpush.msrb.mxu0 %v3713_v51  ;;  %3786 = vmatpush.msrb.mxu1 %v3767_v52  ;;  %v4099_v44 = vld [vmem:[#allocation11 + $0x9d8] sm:$0xff]  ;;  %v3936_v50 = vld [vmem:[#allocation11 + $0x850] sm:$0xff] }
 0x57a   : >> { %3841 = vmatpush.msrb.mxu2 %v3820_v53  ;;  %3898 = vmatpush.msrb.mxu3 %v3877_v54  ;;  %v3937_v46 = vld [vmem:[#allocation11 + $0x858] sm:$0xff]  ;;  %v3990_v51 = vld [vmem:[#allocation11 + $0x8d0] sm:$0xff]  ;;  %v4043_v54 = vld [vmem:[#allocation11 + $0x948] sm:$0xff] }
 0x57b   : >> { %3733 = vmatpush.msrb.mxu0 %v3712_v55  ;;  %3787 = vmatpush.msrb.mxu1 %v3766_v56  ;;  %v3991_v47 = vld [vmem:[#allocation11 + $0x8d8] sm:$0xff]  ;;  %v4097_v55 = vld [vmem:[#allocation11 + $0x9c8] sm:$0xff] }
 0x57c   : >> { %3842 = vmatpush.msrb.mxu2 %v3819_v57  ;;  %3899 = vmatpush.msrb.mxu3 %v3876_v58  ;;  %v3935_v56 = vld [vmem:[#allocation11 + $0x848] sm:$0xff]  ;;  %v4042_v58 = vld [vmem:[#allocation11 + $0x940] sm:$0xff] }
 0x57d   : >> { %3734 = vmatpush.msrb.mxu0 %v3711_v59  ;;  %3788 = vmatpush.msrb.mxu1 %v3765_v60  ;;  %v3989_v57 = vld [vmem:[#allocation11 + $0x8c8] sm:$0xff]  ;;  %v4096_v59 = vld [vmem:[#allocation11 + $0x9c0] sm:$0xff] }
 0x57e   : >> { %3529 = vmatmul.f32.gmra.mxu0 %v6172_v61  ;;  %3583 = vmatmul.f32.gmra.mxu1 %v6176_v62  ;;  %v3934_v62 = vld [vmem:[#allocation11 + $0x840] sm:$0xff] }
 0x57f   : >> { %3640 = vmatmul.f32.gmra.mxu2 %v6181_v63  ;;  %3694 = vmatmul.f32.gmra.mxu3 %v6185_v1  ;;  %v3988_v63 = vld [vmem:[#allocation11 + $0x8c0] sm:$0xff] }
 0x580   : >> { %3843 = vmatpush.msrb.mxu2 %v3818_v2  ;;  %3900 = vmatpush.msrb.mxu3 %v3875_v4  ;;  %v6188_v2 = vld [vmem:[%s7794_s22 + $0x52] sm:$0xff] }
 0x581   : >> { %3735 = vmatpush.msrb.mxu0 %v3710_v5  ;;  %3789 = vmatpush.msrb.mxu1 %v3764_v6  ;;  %v6192_v4 = vld [vmem:[%s7794_s22 + $0x53] sm:$0xff] }
 0x582   : >> { %3844 = vmatpush.msrb.mxu2 %v3817_v7  ;;  %3901 = vmatpush.msrb.mxu3 %v3874_v8  ;;  %v6196_v5 = vld [vmem:[%s7794_s22 + $0x54] sm:$0xff]  ;;  %v4041_v7 = vld [vmem:[#allocation11 + $0x938] sm:$0xff] }
 0x583   : >> { %3736 = vmatpush.msrb.mxu0 %v3709_v9  ;;  %3790 = vmatpush.msrb.mxu1 %v3763_v10  ;;  %v6201_v6 = vld [vmem:[%s7794_s22 + $0x70] sm:$0xff]  ;;  %v4095_v8 = vld [vmem:[#allocation11 + $0x9b8] sm:$0xff] }
 0x584   : >> { %3845 = vmatpush.msrb.mxu2 %v3816_v0  ;;  %3902 = vmatpush.msrb.mxu3 %v3873_v21  ;;  %v3933_v9 = vld [vmem:[#allocation11 + $0x838] sm:$0xff]  ;;  %v4040_v0 = vld [vmem:[#allocation11 + $0x930] sm:$0xff] }
 0x585   : >> { %3737 = vmatpush.msrb.mxu0 %v3708_v22  ;;  %3791 = vmatpush.msrb.mxu1 %v3762_v23  ;;  %v3987_v10 = vld [vmem:[#allocation11 + $0x8b8] sm:$0xff]  ;;  %v4094_v21 = vld [vmem:[#allocation11 + $0x9b0] sm:$0xff] }
 0x586   : >> { %3846 = vmatpush.msrb.mxu2 %v3815_v11  ;;  %3903 = vmatpush.msrb.mxu3 %v3872_v12  ;;  %v3932_v22 = vld [vmem:[#allocation11 + $0x830] sm:$0xff] }
 0x587   : >> { %3738 = vmatpush.msrb.mxu0 %v3707_v13  ;;  %3792 = vmatpush.msrb.mxu1 %v3761_v14  ;;  %v3986_v23 = vld [vmem:[#allocation11 + $0x8b0] sm:$0xff]  ;;  %v4039_v13 = vld [vmem:[#allocation11 + $0x928] sm:$0xff] }
 0x588   : >> { %3739 = vmatmul.f32.vlgmr.msrb.gmra.mxu0 %v6186_v15  ;;  %3793 = vmatmul.f32.vlgmr.msrb.gmra.mxu1 %v6190_v45  ;;  %v4093_v14 = vld [vmem:[#allocation11 + $0x9a8] sm:$0xff] }
 0x589   : >> { %3847 = vmatmul.f32.vlgmr.msrb.gmra.mxu2 %v6194_v16  ;;  %3904 = vmatmul.f32.vlgmr.msrb.gmra.mxu3 %v6199_v17  ;;  %v3931_v45 = vld [vmem:[#allocation11 + $0x828] sm:$0xff]  ;;  %v4038_v17 = vld [vmem:[#allocation11 + $0x920] sm:$0xff] }
 0x58a   : >> { %4050 = vmatpush.msra.mxu2 %v4049_v18  ;;  %4104 = vmatpush.msra.mxu3 %v4103_v19  ;;  %v3985_v16 = vld [vmem:[#allocation11 + $0x8a8] sm:$0xff]  ;;  %v4092_v18 = vld [vmem:[#allocation11 + $0x9a0] sm:$0xff] }
 0x58b   : >> { %3942 = vmatpush.msra.mxu0 %v3941_v20  ;;  %3996 = vmatpush.msra.mxu1 %v3995_v24 }
 0x58c   : >> { %4051 = vmatpush.msra.mxu2 %v4048_v25  ;;  %4105 = vmatpush.msra.mxu3 %v4102_v26  ;;  %v7848_v3 = vpop.f32.mrf.mxu0  ;;  %v3930_v25 = vld [vmem:[#allocation11 + $0x820] sm:$0xff] }
 0x58d   : >> { %3943 = vmatpush.msra.mxu0 %v3940_v27  ;;  %3997 = vmatpush.msra.mxu1 %v3994_v29  ;;  %v7850_v37 = vpop.f32.mrf.mxu1  ;;  %v3984_v26 = vld [vmem:[#allocation11 + $0x8a0] sm:$0xff]  ;;  %v6189_v29 = vld [vmem:[%s7794_s22 + $0x5a] sm:$0xf] }
 0x58e   : >> { %4052 = vmatpush.msra.mxu2 %v4047_v30  ;;  %4106 = vmatpush.msra.mxu3 %v4101_v31  ;;  %v6193_v30 = vld [vmem:[%s7794_s22 + $0x5b] sm:$0xf] }
 0x58f   : >> { %3944 = vmatpush.msra.mxu0 %v3939_v32  ;;  %3998 = vmatpush.msra.mxu1 %v3993_v33  ;;  %v6197_v31 = vld [vmem:[%s7794_s22 + $0x5c] sm:$0xf]  ;;  %v6202_v32 = vld [vmem:[%s7794_s22 + $0x78] sm:$0xf]  ;;  %v4037_v33 = vld [vmem:[#allocation11 + $0x918] sm:$0xff] }
 0x590   : >> { %4053 = vmatpush.msra.mxu2 %v4046_v35  ;;  %4107 = vmatpush.msra.mxu3 %v4100_v36  ;;  %v4091_v35 = vld [vmem:[#allocation11 + $0x998] sm:$0xff] }
 0x591   : >> { %3945 = vmatpush.msra.mxu0 %v3938_v38  ;;  %3999 = vmatpush.msra.mxu1 %v3992_v39  ;;  %v3929_v36 = vld [vmem:[#allocation11 + $0x818] sm:$0xff]  ;;  %v4036_v39 = vld [vmem:[#allocation11 + $0x910] sm:$0xff] }
 0x592   : >> { %3742 = vmatmul.f32.gmra.mxu0 %v6187_v40  ;;  %3796 = vmatmul.f32.gmra.mxu1 %v6191_v41  ;;  %v3983_v38 = vld [vmem:[#allocation11 + $0x898] sm:$0xff]  ;;  %v4090_v40 = vld [vmem:[#allocation11 + $0x990] sm:$0xff] }
 0x593   : >> { %3850 = vmatmul.f32.gmra.mxu2 %v6195_v34  ;;  %3907 = vmatmul.f32.gmra.mxu3 %v6200_v42  ;;  %v3928_v41 = vld [vmem:[#allocation11 + $0x810] sm:$0xff] }
 0x594   : >> { %4054 = vmatpush.msra.mxu2 %v4045_v43  ;;  %4108 = vmatpush.msra.mxu3 %v4099_v44  ;;  %v7856_v52 = vpop.f32.mrf.mxu2  ;;  %v7858_v53 = vpop.f32.mrf.mxu3  ;;  %v3982_v34 = vld [vmem:[#allocation11 + $0x890] sm:$0xff]  ;;  %v4035_v44 = vld [vmem:[#allocation11 + $0x908] sm:$0xff] }
 0x595   : >> { %3946 = vmatpush.msra.mxu0 %v3937_v46  ;;  %4000 = vmatpush.msra.mxu1 %v3991_v47  ;;  %v4089_v46 = vld [vmem:[#allocation11 + $0x988] sm:$0xff] }
 0x596   : >> { %4055 = vmatpush.msra.mxu2 %v4044_v48  ;;  %4109 = vmatpush.msra.mxu3 %v4098_v49  ;;  %v3927_v48 = vld [vmem:[#allocation11 + $0x808] sm:$0xff] }
 0x597   : >> { %3947 = vmatpush.msra.mxu0 %v3936_v50  ;;  %4001 = vmatpush.msra.mxu1 %v3990_v51  ;;  %v3118_v60 = vpop.f32.mrf.mxu0  ;;  %v3147_v61 = vpop.f32.mrf.mxu1  ;;  %v3981_v49 = vld [vmem:[#allocation11 + $0x888] sm:$0xff]  ;;  %v4034_v50 = vld [vmem:[#allocation11 + $0x900] sm:$0xff] }
 0x598   : >> { %4056 = vmatpush.msra.mxu2 %v4043_v54  ;;  %4110 = vmatpush.msra.mxu3 %v4097_v55  ;;  %v3148_v1 = vadd.f32 %v3147_v61, %v3118_v60  ;;  %v4088_v51 = vld [vmem:[#allocation11 + $0x980] sm:$0xff]  ;;  %v6203_v61 = vld [vmem:[%s7794_s22 + $0x61] sm:$0xff] }
 0x599   : >> { %3948 = vmatpush.msra.mxu0 %v3935_v56  ;;  %4002 = vmatpush.msra.mxu1 %v3989_v57  ;;  %v3145_v57 = vadd.f32 %v7850_v37, %v7848_v3  ;;  %v4267_v37 = vld [vmem:[#allocation11 + $0xb70] sm:$0xff] }
 0x59a   : >> { %4057 = vmatpush.msra.mxu2 %v4042_v58  ;;  %4111 = vmatpush.msra.mxu3 %v4096_v59  ;;  %v3926_v58 = vld [vmem:[#allocation11 + $0x800] sm:$0xff] }
 0x59b   : >> { %3949 = vmatpush.msra.mxu0 %v3934_v62  ;;  %4003 = vmatpush.msra.mxu1 %v3988_v63  ;;  %v3980_v59 = vld [vmem:[#allocation11 + $0x880] sm:$0xff]  ;;  %v6207_v62 = vld [vmem:[%s7794_s22 + $0x62] sm:$0xff]  ;;  %v3206_v3 = vadd.f32 %v7856_v52, %v3145_v57  ;;  %v4158_v52 = vld [vmem:[#allocation11 + $0xa68] sm:$0xff] }
 0x59c   : >> { %3745 = vmatmul.f32.gmra.mxu0 %v6188_v2  ;;  %3799 = vmatmul.f32.gmra.mxu1 %v6192_v4  ;;  %v6211_v63 = vld [vmem:[%s7794_s22 + $0x63] sm:$0xff]  ;;  %v6205_v57 = vld [vmem:[%s7794_s22 + $0x71] sm:$0xff] }
 0x59d   : >> { %3853 = vmatmul.f32.gmra.mxu2 %v6196_v5  ;;  %3910 = vmatmul.f32.gmra.mxu3 %v6201_v6  ;;  %v4268_v2 = vld [vmem:[#allocation11 + $0xb78] sm:$0xff] }
 0x59e   : >> { %4058 = vmatpush.msra.mxu2 %v4041_v7  ;;  %4112 = vmatpush.msra.mxu3 %v4095_v8  ;;  %v3197_v11 = vpop.f32.mrf.mxu2  ;;  %v3251_v12 = vpop.f32.mrf.mxu3  ;;  %v4322_v4 = vld [vmem:[#allocation11 + $0xbf8] sm:$0xff]  ;;  %v4321_v7 = vld [vmem:[#allocation11 + $0xbf0] sm:$0xff] }
 0x59f   : >> { %3950 = vmatpush.msra.mxu0 %v3933_v9  ;;  %4004 = vmatpush.msra.mxu1 %v3987_v10  ;;  %v3207_v15 = vadd.f32 %v3197_v11, %v3148_v1  ;;  %v6215_v1 = vld [vmem:[%s7794_s22 + $0x64] sm:$0xff]  ;;  %v3260_v11 = vadd.f32 %v7858_v53, %v3206_v3 }
 0x5a0   : >> { %4059 = vmatpush.msra.mxu2 %v4040_v0  ;;  %4113 = vmatpush.msra.mxu3 %v4094_v21  ;;  %v4160_v5 = vld [vmem:[#allocation11 + $0xa78] sm:$0xff]  ;;  %v4159_v8 = vld [vmem:[#allocation11 + $0xa70] sm:$0xff]  ;;  %v4266_v21 = vld [vmem:[#allocation11 + $0xb68] sm:$0xff] }
 0x5a1   : >> { %3951 = vmatpush.msra.mxu0 %v3932_v22  ;;  %4005 = vmatpush.msra.mxu1 %v3986_v23  ;;  %v7864_v19 = vadd.f32 %v3251_v12, %v3207_v15  ;;  %v3121_v20 = vpop.f32.mrf.mxu0  ;;  %v3150_v24 = vpop.f32.mrf.mxu1  ;;  %v4214_v6 = vld [vmem:[#allocation11 + $0xaf8] sm:$0xff]  ;;  %v4213_v9 = vld [vmem:[#allocation11 + $0xaf0] sm:$0xff]  ;;  %v4320_v22 = vld [vmem:[#allocation11 + $0xbe8] sm:$0xff] }
 0x5a2   : >> { %4060 = vmatpush.msra.mxu2 %v4039_v13  ;;  %4114 = vmatpush.msra.mxu3 %v4093_v14  ;;  %v3151_v27 = vadd.f32 %v3150_v24, %v3121_v20  ;;  %v4212_v12 = vld [vmem:[#allocation11 + $0xae8] sm:$0xff]  ;;  %v4265_v13 = vld [vmem:[#allocation11 + $0xb60] sm:$0xff] }
 0x5a3   : >> { %3952 = vmatpush.msra.mxu0 %v3931_v45  ;;  %4006 = vmatpush.msra.mxu1 %v3985_v16  ;;  %v4319_v14 = vld [vmem:[#allocation11 + $0xbe0] sm:$0xff] }
 0x5a4   : >> { %4061 = vmatpush.msra.mxu2 %v4038_v17  ;;  %4115 = vmatpush.msra.mxu3 %v4092_v18  ;;  %v4157_v17 = vld [vmem:[#allocation11 + $0xa60] sm:$0xff] }
 0x5a5   : >> { %3953 = vmatpush.msra.mxu0 %v3930_v25  ;;  %4007 = vmatpush.msra.mxu1 %v3984_v26  ;;  %v4211_v18 = vld [vmem:[#allocation11 + $0xae0] sm:$0xff] }
 0x5a6   : >> { %3748 = vmatmul.f32.gmra.mxu0 %v6189_v29  ;;  %3802 = vmatmul.f32.gmra.mxu1 %v6193_v30  ;;  %v6204_v53 = vld [vmem:[%s7794_s22 + $0x69] sm:$0xff] }
 0x5a7   : >> { %3856 = vmatmul.f32.gmra.mxu2 %v6197_v31  ;;  %3913 = vmatmul.f32.gmra.mxu3 %v6202_v32  ;;  %v6208_v24 = vld [vmem:[%s7794_s22 + $0x6a] sm:$0xff] }
 0x5a8   : >> { %4062 = vmatpush.msra.mxu2 %v4037_v33  ;;  %4116 = vmatpush.msra.mxu3 %v4091_v35  ;;  %v3200_v42 = vpop.f32.mrf.mxu2  ;;  %v3254_v43 = vpop.f32.mrf.mxu3  ;;  %v6212_v25 = vld [vmem:[%s7794_s22 + $0x6b] sm:$0xff]  ;;  %v4263_v33 = vld [vmem:[#allocation11 + $0xb50] sm:$0xff] }
 0x5a9   : >> { %3954 = vmatpush.msra.mxu0 %v3929_v36  ;;  %4008 = vmatpush.msra.mxu1 %v3983_v38  ;;  %v3208_v47 = vadd.f32 %v3200_v42, %v3151_v27  ;;  %v6216_v26 = vld [vmem:[%s7794_s22 + $0x6c] sm:$0xff]  ;;  %v4317_v35 = vld [vmem:[#allocation11 + $0xbd0] sm:$0xff] }
 0x5aa   : >> { %4063 = vmatpush.msra.mxu2 %v4036_v39  ;;  %4117 = vmatpush.msra.mxu3 %v4090_v40  ;;  %v4264_v29 = vld [vmem:[#allocation11 + $0xb58] sm:$0xff]  ;;  %v4155_v36 = vld [vmem:[#allocation11 + $0xa50] sm:$0xff] }
 0x5ab   : >> { %3955 = vmatpush.msra.mxu0 %v3928_v41  ;;  %4009 = vmatpush.msra.mxu1 %v3982_v34  ;;  %v7870_v54 = vadd.f32 %v3254_v43, %v3208_v47  ;;  %v3124_v55 = vpop.f32.mrf.mxu0  ;;  %v3153_v56 = vpop.f32.mrf.mxu1  ;;  %v4318_v30 = vld [vmem:[#allocation11 + $0xbd8] sm:$0xff]  ;;  %v4209_v38 = vld [vmem:[#allocation11 + $0xad0] sm:$0xff]  ;;  %v4262_v41 = vld [vmem:[#allocation11 + $0xb48] sm:$0xff] }
 0x5ac   : >> { %4064 = vmatpush.msra.mxu2 %v4035_v44  ;;  %4118 = vmatpush.msra.mxu3 %v4089_v46  ;;  %v3154_v60 = vadd.f32 %v3153_v56, %v3124_v55  ;;  %v4156_v31 = vld [vmem:[#allocation11 + $0xa58] sm:$0xff]  ;;  %v4316_v34 = vld [vmem:[#allocation11 + $0xbc8] sm:$0xff]  ;;  %v4261_v46 = vld [vmem:[#allocation11 + $0xb40] sm:$0xff] }
 0x5ad   : >> { %3956 = vmatpush.msra.mxu0 %v3927_v48  ;;  %4010 = vmatpush.msra.mxu1 %v3981_v49  ;;  %v4210_v32 = vld [vmem:[#allocation11 + $0xad8] sm:$0xff]  ;;  %v4154_v43 = vld [vmem:[#allocation11 + $0xa48] sm:$0xff]  ;;  %v4315_v47 = vld [vmem:[#allocation11 + $0xbc0] sm:$0xff] }
 0x5ae   : >> { %4065 = vmatpush.msra.mxu2 %v4034_v50  ;;  %4119 = vmatpush.msra.mxu3 %v4088_v51  ;;  %v4208_v44 = vld [vmem:[#allocation11 + $0xac8] sm:$0xff]  ;;  %v4153_v51 = vld [vmem:[#allocation11 + $0xa40] sm:$0xff] }
 0x5af   : >> { %3957 = vmatpush.msra.mxu0 %v3926_v58  ;;  %4011 = vmatpush.msra.mxu1 %v3980_v59  ;;  %v4207_v55 = vld [vmem:[#allocation11 + $0xac0] sm:$0xff] }
 0x5b0   : >> { %3958 = vmatmul.f32.vlgmr.msra.gmra.mxu0 %v6203_v61  ;;  %4012 = vmatmul.f32.vlgmr.msra.gmra.mxu1 %v6207_v62  ;;  %v6209_v58 = vld [vmem:[%s7794_s22 + $0x72] sm:$0xff]  ;;  %v4260_v62 = vld [vmem:[#allocation11 + $0xb38] sm:$0xff] }
 0x5b1   : >> { %4066 = vmatmul.f32.vlgmr.msra.gmra.mxu2 %v6211_v63  ;;  %4120 = vmatmul.f32.vlgmr.msra.gmra.mxu3 %v6215_v1  ;;  %v6213_v59 = vld [vmem:[%s7794_s22 + $0x73] sm:$0xff]  ;;  %v4314_v63 = vld [vmem:[#allocation11 + $0xbb8] sm:$0xff] }
 0x5b2   : >> { %4269 = vmatpush.msrb.mxu2 %v4268_v2  ;;  %4323 = vmatpush.msrb.mxu3 %v4322_v4  ;;  %v3203_v10 = vpop.f32.mrf.mxu2  ;;  %v3257_v0 = vpop.f32.mrf.mxu3  ;;  %v4152_v1 = vld [vmem:[#allocation11 + $0xa38] sm:$0xff]  ;;  %v4313_v4 = vld [vmem:[#allocation11 + $0xbb0] sm:$0xff] }
 0x5b3   : >> { %4161 = vmatpush.msrb.mxu0 %v4160_v5  ;;  %4215 = vmatpush.msrb.mxu1 %v4214_v6  ;;  %v3209_v23 = vadd.f32 %v3203_v10, %v3154_v60  ;;  %v6217_v60 = vld [vmem:[%s7794_s22 + $0x74] sm:$0xff]  ;;  %v4206_v2 = vld [vmem:[#allocation11 + $0xab8] sm:$0xff]  ;;  %v4151_v5 = vld [vmem:[#allocation11 + $0xa30] sm:$0xff] }
 0x5b4   : >> { %4270 = vmatpush.msrb.mxu2 %v4267_v37  ;;  %4324 = vmatpush.msrb.mxu3 %v4321_v7  ;;  %v4205_v6 = vld [vmem:[#allocation11 + $0xab0] sm:$0xff]  ;;  %v4258_v7 = vld [vmem:[#allocation11 + $0xb28] sm:$0xff] }
 0x5b5   : >> { %4162 = vmatpush.msrb.mxu0 %v4159_v8  ;;  %4216 = vmatpush.msrb.mxu1 %v4213_v9  ;;  %v7880_v15 = vadd.f32 %v3257_v0, %v3209_v23  ;;  %v3302_v45 = vpop.f32.mrf.mxu0  ;;  %v3359_v16 = vpop.f32.mrf.mxu1  ;;  %v4312_v8 = vld [vmem:[#allocation11 + $0xba8] sm:$0xff] }
 0x5b6   : >> { %4271 = vmatpush.msrb.mxu2 %v4266_v21  ;;  %4325 = vmatpush.msrb.mxu3 %v4320_v22  ;;  %v3314_v20 = vadd.f32 %v3302_v45, %v3260_v11  ;;  %v4150_v10 = vld [vmem:[#allocation11 + $0xa28] sm:$0xff]  ;;  %v4257_v21 = vld [vmem:[#allocation11 + $0xb20] sm:$0xff] }
 0x5b7   : >> { %4163 = vmatpush.msrb.mxu0 %v4158_v52  ;;  %4217 = vmatpush.msrb.mxu1 %v4212_v12  ;;  %v4204_v0 = vld [vmem:[#allocation11 + $0xaa8] sm:$0xff]  ;;  %v4311_v22 = vld [vmem:[#allocation11 + $0xba0] sm:$0xff] }
 0x5b8   : >> { %4272 = vmatpush.msrb.mxu2 %v4265_v13  ;;  %4326 = vmatpush.msrb.mxu3 %v4319_v14  ;;  %v3371_v27 = vadd.f32 %v3359_v16, %v3314_v20  ;;  %v4149_v12 = vld [vmem:[#allocation11 + $0xa20] sm:$0xff]  ;;  %v6206_v45 = vld [vmem:[%s7794_s22 + $0x79] sm:$0xf] }
 0x5b9   : >> { %4164 = vmatpush.msrb.mxu0 %v4157_v17  ;;  %4218 = vmatpush.msrb.mxu1 %v4211_v18  ;;  %v4203_v13 = vld [vmem:[#allocation11 + $0xaa0] sm:$0xff]  ;;  %v6210_v16 = vld [vmem:[%s7794_s22 + $0x7a] sm:$0xf] }
 0x5ba   : >> { %3961 = vmatmul.f32.gmra.mxu0 %v6204_v53  ;;  %4015 = vmatmul.f32.gmra.mxu1 %v6208_v24  ;;  %v6214_v17 = vld [vmem:[%s7794_s22 + $0x7b] sm:$0xf]  ;;  %v4256_v53 = vld [vmem:[#allocation11 + $0xb18] sm:$0xff] }
 0x5bb   : >> { %4069 = vmatmul.f32.gmra.mxu2 %v6212_v25  ;;  %4123 = vmatmul.f32.gmra.mxu3 %v6216_v26  ;;  %v6218_v18 = vld [vmem:[%s7794_s22 + $0x7c] sm:$0xf]  ;;  %v4310_v24 = vld [vmem:[#allocation11 + $0xb98] sm:$0xff] }
 0x5bc   : >> { %4273 = vmatpush.msrb.mxu2 %v4264_v29  ;;  %4327 = vmatpush.msrb.mxu3 %v4318_v30  ;;  %v3413_v39 = vpop.f32.mrf.mxu2  ;;  %v3467_v40 = vpop.f32.mrf.mxu3  ;;  %v4148_v25 = vld [vmem:[#allocation11 + $0xa18] sm:$0xff]  ;;  %v4147_v29 = vld [vmem:[#allocation11 + $0xa10] sm:$0xff] }
 0x5bd   : >> { %4165 = vmatpush.msrb.mxu0 %v4156_v31  ;;  %4219 = vmatpush.msrb.mxu1 %v4210_v32  ;;  %v3425_v42 = vadd.f32 %v3413_v39, %v3371_v27  ;;  %v4202_v26 = vld [vmem:[#allocation11 + $0xa98] sm:$0xff]  ;;  %v4309_v27 = vld [vmem:[#allocation11 + $0xb90] sm:$0xff]  ;;  %v4200_v39 = vld [vmem:[#allocation11 + $0xa88] sm:$0xff] }
 0x5be   : >> { %4274 = vmatpush.msrb.mxu2 %v4263_v33  ;;  %4328 = vmatpush.msrb.mxu3 %v4317_v35  ;;  %v4201_v30 = vld [vmem:[#allocation11 + $0xa90] sm:$0xff]  ;;  %v4254_v33 = vld [vmem:[#allocation11 + $0xb08] sm:$0xff] }
 0x5bf   : >> { %4166 = vmatpush.msrb.mxu0 %v4155_v36  ;;  %4220 = vmatpush.msrb.mxu1 %v4209_v38  ;;  %v7886_v48 = vadd.f32 %v3467_v40, %v3425_v42  ;;  %v3305_v49 = vpop.f32.mrf.mxu0  ;;  %v3362_v50 = vpop.f32.mrf.mxu1  ;;  %v4308_v35 = vld [vmem:[#allocation11 + $0xb88] sm:$0xff]  ;;  %v4253_v40 = vld [vmem:[#allocation11 + $0xb00] sm:$0xff] }
 0x5c0   : >> { %4275 = vmatpush.msrb.mxu2 %v4262_v41  ;;  %4329 = vmatpush.msrb.mxu3 %v4316_v34  ;;  %v3315_v56 = vadd.f32 %v3305_v49, %v7864_v19  ;;  %v4259_v19 = vld [vmem:[#allocation11 + $0xb30] sm:$0xff]  ;;  %v4146_v38 = vld [vmem:[#allocation11 + $0xa08] sm:$0xff]  ;;  %v4307_v41 = vld [vmem:[#allocation11 + $0xb80] sm:$0xff] }
 0x5c1   : >> { %4167 = vmatpush.msrb.mxu0 %v4154_v43  ;;  %4221 = vmatpush.msrb.mxu1 %v4208_v44  ;;  %v4145_v44 = vld [vmem:[#allocation11 + $0xa00] sm:$0xff]  ;;  %v6220_v49 = vld [vmem:[%s7794_s22 + $0x80] sm:$0xff] }
 0x5c2   : >> { %4276 = vmatpush.msrb.mxu2 %v4261_v46  ;;  %4330 = vmatpush.msrb.mxu3 %v4315_v47  ;;  %v3372_v61 = vadd.f32 %v3362_v50, %v3315_v56  ;;  %v4199_v46 = vld [vmem:[#allocation11 + $0xa80] sm:$0xff]  ;;  %v6224_v50 = vld [vmem:[%s7794_s22 + $0x81] sm:$0xff] }
 0x5c3   : >> { %4168 = vmatpush.msrb.mxu0 %v4153_v51  ;;  %4222 = vmatpush.msrb.mxu1 %v4207_v55  ;;  %v6228_v51 = vld [vmem:[%s7794_s22 + $0x82] sm:$0xff] }
 0x5c4   : >> { %3964 = vmatmul.f32.gmra.mxu0 %v6205_v57  ;;  %4018 = vmatmul.f32.gmra.mxu1 %v6209_v58  ;;  %v6232_v55 = vld [vmem:[%s7794_s22 + $0x83] sm:$0xff] }
 0x5c5   : >> { %4072 = vmatmul.f32.gmra.mxu2 %v6213_v59  ;;  %4126 = vmatmul.f32.gmra.mxu3 %v6217_v60  ;;  %v4376_v57 = vld [vmem:[#allocation11 + $0xc78] sm:$0xff]  ;;  %v4375_v58 = vld [vmem:[#allocation11 + $0xc70] sm:$0xff]  ;;  %v4374_v60 = vld [vmem:[#allocation11 + $0xc68] sm:$0xff] }
 0x5c6   : >> { %4277 = vmatpush.msrb.mxu2 %v4260_v62  ;;  %4331 = vmatpush.msrb.mxu3 %v4314_v63  ;;  %v3416_v3 = vpop.f32.mrf.mxu2  ;;  %v3470_v37 = vpop.f32.mrf.mxu3  ;;  %v4373_v62 = vld [vmem:[#allocation11 + $0xc60] sm:$0xff] }
 0x5c7   : >> { %4169 = vmatpush.msrb.mxu0 %v4152_v1  ;;  %4223 = vmatpush.msrb.mxu1 %v4206_v2  ;;  %v3426_v9 = vadd.f32 %v3416_v3, %v3372_v61  ;;  %v6233_v3 = vld [vmem:[%s7794_s22 + $0x8b] sm:$0xff] }
 0x5c8   : >> { %4278 = vmatpush.msrb.mxu2 %v4259_v19  ;;  %4332 = vmatpush.msrb.mxu3 %v4313_v4  ;;  %v6221_v4 = vld [vmem:[%s7794_s22 + $0x88] sm:$0xff] }
 0x5c9   : >> { %4170 = vmatpush.msrb.mxu0 %v4151_v5  ;;  %4224 = vmatpush.msrb.mxu1 %v4205_v6  ;;  %v7893_v23 = vadd.f32 %v3470_v37, %v3426_v9  ;;  %v3308_v11 = vpop.f32.mrf.mxu0  ;;  %v3365_v52 = vpop.f32.mrf.mxu1  ;;  %v6225_v5 = vld [vmem:[%s7794_s22 + $0x89] sm:$0xff] }
 0x5ca   : >> { %4279 = vmatpush.msrb.mxu2 %v4258_v7  ;;  %4333 = vmatpush.msrb.mxu3 %v4312_v8  ;;  %v3316_v14 = vadd.f32 %v3308_v11, %v7870_v54  ;;  %v4255_v54 = vld [vmem:[#allocation11 + $0xb10] sm:$0xff]  ;;  %v6229_v6 = vld [vmem:[%s7794_s22 + $0x8a] sm:$0xff] }
 0x5cb   : >> { %4171 = vmatpush.msrb.mxu0 %v4150_v10  ;;  %4225 = vmatpush.msrb.mxu1 %v4204_v0  ;;  %v4372_v7 = vld [vmem:[#allocation11 + $0xc58] sm:$0xff]  ;;  %v4371_v8 = vld [vmem:[#allocation11 + $0xc50] sm:$0xff]  ;;  %v4370_v10 = vld [vmem:[#allocation11 + $0xc48] sm:$0xff] }
 0x5cc   : >> { %4280 = vmatpush.msrb.mxu2 %v4257_v21  ;;  %4334 = vmatpush.msrb.mxu3 %v4311_v22  ;;  %v3373_v20 = vadd.f32 %v3365_v52, %v3316_v14  ;;  %v4369_v21 = vld [vmem:[#allocation11 + $0xc40] sm:$0xff] }
 0x5cd   : >> { %4172 = vmatpush.msrb.mxu0 %v4149_v12  ;;  %4226 = vmatpush.msrb.mxu1 %v4203_v13  ;;  %v6222_v13 = vld [vmem:[%s7794_s22 + $0x90] sm:$0xff] }
 0x5ce   : >> { %3967 = vmatmul.f32.gmra.mxu0 %v6206_v45  ;;  %4021 = vmatmul.f32.gmra.mxu1 %v6210_v16  ;;  %v6226_v14 = vld [vmem:[%s7794_s22 + $0x91] sm:$0xff] }
 0x5cf   : >> { %4075 = vmatmul.f32.gmra.mxu2 %v6214_v17  ;;  %4129 = vmatmul.f32.gmra.mxu3 %v6218_v18  ;;  %v6230_v45 = vld [vmem:[%s7794_s22 + $0x92] sm:$0xff]  ;;  %v4368_v18 = vld [vmem:[#allocation11 + $0xc38] sm:$0xff] }
 0x5d0   : >> { %4281 = vmatpush.msrb.mxu2 %v4256_v53  ;;  %4335 = vmatpush.msrb.mxu3 %v4310_v24  ;;  %v3419_v31 = vpop.f32.mrf.mxu2  ;;  %v3473_v32 = vpop.f32.mrf.mxu3  ;;  %v6234_v16 = vld [vmem:[%s7794_s22 + $0x93] sm:$0xff] }
 0x5d1   : >> { %4173 = vmatpush.msrb.mxu0 %v4148_v25  ;;  %4227 = vmatpush.msrb.mxu1 %v4202_v26  ;;  %v3427_v36 = vadd.f32 %v3419_v31, %v3373_v20  ;;  %v4367_v20 = vld [vmem:[#allocation11 + $0xc30] sm:$0xff]  ;;  %v4366_v24 = vld [vmem:[#allocation11 + $0xc28] sm:$0xff]  ;;  %v4365_v26 = vld [vmem:[#allocation11 + $0xc20] sm:$0xff] }
 0x5d2   : >> { %4282 = vmatpush.msrb.mxu2 %v4255_v54  ;;  %4336 = vmatpush.msrb.mxu3 %v4309_v27  ;;  %v6223_v31 = vld [vmem:[%s7794_s22 + $0x98] sm:$0xf] }
 0x5d3   : >> { %4174 = vmatpush.msrb.mxu0 %v4147_v29  ;;  %4228 = vmatpush.msrb.mxu1 %v4201_v30  ;;  %v7900_v34 = vadd.f32 %v3473_v32, %v3427_v36  ;;  %v3311_v42 = vpop.f32.mrf.mxu0  ;;  %v3368_v43 = vpop.f32.mrf.mxu1  ;;  %v6227_v32 = vld [vmem:[%s7794_s22 + $0x99] sm:$0xf] }
 0x5d4   : >> { %4283 = vmatpush.msrb.mxu2 %v4254_v33  ;;  %4337 = vmatpush.msrb.mxu3 %v4308_v35  ;;  %v3317_v47 = vadd.f32 %v3311_v42, %v7880_v15  ;;  %v6231_v33 = vld [vmem:[%s7794_s22 + $0x9a] sm:$0xf] }
 0x5d5   : >> { %4175 = vmatpush.msrb.mxu0 %v4146_v38  ;;  %4229 = vmatpush.msrb.mxu1 %v4200_v39  ;;  %v6235_v35 = vld [vmem:[%s7794_s22 + $0x9b] sm:$0xf]  ;;  %v4364_v38 = vld [vmem:[#allocation11 + $0xc18] sm:$0xff]  ;;  %v4363_v39 = vld [vmem:[#allocation11 + $0xc10] sm:$0xff] }
 0x5d6   : >> { %4284 = vmatpush.msrb.mxu2 %v4253_v40  ;;  %4338 = vmatpush.msrb.mxu3 %v4307_v41  ;;  %v3374_v56 = vadd.f32 %v3368_v43, %v3317_v47  ;;  %v4361_v43 = vld [vmem:[#allocation11 + $0xc00] sm:$0xff] }
 0x5d7   : >> { %4176 = vmatpush.msrb.mxu0 %v4145_v44  ;;  %4230 = vmatpush.msrb.mxu1 %v4199_v46 }
 0x5d8   : >> { %4177 = vmatmul.f32.vlgmr.msrb.gmra.mxu0 %v6220_v49  ;;  %4231 = vmatmul.f32.vlgmr.msrb.gmra.mxu1 %v6224_v50  ;;  %v6236_v50 = vld [vmem:[%s7794_s22 + $0x84] sm:$0xff] }
 0x5d9   : >> { %4285 = vmatmul.f32.vlgmr.msrb.gmra.mxu2 %v6228_v51  ;;  %4339 = vmatmul.f32.vlgmr.msrb.gmra.mxu3 %v6232_v55  ;;  %v6237_v51 = vld [vmem:[%s7794_s22 + $0x8c] sm:$0xff]  ;;  %v6238_v55 = vld [vmem:[%s7794_s22 + $0x94] sm:$0xff] }
 0x5da   : >> { %6346 = vmatpush.msra.mxu2 %v4376_v57  ;;  %6347 = vmatpush.msra.mxu3 %v4376_v57  ;;  %v3422_v15 = vpop.f32.mrf.mxu2  ;;  %v3476_v59 = vpop.f32.mrf.mxu3 }
 0x5db   : >> { %4377 = vmatpush.msra.mxu0 %v4376_v57  ;;  %6345 = vmatpush.msra.mxu1 %v4376_v57  ;;  %v3428_v61 = vadd.f32 %v3422_v15, %v3374_v56  ;;  %v6239_v56 = vld [vmem:[%s7794_s22 + $0x9c] sm:$0xf] }
 0x5dc   : >> { %6349 = vmatpush.msra.mxu2 %v4375_v58  ;;  %6350 = vmatpush.msra.mxu3 %v4375_v58 }
 0x5dd   : >> { %4378 = vmatpush.msra.mxu0 %v4375_v58  ;;  %6348 = vmatpush.msra.mxu1 %v4375_v58  ;;  %v7907_v63 = vadd.f32 %v3476_v59, %v3428_v61  ;;  %v3521_v1 = vpop.f32.mrf.mxu0  ;;  %v3575_v2 = vpop.f32.mrf.mxu1 }
 0x5de   : >> { %6352 = vmatpush.msra.mxu2 %v4374_v60  ;;  %6353 = vmatpush.msra.mxu3 %v4374_v60  ;;  %v3533_v19 = vadd.f32 %v3521_v1, %v7886_v48 }
 0x5df   : >> { %4379 = vmatpush.msra.mxu0 %v4374_v60  ;;  %6351 = vmatpush.msra.mxu1 %v4374_v60 }
 0x5e0   : >> { %6355 = vmatpush.msra.mxu2 %v4373_v62  ;;  %6356 = vmatpush.msra.mxu3 %v4373_v62  ;;  %v3587_v37 = vadd.f32 %v3575_v2, %v3533_v19 }
 0x5e1   : >> { %4380 = vmatpush.msra.mxu0 %v4373_v62  ;;  %6354 = vmatpush.msra.mxu1 %v4373_v62 }
 0x5e2   : >> { %4180 = vmatmul.f32.gmra.mxu0 %v6221_v4  ;;  %4234 = vmatmul.f32.gmra.mxu1 %v6225_v5 }
 0x5e3   : >> { %4288 = vmatmul.f32.gmra.mxu2 %v6229_v6  ;;  %4342 = vmatmul.f32.gmra.mxu3 %v6233_v3 }
 0x5e4   : >> { %6358 = vmatpush.msra.mxu2 %v4372_v7  ;;  %6359 = vmatpush.msra.mxu3 %v4372_v7  ;;  %v3632_v48 = vpop.f32.mrf.mxu2  ;;  %v3686_v9 = vpop.f32.mrf.mxu3 }
 0x5e5   : >> { %4381 = vmatpush.msra.mxu0 %v4372_v7  ;;  %6357 = vmatpush.msra.mxu1 %v4372_v7  ;;  %v3644_v0 = vadd.f32 %v3632_v48, %v3587_v37 }
 0x5e6   : >> { %6361 = vmatpush.msra.mxu2 %v4371_v8  ;;  %6362 = vmatpush.msra.mxu3 %v4371_v8 }
 0x5e7   : >> { %4382 = vmatpush.msra.mxu0 %v4371_v8  ;;  %6360 = vmatpush.msra.mxu1 %v4371_v8  ;;  %v7914_v22 = vadd.f32 %v3686_v9, %v3644_v0  ;;  %v3524_v11 = vpop.f32.mrf.mxu0  ;;  %v3578_v52 = vpop.f32.mrf.mxu1 }
 0x5e8   : >> { %6364 = vmatpush.msra.mxu2 %v4370_v10  ;;  %6365 = vmatpush.msra.mxu3 %v4370_v10  ;;  %v3534_v12 = vadd.f32 %v3524_v11, %v7893_v23 }
 0x5e9   : >> { %4383 = vmatpush.msra.mxu0 %v4370_v10  ;;  %6363 = vmatpush.msra.mxu1 %v4370_v10 }
 0x5ea   : >> { %6367 = vmatpush.msra.mxu2 %v4369_v21  ;;  %6368 = vmatpush.msra.mxu3 %v4369_v21  ;;  %v3588_v17 = vadd.f32 %v3578_v52, %v3534_v12 }
 0x5eb   : >> { %4384 = vmatpush.msra.mxu0 %v4369_v21  ;;  %6366 = vmatpush.msra.mxu1 %v4369_v21 }
 0x5ec   : >> { %4183 = vmatmul.f32.gmra.mxu0 %v6222_v13  ;;  %4237 = vmatmul.f32.gmra.mxu1 %v6226_v14 }
 0x5ed   : >> { %4291 = vmatmul.f32.gmra.mxu2 %v6230_v45  ;;  %4345 = vmatmul.f32.gmra.mxu3 %v6234_v16 }
 0x5ee   : >> { %6370 = vmatpush.msra.mxu2 %v4368_v18  ;;  %6371 = vmatpush.msra.mxu3 %v4368_v18  ;;  %v3635_v23 = vpop.f32.mrf.mxu2  ;;  %v3689_v53 = vpop.f32.mrf.mxu3 }
 0x5ef   : >> { %4385 = vmatpush.msra.mxu0 %v4368_v18  ;;  %6369 = vmatpush.msra.mxu1 %v4368_v18  ;;  %v3645_v25 = vadd.f32 %v3635_v23, %v3588_v17 }
 0x5f0   : >> { %6373 = vmatpush.msra.mxu2 %v4367_v20  ;;  %6374 = vmatpush.msra.mxu3 %v4367_v20 }
 0x5f1   : >> { %4386 = vmatpush.msra.mxu0 %v4367_v20  ;;  %6372 = vmatpush.msra.mxu1 %v4367_v20  ;;  %v7921_v54 = vadd.f32 %v3689_v53, %v3645_v25  ;;  %v3527_v27 = vpop.f32.mrf.mxu0  ;;  %v3581_v29 = vpop.f32.mrf.mxu1 }
 0x5f2   : >> { %6376 = vmatpush.msra.mxu2 %v4366_v24  ;;  %6377 = vmatpush.msra.mxu3 %v4366_v24  ;;  %v3535_v30 = vadd.f32 %v3527_v27, %v7900_v34  ;;  %v4362_v34 = vld [vmem:[#allocation11 + $0xc08] sm:$0xff] }
 0x5f3   : >> { %4387 = vmatpush.msra.mxu0 %v4366_v24  ;;  %6375 = vmatpush.msra.mxu1 %v4366_v24 }
 0x5f4   : >> { %6379 = vmatpush.msra.mxu2 %v4365_v26  ;;  %6380 = vmatpush.msra.mxu3 %v4365_v26  ;;  %v3589_v36 = vadd.f32 %v3581_v29, %v3535_v30 }
 0x5f5   : >> { %4388 = vmatpush.msra.mxu0 %v4365_v26  ;;  %6378 = vmatpush.msra.mxu1 %v4365_v26 }
 0x5f6   : >> { %4186 = vmatmul.f32.gmra.mxu0 %v6223_v31  ;;  %4240 = vmatmul.f32.gmra.mxu1 %v6227_v32 }
 0x5f7   : >> { %4294 = vmatmul.f32.gmra.mxu2 %v6231_v33  ;;  %4348 = vmatmul.f32.gmra.mxu3 %v6235_v35 }
 0x5f8   : >> { %6382 = vmatpush.msra.mxu2 %v4364_v38  ;;  %6383 = vmatpush.msra.mxu3 %v4364_v38  ;;  %v3638_v40 = vpop.f32.mrf.mxu2  ;;  %v3692_v41 = vpop.f32.mrf.mxu3 }
 0x5f9   : >> { %4389 = vmatpush.msra.mxu0 %v4364_v38  ;;  %6381 = vmatpush.msra.mxu1 %v4364_v38  ;;  %v3646_v42 = vadd.f32 %v3638_v40, %v3589_v36 }
 0x5fa   : >> { %6385 = vmatpush.msra.mxu2 %v4363_v39  ;;  %6386 = vmatpush.msra.mxu3 %v4363_v39 }
 0x5fb   : >> { %4390 = vmatpush.msra.mxu0 %v4363_v39  ;;  %6384 = vmatpush.msra.mxu1 %v4363_v39  ;;  %v3700_v44 = vadd.f32 %v3692_v41, %v3646_v42  ;;  %v3530_v46 = vpop.f32.mrf.mxu0  ;;  %v3584_v47 = vpop.f32.mrf.mxu1 }
 0x5fc   : >> { %6388 = vmatpush.msra.mxu2 %v4362_v34  ;;  %6389 = vmatpush.msra.mxu3 %v4362_v34  ;;  %v3536_v49 = vadd.f32 %v3530_v46, %v7907_v63 }
 0x5fd   : >> { %4391 = vmatpush.msra.mxu0 %v4362_v34  ;;  %6387 = vmatpush.msra.mxu1 %v4362_v34 }
 0x5fe   : >> { %6391 = vmatpush.msra.mxu2 %v4361_v43  ;;  %6392 = vmatpush.msra.mxu3 %v4361_v43  ;;  %v3590_v57 = vadd.f32 %v3584_v47, %v3536_v49 }
 0x5ff   : >> { %4392 = vmatpush.msra.mxu0 %v4361_v43  ;;  %6390 = vmatpush.msra.mxu1 %v4361_v43 }
 0x600   : >> { %4393 = vmatmul.f32.vlgmr.msra.gmra.mxu0 %v6236_v50  ;;  %4396 = vmatmul.f32.vlgmr.msra.gmra.mxu1 %v6237_v51 }
 0x601   : >> { %4399 = vmatmul.f32.vlgmr.msra.gmra.mxu2 %v6238_v55  ;;  %4402 = vmatmul.f32.vlgmr.msra.gmra.mxu3 %v6239_v56 }
 0x602   : >> { %v3641_v58 = vpop.f32.mrf.mxu2  ;;  %v3695_v15 = vpop.f32.mrf.mxu3 }
 0x603   : >> { %v3647_v59 = vadd.f32 %v3641_v58, %v3590_v57 }
 0x605   : >> { %v3701_v60 = vadd.f32 %v3695_v15, %v3647_v59  ;;  %v3740_v61 = vpop.f32.mrf.mxu0  ;;  %v3794_v62 = vpop.f32.mrf.mxu1 }
 0x606   : >> { %v3752_v63 = vadd.f32 %v3740_v61, %v7914_v22 }
 0x608   : >> { %v3806_v1 = vadd.f32 %v3794_v62, %v3752_v63 }
 0x60c   : >> { %v3848_v2 = vpop.f32.mrf.mxu2  ;;  %v3905_v19 = vpop.f32.mrf.mxu3 }
 0x60d   : >> { %v3860_v4 = vadd.f32 %v3848_v2, %v3806_v1 }
 0x60f   : >> { %v3917_v5 = vadd.f32 %v3905_v19, %v3860_v4  ;;  %v3743_v6 = vpop.f32.mrf.mxu0  ;;  %v3797_v3 = vpop.f32.mrf.mxu1 }
 0x610   : >> { %v3753_v37 = vadd.f32 %v3743_v6, %v7921_v54 }
 0x612   : >> { %v3807_v7 = vadd.f32 %v3797_v3, %v3753_v37 }
 0x616   : >> { %v3851_v8 = vpop.f32.mrf.mxu2  ;;  %v3908_v48 = vpop.f32.mrf.mxu3 }
 0x617   : >> { %v3861_v41 = vadd.f32 %v3851_v8, %v3807_v7 }
 0x619   : >> { %v3746_v9 = vpop.f32.mrf.mxu0  ;;  %v3800_v10 = vpop.f32.mrf.mxu1  ;;  %v3918_v42 = vadd.f32 %v3908_v48, %v3861_v41 }
 0x61a   : >> { %v3754_v0 = vadd.f32 %v3746_v9, %v3700_v44 }
 0x61c   : >> { %v3808_v21 = vadd.f32 %v3800_v10, %v3754_v0 }
 0x620   : >> { %v3854_v11 = vpop.f32.mrf.mxu2  ;;  %v3911_v52 = vpop.f32.mrf.mxu3 }
 0x621   : >> { %v3862_v50 = vadd.f32 %v3854_v11, %v3808_v21 }
 0x623   : >> { %v3749_v12 = vpop.f32.mrf.mxu0  ;;  %v3803_v22 = vpop.f32.mrf.mxu1  ;;  %v3919_v15 = vadd.f32 %v3911_v52, %v3862_v50 }
 0x624   : >> { %v3755_v34 = vadd.f32 %v3749_v12, %v3701_v60 }
 0x626   : >> { %v3809_v43 = vadd.f32 %v3803_v22, %v3755_v34 }
 0x62a   : >> { %v3857_v13 = vpop.f32.mrf.mxu2  ;;  %v3914_v14 = vpop.f32.mrf.mxu3 }
 0x62b   : >> { %v3863_v51 = vadd.f32 %v3857_v13, %v3809_v43 }
 0x62d   : >> { %v3959_v45 = vpop.f32.mrf.mxu0  ;;  %v4013_v16 = vpop.f32.mrf.mxu1  ;;  %v3920_v59 = vadd.f32 %v3914_v14, %v3863_v51 }
 0x62e   : >> { %v3971_v44 = vadd.f32 %v3959_v45, %v3917_v5 }
 0x630   : >> { %v4025_v57 = vadd.f32 %v4013_v16, %v3971_v44  ;;  %v7940_v44 = vld [vmem:[#allocation20] sm:$0x1] (%p3051_p9) }
 0x634   : >> { %v4067_v17 = vpop.f32.mrf.mxu2  ;;  %v4121_v18 = vpop.f32.mrf.mxu3 }
 0x635   : >> { %v4079_v61 = vadd.f32 %v4067_v17, %v4025_v57 }
 0x637   : >> { %v3962_v20 = vpop.f32.mrf.mxu0  ;;  %v4016_v23 = vpop.f32.mrf.mxu1  ;;  %v4133_v2 = vadd.f32 %v4121_v18, %v4079_v61  ;;  %v4411_v18 = vperm.slane %v7786_v28, 0 }
 0x638   : >> { %v3972_v46 = vadd.f32 %v3962_v20, %v3918_v42 }
 0x63a   : >> { %v4026_v58 = vadd.f32 %v4016_v23, %v3972_v46 }
 0x63e   : >> { %v4070_v53 = vpop.f32.mrf.mxu2  ;;  %v4124_v24 = vpop.f32.mrf.mxu3 }
 0x63f   : >> { %v4080_v62 = vadd.f32 %v4070_v53, %v4026_v58 }
 0x641   : >> { %v3965_v25 = vpop.f32.mrf.mxu0  ;;  %v4019_v26 = vpop.f32.mrf.mxu1  ;;  %v4134_v60 = vadd.f32 %v4124_v24, %v4080_v62 }
 0x642   : >> { %v3973_v63 = vadd.f32 %v3965_v25, %v3919_v15 }
 0x644   : >> { %v4027_v5 = vadd.f32 %v4019_v26, %v3973_v63 }
 0x648   : >> { %v4073_v54 = vpop.f32.mrf.mxu2  ;;  %v4127_v27 = vpop.f32.mrf.mxu3 }
 0x649   : >> { %v4081_v7 = vadd.f32 %v4073_v54, %v4027_v5 }
 0x64b   : >> { %v3968_v29 = vpop.f32.mrf.mxu0  ;;  %v4022_v30 = vpop.f32.mrf.mxu1  ;;  %v4135_v21 = vadd.f32 %v4127_v27, %v4081_v7 }
 0x64c   : >> { %v3974_v1 = vadd.f32 %v3968_v29, %v3920_v59 }
 0x64e   : >> { %v4028_v6 = vadd.f32 %v4022_v30, %v3974_v1 }
 0x652   : >> { %v4076_v31 = vpop.f32.mrf.mxu2  ;;  %v4130_v32 = vpop.f32.mrf.mxu3 }
 0x653   : >> { %v4082_v8 = vadd.f32 %v4076_v31, %v4028_v6 }
 0x655   : >> { %v4178_v33 = vpop.f32.mrf.mxu0  ;;  %v4232_v35 = vpop.f32.mrf.mxu1  ;;  %v4136_v11 = vadd.f32 %v4130_v32, %v4082_v8 }
 0x656   : >> { %v4190_v3 = vadd.f32 %v4178_v33, %v4133_v2 }
 0x658   : >> { %v4244_v10 = vadd.f32 %v4232_v35, %v4190_v3 }
 0x65c   : >> { %v4286_v36 = vpop.f32.mrf.mxu2  ;;  %v4340_v38 = vpop.f32.mrf.mxu3 }
 0x65d   : >> { %v4298_v52 = vadd.f32 %v4286_v36, %v4244_v10 }
 0x65f   : >> { %v4181_v39 = vpop.f32.mrf.mxu0  ;;  %v4235_v40 = vpop.f32.mrf.mxu1  ;;  %v4352_v16 = vadd.f32 %v4340_v38, %v4298_v52 }
 0x660   : >> { %v4191_v37 = vadd.f32 %v4181_v39, %v4134_v60 }
 0x662   : >> { %v4245_v0 = vadd.f32 %v4235_v40, %v4191_v37 }
 0x666   : >> { %v4289_v47 = vpop.f32.mrf.mxu2  ;;  %v4343_v49 = vpop.f32.mrf.mxu3 }
 0x667   : >> { %v4299_v12 = vadd.f32 %v4289_v47, %v4245_v0 }
 0x669   : >> { %v4184_v55 = vpop.f32.mrf.mxu0  ;;  %v4238_v56 = vpop.f32.mrf.mxu1  ;;  %v4353_v17 = vadd.f32 %v4343_v49, %v4299_v12 }
 0x66a   : >> { %v4192_v22 = vadd.f32 %v4184_v55, %v4135_v21 }
 0x66c   : >> { %v4246_v20 = vadd.f32 %v4238_v56, %v4192_v22 }
 0x670   : >> { %v4292_v19 = vpop.f32.mrf.mxu2  ;;  %v4346_v4 = vpop.f32.mrf.mxu3 }
 0x671   : >> { %v4300_v54 = vadd.f32 %v4292_v19, %v4246_v20 }
 0x673   : >> { %v4187_v48 = vpop.f32.mrf.mxu0  ;;  %v4241_v9 = vpop.f32.mrf.mxu1  ;;  %v4354_v33 = vadd.f32 %v4346_v4, %v4300_v54 }
 0x674   : >> { %v4193_v13 = vadd.f32 %v4187_v48, %v4136_v11 }
 0x676   : >> { %v4247_v23 = vadd.f32 %v4241_v9, %v4193_v13 }
 0x67a   : >> { %v4295_v14 = vpop.f32.mrf.mxu2  ;;  %v4349_v45 = vpop.f32.mrf.mxu3 }
 0x67b   : >> { %v4301_v27 = vadd.f32 %v4295_v14, %v4247_v23 }
 0x67d   : >> { %v4394_v53 = vpop.f32.mrf.mxu0  ;;  %v4397_v24 = vpop.f32.mrf.mxu1  ;;  %v4355_v35 = vadd.f32 %v4349_v45, %v4301_v27 }
 0x67e   : >> { %v4406_v25 = vadd.f32 %v4394_v53, %v4352_v16  ;;  %v4407_v26 = vadd.f32 %v4397_v24, %v4353_v17 }
 0x680   : >> { %v4413_v29 = vadd.f32 %v4411_v18, %v4406_v25  ;;  %v4414_v30 = vadd.f32 %v4411_v18, %v4407_v26 }
 0x682   : >> { %v4417_v31 = vmax.f32 %v4413_v29, 0.0  ;;  %v4418_v32 = vmax.f32 %v4414_v30, 0.0 }
 0x684   : >> { %6240 = vst [vmem:[%s5883_s13 + $0xa4] sm:$0xff] %v4417_v31  ;;  %v4400_v36 = vpop.f32.mrf.mxu2  ;;  %v4403_v38 = vpop.f32.mrf.mxu3 }
 0x685   : >> { %6241 = vst [vmem:[%s5883_s13 + $0xac] sm:$0xff] %v4418_v32  ;;  %v4408_v39 = vadd.f32 %v4400_v36, %v4354_v33  ;;  %v4409_v40 = vadd.f32 %v4403_v38, %v4355_v35 }
 0x687   : >> { %v4415_v41 = vadd.f32 %v4411_v18, %v4408_v39  ;;  %v4416_v34 = vadd.f32 %v4411_v18, %v4409_v40 }
 0x688   : > { %3053 = sbr.rel (!%p3051_p9) target bundleno = 1262 (0x4ee), region = 282 }
 0x689   : >> { %v4419_v42 = vmax.f32 %v4415_v41, 0.0  ;;  %v4420_v43 = vmax.f32 %v4416_v34, 0.0 }
 0x68b   : >> { %6242 = vst [vmem:[%s5883_s13 + $0xb4] sm:$0xff] %v4419_v42 }
 0x68c   : >> { %6243 = vst [vmem:[%s5883_s13 + $0xbc] sm:$0xf] %v4420_v43 }
 0x68d LB: >> { %v4476_v46 = vld [vmem:[#allocation13 + $0xf8] sm:$0xff]  ;;  %v4475_v51 = vld [vmem:[#allocation13 + $0xf0] sm:$0xff]  ;;  %v4474_v57 = vld [vmem:[#allocation13 + $0xe8] sm:$0xff]  ;;  %s4434_s15 = smul.u32 40, %s6950_s23  ;;  %s6324_s21 = sshll.u32 %s6950_s23, 5  ;;  %s6950_s23 = sphi %s7942_s23, %s4433_s23  }
 0x68e   : >> { %v4455_v47 = vld [vmem:[#allocation13 + $0x78] sm:$0xff]  ;;  %4477 = vmatpush.msra.mxu0 %v4476_v46  ;;  %v4454_v55 = vld [vmem:[#allocation13 + $0x70] sm:$0xff]  ;;  %v4453_v58 = vld [vmem:[#allocation13 + $0x68] sm:$0xff]  ;;  %s5801_s19 = scalar_lea.vmem %s7146_s27, %s6324_s21  ;;  %s4433_s23 = sadd.s32 1, %s6950_s23  }
 0x68f   : >> { %v4555_v49 = vld [vmem:[#allocation13 + $0x178] sm:$0xff]  ;;  %4506 = vmatpush.msra.mxu1 %v4455_v47  ;;  %v4554_v56 = vld [vmem:[#allocation13 + $0x170] sm:$0xff]  ;;  %v4553_v15 = vld [vmem:[#allocation13 + $0x168] sm:$0xff]  ;;  %s7948_s14 = scalar_lea.vmem [#allocation5], %s4434_s15  ;;  %p4430_p10 = scmp.ge.s32.totalorder %s4433_s23, 32  }
 0x690   : >> { %v4609_v50 = vld [vmem:[#allocation13 + $0x1f8] sm:$0xff]  ;;  %4556 = vmatpush.msra.mxu2 %v4555_v49  ;;  %v4608_v28 = vld [vmem:[#allocation13 + $0x1f0] sm:$0xff]  ;;  %4478 = vmatpush.msra.mxu0 %v4475_v51  ;;  %v4607_v59 = vld [vmem:[#allocation13 + $0x1e8] sm:$0xff] }
 0x691   : >> { %4610 = vmatpush.msra.mxu3 %v4609_v50  ;;  %4507 = vmatpush.msra.mxu1 %v4454_v55  ;;  %v4473_v61 = vld [vmem:[#allocation13 + $0xe0] sm:$0xff]  ;;  %v4472_v2 = vld [vmem:[#allocation13 + $0xd8] sm:$0xff]  ;;  %v4471_v5 = vld [vmem:[#allocation13 + $0xd0] sm:$0xff] }
 0x692   : >> { %4557 = vmatpush.msra.mxu2 %v4554_v56  ;;  %v4452_v62 = vld [vmem:[#allocation13 + $0x60] sm:$0xff]  ;;  %4479 = vmatpush.msra.mxu0 %v4474_v57  ;;  %v4451_v60 = vld [vmem:[#allocation13 + $0x58] sm:$0xff]  ;;  %v4450_v6 = vld [vmem:[#allocation13 + $0x50] sm:$0xff] }
 0x693   : >> { %4611 = vmatpush.msra.mxu3 %v4608_v28  ;;  %4508 = vmatpush.msra.mxu1 %v4453_v58  ;;  %v4552_v63 = vld [vmem:[#allocation13 + $0x160] sm:$0xff]  ;;  %v4551_v19 = vld [vmem:[#allocation13 + $0x158] sm:$0xff]  ;;  %v4550_v3 = vld [vmem:[#allocation13 + $0x150] sm:$0xff] }
 0x694   : >> { %v4606_v1 = vld [vmem:[#allocation13 + $0x1e0] sm:$0xff]  ;;  %4558 = vmatpush.msra.mxu2 %v4553_v15  ;;  %4480 = vmatpush.msra.mxu0 %v4473_v61  ;;  %v4605_v4 = vld [vmem:[#allocation13 + $0x1d8] sm:$0xff]  ;;  %v4604_v37 = vld [vmem:[#allocation13 + $0x1d0] sm:$0xff] }
 0x695   : >> { %4612 = vmatpush.msra.mxu3 %v4607_v59  ;;  %4509 = vmatpush.msra.mxu1 %v4452_v62  ;;  %v4470_v7 = vld [vmem:[#allocation13 + $0xc8] sm:$0xff]  ;;  %v4469_v10 = vld [vmem:[#allocation13 + $0xc0] sm:$0xff]  ;;  %v4468_v52 = vld [vmem:[#allocation13 + $0xb8] sm:$0xff] }
 0x696   : >> { %4559 = vmatpush.msra.mxu2 %v4552_v63  ;;  %4481 = vmatpush.msra.mxu0 %v4472_v2  ;;  %v4449_v8 = vld [vmem:[#allocation13 + $0x48] sm:$0xff]  ;;  %v4448_v0 = vld [vmem:[#allocation13 + $0x40] sm:$0xff]  ;;  %v4447_v12 = vld [vmem:[#allocation13 + $0x38] sm:$0xff] }
 0x697   : >> { %4613 = vmatpush.msra.mxu3 %v4606_v1  ;;  %4510 = vmatpush.msra.mxu1 %v4451_v60  ;;  %v4549_v48 = vld [vmem:[#allocation13 + $0x148] sm:$0xff]  ;;  %v4548_v21 = vld [vmem:[#allocation13 + $0x140] sm:$0xff]  ;;  %v4547_v22 = vld [vmem:[#allocation13 + $0x138] sm:$0xff] }
 0x698   : >> { %4560 = vmatpush.msra.mxu2 %v4551_v19  ;;  %4482 = vmatpush.msra.mxu0 %v4471_v5  ;;  %v4603_v9 = vld [vmem:[#allocation13 + $0x1c8] sm:$0xff]  ;;  %v4602_v11 = vld [vmem:[#allocation13 + $0x1c0] sm:$0xff]  ;;  %v4601_v13 = vld [vmem:[#allocation13 + $0x1b8] sm:$0xff] }
 0x699   : >> { %4614 = vmatpush.msra.mxu3 %v4605_v4  ;;  %4511 = vmatpush.msra.mxu1 %v4450_v6  ;;  %v4467_v14 = vld [vmem:[#allocation13 + $0xb0] sm:$0xff]  ;;  %v4466_v18 = vld [vmem:[#allocation13 + $0xa8] sm:$0xff]  ;;  %v4465_v24 = vld [vmem:[#allocation13 + $0xa0] sm:$0xff] }
 0x69a   : >> { %4561 = vmatpush.msra.mxu2 %v4550_v3  ;;  %4483 = vmatpush.msra.mxu0 %v4470_v7  ;;  %v4446_v45 = vld [vmem:[#allocation13 + $0x30] sm:$0xff]  ;;  %v4445_v20 = vld [vmem:[#allocation13 + $0x28] sm:$0xff]  ;;  %v4444_v25 = vld [vmem:[#allocation13 + $0x20] sm:$0xff] }
 0x69b   : >> { %4615 = vmatpush.msra.mxu3 %v4604_v37  ;;  %4512 = vmatpush.msra.mxu1 %v4449_v8  ;;  %v4546_v16 = vld [vmem:[#allocation13 + $0x130] sm:$0xff]  ;;  %v4545_v23 = vld [vmem:[#allocation13 + $0x128] sm:$0xff]  ;;  %v4544_v26 = vld [vmem:[#allocation13 + $0x120] sm:$0xff] }
 0x69c   : >> { %4562 = vmatpush.msra.mxu2 %v4549_v48  ;;  %4484 = vmatpush.msra.mxu0 %v4469_v10  ;;  %v4600_v17 = vld [vmem:[#allocation13 + $0x1b0] sm:$0xff]  ;;  %v4599_v53 = vld [vmem:[#allocation13 + $0x1a8] sm:$0xff]  ;;  %v4598_v54 = vld [vmem:[#allocation13 + $0x1a0] sm:$0xff] }
 0x69d   : >> { %4616 = vmatpush.msra.mxu3 %v4603_v9  ;;  %4513 = vmatpush.msra.mxu1 %v4448_v0  ;;  %v4464_v27 = vld [vmem:[#allocation13 + $0x98] sm:$0xff]  ;;  %v4463_v32 = vld [vmem:[#allocation13 + $0x90] sm:$0xff]  ;;  %v4462_v38 = vld [vmem:[#allocation13 + $0x88] sm:$0xff] }
 0x69e   : >> { %4563 = vmatpush.msra.mxu2 %v4548_v21  ;;  %4485 = vmatpush.msra.mxu0 %v4468_v52  ;;  %v4443_v29 = vld [vmem:[#allocation13 + $0x18] sm:$0xff]  ;;  %v4442_v33 = vld [vmem:[#allocation13 + $0x10] sm:$0xff]  ;;  %v4441_v39 = vld [vmem:[#allocation13 + $0x8] sm:$0xff] }
 0x69f   : >> { %4617 = vmatpush.msra.mxu3 %v4602_v11  ;;  %4514 = vmatpush.msra.mxu1 %v4447_v12  ;;  %v4543_v30 = vld [vmem:[#allocation13 + $0x118] sm:$0xff]  ;;  %v4542_v35 = vld [vmem:[#allocation13 + $0x110] sm:$0xff]  ;;  %v4541_v40 = vld [vmem:[#allocation13 + $0x108] sm:$0xff] }
 0x6a0   : >> { %4564 = vmatpush.msra.mxu2 %v4547_v22  ;;  %4486 = vmatpush.msra.mxu0 %v4467_v14  ;;  %v4597_v31 = vld [vmem:[#allocation13 + $0x198] sm:$0xff]  ;;  %v4596_v36 = vld [vmem:[#allocation13 + $0x190] sm:$0xff]  ;;  %v4595_v41 = vld [vmem:[#allocation13 + $0x188] sm:$0xff] }
 0x6a1   : >> { %4618 = vmatpush.msra.mxu3 %v4601_v13  ;;  %4515 = vmatpush.msra.mxu1 %v4446_v45  ;;  %v4461_v34 = vld [vmem:[#allocation13 + $0x80] sm:$0xff]  ;;  %v4456_v47 = vld [vmem:[%s7948_s14 + $0x1] sm:$0xff]  ;;  %v4772_v62 = vld [vmem:[#allocation13 + $0x368] sm:$0xff] }
 0x6a2   : >> { %4565 = vmatpush.msra.mxu2 %v4546_v16  ;;  %4487 = vmatpush.msra.mxu0 %v4466_v18  ;;  %v4440_v42 = vld [vmem:[#allocation13] sm:$0xff]  ;;  %v4436_v49 = vld [vmem:[%s7948_s14] sm:$0xff]  ;;  %v4774_v55 = vld [vmem:[#allocation13 + $0x378] sm:$0xff] }
 0x6a3   : >> { %4619 = vmatpush.msra.mxu3 %v4600_v17  ;;  %4516 = vmatpush.msra.mxu1 %v4445_v20  ;;  %v4540_v43 = vld [vmem:[#allocation13 + $0x100] sm:$0xff]  ;;  %v4535_v50 = vld [vmem:[%s7948_s14 + $0x2] sm:$0xff]  ;;  %v4826_v63 = vld [vmem:[#allocation13 + $0x3e8] sm:$0xff] }
 0x6a4   : >> { %4566 = vmatpush.msra.mxu2 %v4545_v23  ;;  %4488 = vmatpush.msra.mxu0 %v4465_v24  ;;  %v4594_v46 = vld [vmem:[#allocation13 + $0x180] sm:$0xff]  ;;  %v4589_v51 = vld [vmem:[%s7948_s14 + $0x3] sm:$0xff]  ;;  %v4661_v1 = vld [vmem:[#allocation13 + $0x268] sm:$0xff] }
 0x6a5   : >> { %4620 = vmatpush.msra.mxu3 %v4599_v53  ;;  %4517 = vmatpush.msra.mxu1 %v4444_v25  ;;  %v4828_v56 = vld [vmem:[#allocation13 + $0x3f8] sm:$0xff]  ;;  %v4773_v58 = vld [vmem:[#allocation13 + $0x370] sm:$0xff]  ;;  %v4718_v2 = vld [vmem:[#allocation13 + $0x2e8] sm:$0xff] }
 0x6a6   : >> { %4567 = vmatpush.msra.mxu2 %v4544_v26  ;;  %4489 = vmatpush.msra.mxu0 %v4464_v27  ;;  %v4663_v28 = vld [vmem:[#allocation13 + $0x278] sm:$0xff]  ;;  %v4827_v15 = vld [vmem:[#allocation13 + $0x3f0] sm:$0xff]  ;;  %v4771_v60 = vld [vmem:[#allocation13 + $0x360] sm:$0xff] }
 0x6a7   : >> { %4621 = vmatpush.msra.mxu3 %v4598_v54  ;;  %4518 = vmatpush.msra.mxu1 %v4443_v29  ;;  %v4720_v57 = vld [vmem:[#allocation13 + $0x2f8] sm:$0xff]  ;;  %v4662_v59 = vld [vmem:[#allocation13 + $0x270] sm:$0xff]  ;;  %v4825_v19 = vld [vmem:[#allocation13 + $0x3e0] sm:$0xff] }
 0x6a8   : >> { %4568 = vmatpush.msra.mxu2 %v4543_v30  ;;  %4490 = vmatpush.msra.mxu0 %v4463_v32  ;;  %v4719_v61 = vld [vmem:[#allocation13 + $0x2f0] sm:$0xff]  ;;  %v4660_v4 = vld [vmem:[#allocation13 + $0x260] sm:$0xff]  ;;  %v4437_v3 = vld [vmem:[%s7948_s14 + $0x8] sm:$0xff] }
 0x6a9   : >> { %4622 = vmatpush.msra.mxu3 %v4597_v31  ;;  %4519 = vmatpush.msra.mxu1 %v4442_v33  ;;  %v4717_v5 = vld [vmem:[#allocation13 + $0x2e0] sm:$0xff]  ;;  %v4770_v8 = vld [vmem:[#allocation13 + $0x358] sm:$0xff]  ;;  %v4769_v0 = vld [vmem:[#allocation13 + $0x350] sm:$0xff] }
 0x6aa   : >> { %4569 = vmatpush.msra.mxu2 %v4542_v35  ;;  %4491 = vmatpush.msra.mxu0 %v4462_v38  ;;  %v4457_v6 = vld [vmem:[%s7948_s14 + $0x9] sm:$0xff]  ;;  %v4823_v21 = vld [vmem:[#allocation13 + $0x3d0] sm:$0xff]  ;;  %v4768_v12 = vld [vmem:[#allocation13 + $0x348] sm:$0xff] }
 0x6ab   : >> { %4623 = vmatpush.msra.mxu3 %v4596_v36  ;;  %4520 = vmatpush.msra.mxu1 %v4441_v39  ;;  %v4536_v37 = vld [vmem:[%s7948_s14 + $0xa] sm:$0xff]  ;;  %v4658_v11 = vld [vmem:[#allocation13 + $0x250] sm:$0xff]  ;;  %v4822_v22 = vld [vmem:[#allocation13 + $0x3c8] sm:$0xff] }
 0x6ac   : >> { %4570 = vmatpush.msra.mxu2 %v4541_v40  ;;  %4492 = vmatpush.msra.mxu0 %v4461_v34  ;;  %v4590_v7 = vld [vmem:[%s7948_s14 + $0xb] sm:$0xff]  ;;  %v4715_v52 = vld [vmem:[#allocation13 + $0x2d0] sm:$0xff]  ;;  %v4657_v13 = vld [vmem:[#allocation13 + $0x248] sm:$0xff] }
 0x6ad   : >> { %4624 = vmatpush.msra.mxu3 %v4595_v41  ;;  %4521 = vmatpush.msra.mxu1 %v4440_v42  ;;  %v4824_v48 = vld [vmem:[#allocation13 + $0x3d8] sm:$0xff]  ;;  %v4714_v14 = vld [vmem:[#allocation13 + $0x2c8] sm:$0xff]  ;;  %v4767_v45 = vld [vmem:[#allocation13 + $0x340] sm:$0xff] }
 0x6ae   : >> { %4571 = vmatpush.msra.mxu2 %v4540_v43  ;;  %4493 = vmatmul.f32.vlgmr.msra.gmra.mxu0 %v4456_v47  ;;  %v4659_v9 = vld [vmem:[#allocation13 + $0x258] sm:$0xff]  ;;  %v4821_v16 = vld [vmem:[#allocation13 + $0x3c0] sm:$0xff]  ;;  %v4765_v29 = vld [vmem:[#allocation13 + $0x330] sm:$0xff] }
 0x6af   : >> { %4625 = vmatpush.msra.mxu3 %v4594_v46  ;;  %4522 = vmatmul.f32.vlgmr.msra.gmra.mxu1 %v4436_v49  ;;  %v4716_v10 = vld [vmem:[#allocation13 + $0x2d8] sm:$0xff]  ;;  %v4656_v17 = vld [vmem:[#allocation13 + $0x240] sm:$0xff]  ;;  %v4819_v30 = vld [vmem:[#allocation13 + $0x3b0] sm:$0xff] }
 0x6b0   : >> { %4572 = vmatmul.f32.vlgmr.msra.gmra.mxu2 %v4535_v50  ;;  %4626 = vmatmul.f32.vlgmr.msra.gmra.mxu3 %v4589_v51  ;;  %v4713_v18 = vld [vmem:[#allocation13 + $0x2c0] sm:$0xff]  ;;  %v4766_v25 = vld [vmem:[#allocation13 + $0x338] sm:$0xff]  ;;  %v4654_v31 = vld [vmem:[#allocation13 + $0x230] sm:$0xff] }
 0x6b1   : >> { %4775 = vmatpush.msrb.mxu2 %v4774_v55  ;;  %4829 = vmatpush.msrb.mxu3 %v4828_v56  ;;  %v4458_v20 = vld [vmem:[%s7948_s14 + $0x11] sm:$0xff]  ;;  %v4820_v26 = vld [vmem:[#allocation13 + $0x3b8] sm:$0xff]  ;;  %v4711_v32 = vld [vmem:[#allocation13 + $0x2b0] sm:$0xff] }
 0x6b2   : >> { %4664 = vmatpush.msrb.mxu0 %v4663_v28  ;;  %4721 = vmatpush.msrb.mxu1 %v4720_v57  ;;  %v4438_v23 = vld [vmem:[%s7948_s14 + $0x10] sm:$0xff]  ;;  %v4655_v54 = vld [vmem:[#allocation13 + $0x238] sm:$0xff]  ;;  %v4764_v33 = vld [vmem:[#allocation13 + $0x328] sm:$0xff] }
 0x6b3   : >> { %4776 = vmatpush.msrb.mxu2 %v4773_v58  ;;  %4830 = vmatpush.msrb.mxu3 %v4827_v15  ;;  %v4537_v53 = vld [vmem:[%s7948_s14 + $0x12] sm:$0xff]  ;;  %v4712_v27 = vld [vmem:[#allocation13 + $0x2b8] sm:$0xff]  ;;  %v4538_v46 = vld [vmem:[%s7948_s14 + $0x1a] sm:$0xff] }
 0x6b4   : >> { %4665 = vmatpush.msrb.mxu0 %v4662_v59  ;;  %4722 = vmatpush.msrb.mxu1 %v4719_v61  ;;  %v4591_v24 = vld [vmem:[%s7948_s14 + $0x13] sm:$0xff]  ;;  %v4592_v47 = vld [vmem:[%s7948_s14 + $0x1b] sm:$0xff]  ;;  %v4762_v49 = vld [vmem:[#allocation13 + $0x318] sm:$0xff] }
 0x6b5   : >> { %4777 = vmatpush.msrb.mxu2 %v4772_v62  ;;  %4831 = vmatpush.msrb.mxu3 %v4826_v63  ;;  %v4818_v35 = vld [vmem:[#allocation13 + $0x3a8] sm:$0xff]  ;;  %v4763_v39 = vld [vmem:[#allocation13 + $0x320] sm:$0xff]  ;;  %v4816_v50 = vld [vmem:[#allocation13 + $0x398] sm:$0xff] }
 0x6b6   : >> { %4666 = vmatpush.msrb.mxu0 %v4661_v1  ;;  %4723 = vmatpush.msrb.mxu1 %v4718_v2  ;;  %v4653_v36 = vld [vmem:[#allocation13 + $0x228] sm:$0xff]  ;;  %v4817_v40 = vld [vmem:[#allocation13 + $0x3a0] sm:$0xff]  ;;  %v4651_v51 = vld [vmem:[#allocation13 + $0x218] sm:$0xff] }
 0x6b7   : >> { %4778 = vmatpush.msrb.mxu2 %v4771_v60  ;;  %4832 = vmatpush.msrb.mxu3 %v4825_v19  ;;  %v4710_v38 = vld [vmem:[#allocation13 + $0x2a8] sm:$0xff]  ;;  %v4652_v41 = vld [vmem:[#allocation13 + $0x220] sm:$0xff]  ;;  %v4708_v55 = vld [vmem:[#allocation13 + $0x298] sm:$0xff] }
 0x6b8   : >> { %4667 = vmatpush.msrb.mxu0 %v4660_v4  ;;  %4724 = vmatpush.msrb.mxu1 %v4717_v5  ;;  %v4709_v34 = vld [vmem:[#allocation13 + $0x2a0] sm:$0xff]  ;;  %v4459_v42 = vld [vmem:[%s7948_s14 + $0x19] sm:$0xff]  ;;  %v4643_v19 = vld [vmem:[%s7948_s14 + $0x4] sm:$0xff] }
 0x6b9   : >> { %4496 = vmatmul.f32.gmra.mxu0 %v4457_v6  ;;  %4525 = vmatmul.f32.gmra.mxu1 %v4437_v3  ;;  %v4439_v43 = vld [vmem:[%s7948_s14 + $0x18] sm:$0xff]  ;;  %v4761_v56 = vld [vmem:[#allocation13 + $0x310] sm:$0xff]  ;;  %v4759_v63 = vld [vmem:[#allocation13 + $0x300] sm:$0xff] }
 0x6ba   : >> { %4575 = vmatmul.f32.gmra.mxu2 %v4536_v37  ;;  %4629 = vmatmul.f32.gmra.mxu3 %v4590_v7  ;;  %v4815_v28 = vld [vmem:[#allocation13 + $0x390] sm:$0xff]  ;;  %v4760_v15 = vld [vmem:[#allocation13 + $0x308] sm:$0xff]  ;;  %v4813_v1 = vld [vmem:[#allocation13 + $0x380] sm:$0xff] }
 0x6bb   : >> { %4779 = vmatpush.msrb.mxu2 %v4770_v8  ;;  %4833 = vmatpush.msrb.mxu3 %v4824_v48  ;;  %v4650_v57 = vld [vmem:[#allocation13 + $0x210] sm:$0xff]  ;;  %v4814_v59 = vld [vmem:[#allocation13 + $0x388] sm:$0xff]  ;;  %v4648_v2 = vld [vmem:[#allocation13 + $0x200] sm:$0xff] }
 0x6bc   : >> { %4668 = vmatpush.msrb.mxu0 %v4659_v9  ;;  %4725 = vmatpush.msrb.mxu1 %v4716_v10  ;;  %v4707_v58 = vld [vmem:[#allocation13 + $0x290] sm:$0xff]  ;;  %v4649_v61 = vld [vmem:[#allocation13 + $0x208] sm:$0xff]  ;;  %v4705_v60 = vld [vmem:[#allocation13 + $0x280] sm:$0xff] }
 0x6bd   : >> { %4780 = vmatpush.msrb.mxu2 %v4769_v0  ;;  %4834 = vmatpush.msrb.mxu3 %v4823_v21  ;;  %v4706_v62 = vld [vmem:[#allocation13 + $0x288] sm:$0xff]  ;;  %v6244_v4 = vld [vmem:[%s7948_s14 + $0x28] sm:$0xff]  ;;  %v4992_v48 = vld [vmem:[#allocation13 + $0x570] sm:$0xff] }
 0x6be   : >> { %4669 = vmatpush.msrb.mxu0 %v4658_v11  ;;  %4726 = vmatpush.msrb.mxu1 %v4715_v52  ;;  %v6248_v5 = vld [vmem:[%s7948_s14 + $0x29] sm:$0xff]  ;;  %v5046_v9 = vld [vmem:[#allocation13 + $0x5f0] sm:$0xff]  ;;  %v4991_v21 = vld [vmem:[#allocation13 + $0x568] sm:$0xff] }
 0x6bf   : >> { %4781 = vmatpush.msrb.mxu2 %v4768_v12  ;;  %4835 = vmatpush.msrb.mxu3 %v4822_v22  ;;  %v6252_v6 = vld [vmem:[%s7948_s14 + $0x2a] sm:$0xff]  ;;  %v4881_v10 = vld [vmem:[#allocation13 + $0x470] sm:$0xff]  ;;  %v5045_v11 = vld [vmem:[#allocation13 + $0x5e8] sm:$0xff] }
 0x6c0   : >> { %4670 = vmatpush.msrb.mxu0 %v4657_v13  ;;  %4727 = vmatpush.msrb.mxu1 %v4714_v14  ;;  %v4993_v3 = vld [vmem:[#allocation13 + $0x578] sm:$0xff]  ;;  %v4935_v0 = vld [vmem:[#allocation13 + $0x4f0] sm:$0xff]  ;;  %v4880_v52 = vld [vmem:[#allocation13 + $0x468] sm:$0xff] }
 0x6c1   : >> { %4782 = vmatpush.msrb.mxu2 %v4767_v45  ;;  %4836 = vmatpush.msrb.mxu3 %v4821_v16  ;;  %v5047_v37 = vld [vmem:[#allocation13 + $0x5f8] sm:$0xff]  ;;  %v4934_v12 = vld [vmem:[#allocation13 + $0x4e8] sm:$0xff]  ;;  %v4990_v22 = vld [vmem:[#allocation13 + $0x560] sm:$0xff] }
 0x6c2   : >> { %4671 = vmatpush.msrb.mxu0 %v4656_v17  ;;  %4728 = vmatpush.msrb.mxu1 %v4713_v18  ;;  %v4882_v7 = vld [vmem:[#allocation13 + $0x478] sm:$0xff]  ;;  %v5044_v13 = vld [vmem:[#allocation13 + $0x5e0] sm:$0xff] }
 0x6c3   : >> { %4499 = vmatmul.f32.gmra.mxu0 %v4458_v20  ;;  %4528 = vmatmul.f32.gmra.mxu1 %v4438_v23  ;;  %v4936_v8 = vld [vmem:[#allocation13 + $0x4f8] sm:$0xff]  ;;  %v4879_v14 = vld [vmem:[#allocation13 + $0x460] sm:$0xff] }
 0x6c4   : >> { %4578 = vmatmul.f32.gmra.mxu2 %v4537_v53  ;;  %4632 = vmatmul.f32.gmra.mxu3 %v4591_v24  ;;  %v4933_v45 = vld [vmem:[#allocation13 + $0x4e0] sm:$0xff]  ;;  %v4989_v23 = vld [vmem:[#allocation13 + $0x558] sm:$0xff] }
 0x6c5   : >> { %4783 = vmatpush.msrb.mxu2 %v4766_v25  ;;  %4837 = vmatpush.msrb.mxu3 %v4820_v26  ;;  %v4644_v16 = vld [vmem:[%s7948_s14 + $0xc] sm:$0xff]  ;;  %v4988_v26 = vld [vmem:[#allocation13 + $0x550] sm:$0xff] }
 0x6c6   : >> { %4672 = vmatpush.msrb.mxu0 %v4655_v54  ;;  %4729 = vmatpush.msrb.mxu1 %v4712_v27  ;;  %v6245_v17 = vld [vmem:[%s7948_s14 + $0x30] sm:$0xff]  ;;  %v5043_v53 = vld [vmem:[#allocation13 + $0x5d8] sm:$0xff]  ;;  %v5042_v54 = vld [vmem:[#allocation13 + $0x5d0] sm:$0xff] }
 0x6c7   : >> { %4784 = vmatpush.msrb.mxu2 %v4765_v29  ;;  %4838 = vmatpush.msrb.mxu3 %v4819_v30  ;;  %v6249_v18 = vld [vmem:[%s7948_s14 + $0x31] sm:$0xff]  ;;  %v4878_v24 = vld [vmem:[#allocation13 + $0x458] sm:$0xff]  ;;  %v4877_v27 = vld [vmem:[#allocation13 + $0x450] sm:$0xff] }
 0x6c8   : >> { %4673 = vmatpush.msrb.mxu0 %v4654_v31  ;;  %4730 = vmatpush.msrb.mxu1 %v4711_v32  ;;  %v6253_v20 = vld [vmem:[%s7948_s14 + $0x32] sm:$0xff]  ;;  %v4932_v25 = vld [vmem:[#allocation13 + $0x4d8] sm:$0xff]  ;;  %v4931_v29 = vld [vmem:[#allocation13 + $0x4d0] sm:$0xff] }
 0x6c9   : >> { %4785 = vmatpush.msrb.mxu2 %v4764_v33  ;;  %4839 = vmatpush.msrb.mxu3 %v4818_v35  ;;  %v4987_v30 = vld [vmem:[#allocation13 + $0x548] sm:$0xff]  ;;  %v4986_v35 = vld [vmem:[#allocation13 + $0x540] sm:$0xff] }
 0x6ca   : >> { %4674 = vmatpush.msrb.mxu0 %v4653_v36  ;;  %4731 = vmatpush.msrb.mxu1 %v4710_v38  ;;  %v5041_v31 = vld [vmem:[#allocation13 + $0x5c8] sm:$0xff]  ;;  %v5040_v36 = vld [vmem:[#allocation13 + $0x5c0] sm:$0xff] }
 0x6cb   : >> { %4786 = vmatpush.msrb.mxu2 %v4763_v39  ;;  %4840 = vmatpush.msrb.mxu3 %v4817_v40  ;;  %v4876_v32 = vld [vmem:[#allocation13 + $0x448] sm:$0xff]  ;;  %v4875_v38 = vld [vmem:[#allocation13 + $0x440] sm:$0xff] }
 0x6cc   : >> { %4675 = vmatpush.msrb.mxu0 %v4652_v41  ;;  %4732 = vmatpush.msrb.mxu1 %v4709_v34  ;;  %v4930_v33 = vld [vmem:[#allocation13 + $0x4c8] sm:$0xff]  ;;  %v4929_v39 = vld [vmem:[#allocation13 + $0x4c0] sm:$0xff] }
 0x6cd   : >> { %4502 = vmatmul.f32.gmra.mxu0 %v4459_v42  ;;  %4531 = vmatmul.f32.gmra.mxu1 %v4439_v43  ;;  %v4645_v40 = vld [vmem:[%s7948_s14 + $0x14] sm:$0xff]  ;;  %v4985_v43 = vld [vmem:[#allocation13 + $0x538] sm:$0xff] }
 0x6ce   : >> { %4581 = vmatmul.f32.gmra.mxu2 %v4538_v46  ;;  %4635 = vmatmul.f32.gmra.mxu3 %v4592_v47  ;;  %v6246_v41 = vld [vmem:[%s7948_s14 + $0x38] sm:$0xff]  ;;  %v5039_v46 = vld [vmem:[#allocation13 + $0x5b8] sm:$0xff] }
 0x6cf   : >> { %4787 = vmatpush.msrb.mxu2 %v4762_v49  ;;  %4841 = vmatpush.msrb.mxu3 %v4816_v50  ;;  %v6250_v34 = vld [vmem:[%s7948_s14 + $0x39] sm:$0xff]  ;;  %v4874_v47 = vld [vmem:[#allocation13 + $0x438] sm:$0xff] }
 0x6d0   : >> { %4676 = vmatpush.msrb.mxu0 %v4651_v51  ;;  %4733 = vmatpush.msrb.mxu1 %v4708_v55  ;;  %v6254_v42 = vld [vmem:[%s7948_s14 + $0x3a] sm:$0xff]  ;;  %v4928_v49 = vld [vmem:[#allocation13 + $0x4b8] sm:$0xff] }
 0x6d1   : >> { %4788 = vmatpush.msrb.mxu2 %v4761_v56  ;;  %4842 = vmatpush.msrb.mxu3 %v4815_v28  ;;  %v4984_v50 = vld [vmem:[#allocation13 + $0x530] sm:$0xff]  ;;  %v4983_v28 = vld [vmem:[#allocation13 + $0x528] sm:$0xff] }
 0x6d2   : >> { %4677 = vmatpush.msrb.mxu0 %v4650_v57  ;;  %4734 = vmatpush.msrb.mxu1 %v4707_v58  ;;  %v5038_v51 = vld [vmem:[#allocation13 + $0x5b0] sm:$0xff]  ;;  %v5037_v57 = vld [vmem:[#allocation13 + $0x5a8] sm:$0xff] }
 0x6d3   : >> { %4789 = vmatpush.msrb.mxu2 %v4760_v15  ;;  %4843 = vmatpush.msrb.mxu3 %v4814_v59  ;;  %v4873_v55 = vld [vmem:[#allocation13 + $0x430] sm:$0xff]  ;;  %v4872_v58 = vld [vmem:[#allocation13 + $0x428] sm:$0xff]  ;;  %v4982_v59 = vld [vmem:[#allocation13 + $0x520] sm:$0xff] }
 0x6d4   : >> { %4678 = vmatpush.msrb.mxu0 %v4649_v61  ;;  %4735 = vmatpush.msrb.mxu1 %v4706_v62  ;;  %v4927_v56 = vld [vmem:[#allocation13 + $0x4b0] sm:$0xff]  ;;  %v4926_v15 = vld [vmem:[#allocation13 + $0x4a8] sm:$0xff]  ;;  %v5036_v61 = vld [vmem:[#allocation13 + $0x5a0] sm:$0xff] }
 0x6d5   : >> { %4790 = vmatpush.msrb.mxu2 %v4759_v63  ;;  %4844 = vmatpush.msrb.mxu3 %v4813_v1  ;;  %v4871_v62 = vld [vmem:[#allocation13 + $0x420] sm:$0xff]  ;;  %v4646_v1 = vld [vmem:[%s7948_s14 + $0x1c] sm:$0xff] }
 0x6d6   : >> { %4679 = vmatpush.msrb.mxu0 %v4648_v2  ;;  %4736 = vmatpush.msrb.mxu1 %v4705_v60  ;;  %v4925_v63 = vld [vmem:[#allocation13 + $0x4a0] sm:$0xff]  ;;  %v6247_v2 = vld [vmem:[%s7948_s14 + $0x40] sm:$0xff] }
 0x6d7   : >> { %4680 = vmatmul.f32.vlgmr.msrb.gmra.mxu0 %v4643_v19  ;;  %4737 = vmatmul.f32.vlgmr.msrb.gmra.mxu1 %v6244_v4  ;;  %v6251_v60 = vld [vmem:[%s7948_s14 + $0x41] sm:$0xff] }
 0x6d8   : >> { %4791 = vmatmul.f32.vlgmr.msrb.gmra.mxu2 %v6248_v5  ;;  %4845 = vmatmul.f32.vlgmr.msrb.gmra.mxu3 %v6252_v6  ;;  %v6255_v19 = vld [vmem:[%s7948_s14 + $0x42] sm:$0xff] }
 0x6d9   : >> { %4994 = vmatpush.msra.mxu2 %v4993_v3  ;;  %5048 = vmatpush.msra.mxu3 %v5047_v37  ;;  %v4981_v4 = vld [vmem:[#allocation13 + $0x518] sm:$0xff]  ;;  %v4980_v37 = vld [vmem:[#allocation13 + $0x510] sm:$0xff] }
 0x6da   : >> { %4883 = vmatpush.msra.mxu0 %v4882_v7  ;;  %4937 = vmatpush.msra.mxu1 %v4936_v8  ;;  %v5035_v5 = vld [vmem:[#allocation13 + $0x598] sm:$0xff]  ;;  %v5034_v7 = vld [vmem:[#allocation13 + $0x590] sm:$0xff] }
 0x6db   : >> { %4995 = vmatpush.msra.mxu2 %v4992_v48  ;;  %5049 = vmatpush.msra.mxu3 %v5046_v9  ;;  %v4870_v6 = vld [vmem:[#allocation13 + $0x418] sm:$0xff]  ;;  %v4869_v8 = vld [vmem:[#allocation13 + $0x410] sm:$0xff]  ;;  %v4979_v9 = vld [vmem:[#allocation13 + $0x508] sm:$0xff] }
 0x6dc   : >> { %4884 = vmatpush.msra.mxu0 %v4881_v10  ;;  %4938 = vmatpush.msra.mxu1 %v4935_v0  ;;  %v4924_v3 = vld [vmem:[#allocation13 + $0x498] sm:$0xff]  ;;  %v4923_v48 = vld [vmem:[#allocation13 + $0x490] sm:$0xff]  ;;  %v5033_v10 = vld [vmem:[#allocation13 + $0x588] sm:$0xff] }
 0x6dd   : >> { %4996 = vmatpush.msra.mxu2 %v4991_v21  ;;  %5050 = vmatpush.msra.mxu3 %v5045_v11  ;;  %v4868_v0 = vld [vmem:[#allocation13 + $0x408] sm:$0xff]  ;;  %v4978_v11 = vld [vmem:[#allocation13 + $0x500] sm:$0xff] }
 0x6de   : >> { %4885 = vmatpush.msra.mxu0 %v4880_v52  ;;  %4939 = vmatpush.msra.mxu1 %v4934_v12  ;;  %v4922_v21 = vld [vmem:[#allocation13 + $0x488] sm:$0xff]  ;;  %v5032_v52 = vld [vmem:[#allocation13 + $0x580] sm:$0xff] }
 0x6df   : >> { %4997 = vmatpush.msra.mxu2 %v4990_v22  ;;  %5051 = vmatpush.msra.mxu3 %v5044_v13  ;;  %v4867_v12 = vld [vmem:[#allocation13 + $0x400] sm:$0xff] }
 0x6e0   : >> { %4886 = vmatpush.msra.mxu0 %v4879_v14  ;;  %4940 = vmatpush.msra.mxu1 %v4933_v45  ;;  %v4921_v22 = vld [vmem:[#allocation13 + $0x480] sm:$0xff] }
 0x6e1   : >> { %4683 = vmatmul.f32.gmra.mxu0 %v4644_v16  ;;  %4740 = vmatmul.f32.gmra.mxu1 %v6245_v17  ;;  %v6256_v13 = vld [vmem:[%s7948_s14 + $0x2b] sm:$0xff] }
 0x6e2   : >> { %4794 = vmatmul.f32.gmra.mxu2 %v6249_v18  ;;  %4848 = vmatmul.f32.gmra.mxu3 %v6253_v20  ;;  %v6260_v14 = vld [vmem:[%s7948_s14 + $0x2c] sm:$0xff] }
 0x6e3   : >> { %4998 = vmatpush.msra.mxu2 %v4989_v23  ;;  %5052 = vmatpush.msra.mxu3 %v5043_v53  ;;  %v6264_v45 = vld [vmem:[%s7948_s14 + $0x50] sm:$0xff]  ;;  %v5209_v17 = vld [vmem:[#allocation13 + $0x778] sm:$0xff]  ;;  %v5208_v53 = vld [vmem:[#allocation13 + $0x770] sm:$0xff] }
 0x6e4   : >> { %4887 = vmatpush.msra.mxu0 %v4878_v24  ;;  %4941 = vmatpush.msra.mxu1 %v4932_v25  ;;  %v6268_v16 = vld [vmem:[%s7948_s14 + $0x51] sm:$0xff]  ;;  %v5266_v18 = vld [vmem:[#allocation13 + $0x7f8] sm:$0xff]  ;;  %v5265_v24 = vld [vmem:[#allocation13 + $0x7f0] sm:$0xff] }
 0x6e5   : >> { %4999 = vmatpush.msra.mxu2 %v4988_v26  ;;  %5053 = vmatpush.msra.mxu3 %v5042_v54  ;;  %v5101_v20 = vld [vmem:[#allocation13 + $0x678] sm:$0xff]  ;;  %v5100_v25 = vld [vmem:[#allocation13 + $0x670] sm:$0xff]  ;;  %v5207_v54 = vld [vmem:[#allocation13 + $0x768] sm:$0xff] }
 0x6e6   : >> { %4888 = vmatpush.msra.mxu0 %v4877_v27  ;;  %4942 = vmatpush.msra.mxu1 %v4931_v29  ;;  %v5155_v23 = vld [vmem:[#allocation13 + $0x6f8] sm:$0xff]  ;;  %v5154_v26 = vld [vmem:[#allocation13 + $0x6f0] sm:$0xff]  ;;  %v5264_v27 = vld [vmem:[#allocation13 + $0x7e8] sm:$0xff] }
 0x6e7   : >> { %5000 = vmatpush.msra.mxu2 %v4987_v30  ;;  %5054 = vmatpush.msra.mxu3 %v5041_v31  ;;  %v5099_v29 = vld [vmem:[#allocation13 + $0x668] sm:$0xff]  ;;  %v5206_v31 = vld [vmem:[#allocation13 + $0x760] sm:$0xff] }
 0x6e8   : >> { %4889 = vmatpush.msra.mxu0 %v4876_v32  ;;  %4943 = vmatpush.msra.mxu1 %v4930_v33  ;;  %v5153_v30 = vld [vmem:[#allocation13 + $0x6e8] sm:$0xff]  ;;  %v5263_v32 = vld [vmem:[#allocation13 + $0x7e0] sm:$0xff] }
 0x6e9   : >> { %5001 = vmatpush.msra.mxu2 %v4986_v35  ;;  %5055 = vmatpush.msra.mxu3 %v5040_v36  ;;  %v5098_v33 = vld [vmem:[#allocation13 + $0x660] sm:$0xff] }
 0x6ea   : >> { %4890 = vmatpush.msra.mxu0 %v4875_v38  ;;  %4944 = vmatpush.msra.mxu1 %v4929_v39  ;;  %v5152_v35 = vld [vmem:[#allocation13 + $0x6e0] sm:$0xff]  ;;  %v6265_v39 = vld [vmem:[%s7948_s14 + $0x58] sm:$0xff] }
 0x6eb   : >> { %4686 = vmatmul.f32.gmra.mxu0 %v4645_v40  ;;  %4743 = vmatmul.f32.gmra.mxu1 %v6246_v41  ;;  %v6257_v36 = vld [vmem:[%s7948_s14 + $0x33] sm:$0xff]  ;;  %v5205_v41 = vld [vmem:[#allocation13 + $0x758] sm:$0xff] }
 0x6ec   : >> { %4797 = vmatmul.f32.gmra.mxu2 %v6250_v34  ;;  %4851 = vmatmul.f32.gmra.mxu3 %v6254_v42  ;;  %v6261_v38 = vld [vmem:[%s7948_s14 + $0x34] sm:$0xff]  ;;  %v5262_v34 = vld [vmem:[#allocation13 + $0x7d8] sm:$0xff] }
 0x6ed   : >> { %5002 = vmatpush.msra.mxu2 %v4985_v43  ;;  %5056 = vmatpush.msra.mxu3 %v5039_v46  ;;  %v6269_v40 = vld [vmem:[%s7948_s14 + $0x59] sm:$0xff]  ;;  %v5097_v42 = vld [vmem:[#allocation13 + $0x658] sm:$0xff] }
 0x6ee   : >> { %4891 = vmatpush.msra.mxu0 %v4874_v47  ;;  %4945 = vmatpush.msra.mxu1 %v4928_v49  ;;  %v5151_v43 = vld [vmem:[#allocation13 + $0x6d8] sm:$0xff]  ;;  %v5204_v46 = vld [vmem:[#allocation13 + $0x750] sm:$0xff] }
 0x6ef   : >> { %5003 = vmatpush.msra.mxu2 %v4984_v50  ;;  %5057 = vmatpush.msra.mxu3 %v5038_v51  ;;  %v5261_v47 = vld [vmem:[#allocation13 + $0x7d0] sm:$0xff]  ;;  %v5203_v51 = vld [vmem:[#allocation13 + $0x748] sm:$0xff] }
 0x6f0   : >> { %4892 = vmatpush.msra.mxu0 %v4873_v55  ;;  %4946 = vmatpush.msra.mxu1 %v4927_v56  ;;  %v5096_v49 = vld [vmem:[#allocation13 + $0x650] sm:$0xff]  ;;  %v5260_v55 = vld [vmem:[#allocation13 + $0x7c8] sm:$0xff] }
 0x6f1   : >> { %5004 = vmatpush.msra.mxu2 %v4983_v28  ;;  %5058 = vmatpush.msra.mxu3 %v5037_v57  ;;  %v5150_v50 = vld [vmem:[#allocation13 + $0x6d0] sm:$0xff]  ;;  %v5095_v56 = vld [vmem:[#allocation13 + $0x648] sm:$0xff]  ;;  %v5202_v57 = vld [vmem:[#allocation13 + $0x740] sm:$0xff] }
 0x6f2   : >> { %4893 = vmatpush.msra.mxu0 %v4872_v58  ;;  %4947 = vmatpush.msra.mxu1 %v4926_v15  ;;  %v5149_v28 = vld [vmem:[#allocation13 + $0x6c8] sm:$0xff]  ;;  %v5259_v58 = vld [vmem:[#allocation13 + $0x7c0] sm:$0xff] }
 0x6f3   : >> { %5005 = vmatpush.msra.mxu2 %v4982_v59  ;;  %5059 = vmatpush.msra.mxu3 %v5036_v61  ;;  %v5094_v15 = vld [vmem:[#allocation13 + $0x640] sm:$0xff]  ;;  %v6258_v61 = vld [vmem:[%s7948_s14 + $0x3b] sm:$0xff] }
 0x6f4   : >> { %4894 = vmatpush.msra.mxu0 %v4871_v62  ;;  %4948 = vmatpush.msra.mxu1 %v4925_v63  ;;  %v5148_v59 = vld [vmem:[#allocation13 + $0x6c0] sm:$0xff]  ;;  %v6262_v62 = vld [vmem:[%s7948_s14 + $0x3c] sm:$0xff] }
 0x6f5   : >> { %4689 = vmatmul.f32.gmra.mxu0 %v4646_v1  ;;  %4746 = vmatmul.f32.gmra.mxu1 %v6247_v2  ;;  %v6266_v63 = vld [vmem:[%s7948_s14 + $0x60] sm:$0xff]  ;;  %v5201_v2 = vld [vmem:[#allocation13 + $0x738] sm:$0xff] }
 0x6f6   : >> { %4800 = vmatmul.f32.gmra.mxu2 %v6251_v60  ;;  %4854 = vmatmul.f32.gmra.mxu3 %v6255_v19  ;;  %v6270_v1 = vld [vmem:[%s7948_s14 + $0x61] sm:$0xff] }
 0x6f7   : >> { %5006 = vmatpush.msra.mxu2 %v4981_v4  ;;  %5060 = vmatpush.msra.mxu3 %v5035_v5  ;;  %v5258_v60 = vld [vmem:[#allocation13 + $0x7b8] sm:$0xff]  ;;  %v5200_v5 = vld [vmem:[#allocation13 + $0x730] sm:$0xff] }
 0x6f8   : >> { %4895 = vmatpush.msra.mxu0 %v4870_v6  ;;  %4949 = vmatpush.msra.mxu1 %v4924_v3  ;;  %v5093_v19 = vld [vmem:[#allocation13 + $0x638] sm:$0xff]  ;;  %v5257_v6 = vld [vmem:[#allocation13 + $0x7b0] sm:$0xff] }
 0x6f9   : >> { %5007 = vmatpush.msra.mxu2 %v4980_v37  ;;  %5061 = vmatpush.msra.mxu3 %v5034_v7  ;;  %v5147_v4 = vld [vmem:[#allocation13 + $0x6b8] sm:$0xff]  ;;  %v5092_v3 = vld [vmem:[#allocation13 + $0x630] sm:$0xff]  ;;  %v5199_v7 = vld [vmem:[#allocation13 + $0x728] sm:$0xff] }
 0x6fa   : >> { %4896 = vmatpush.msra.mxu0 %v4869_v8  ;;  %4950 = vmatpush.msra.mxu1 %v4923_v48  ;;  %v5146_v37 = vld [vmem:[#allocation13 + $0x6b0] sm:$0xff]  ;;  %v5256_v8 = vld [vmem:[#allocation13 + $0x7a8] sm:$0xff] }
 0x6fb   : >> { %5008 = vmatpush.msra.mxu2 %v4979_v9  ;;  %5062 = vmatpush.msra.mxu3 %v5033_v10  ;;  %v5091_v48 = vld [vmem:[#allocation13 + $0x628] sm:$0xff]  ;;  %v5198_v10 = vld [vmem:[#allocation13 + $0x720] sm:$0xff] }
 0x6fc   : >> { %4897 = vmatpush.msra.mxu0 %v4868_v0  ;;  %4951 = vmatpush.msra.mxu1 %v4922_v21  ;;  %v5145_v9 = vld [vmem:[#allocation13 + $0x6a8] sm:$0xff]  ;;  %v5255_v0 = vld [vmem:[#allocation13 + $0x7a0] sm:$0xff] }
 0x6fd   : >> { %5009 = vmatpush.msra.mxu2 %v4978_v11  ;;  %5063 = vmatpush.msra.mxu3 %v5032_v52  ;;  %v5090_v21 = vld [vmem:[#allocation13 + $0x620] sm:$0xff]  ;;  %v6259_v52 = vld [vmem:[%s7948_s14 + $0x43] sm:$0xff] }
 0x6fe   : >> { %4898 = vmatpush.msra.mxu0 %v4867_v12  ;;  %4952 = vmatpush.msra.mxu1 %v4921_v22  ;;  %v5144_v11 = vld [vmem:[#allocation13 + $0x6a0] sm:$0xff]  ;;  %v6263_v12 = vld [vmem:[%s7948_s14 + $0x44] sm:$0xff] }
 0x6ff   : >> { %4899 = vmatmul.f32.vlgmr.msra.gmra.mxu0 %v6256_v13  ;;  %4953 = vmatmul.f32.vlgmr.msra.gmra.mxu1 %v6260_v14  ;;  %v6267_v22 = vld [vmem:[%s7948_s14 + $0x68] sm:$0xff] }
 0x700   : >> { %5010 = vmatmul.f32.vlgmr.msra.gmra.mxu2 %v6264_v45  ;;  %5064 = vmatmul.f32.vlgmr.msra.gmra.mxu3 %v6268_v16  ;;  %v6271_v13 = vld [vmem:[%s7948_s14 + $0x69] sm:$0xff] }
 0x701   : >> { %5210 = vmatpush.msrb.mxu2 %v5209_v17  ;;  %5267 = vmatpush.msrb.mxu3 %v5266_v18  ;;  %v5197_v14 = vld [vmem:[#allocation13 + $0x718] sm:$0xff]  ;;  %v5196_v18 = vld [vmem:[#allocation13 + $0x710] sm:$0xff] }
 0x702   : >> { %5102 = vmatpush.msrb.mxu0 %v5101_v20  ;;  %5156 = vmatpush.msrb.mxu1 %v5155_v23  ;;  %v5254_v45 = vld [vmem:[#allocation13 + $0x798] sm:$0xff]  ;;  %v5253_v20 = vld [vmem:[#allocation13 + $0x790] sm:$0xff] }
 0x703   : >> { %5211 = vmatpush.msrb.mxu2 %v5208_v53  ;;  %5268 = vmatpush.msrb.mxu3 %v5265_v24  ;;  %v5089_v16 = vld [vmem:[#allocation13 + $0x618] sm:$0xff]  ;;  %v5088_v23 = vld [vmem:[#allocation13 + $0x610] sm:$0xff]  ;;  %v5195_v24 = vld [vmem:[#allocation13 + $0x708] sm:$0xff] }
 0x704   : >> { %5103 = vmatpush.msrb.mxu0 %v5100_v25  ;;  %5157 = vmatpush.msrb.mxu1 %v5154_v26  ;;  %v5143_v17 = vld [vmem:[#allocation13 + $0x698] sm:$0xff]  ;;  %v5142_v53 = vld [vmem:[#allocation13 + $0x690] sm:$0xff]  ;;  %v5252_v25 = vld [vmem:[#allocation13 + $0x788] sm:$0xff] }
 0x705   : >> { %5212 = vmatpush.msrb.mxu2 %v5207_v54  ;;  %5269 = vmatpush.msrb.mxu3 %v5264_v27  ;;  %v5087_v26 = vld [vmem:[#allocation13 + $0x608] sm:$0xff]  ;;  %v5194_v27 = vld [vmem:[#allocation13 + $0x700] sm:$0xff] }
 0x706   : >> { %5104 = vmatpush.msrb.mxu0 %v5099_v29  ;;  %5158 = vmatpush.msrb.mxu1 %v5153_v30  ;;  %v5141_v54 = vld [vmem:[#allocation13 + $0x688] sm:$0xff]  ;;  %v5251_v29 = vld [vmem:[#allocation13 + $0x780] sm:$0xff] }
 0x707   : >> { %5213 = vmatpush.msrb.mxu2 %v5206_v31  ;;  %5270 = vmatpush.msrb.mxu3 %v5263_v32  ;;  %v5086_v30 = vld [vmem:[#allocation13 + $0x600] sm:$0xff] }
 0x708   : >> { %5105 = vmatpush.msrb.mxu0 %v5098_v33  ;;  %5159 = vmatpush.msrb.mxu1 %v5152_v35  ;;  %v5140_v31 = vld [vmem:[#allocation13 + $0x680] sm:$0xff] }
 0x709   : >> { %4902 = vmatmul.f32.gmra.mxu0 %v6257_v36  ;;  %4956 = vmatmul.f32.gmra.mxu1 %v6261_v38  ;;  %v6272_v32 = vld [vmem:[%s7948_s14 + $0x52] sm:$0xff]  ;;  %v5428_v38 = vld [vmem:[#allocation13 + $0x978] sm:$0xff] }
 0x70a   : >> { %5013 = vmatmul.f32.gmra.mxu2 %v6265_v39  ;;  %5067 = vmatmul.f32.gmra.mxu3 %v6269_v40  ;;  %v6276_v33 = vld [vmem:[%s7948_s14 + $0x53] sm:$0xff]  ;;  %v5482_v39 = vld [vmem:[#allocation13 + $0x9f8] sm:$0xff] }
 0x70b   : >> { %5214 = vmatpush.msrb.mxu2 %v5205_v41  ;;  %5271 = vmatpush.msrb.mxu3 %v5262_v34  ;;  %v6280_v35 = vld [vmem:[%s7948_s14 + $0x54] sm:$0xff]  ;;  %v5320_v40 = vld [vmem:[#allocation13 + $0x878] sm:$0xff]  ;;  %v5427_v34 = vld [vmem:[#allocation13 + $0x970] sm:$0xff] }
 0x70c   : >> { %5106 = vmatpush.msrb.mxu0 %v5097_v42  ;;  %5160 = vmatpush.msrb.mxu1 %v5151_v43  ;;  %v6284_v36 = vld [vmem:[%s7948_s14 + $0x78] sm:$0xff]  ;;  %v5374_v41 = vld [vmem:[#allocation13 + $0x8f8] sm:$0xff]  ;;  %v5481_v42 = vld [vmem:[#allocation13 + $0x9f0] sm:$0xff] }
 0x70d   : >> { %5215 = vmatpush.msrb.mxu2 %v5204_v46  ;;  %5272 = vmatpush.msrb.mxu3 %v5261_v47  ;;  %v5319_v43 = vld [vmem:[#allocation13 + $0x870] sm:$0xff]  ;;  %v5426_v47 = vld [vmem:[#allocation13 + $0x968] sm:$0xff] }
 0x70e   : >> { %5107 = vmatpush.msrb.mxu0 %v5096_v49  ;;  %5161 = vmatpush.msrb.mxu1 %v5150_v50  ;;  %v5373_v46 = vld [vmem:[#allocation13 + $0x8f0] sm:$0xff]  ;;  %v5480_v49 = vld [vmem:[#allocation13 + $0x9e8] sm:$0xff] }
 0x70f   : >> { %5216 = vmatpush.msrb.mxu2 %v5203_v51  ;;  %5273 = vmatpush.msrb.mxu3 %v5260_v55  ;;  %v5318_v50 = vld [vmem:[#allocation13 + $0x868] sm:$0xff]  ;;  %v5425_v55 = vld [vmem:[#allocation13 + $0x960] sm:$0xff] }
 0x710   : >> { %5108 = vmatpush.msrb.mxu0 %v5095_v56  ;;  %5162 = vmatpush.msrb.mxu1 %v5149_v28  ;;  %v5372_v51 = vld [vmem:[#allocation13 + $0x8e8] sm:$0xff]  ;;  %v5479_v56 = vld [vmem:[#allocation13 + $0x9e0] sm:$0xff] }
 0x711   : >> { %5217 = vmatpush.msrb.mxu2 %v5202_v57  ;;  %5274 = vmatpush.msrb.mxu3 %v5259_v58  ;;  %v5317_v58 = vld [vmem:[#allocation13 + $0x860] sm:$0xff] }
 0x712   : >> { %5109 = vmatpush.msrb.mxu0 %v5094_v15  ;;  %5163 = vmatpush.msrb.mxu1 %v5148_v59  ;;  %v5371_v15 = vld [vmem:[#allocation13 + $0x8e0] sm:$0xff]  ;;  %v6273_v59 = vld [vmem:[%s7948_s14 + $0x5a] sm:$0xff] }
 0x713   : >> { %4905 = vmatmul.f32.gmra.mxu0 %v6258_v61  ;;  %4959 = vmatmul.f32.gmra.mxu1 %v6262_v62  ;;  %v6277_v61 = vld [vmem:[%s7948_s14 + $0x5b] sm:$0xff] }
 0x714   : >> { %5016 = vmatmul.f32.gmra.mxu2 %v6266_v63  ;;  %5070 = vmatmul.f32.gmra.mxu3 %v6270_v1  ;;  %v6281_v62 = vld [vmem:[%s7948_s14 + $0x5c] sm:$0xff]  ;;  %v5424_v1 = vld [vmem:[#allocation13 + $0x958] sm:$0xff] }
 0x715   : >> { %5218 = vmatpush.msrb.mxu2 %v5201_v2  ;;  %5275 = vmatpush.msrb.mxu3 %v5258_v60  ;;  %v6285_v63 = vld [vmem:[%s7948_s14 + $0x80] sm:$0xff]  ;;  %v5478_v2 = vld [vmem:[#allocation13 + $0x9d8] sm:$0xff] }
 0x716   : >> { %5110 = vmatpush.msrb.mxu0 %v5093_v19  ;;  %5164 = vmatpush.msrb.mxu1 %v5147_v4  ;;  %v5316_v60 = vld [vmem:[#allocation13 + $0x858] sm:$0xff]  ;;  %v5423_v4 = vld [vmem:[#allocation13 + $0x950] sm:$0xff] }
 0x717   : >> { %5219 = vmatpush.msrb.mxu2 %v5200_v5  ;;  %5276 = vmatpush.msrb.mxu3 %v5257_v6  ;;  %v5370_v19 = vld [vmem:[#allocation13 + $0x8d8] sm:$0xff]  ;;  %v5477_v5 = vld [vmem:[#allocation13 + $0x9d0] sm:$0xff] }
 0x718   : >> { %5111 = vmatpush.msrb.mxu0 %v5092_v3  ;;  %5165 = vmatpush.msrb.mxu1 %v5146_v37  ;;  %v5315_v6 = vld [vmem:[#allocation13 + $0x850] sm:$0xff] }
 0x719   : >> { %5220 = vmatpush.msrb.mxu2 %v5199_v7  ;;  %5277 = vmatpush.msrb.mxu3 %v5256_v8  ;;  %v5369_v3 = vld [vmem:[#allocation13 + $0x8d0] sm:$0xff]  ;;  %v5422_v8 = vld [vmem:[#allocation13 + $0x948] sm:$0xff] }
 0x71a   : >> { %5112 = vmatpush.msrb.mxu0 %v5091_v48  ;;  %5166 = vmatpush.msrb.mxu1 %v5145_v9  ;;  %v5476_v48 = vld [vmem:[#allocation13 + $0x9c8] sm:$0xff] }
 0x71b   : >> { %5221 = vmatpush.msrb.mxu2 %v5198_v10  ;;  %5278 = vmatpush.msrb.mxu3 %v5255_v0  ;;  %v5314_v9 = vld [vmem:[#allocation13 + $0x848] sm:$0xff]  ;;  %v5421_v0 = vld [vmem:[#allocation13 + $0x940] sm:$0xff] }
 0x71c   : >> { %5113 = vmatpush.msrb.mxu0 %v5090_v21  ;;  %5167 = vmatpush.msrb.mxu1 %v5144_v11  ;;  %v5368_v10 = vld [vmem:[#allocation13 + $0x8c8] sm:$0xff]  ;;  %v5475_v21 = vld [vmem:[#allocation13 + $0x9c0] sm:$0xff] }
 0x71d   : >> { %4908 = vmatmul.f32.gmra.mxu0 %v6259_v52  ;;  %4962 = vmatmul.f32.gmra.mxu1 %v6263_v12  ;;  %v5313_v12 = vld [vmem:[#allocation13 + $0x840] sm:$0xff] }
 0x71e   : >> { %5019 = vmatmul.f32.gmra.mxu2 %v6267_v22  ;;  %5073 = vmatmul.f32.gmra.mxu3 %v6271_v13  ;;  %v5367_v22 = vld [vmem:[#allocation13 + $0x8c0] sm:$0xff] }
 0x71f   : >> { %5222 = vmatpush.msrb.mxu2 %v5197_v14  ;;  %5279 = vmatpush.msrb.mxu3 %v5254_v45  ;;  %v6274_v14 = vld [vmem:[%s7948_s14 + $0x62] sm:$0xff] }
 0x720   : >> { %5114 = vmatpush.msrb.mxu0 %v5089_v16  ;;  %5168 = vmatpush.msrb.mxu1 %v5143_v17  ;;  %v6278_v45 = vld [vmem:[%s7948_s14 + $0x63] sm:$0xff] }
 0x721   : >> { %5223 = vmatpush.msrb.mxu2 %v5196_v18  ;;  %5280 = vmatpush.msrb.mxu3 %v5253_v20  ;;  %v6282_v16 = vld [vmem:[%s7948_s14 + $0x64] sm:$0xff] }
 0x722   : >> { %5115 = vmatpush.msrb.mxu0 %v5088_v23  ;;  %5169 = vmatpush.msrb.mxu1 %v5142_v53  ;;  %v6286_v17 = vld [vmem:[%s7948_s14 + $0x88] sm:$0xff] }
 0x723   : >> { %5224 = vmatpush.msrb.mxu2 %v5195_v24  ;;  %5281 = vmatpush.msrb.mxu3 %v5252_v25  ;;  %v5420_v18 = vld [vmem:[#allocation13 + $0x938] sm:$0xff]  ;;  %v5419_v24 = vld [vmem:[#allocation13 + $0x930] sm:$0xff] }
 0x724   : >> { %5116 = vmatpush.msrb.mxu0 %v5087_v26  ;;  %5170 = vmatpush.msrb.mxu1 %v5141_v54  ;;  %v5474_v20 = vld [vmem:[#allocation13 + $0x9b8] sm:$0xff]  ;;  %v5473_v25 = vld [vmem:[#allocation13 + $0x9b0] sm:$0xff] }
 0x725   : >> { %5225 = vmatpush.msrb.mxu2 %v5194_v27  ;;  %5282 = vmatpush.msrb.mxu3 %v5251_v29  ;;  %v5312_v23 = vld [vmem:[#allocation13 + $0x838] sm:$0xff]  ;;  %v5311_v26 = vld [vmem:[#allocation13 + $0x830] sm:$0xff] }
 0x726   : >> { %5117 = vmatpush.msrb.mxu0 %v5086_v30  ;;  %5171 = vmatpush.msrb.mxu1 %v5140_v31  ;;  %v5366_v53 = vld [vmem:[#allocation13 + $0x8b8] sm:$0xff]  ;;  %v5365_v54 = vld [vmem:[#allocation13 + $0x8b0] sm:$0xff]  ;;  %v5418_v30 = vld [vmem:[#allocation13 + $0x928] sm:$0xff] }
 0x727   : >> { %5118 = vmatmul.f32.vlgmr.msrb.gmra.mxu0 %v6272_v32  ;;  %5172 = vmatmul.f32.vlgmr.msrb.gmra.mxu1 %v6276_v33  ;;  %v5472_v31 = vld [vmem:[#allocation13 + $0x9a8] sm:$0xff] }
 0x728   : >> { %5226 = vmatmul.f32.vlgmr.msrb.gmra.mxu2 %v6280_v35  ;;  %5283 = vmatmul.f32.vlgmr.msrb.gmra.mxu3 %v6284_v36  ;;  %v5310_v33 = vld [vmem:[#allocation13 + $0x828] sm:$0xff]  ;;  %v5417_v36 = vld [vmem:[#allocation13 + $0x920] sm:$0xff] }
 0x729   : >> { %5429 = vmatpush.msra.mxu2 %v5428_v38  ;;  %5483 = vmatpush.msra.mxu3 %v5482_v39  ;;  %v5364_v35 = vld [vmem:[#allocation13 + $0x8a8] sm:$0xff]  ;;  %v5471_v38 = vld [vmem:[#allocation13 + $0x9a0] sm:$0xff] }
 0x72a   : >> { %5321 = vmatpush.msra.mxu0 %v5320_v40  ;;  %5375 = vmatpush.msra.mxu1 %v5374_v41 }
 0x72b   : >> { %5430 = vmatpush.msra.mxu2 %v5427_v34  ;;  %5484 = vmatpush.msra.mxu3 %v5481_v42  ;;  %v8002_v28 = vpop.f32.mrf.mxu0  ;;  %v5309_v34 = vld [vmem:[#allocation13 + $0x820] sm:$0xff] }
 0x72c   : >> { %5322 = vmatpush.msra.mxu0 %v5319_v43  ;;  %5376 = vmatpush.msra.mxu1 %v5373_v46  ;;  %v8004_v57 = vpop.f32.mrf.mxu1  ;;  %v5363_v42 = vld [vmem:[#allocation13 + $0x8a0] sm:$0xff] }
 0x72d   : >> { %5431 = vmatpush.msra.mxu2 %v5426_v47  ;;  %5485 = vmatpush.msra.mxu3 %v5480_v49  ;;  %v6275_v46 = vld [vmem:[%s7948_s14 + $0x6a] sm:$0xff] }
 0x72e   : >> { %5323 = vmatpush.msra.mxu0 %v5318_v50  ;;  %5377 = vmatpush.msra.mxu1 %v5372_v51  ;;  %v6279_v47 = vld [vmem:[%s7948_s14 + $0x6b] sm:$0xff] }
 0x72f   : >> { %5432 = vmatpush.msra.mxu2 %v5425_v55  ;;  %5486 = vmatpush.msra.mxu3 %v5479_v56  ;;  %v6283_v49 = vld [vmem:[%s7948_s14 + $0x6c] sm:$0xff] }
 0x730   : >> { %5324 = vmatpush.msra.mxu0 %v5317_v58  ;;  %5378 = vmatpush.msra.mxu1 %v5371_v15  ;;  %v6287_v50 = vld [vmem:[%s7948_s14 + $0x90] sm:$0xff]  ;;  %v5416_v51 = vld [vmem:[#allocation13 + $0x918] sm:$0xff]  ;;  %v5415_v15 = vld [vmem:[#allocation13 + $0x910] sm:$0xff] }
 0x731   : >> { %5121 = vmatmul.f32.gmra.mxu0 %v6273_v59  ;;  %5175 = vmatmul.f32.gmra.mxu1 %v6277_v61  ;;  %v5470_v55 = vld [vmem:[#allocation13 + $0x998] sm:$0xff]  ;;  %v5469_v59 = vld [vmem:[#allocation13 + $0x990] sm:$0xff] }
 0x732   : >> { %5229 = vmatmul.f32.gmra.mxu2 %v6281_v62  ;;  %5286 = vmatmul.f32.gmra.mxu3 %v6285_v63  ;;  %v5308_v56 = vld [vmem:[#allocation13 + $0x818] sm:$0xff]  ;;  %v5307_v61 = vld [vmem:[#allocation13 + $0x810] sm:$0xff] }
 0x733   : >> { %5433 = vmatpush.msra.mxu2 %v5424_v1  ;;  %5487 = vmatpush.msra.mxu3 %v5478_v2  ;;  %v8010_v37 = vpop.f32.mrf.mxu2  ;;  %v8012_v7 = vpop.f32.mrf.mxu3  ;;  %v5362_v58 = vld [vmem:[#allocation13 + $0x898] sm:$0xff]  ;;  %v5361_v62 = vld [vmem:[#allocation13 + $0x890] sm:$0xff]  ;;  %v5414_v2 = vld [vmem:[#allocation13 + $0x908] sm:$0xff] }
 0x734   : >> { %5325 = vmatpush.msra.mxu0 %v5316_v60  ;;  %5379 = vmatpush.msra.mxu1 %v5370_v19  ;;  %v5468_v60 = vld [vmem:[#allocation13 + $0x988] sm:$0xff] }
 0x735   : >> { %5434 = vmatpush.msra.mxu2 %v5423_v4  ;;  %5488 = vmatpush.msra.mxu3 %v5477_v5  ;;  %v5306_v4 = vld [vmem:[#allocation13 + $0x808] sm:$0xff] }
 0x736   : >> { %5326 = vmatpush.msra.mxu0 %v5315_v6  ;;  %5380 = vmatpush.msra.mxu1 %v5369_v3  ;;  %v4497_v11 = vpop.f32.mrf.mxu0  ;;  %v4526_v52 = vpop.f32.mrf.mxu1  ;;  %v5360_v5 = vld [vmem:[#allocation13 + $0x888] sm:$0xff]  ;;  %v5413_v6 = vld [vmem:[#allocation13 + $0x900] sm:$0xff] }
 0x737   : >> { %5435 = vmatpush.msra.mxu2 %v5422_v8  ;;  %5489 = vmatpush.msra.mxu3 %v5476_v48  ;;  %v4527_v13 = vadd.f32 %v4526_v52, %v4497_v11  ;;  %v5467_v3 = vld [vmem:[#allocation13 + $0x980] sm:$0xff]  ;;  %v6288_v52 = vld [vmem:[%s7948_s14 + $0x79] sm:$0xff] }
 0x738   : >> { %5327 = vmatpush.msra.mxu0 %v5314_v9  ;;  %5381 = vmatpush.msra.mxu1 %v5368_v10  ;;  %v4524_v10 = vadd.f32 %v8004_v57, %v8002_v28  ;;  %v5646_v57 = vld [vmem:[#allocation13 + $0xb70] sm:$0xff] }
 0x739   : >> { %5436 = vmatpush.msra.mxu2 %v5421_v0  ;;  %5490 = vmatpush.msra.mxu3 %v5475_v21  ;;  %v5305_v0 = vld [vmem:[#allocation13 + $0x800] sm:$0xff] }
 0x73a   : >> { %5328 = vmatpush.msra.mxu0 %v5313_v12  ;;  %5382 = vmatpush.msra.mxu1 %v5367_v22  ;;  %v5359_v21 = vld [vmem:[#allocation13 + $0x880] sm:$0xff]  ;;  %v6292_v12 = vld [vmem:[%s7948_s14 + $0x7a] sm:$0xff]  ;;  %v4585_v28 = vadd.f32 %v8010_v37, %v4524_v10 }
 0x73b   : >> { %5124 = vmatmul.f32.gmra.mxu0 %v6274_v14  ;;  %5178 = vmatmul.f32.gmra.mxu1 %v6278_v45  ;;  %v6296_v22 = vld [vmem:[%s7948_s14 + $0x7b] sm:$0xff]  ;;  %v5647_v14 = vld [vmem:[#allocation13 + $0xb78] sm:$0xff] }
 0x73c   : >> { %5232 = vmatmul.f32.gmra.mxu2 %v6282_v16  ;;  %5289 = vmatmul.f32.gmra.mxu3 %v6286_v17  ;;  %v5701_v45 = vld [vmem:[#allocation13 + $0xbf8] sm:$0xff]  ;;  %v5537_v37 = vld [vmem:[#allocation13 + $0xa68] sm:$0xff] }
 0x73d   : >> { %5437 = vmatpush.msra.mxu2 %v5420_v18  ;;  %5491 = vmatpush.msra.mxu3 %v5474_v20  ;;  %v4576_v27 = vpop.f32.mrf.mxu2  ;;  %v4630_v29 = vpop.f32.mrf.mxu3  ;;  %v5539_v16 = vld [vmem:[#allocation13 + $0xa78] sm:$0xff]  ;;  %v5700_v18 = vld [vmem:[#allocation13 + $0xbf0] sm:$0xff] }
 0x73e   : >> { %5329 = vmatpush.msra.mxu0 %v5312_v23  ;;  %5383 = vmatpush.msra.mxu1 %v5366_v53  ;;  %v4586_v32 = vadd.f32 %v4576_v27, %v4527_v13  ;;  %v6300_v13 = vld [vmem:[%s7948_s14 + $0x7c] sm:$0xff]  ;;  %v5593_v17 = vld [vmem:[#allocation13 + $0xaf8] sm:$0xff]  ;;  %v4639_v27 = vadd.f32 %v8012_v7, %v4585_v28 }
 0x73f   : >> { %5438 = vmatpush.msra.mxu2 %v5419_v24  ;;  %5492 = vmatpush.msra.mxu3 %v5473_v25  ;;  %v5538_v20 = vld [vmem:[#allocation13 + $0xa70] sm:$0xff]  ;;  %v5645_v25 = vld [vmem:[#allocation13 + $0xb68] sm:$0xff]  ;;  %v6290_v10 = vld [vmem:[%s7948_s14 + $0x89] sm:$0xff] }
 0x740   : >> { %5330 = vmatpush.msra.mxu0 %v5311_v26  ;;  %5384 = vmatpush.msra.mxu1 %v5365_v54  ;;  %v8018_v39 = vadd.f32 %v4630_v29, %v4586_v32  ;;  %v4500_v40 = vpop.f32.mrf.mxu0  ;;  %v4529_v41 = vpop.f32.mrf.mxu1  ;;  %v5592_v23 = vld [vmem:[#allocation13 + $0xaf0] sm:$0xff]  ;;  %v5699_v26 = vld [vmem:[#allocation13 + $0xbe8] sm:$0xff] }
 0x741   : >> { %5439 = vmatpush.msra.mxu2 %v5418_v30  ;;  %5493 = vmatpush.msra.mxu3 %v5472_v31  ;;  %v4530_v43 = vadd.f32 %v4529_v41, %v4500_v40  ;;  %v5591_v29 = vld [vmem:[#allocation13 + $0xae8] sm:$0xff]  ;;  %v5644_v30 = vld [vmem:[#allocation13 + $0xb60] sm:$0xff]  ;;  %v6289_v7 = vld [vmem:[%s7948_s14 + $0x81] sm:$0xff] }
 0x742   : >> { %5331 = vmatpush.msra.mxu0 %v5310_v33  ;;  %5385 = vmatpush.msra.mxu1 %v5364_v35  ;;  %v5698_v31 = vld [vmem:[#allocation13 + $0xbe0] sm:$0xff]  ;;  %v6293_v41 = vld [vmem:[%s7948_s14 + $0x82] sm:$0xff] }
 0x743   : >> { %5440 = vmatpush.msra.mxu2 %v5417_v36  ;;  %5494 = vmatpush.msra.mxu3 %v5471_v38  ;;  %v5536_v36 = vld [vmem:[#allocation13 + $0xa60] sm:$0xff] }
 0x744   : >> { %5332 = vmatpush.msra.mxu0 %v5309_v34  ;;  %5386 = vmatpush.msra.mxu1 %v5363_v42  ;;  %v5590_v38 = vld [vmem:[#allocation13 + $0xae0] sm:$0xff]  ;;  %v6297_v34 = vld [vmem:[%s7948_s14 + $0x83] sm:$0xff] }
 0x745   : >> { %5127 = vmatmul.f32.gmra.mxu0 %v6275_v46  ;;  %5181 = vmatmul.f32.gmra.mxu1 %v6279_v47  ;;  %v6301_v42 = vld [vmem:[%s7948_s14 + $0x84] sm:$0xff] }
 0x746   : >> { %5235 = vmatmul.f32.gmra.mxu2 %v6283_v49  ;;  %5292 = vmatmul.f32.gmra.mxu3 %v6287_v50  ;;  %v5643_v46 = vld [vmem:[#allocation13 + $0xb58] sm:$0xff] }
 0x747   : >> { %5441 = vmatpush.msra.mxu2 %v5416_v51  ;;  %5495 = vmatpush.msra.mxu3 %v5470_v55  ;;  %v4579_v63 = vpop.f32.mrf.mxu2  ;;  %v4633_v1 = vpop.f32.mrf.mxu3  ;;  %v5697_v47 = vld [vmem:[#allocation13 + $0xbd8] sm:$0xff]  ;;  %v5642_v51 = vld [vmem:[#allocation13 + $0xb50] sm:$0xff] }
 0x748   : >> { %5333 = vmatpush.msra.mxu0 %v5308_v56  ;;  %5387 = vmatpush.msra.mxu1 %v5362_v58  ;;  %v4587_v19 = vadd.f32 %v4579_v63, %v4530_v43  ;;  %v5535_v49 = vld [vmem:[#allocation13 + $0xa58] sm:$0xff]  ;;  %v5696_v55 = vld [vmem:[#allocation13 + $0xbd0] sm:$0xff] }
 0x749   : >> { %5442 = vmatpush.msra.mxu2 %v5415_v15  ;;  %5496 = vmatpush.msra.mxu3 %v5469_v59  ;;  %v5589_v50 = vld [vmem:[#allocation13 + $0xad8] sm:$0xff]  ;;  %v5534_v56 = vld [vmem:[#allocation13 + $0xa50] sm:$0xff] }
 0x74a   : >> { %5334 = vmatpush.msra.mxu0 %v5307_v61  ;;  %5388 = vmatpush.msra.mxu1 %v5361_v62  ;;  %v8024_v8 = vadd.f32 %v4633_v1, %v4587_v19  ;;  %v4503_v48 = vpop.f32.mrf.mxu0  ;;  %v4532_v9 = vpop.f32.mrf.mxu1  ;;  %v5588_v58 = vld [vmem:[#allocation13 + $0xad0] sm:$0xff]  ;;  %v5641_v61 = vld [vmem:[#allocation13 + $0xb48] sm:$0xff]  ;;  %v5694_v19 = vld [vmem:[#allocation13 + $0xbc0] sm:$0xff] }
 0x74b   : >> { %5443 = vmatpush.msra.mxu2 %v5414_v2  ;;  %5497 = vmatpush.msra.mxu3 %v5468_v60  ;;  %v4533_v11 = vadd.f32 %v4532_v9, %v4503_v48  ;;  %v5695_v62 = vld [vmem:[#allocation13 + $0xbc8] sm:$0xff]  ;;  %v5640_v60 = vld [vmem:[#allocation13 + $0xb40] sm:$0xff] }
 0x74c   : >> { %5335 = vmatpush.msra.mxu0 %v5306_v4  ;;  %5389 = vmatpush.msra.mxu1 %v5360_v5  ;;  %v5533_v1 = vld [vmem:[#allocation13 + $0xa48] sm:$0xff]  ;;  %v5586_v48 = vld [vmem:[#allocation13 + $0xac0] sm:$0xff] }
 0x74d   : >> { %5444 = vmatpush.msra.mxu2 %v5413_v6  ;;  %5498 = vmatpush.msra.mxu3 %v5467_v3  ;;  %v5587_v2 = vld [vmem:[#allocation13 + $0xac8] sm:$0xff]  ;;  %v5532_v3 = vld [vmem:[#allocation13 + $0xa40] sm:$0xff] }
 0x74e   : >> { %5336 = vmatpush.msra.mxu0 %v5305_v0  ;;  %5390 = vmatpush.msra.mxu1 %v5359_v21  ;;  %v6294_v0 = vld [vmem:[%s7948_s14 + $0x8a] sm:$0xff] }
 0x74f   : >> { %5337 = vmatmul.f32.vlgmr.msra.gmra.mxu0 %v6288_v52  ;;  %5391 = vmatmul.f32.vlgmr.msra.gmra.mxu1 %v6292_v12  ;;  %v6298_v21 = vld [vmem:[%s7948_s14 + $0x8b] sm:$0xff] }
 0x750   : >> { %5445 = vmatmul.f32.vlgmr.msra.gmra.mxu2 %v6296_v22  ;;  %5499 = vmatmul.f32.vlgmr.msra.gmra.mxu3 %v6300_v13  ;;  %v5639_v12 = vld [vmem:[#allocation13 + $0xb38] sm:$0xff] }
 0x751   : >> { %5648 = vmatpush.msrb.mxu2 %v5647_v14  ;;  %5702 = vmatpush.msrb.mxu3 %v5701_v45  ;;  %v4582_v53 = vpop.f32.mrf.mxu2  ;;  %v4636_v24 = vpop.f32.mrf.mxu3  ;;  %v5693_v22 = vld [vmem:[#allocation13 + $0xbb8] sm:$0xff]  ;;  %v5692_v45 = vld [vmem:[#allocation13 + $0xbb0] sm:$0xff] }
 0x752   : >> { %5540 = vmatpush.msrb.mxu0 %v5539_v16  ;;  %5594 = vmatpush.msrb.mxu1 %v5593_v17  ;;  %v4588_v54 = vadd.f32 %v4582_v53, %v4533_v11  ;;  %v6302_v11 = vld [vmem:[%s7948_s14 + $0x8c] sm:$0xff]  ;;  %v5530_v16 = vld [vmem:[#allocation13 + $0xa30] sm:$0xff]  ;;  %v5529_v53 = vld [vmem:[#allocation13 + $0xa28] sm:$0xff] }
 0x753   : >> { %5649 = vmatpush.msrb.mxu2 %v5646_v57  ;;  %5703 = vmatpush.msrb.mxu3 %v5700_v18  ;;  %v5531_v13 = vld [vmem:[#allocation13 + $0xa38] sm:$0xff]  ;;  %v5584_v17 = vld [vmem:[#allocation13 + $0xab0] sm:$0xff]  ;;  %v5637_v18 = vld [vmem:[#allocation13 + $0xb28] sm:$0xff] }
 0x754   : >> { %5541 = vmatpush.msrb.mxu0 %v5538_v20  ;;  %5595 = vmatpush.msrb.mxu1 %v5592_v23  ;;  %v8034_v32 = vadd.f32 %v4636_v24, %v4588_v54  ;;  %v4681_v33 = vpop.f32.mrf.mxu0  ;;  %v4738_v35 = vpop.f32.mrf.mxu1  ;;  %v5585_v14 = vld [vmem:[#allocation13 + $0xab8] sm:$0xff]  ;;  %v5691_v20 = vld [vmem:[#allocation13 + $0xba8] sm:$0xff] }
 0x755   : >> { %5650 = vmatpush.msrb.mxu2 %v5645_v25  ;;  %5704 = vmatpush.msrb.mxu3 %v5699_v26  ;;  %v4693_v40 = vadd.f32 %v4681_v33, %v4639_v27  ;;  %v5583_v24 = vld [vmem:[#allocation13 + $0xaa8] sm:$0xff]  ;;  %v5636_v25 = vld [vmem:[#allocation13 + $0xb20] sm:$0xff] }
 0x756   : >> { %5542 = vmatpush.msrb.mxu0 %v5537_v37  ;;  %5596 = vmatpush.msrb.mxu1 %v5591_v29  ;;  %v5690_v26 = vld [vmem:[#allocation13 + $0xba0] sm:$0xff] }
 0x757   : >> { %5651 = vmatpush.msrb.mxu2 %v5644_v30  ;;  %5705 = vmatpush.msrb.mxu3 %v5698_v31  ;;  %v4750_v43 = vadd.f32 %v4738_v35, %v4693_v40  ;;  %v5528_v29 = vld [vmem:[#allocation13 + $0xa20] sm:$0xff] }
 0x758   : >> { %5543 = vmatpush.msrb.mxu0 %v5536_v36  ;;  %5597 = vmatpush.msrb.mxu1 %v5590_v38  ;;  %v5582_v30 = vld [vmem:[#allocation13 + $0xaa0] sm:$0xff] }
 0x759   : >> { %5340 = vmatmul.f32.gmra.mxu0 %v6289_v7  ;;  %5394 = vmatmul.f32.gmra.mxu1 %v6293_v41  ;;  %v6291_v33 = vld [vmem:[%s7948_s14 + $0x91] sm:$0xff]  ;;  %v5635_v7 = vld [vmem:[#allocation13 + $0xb18] sm:$0xff] }
 0x75a   : >> { %5448 = vmatmul.f32.gmra.mxu2 %v6297_v34  ;;  %5502 = vmatmul.f32.gmra.mxu3 %v6301_v42  ;;  %v6295_v35 = vld [vmem:[%s7948_s14 + $0x92] sm:$0xff]  ;;  %v5689_v41 = vld [vmem:[#allocation13 + $0xb98] sm:$0xff] }
 0x75b   : >> { %5652 = vmatpush.msrb.mxu2 %v5643_v46  ;;  %5706 = vmatpush.msrb.mxu3 %v5697_v47  ;;  %v4792_v15 = vpop.f32.mrf.mxu2  ;;  %v4846_v59 = vpop.f32.mrf.mxu3  ;;  %v6299_v36 = vld [vmem:[%s7948_s14 + $0x93] sm:$0xff]  ;;  %v5527_v34 = vld [vmem:[#allocation13 + $0xa18] sm:$0xff]  ;;  %v5526_v46 = vld [vmem:[#allocation13 + $0xa10] sm:$0xff] }
 0x75c   : >> { %5544 = vmatpush.msrb.mxu0 %v5535_v49  ;;  %5598 = vmatpush.msrb.mxu1 %v5589_v50  ;;  %v4804_v63 = vadd.f32 %v4792_v15, %v4750_v43  ;;  %v6303_v38 = vld [vmem:[%s7948_s14 + $0x94] sm:$0xff]  ;;  %v5581_v42 = vld [vmem:[#allocation13 + $0xa98] sm:$0xff]  ;;  %v5688_v43 = vld [vmem:[#allocation13 + $0xb90] sm:$0xff] }
 0x75d   : >> { %5653 = vmatpush.msrb.mxu2 %v5642_v51  ;;  %5707 = vmatpush.msrb.mxu3 %v5696_v55  ;;  %v5580_v47 = vld [vmem:[#allocation13 + $0xa90] sm:$0xff]  ;;  %v5633_v51 = vld [vmem:[#allocation13 + $0xb08] sm:$0xff] }
 0x75e   : >> { %5545 = vmatpush.msrb.mxu0 %v5534_v56  ;;  %5599 = vmatpush.msrb.mxu1 %v5588_v58  ;;  %v8040_v4 = vadd.f32 %v4846_v59, %v4804_v63  ;;  %v4684_v5 = vpop.f32.mrf.mxu0  ;;  %v4741_v6 = vpop.f32.mrf.mxu1  ;;  %v5687_v55 = vld [vmem:[#allocation13 + $0xb88] sm:$0xff]  ;;  %v5632_v59 = vld [vmem:[#allocation13 + $0xb00] sm:$0xff] }
 0x75f   : >> { %5654 = vmatpush.msrb.mxu2 %v5641_v61  ;;  %5708 = vmatpush.msrb.mxu3 %v5695_v62  ;;  %v4694_v9 = vadd.f32 %v4684_v5, %v8018_v39  ;;  %v5638_v39 = vld [vmem:[#allocation13 + $0xb30] sm:$0xff]  ;;  %v5525_v58 = vld [vmem:[#allocation13 + $0xa08] sm:$0xff]  ;;  %v5686_v61 = vld [vmem:[#allocation13 + $0xb80] sm:$0xff] }
 0x760   : >> { %5546 = vmatpush.msrb.mxu0 %v5533_v1  ;;  %5600 = vmatpush.msrb.mxu1 %v5587_v2  ;;  %v5579_v15 = vld [vmem:[#allocation13 + $0xa88] sm:$0xff]  ;;  %v5524_v2 = vld [vmem:[#allocation13 + $0xa00] sm:$0xff]  ;;  %v6304_v5 = vld [vmem:[%s7948_s14 + $0xa0] sm:$0xff] }
 0x761   : >> { %5655 = vmatpush.msrb.mxu2 %v5640_v60  ;;  %5709 = vmatpush.msrb.mxu3 %v5694_v19  ;;  %v4751_v52 = vadd.f32 %v4741_v6, %v4694_v9  ;;  %v5578_v60 = vld [vmem:[#allocation13 + $0xa80] sm:$0xff]  ;;  %v6308_v6 = vld [vmem:[%s7948_s14 + $0xa1] sm:$0xff] }
 0x762   : >> { %5547 = vmatpush.msrb.mxu0 %v5532_v3  ;;  %5601 = vmatpush.msrb.mxu1 %v5586_v48  ;;  %v6312_v3 = vld [vmem:[%s7948_s14 + $0xa2] sm:$0xff] }
 0x763   : >> { %5343 = vmatmul.f32.gmra.mxu0 %v6290_v10  ;;  %5397 = vmatmul.f32.gmra.mxu1 %v6294_v0  ;;  %v6316_v48 = vld [vmem:[%s7948_s14 + $0xa3] sm:$0xff] }
 0x764   : >> { %5451 = vmatmul.f32.gmra.mxu2 %v6298_v21  ;;  %5505 = vmatmul.f32.gmra.mxu3 %v6302_v11  ;;  %v5755_v10 = vld [vmem:[#allocation13 + $0xc78] sm:$0xff]  ;;  %v5754_v0 = vld [vmem:[#allocation13 + $0xc70] sm:$0xff]  ;;  %v5753_v11 = vld [vmem:[#allocation13 + $0xc68] sm:$0xff] }
 0x765   : >> { %5656 = vmatpush.msrb.mxu2 %v5639_v12  ;;  %5710 = vmatpush.msrb.mxu3 %v5693_v22  ;;  %v4795_v28 = vpop.f32.mrf.mxu2  ;;  %v4849_v57 = vpop.f32.mrf.mxu3  ;;  %v5752_v12 = vld [vmem:[#allocation13 + $0xc60] sm:$0xff] }
 0x766   : >> { %5548 = vmatpush.msrb.mxu0 %v5531_v13  ;;  %5602 = vmatpush.msrb.mxu1 %v5585_v14  ;;  %v4805_v23 = vadd.f32 %v4795_v28, %v4751_v52  ;;  %v6317_v28 = vld [vmem:[%s7948_s14 + $0xab] sm:$0xff] }
 0x767   : >> { %5657 = vmatpush.msrb.mxu2 %v5638_v39  ;;  %5711 = vmatpush.msrb.mxu3 %v5692_v45  ;;  %v6305_v45 = vld [vmem:[%s7948_s14 + $0xa8] sm:$0xff] }
 0x768   : >> { %5549 = vmatpush.msrb.mxu0 %v5530_v16  ;;  %5603 = vmatpush.msrb.mxu1 %v5584_v17  ;;  %v8047_v54 = vadd.f32 %v4849_v57, %v4805_v23  ;;  %v4687_v27 = vpop.f32.mrf.mxu0  ;;  %v4744_v37 = vpop.f32.mrf.mxu1  ;;  %v6309_v16 = vld [vmem:[%s7948_s14 + $0xa9] sm:$0xff] }
 0x769   : >> { %5658 = vmatpush.msrb.mxu2 %v5637_v18  ;;  %5712 = vmatpush.msrb.mxu3 %v5691_v20  ;;  %v4695_v31 = vadd.f32 %v4687_v27, %v8024_v8  ;;  %v5634_v8 = vld [vmem:[#allocation13 + $0xb10] sm:$0xff]  ;;  %v6313_v17 = vld [vmem:[%s7948_s14 + $0xaa] sm:$0xff] }
 0x76a   : >> { %5550 = vmatpush.msrb.mxu0 %v5529_v53  ;;  %5604 = vmatpush.msrb.mxu1 %v5583_v24  ;;  %v5751_v18 = vld [vmem:[#allocation13 + $0xc58] sm:$0xff]  ;;  %v5750_v20 = vld [vmem:[#allocation13 + $0xc50] sm:$0xff]  ;;  %v5749_v53 = vld [vmem:[#allocation13 + $0xc48] sm:$0xff] }
 0x76b   : >> { %5659 = vmatpush.msrb.mxu2 %v5636_v25  ;;  %5713 = vmatpush.msrb.mxu3 %v5690_v26  ;;  %v4752_v40 = vadd.f32 %v4744_v37, %v4695_v31  ;;  %v5748_v25 = vld [vmem:[#allocation13 + $0xc40] sm:$0xff] }
 0x76c   : >> { %5551 = vmatpush.msrb.mxu0 %v5528_v29  ;;  %5605 = vmatpush.msrb.mxu1 %v5582_v30  ;;  %v6306_v30 = vld [vmem:[%s7948_s14 + $0xb0] sm:$0xff] }
 0x76d   : >> { %5346 = vmatmul.f32.gmra.mxu0 %v6291_v33  ;;  %5400 = vmatmul.f32.gmra.mxu1 %v6295_v35  ;;  %v6310_v31 = vld [vmem:[%s7948_s14 + $0xb1] sm:$0xff] }
 0x76e   : >> { %5454 = vmatmul.f32.gmra.mxu2 %v6299_v36  ;;  %5508 = vmatmul.f32.gmra.mxu3 %v6303_v38  ;;  %v6314_v33 = vld [vmem:[%s7948_s14 + $0xb2] sm:$0xff]  ;;  %v5747_v38 = vld [vmem:[#allocation13 + $0xc38] sm:$0xff] }
 0x76f   : >> { %5660 = vmatpush.msrb.mxu2 %v5635_v7  ;;  %5714 = vmatpush.msrb.mxu3 %v5689_v41  ;;  %v4798_v49 = vpop.f32.mrf.mxu2  ;;  %v4852_v50 = vpop.f32.mrf.mxu3  ;;  %v6318_v35 = vld [vmem:[%s7948_s14 + $0xb3] sm:$0xff] }
 0x770   : >> { %5552 = vmatpush.msrb.mxu0 %v5527_v34  ;;  %5606 = vmatpush.msrb.mxu1 %v5581_v42  ;;  %v4806_v56 = vadd.f32 %v4798_v49, %v4752_v40  ;;  %v5746_v40 = vld [vmem:[#allocation13 + $0xc30] sm:$0xff]  ;;  %v5745_v41 = vld [vmem:[#allocation13 + $0xc28] sm:$0xff]  ;;  %v5744_v42 = vld [vmem:[#allocation13 + $0xc20] sm:$0xff] }
 0x771   : >> { %5661 = vmatpush.msrb.mxu2 %v5634_v8  ;;  %5715 = vmatpush.msrb.mxu3 %v5688_v43  ;;  %v6307_v49 = vld [vmem:[%s7948_s14 + $0xb8] sm:$0xff] }
 0x772   : >> { %5553 = vmatpush.msrb.mxu0 %v5526_v46  ;;  %5607 = vmatpush.msrb.mxu1 %v5580_v47  ;;  %v8054_v62 = vadd.f32 %v4852_v50, %v4806_v56  ;;  %v4690_v63 = vpop.f32.mrf.mxu0  ;;  %v4747_v1 = vpop.f32.mrf.mxu1  ;;  %v6311_v50 = vld [vmem:[%s7948_s14 + $0xb9] sm:$0xff] }
 0x773   : >> { %5662 = vmatpush.msrb.mxu2 %v5633_v51  ;;  %5716 = vmatpush.msrb.mxu3 %v5687_v55  ;;  %v4696_v19 = vadd.f32 %v4690_v63, %v8034_v32  ;;  %v6315_v51 = vld [vmem:[%s7948_s14 + $0xba] sm:$0xff] }
 0x774   : >> { %5554 = vmatpush.msrb.mxu0 %v5525_v58  ;;  %5608 = vmatpush.msrb.mxu1 %v5579_v15  ;;  %v6319_v55 = vld [vmem:[%s7948_s14 + $0xbb] sm:$0xff]  ;;  %v5743_v58 = vld [vmem:[#allocation13 + $0xc18] sm:$0xff] }
 0x775   : >> { %5663 = vmatpush.msrb.mxu2 %v5632_v59  ;;  %5717 = vmatpush.msrb.mxu3 %v5686_v61  ;;  %v4753_v9 = vadd.f32 %v4747_v1, %v4696_v19  ;;  %v5742_v15 = vld [vmem:[#allocation13 + $0xc10] sm:$0xff]  ;;  %v5740_v1 = vld [vmem:[#allocation13 + $0xc00] sm:$0xff] }
 0x776   : >> { %5555 = vmatpush.msrb.mxu0 %v5524_v2  ;;  %5609 = vmatpush.msrb.mxu1 %v5578_v60 }
 0x777   : >> { %5556 = vmatmul.f32.vlgmr.msrb.gmra.mxu0 %v6304_v5  ;;  %5610 = vmatmul.f32.vlgmr.msrb.gmra.mxu1 %v6308_v6  ;;  %v6320_v6 = vld [vmem:[%s7948_s14 + $0xa4] sm:$0xff] }
 0x778   : >> { %5664 = vmatmul.f32.vlgmr.msrb.gmra.mxu2 %v6312_v3  ;;  %5718 = vmatmul.f32.vlgmr.msrb.gmra.mxu3 %v6316_v48  ;;  %v6321_v3 = vld [vmem:[%s7948_s14 + $0xac] sm:$0xff]  ;;  %v6322_v48 = vld [vmem:[%s7948_s14 + $0xb4] sm:$0xff] }
 0x779   : >> { %6394 = vmatpush.msra.mxu2 %v5755_v10  ;;  %6395 = vmatpush.msra.mxu3 %v5755_v10  ;;  %v4801_v32 = vpop.f32.mrf.mxu2  ;;  %v4855_v21 = vpop.f32.mrf.mxu3 }
 0x77a   : >> { %5756 = vmatpush.msra.mxu0 %v5755_v10  ;;  %6393 = vmatpush.msra.mxu1 %v5755_v10  ;;  %v4807_v52 = vadd.f32 %v4801_v32, %v4753_v9  ;;  %v6323_v9 = vld [vmem:[%s7948_s14 + $0xbc] sm:$0xff] }
 0x77b   : >> { %6397 = vmatpush.msra.mxu2 %v5754_v0  ;;  %6398 = vmatpush.msra.mxu3 %v5754_v0 }
 0x77c   : >> { %5757 = vmatpush.msra.mxu0 %v5754_v0  ;;  %6396 = vmatpush.msra.mxu1 %v5754_v0  ;;  %v8061_v22 = vadd.f32 %v4855_v21, %v4807_v52  ;;  %v4900_v13 = vpop.f32.mrf.mxu0  ;;  %v4954_v14 = vpop.f32.mrf.mxu1 }
 0x77d   : >> { %6400 = vmatpush.msra.mxu2 %v5753_v11  ;;  %6401 = vmatpush.msra.mxu3 %v5753_v11  ;;  %v4912_v39 = vadd.f32 %v4900_v13, %v8040_v4 }
 0x77e   : >> { %5758 = vmatpush.msra.mxu0 %v5753_v11  ;;  %6399 = vmatpush.msra.mxu1 %v5753_v11 }
 0x77f   : >> { %6403 = vmatpush.msra.mxu2 %v5752_v12  ;;  %6404 = vmatpush.msra.mxu3 %v5752_v12  ;;  %v4966_v57 = vadd.f32 %v4954_v14, %v4912_v39 }
 0x780   : >> { %5759 = vmatpush.msra.mxu0 %v5752_v12  ;;  %6402 = vmatpush.msra.mxu1 %v5752_v12 }
 0x781   : >> { %5559 = vmatmul.f32.gmra.mxu0 %v6305_v45  ;;  %5613 = vmatmul.f32.gmra.mxu1 %v6309_v16 }
 0x782   : >> { %5667 = vmatmul.f32.gmra.mxu2 %v6313_v17  ;;  %5721 = vmatmul.f32.gmra.mxu3 %v6317_v28 }
 0x783   : >> { %6406 = vmatpush.msra.mxu2 %v5751_v18  ;;  %6407 = vmatpush.msra.mxu3 %v5751_v18  ;;  %v5011_v4 = vpop.f32.mrf.mxu2  ;;  %v5065_v23 = vpop.f32.mrf.mxu3 }
 0x784   : >> { %5760 = vmatpush.msra.mxu0 %v5751_v18  ;;  %6405 = vmatpush.msra.mxu1 %v5751_v18  ;;  %v5023_v24 = vadd.f32 %v5011_v4, %v4966_v57 }
 0x785   : >> { %6409 = vmatpush.msra.mxu2 %v5750_v20  ;;  %6410 = vmatpush.msra.mxu3 %v5750_v20 }
 0x786   : >> { %5761 = vmatpush.msra.mxu0 %v5750_v20  ;;  %6408 = vmatpush.msra.mxu1 %v5750_v20  ;;  %v8068_v26 = vadd.f32 %v5065_v23, %v5023_v24  ;;  %v4903_v27 = vpop.f32.mrf.mxu0  ;;  %v4957_v37 = vpop.f32.mrf.mxu1 }
 0x787   : >> { %6412 = vmatpush.msra.mxu2 %v5749_v53  ;;  %6413 = vmatpush.msra.mxu3 %v5749_v53  ;;  %v4913_v29 = vadd.f32 %v4903_v27, %v8047_v54 }
 0x788   : >> { %5762 = vmatpush.msra.mxu0 %v5749_v53  ;;  %6411 = vmatpush.msra.mxu1 %v5749_v53 }
 0x789   : >> { %6415 = vmatpush.msra.mxu2 %v5748_v25  ;;  %6416 = vmatpush.msra.mxu3 %v5748_v25  ;;  %v4967_v36 = vadd.f32 %v4957_v37, %v4913_v29 }
 0x78a   : >> { %5763 = vmatpush.msra.mxu0 %v5748_v25  ;;  %6414 = vmatpush.msra.mxu1 %v5748_v25 }
 0x78b   : >> { %5562 = vmatmul.f32.gmra.mxu0 %v6306_v30  ;;  %5616 = vmatmul.f32.gmra.mxu1 %v6310_v31 }
 0x78c   : >> { %5670 = vmatmul.f32.gmra.mxu2 %v6314_v33  ;;  %5724 = vmatmul.f32.gmra.mxu3 %v6318_v35 }
 0x78d   : >> { %6418 = vmatpush.msra.mxu2 %v5747_v38  ;;  %6419 = vmatpush.msra.mxu3 %v5747_v38  ;;  %v5014_v54 = vpop.f32.mrf.mxu2  ;;  %v5068_v7 = vpop.f32.mrf.mxu3 }
 0x78e   : >> { %5764 = vmatpush.msra.mxu0 %v5747_v38  ;;  %6417 = vmatpush.msra.mxu1 %v5747_v38  ;;  %v5024_v34 = vadd.f32 %v5014_v54, %v4967_v36 }
 0x78f   : >> { %6421 = vmatpush.msra.mxu2 %v5746_v40  ;;  %6422 = vmatpush.msra.mxu3 %v5746_v40 }
 0x790   : >> { %5765 = vmatpush.msra.mxu0 %v5746_v40  ;;  %6420 = vmatpush.msra.mxu1 %v5746_v40  ;;  %v8075_v8 = vadd.f32 %v5068_v7, %v5024_v34  ;;  %v4906_v43 = vpop.f32.mrf.mxu0  ;;  %v4960_v46 = vpop.f32.mrf.mxu1 }
 0x791   : >> { %6424 = vmatpush.msra.mxu2 %v5745_v41  ;;  %6425 = vmatpush.msra.mxu3 %v5745_v41  ;;  %v4914_v47 = vadd.f32 %v4906_v43, %v8054_v62  ;;  %v5741_v62 = vld [vmem:[#allocation13 + $0xc08] sm:$0xff] }
 0x792   : >> { %5766 = vmatpush.msra.mxu0 %v5745_v41  ;;  %6423 = vmatpush.msra.mxu1 %v5745_v41 }
 0x793   : >> { %6427 = vmatpush.msra.mxu2 %v5744_v42  ;;  %6428 = vmatpush.msra.mxu3 %v5744_v42  ;;  %v4968_v56 = vadd.f32 %v4960_v46, %v4914_v47 }
 0x794   : >> { %5767 = vmatpush.msra.mxu0 %v5744_v42  ;;  %6426 = vmatpush.msra.mxu1 %v5744_v42 }
 0x795   : >> { %5565 = vmatmul.f32.gmra.mxu0 %v6307_v49  ;;  %5619 = vmatmul.f32.gmra.mxu1 %v6311_v50 }
 0x796   : >> { %5673 = vmatmul.f32.gmra.mxu2 %v6315_v51  ;;  %5727 = vmatmul.f32.gmra.mxu3 %v6319_v55 }
 0x797   : >> { %6430 = vmatpush.msra.mxu2 %v5743_v58  ;;  %6431 = vmatpush.msra.mxu3 %v5743_v58  ;;  %v5017_v59 = vpop.f32.mrf.mxu2  ;;  %v5071_v61 = vpop.f32.mrf.mxu3 }
 0x798   : >> { %5768 = vmatpush.msra.mxu0 %v5743_v58  ;;  %6429 = vmatpush.msra.mxu1 %v5743_v58  ;;  %v5025_v63 = vadd.f32 %v5017_v59, %v4968_v56 }
 0x799   : >> { %6433 = vmatpush.msra.mxu2 %v5742_v15  ;;  %6434 = vmatpush.msra.mxu3 %v5742_v15 }
 0x79a   : >> { %5769 = vmatpush.msra.mxu0 %v5742_v15  ;;  %6432 = vmatpush.msra.mxu1 %v5742_v15  ;;  %v5079_v2 = vadd.f32 %v5071_v61, %v5025_v63  ;;  %v4909_v60 = vpop.f32.mrf.mxu0  ;;  %v4963_v19 = vpop.f32.mrf.mxu1 }
 0x79b   : >> { %6436 = vmatpush.msra.mxu2 %v5741_v62  ;;  %6437 = vmatpush.msra.mxu3 %v5741_v62  ;;  %v4915_v5 = vadd.f32 %v4909_v60, %v8061_v22 }
 0x79c   : >> { %5770 = vmatpush.msra.mxu0 %v5741_v62  ;;  %6435 = vmatpush.msra.mxu1 %v5741_v62 }
 0x79d   : >> { %6439 = vmatpush.msra.mxu2 %v5740_v1  ;;  %6440 = vmatpush.msra.mxu3 %v5740_v1  ;;  %v4969_v10 = vadd.f32 %v4963_v19, %v4915_v5 }
 0x79e   : >> { %5771 = vmatpush.msra.mxu0 %v5740_v1  ;;  %6438 = vmatpush.msra.mxu1 %v5740_v1 }
 0x79f   : >> { %5772 = vmatmul.f32.vlgmr.msra.gmra.mxu0 %v6320_v6  ;;  %5775 = vmatmul.f32.vlgmr.msra.gmra.mxu1 %v6321_v3 }
 0x7a0   : >> { %5778 = vmatmul.f32.vlgmr.msra.gmra.mxu2 %v6322_v48  ;;  %5781 = vmatmul.f32.vlgmr.msra.gmra.mxu3 %v6323_v9 }
 0x7a1   : >> { %v5020_v0 = vpop.f32.mrf.mxu2  ;;  %v5074_v32 = vpop.f32.mrf.mxu3 }
 0x7a2   : >> { %v5026_v21 = vadd.f32 %v5020_v0, %v4969_v10 }
 0x7a4   : >> { %v5080_v11 = vadd.f32 %v5074_v32, %v5026_v21  ;;  %v5119_v52 = vpop.f32.mrf.mxu0  ;;  %v5173_v12 = vpop.f32.mrf.mxu1 }
 0x7a5   : >> { %v5131_v22 = vadd.f32 %v5119_v52, %v8068_v26 }
 0x7a7   : >> { %v5185_v13 = vadd.f32 %v5173_v12, %v5131_v22 }
 0x7ab   : >> { %v5227_v14 = vpop.f32.mrf.mxu2  ;;  %v5284_v39 = vpop.f32.mrf.mxu3 }
 0x7ac   : >> { %v5239_v45 = vadd.f32 %v5227_v14, %v5185_v13 }
 0x7ae   : >> { %v5296_v16 = vadd.f32 %v5284_v39, %v5239_v45  ;;  %v5122_v17 = vpop.f32.mrf.mxu0  ;;  %v5176_v28 = vpop.f32.mrf.mxu1 }
 0x7af   : >> { %v5132_v57 = vadd.f32 %v5122_v17, %v8075_v8 }
 0x7b1   : >> { %v5186_v18 = vadd.f32 %v5176_v28, %v5132_v57 }
 0x7b5   : >> { %v5230_v20 = vpop.f32.mrf.mxu2  ;;  %v5287_v4 = vpop.f32.mrf.mxu3 }
 0x7b6   : >> { %v5240_v61 = vadd.f32 %v5230_v20, %v5186_v18 }
 0x7b8   : >> { %v5125_v23 = vpop.f32.mrf.mxu0  ;;  %v5179_v53 = vpop.f32.mrf.mxu1  ;;  %v5297_v63 = vadd.f32 %v5287_v4, %v5240_v61 }
 0x7b9   : >> { %v5133_v24 = vadd.f32 %v5125_v23, %v5079_v2 }
 0x7bb   : >> { %v5187_v25 = vadd.f32 %v5179_v53, %v5133_v24 }
 0x7bf   : >> { %v5233_v27 = vpop.f32.mrf.mxu2  ;;  %v5290_v37 = vpop.f32.mrf.mxu3 }
 0x7c0   : >> { %v5241_v6 = vadd.f32 %v5233_v27, %v5187_v25 }
 0x7c2   : >> { %v5128_v29 = vpop.f32.mrf.mxu0  ;;  %v5182_v26 = vpop.f32.mrf.mxu1  ;;  %v5298_v32 = vadd.f32 %v5290_v37, %v5241_v6 }
 0x7c3   : >> { %v5134_v62 = vadd.f32 %v5128_v29, %v5080_v11 }
 0x7c5   : >> { %v5188_v1 = vadd.f32 %v5182_v26, %v5134_v62 }
 0x7c9   : >> { %v5236_v30 = vpop.f32.mrf.mxu2  ;;  %v5293_v31 = vpop.f32.mrf.mxu3 }
 0x7ca   : >> { %v5242_v3 = vadd.f32 %v5236_v30, %v5188_v1 }
 0x7cc   : >> { %v5338_v33 = vpop.f32.mrf.mxu0  ;;  %v5392_v35 = vpop.f32.mrf.mxu1  ;;  %v5299_v21 = vadd.f32 %v5293_v31, %v5242_v3 }
 0x7cd   : >> { %v5350_v2 = vadd.f32 %v5338_v33, %v5296_v16 }
 0x7cf   : >> { %v5404_v10 = vadd.f32 %v5392_v35, %v5350_v2 }
 0x7d3   : >> { %v5446_v36 = vpop.f32.mrf.mxu2  ;;  %v5500_v38 = vpop.f32.mrf.mxu3 }
 0x7d4   : >> { %v5458_v52 = vadd.f32 %v5446_v36, %v5404_v10 }
 0x7d6   : >> { %v5341_v40 = vpop.f32.mrf.mxu0  ;;  %v5395_v54 = vpop.f32.mrf.mxu1  ;;  %v5512_v14 = vadd.f32 %v5500_v38, %v5458_v52  ;;  %v5790_v38 = vperm.slane %v7940_v44, 0 }
 0x7d7   : >> { %v5351_v60 = vadd.f32 %v5341_v40, %v5297_v63 }
 0x7d9   : >> { %v5405_v0 = vadd.f32 %v5395_v54, %v5351_v60 }
 0x7dd   : >> { %v5449_v7 = vpop.f32.mrf.mxu2  ;;  %v5503_v41 = vpop.f32.mrf.mxu3 }
 0x7de   : >> { %v5459_v12 = vadd.f32 %v5449_v7, %v5405_v0 }
 0x7e0   : >> { %v5344_v34 = vpop.f32.mrf.mxu0  ;;  %v5398_v42 = vpop.f32.mrf.mxu1  ;;  %v5513_v11 = vadd.f32 %v5503_v41, %v5459_v12 }
 0x7e1   : >> { %v5352_v22 = vadd.f32 %v5344_v34, %v5298_v32 }
 0x7e3   : >> { %v5406_v16 = vadd.f32 %v5398_v42, %v5352_v22 }
 0x7e7   : >> { %v5452_v8 = vpop.f32.mrf.mxu2  ;;  %v5506_v43 = vpop.f32.mrf.mxu3 }
 0x7e8   : >> { %v5460_v18 = vadd.f32 %v5452_v8, %v5406_v16 }
 0x7ea   : >> { %v5347_v46 = vpop.f32.mrf.mxu0  ;;  %v5401_v47 = vpop.f32.mrf.mxu1  ;;  %v5514_v25 = vadd.f32 %v5506_v43, %v5460_v18 }
 0x7eb   : >> { %v5353_v13 = vadd.f32 %v5347_v46, %v5299_v21 }
 0x7ed   : >> { %v5407_v17 = vadd.f32 %v5401_v47, %v5353_v13 }
 0x7f1   : >> { %v5455_v49 = vpop.f32.mrf.mxu2  ;;  %v5509_v50 = vpop.f32.mrf.mxu3 }
 0x7f2   : >> { %v5461_v20 = vadd.f32 %v5455_v49, %v5407_v17 }
 0x7f4   : >> { %v5557_v51 = vpop.f32.mrf.mxu0  ;;  %v5611_v55 = vpop.f32.mrf.mxu1  ;;  %v5515_v27 = vadd.f32 %v5509_v50, %v5461_v20 }
 0x7f5   : >> { %v5569_v28 = vadd.f32 %v5557_v51, %v5512_v14 }
 0x7f7   : >> { %v5623_v53 = vadd.f32 %v5611_v55, %v5569_v28 }
 0x7fb   : >> { %v5665_v56 = vpop.f32.mrf.mxu2  ;;  %v5719_v58 = vpop.f32.mrf.mxu3 }
 0x7fc   : >> { %v5677_v37 = vadd.f32 %v5665_v56, %v5623_v53 }
 0x7fe   : >> { %v5560_v15 = vpop.f32.mrf.mxu0  ;;  %v5614_v59 = vpop.f32.mrf.mxu1  ;;  %v5731_v35 = vadd.f32 %v5719_v58, %v5677_v37 }
 0x7ff   : >> { %v5570_v57 = vadd.f32 %v5560_v15, %v5513_v11 }
 0x801   : >> { %v5624_v24 = vadd.f32 %v5614_v59, %v5570_v57 }
 0x805   : >> { %v5668_v19 = vpop.f32.mrf.mxu2  ;;  %v5722_v5 = vpop.f32.mrf.mxu3 }
 0x806   : >> { %v5678_v29 = vadd.f32 %v5668_v19, %v5624_v24 }
 0x808   : >> { %v5563_v48 = vpop.f32.mrf.mxu0  ;;  %v5617_v9 = vpop.f32.mrf.mxu1  ;;  %v5732_v36 = vadd.f32 %v5722_v5, %v5678_v29 }
 0x809   : >> { %v5571_v26 = vadd.f32 %v5563_v48, %v5514_v25 }
 0x80b   : >> { %v5625_v40 = vadd.f32 %v5617_v9, %v5571_v26 }
 0x80f   : >> { %v5671_v39 = vpop.f32.mrf.mxu2  ;;  %v5725_v45 = vpop.f32.mrf.mxu3 }
 0x810   : >> { %v5679_v8 = vadd.f32 %v5671_v39, %v5625_v40 }
 0x812   : >> { %v5566_v4 = vpop.f32.mrf.mxu0  ;;  %v5620_v23 = vpop.f32.mrf.mxu1  ;;  %v5733_v51 = vadd.f32 %v5725_v45, %v5679_v8 }
 0x813   : >> { %v5572_v30 = vadd.f32 %v5566_v4, %v5515_v27 }
 0x815   : >> { %v5626_v54 = vadd.f32 %v5620_v23, %v5572_v30 }
 0x819   : >> { %v5674_v31 = vpop.f32.mrf.mxu2  ;;  %v5728_v33 = vpop.f32.mrf.mxu3 }
 0x81a   : >> { %v5680_v43 = vadd.f32 %v5674_v31, %v5626_v54 }
 0x81c   : >> { %v5773_v7 = vpop.f32.mrf.mxu0  ;;  %v5776_v41 = vpop.f32.mrf.mxu1  ;;  %v5734_v55 = vadd.f32 %v5728_v33, %v5680_v43 }
 0x81d   : >> { %v5785_v34 = vadd.f32 %v5773_v7, %v5731_v35  ;;  %v5786_v42 = vadd.f32 %v5776_v41, %v5732_v36 }
 0x81f   : >> { %v5792_v46 = vadd.f32 %v5790_v38, %v5785_v34  ;;  %v5793_v47 = vadd.f32 %v5790_v38, %v5786_v42 }
 0x821   : >> { %v5796_v49 = vmax.f32 %v5792_v46, 0.0  ;;  %v5797_v50 = vmax.f32 %v5793_v47, 0.0 }
 0x823   : >> { %5802 = vst [vmem:[%s5801_s19] sm:$0xff] %v5796_v49  ;;  %v5779_v56 = vpop.f32.mrf.mxu2  ;;  %v5782_v58 = vpop.f32.mrf.mxu3 }
 0x824   : >> { %5803 = vst [vmem:[%s5801_s19 + $0x8] sm:$0xff] %v5797_v50  ;;  %v5787_v15 = vadd.f32 %v5779_v56, %v5733_v51  ;;  %v5788_v59 = vadd.f32 %v5782_v58, %v5734_v55 }
 0x826   : >> { %v5794_v61 = vadd.f32 %v5790_v38, %v5787_v15  ;;  %v5795_v62 = vadd.f32 %v5790_v38, %v5788_v59 }
 0x827   : > { %4432 = sbr.rel (!%p4430_p10) target bundleno = 1677 (0x68d), region = 293 }
 0x828   : >> { %v5798_v63 = vmax.f32 %v5794_v61, 0.0  ;;  %v5799_v1 = vmax.f32 %v5795_v62, 0.0 }
 0x82a   : >> { %5804 = vst [vmem:[%s5801_s19 + $0x10] sm:$0xff] %v5798_v63 }
 0x82b   : >> { %5805 = vst [vmem:[%s5801_s19 + $0x18] sm:$0xff] %v5799_v1 }
 0x82c PF: > { %s27_s17 = sadd.s32 1, %s6934_s17  }
 0x82d   : > { %p24_p11 = scmp.ge.s32.totalorder %s27_s17, 4  }
 0x82f   :  { %26 = sbr.rel (!%p24_p11) target bundleno = 6 (0x6), region = 304 }
 0x834   :  { %5827 = vsyncpa [#allocation7], 1 }
 0x835   :  { %5829 = vsyncpa [#allocation7 + $0x1], 1 }
 0x836   :  { %5830 = vsyncpa [#allocation9], 1 }
 0x837   :  { %5831 = vsyncpa [#allocation12], 1 }
 0x838   :  { %5832 = vsyncpa [#allocation15], 1 }
 0x839   :  { %5833 = vsyncpa [#allocation18], 1 }
 0x83a   :  { %5834 = vsyncpa [#allocation21], 1 }

</bundles_post_ra>
